<compile_context>
chip_gen: v6e
topology: v6e:2x2x1
jax: 0.10.0
libtpu: 0.0.40
codegen_flags: <defaults>
</compile_context>

<pallas_src>
import math

import jax
import jax.numpy as jnp
from jax.experimental import pallas as pl
from jax.experimental.pallas import tpu as pltpu

# ----------------------------- configuration -------------------------------
IN_FEATURES = 640       # head.in_features of mamba_vision_T (640) - lane aligned
HIDDEN = 512            # fixed by the module: nn.Linear(in_features, 512)
NUM_CLASSES = 1         # default of MambaVisionModel
STEM_C1 = 128           # first stem conv channels (lane-dense)
CIN = 3                 # RGB input channels
K1 = 9 * CIN            # conv1 im2col columns (27)
K1_PAD = 128            # padded to one full lane tile
LN_EPS = 1e-5
VMEM_LIMIT_BYTES = 32 * 1024 * 1024


# ------------------------------ Pallas kernels ------------------------------
def conv1_kernel(x_ref, w_ref, b_ref, o_ref):
    """Conv1 as ONE lane-dense matmul per image: [rows,128]x[128,128]+bias+ReLU."""
    acc = jnp.dot(x_ref[0], w_ref[...], preferred_element_type=jnp.float32)
    o_ref[0] = jnp.maximum(acc + b_ref[...], 0.0).astype(o_ref.dtype)


def _make_stage2_kernel(ho, wo, cin, cout):
    """Conv2 (K-folded single matmul) + global avg pool + classification head.

    ph_ref : [4, ho+1, wo+1, cin] bf16   4-phase split of padded y1 (one image)
    w2_ref : [9*cin, cout]        bf16   K-folded conv2 weight
    b2_ref : [1, cout]            f32
    head params: ln1 g/b, fc1 w/b, ln2 g/b, fc2 w/b
    o_ref  : [1, 1, NUM_CLASSES]  f32
    xcat_ref (scratch): [ho*wo, 9*cin] bf16
    """
    taps = [(di, dj) for di in range(3) for dj in range(3)]

    def kernel(ph_ref, w2_ref, b2_ref, g1_ref, be1_ref, w1_ref, b1_ref,
               g2_ref, be2_ref, wc_ref, bc_ref, o_ref, xcat_ref):
        # Fold the 9 taps into K: nine contiguous copies into a bf16 VMEM
        # scratch (same traffic one accumulation pass already paid), then a
        # single [ho*wo, 9*cin] x [9*cin, cout] MXU matmul with f32 accumulation
        # -> no per-tap read-modify-write of a large f32 accumulator.
        for t, (di, dj) in enumerate(taps):
            p = (di & 1) * 2 + (dj & 1)
            a, b = di // 2, dj // 2
            xcat_ref[:, t * cin:(t + 1) * cin] = (
                ph_ref[p, a:a + ho, b:b + wo, :].reshape(ho * wo, cin))
        act = jnp.dot(xcat_ref[...], w2_ref[...],
                      preferred_element_type=jnp.float32)          # [ho*wo, cout]
        act = jnp.maximum(act + b2_ref[...], 0.0)                  # bias + ReLU (f32)

        # Fused global average pool: token map never round-trips HBM.
        feat = jnp.mean(act, axis=0, keepdims=True)                # [1, cout] f32
        # Broadcast to a full 8-row sublane tile so head matmuls / reductions
        # run on clean (8, lane) shapes (rows are identical; row 0 is kept).
        h = jnp.broadcast_to(feat, (8, cout))

        # LayerNorm(in_features)
        mu = jnp.mean(h, axis=-1, keepdims=True)
        var = jnp.mean((h - mu) ** 2, axis=-1, keepdims=True)
        h = (h - mu) * jax.lax.rsqrt(var + LN_EPS) * g1_ref[...] + be1_ref[...]

        # Linear(in_features, 512): bf16 operands on the MXU, f32 accumulation.
        h = jnp.dot(h.astype(jnp.bfloat16), w1_ref[...],
                    preferred_element_type=jnp.float32) + b1_ref[...]
        # TODO(synk): PyTorch nn.GELU defaults to exact erf; tanh approximation
        # used here (|delta| < 1e-3), matching the bundled JAX reference.
        h = jax.nn.gelu(h)

        # LayerNorm(512)
        mu2 = jnp.mean(h, axis=-1, keepdims=True)
        var2 = jnp.mean((h - mu2) ** 2, axis=-1, keepdims=True)
        h = (h - mu2) * jax.lax.rsqrt(var2 + LN_EPS) * g2_ref[...] + be2_ref[...]

        # Linear(512, num_classes): N is tiny -> VPU multiply + lane reduction.
        if NUM_CLASSES == 1:
            logits = jnp.sum(h * wc_ref[...], axis=-1, keepdims=True)
        else:
            logits = jax.lax.dot_general(h, wc_ref[...], (((1,), (1,)), ((), ())),
                                         preferred_element_type=jnp.float32)
        o_ref[0] = logits[0:1] + bc_ref[...]

    return kernel


# ------------------------------ wrappers ------------------------------------
def _im2col_s2(x_nhwc):
    """3x3 / stride-2 / pad-1 im2col: [B,H,W,C] -> [B, (H/2)*(W/2), 9*C]."""
    b, h, w, c = x_nhwc.shape
    ho, wo = h // 2, w // 2
    xp = jnp.pad(x_nhwc, ((0, 0), (1, 1), (1, 1), (0, 0)))
    taps = [xp[:, di:di + 2 * ho:2, dj:dj + 2 * wo:2, :]
            for di in range(3) for dj in range(3)]
    return jnp.stack(taps, axis=-2).reshape(b, ho * wo, 9 * c)


def _phase_split(x_nhwc):
    """Pad H,W by 1 and split into the 4 stride-2 parity phases.

    [B, H, W, C] -> [B*4, H/2+1, W/2+1, C]  (so conv2's taps are static slices)
    """
    b, h, w, c = x_nhwc.shape
    xp = jnp.pad(x_nhwc, ((0, 0), (1, 1), (1, 1), (0, 0)))
    ph = jnp.stack([xp[:, p::2, q::2, :] for p in (0, 1) for q in (0, 1)], axis=1)
    return ph.reshape(b * 4, h // 2 + 1, w // 2 + 1, c)


def conv1_matmul(im2col, w_pad, b_row):
    """[B, rows, 128] bf16 x [128, 128] bf16 + bias + ReLU -> [B, rows, 128] bf16."""
    b, rows, kpad = im2col.shape
    cout = w_pad.shape[-1]
    return pl.pallas_call(
        conv1_kernel,
        out_shape=jax.ShapeDtypeStruct((b, rows, cout), jnp.bfloat16),
        grid=(b,),
        in_specs=[
            pl.BlockSpec((1, rows, kpad), lambda i: (i, 0, 0)),
            pl.BlockSpec((kpad, cout), lambda i: (0, 0)),     # resident weight
            pl.BlockSpec((1, cout), lambda i: (0, 0)),        # resident bias
        ],
        out_specs=pl.BlockSpec((1, rows, cout), lambda i: (i, 0, 0)),
        compiler_params=pltpu.CompilerParams(
            dimension_semantics=("parallel",),
            vmem_limit_bytes=VMEM_LIMIT_BYTES),
    )(im2col, w_pad, b_row)


def stage2_pool_head(y1_phases, w2k, params, batch, ho, wo):
    """Fused conv2 + global average pool + classification head."""
    cin, cout = STEM_C1, IN_FEATURES
    kernel = _make_stage2_kernel(ho, wo, cin, cout)

    def const_spec(shape):
        n = len(shape)
        return pl.BlockSpec(shape, lambda i: (0,) * n)

    out = pl.pallas_call(
        kernel,
        out_shape=jax.ShapeDtypeStruct((batch, 1, NUM_CLASSES), jnp.float32),
        grid=(batch,),
        in_specs=[
            pl.BlockSpec((4, ho + 1, wo + 1, cin), lambda i: (i, 0, 0, 0)),
            const_spec((9 * cin, cout)),                         # conv2 weight
            const_spec((1, cout)),                               # conv2 bias
            const_spec((1, cout)), const_spec((1, cout)),        # LN1 gamma/beta
            const_spec((cout, HIDDEN)), const_spec((1, HIDDEN)), # fc1 w / b
            const_spec((1, HIDDEN)), const_spec((1, HIDDEN)),    # LN2 gamma/beta
            const_spec((NUM_CLASSES, HIDDEN)),                   # fc2 w
            const_spec((1, NUM_CLASSES)),                        # fc2 b
        ],
        out_specs=pl.BlockSpec((1, 1, NUM_CLASSES), lambda i: (i, 0, 0)),
        scratch_shapes=[pltpu.VMEM((ho * wo, 9 * cin), jnp.bfloat16)],
        compiler_params=pltpu.CompilerParams(
            dimension_semantics=("parallel",),
            vmem_limit_bytes=VMEM_LIMIT_BYTES),
    )(y1_phases, w2k, params["conv2_b"],
      params["ln1_g"], params["ln1_b"], params["fc1_w"], params["fc1_b"],
      params["ln2_g"], params["ln2_b"], params["fc2_w"], params["fc2_b"])
    return out.reshape(batch, NUM_CLASSES)


def init_params(key):
    ks = jax.random.split(key, 8)

    def uni(k, fan_in, shape, dtype=jnp.float32):
        bound = 1.0 / math.sqrt(fan_in)
        return jax.random.uniform(k, shape, jnp.float32, -bound, bound).astype(dtype)

    return {
        # synthetic conv stem (BatchNorm folded / omitted), bf16 matmul weights
        "conv1_w": uni(ks[0], 9 * CIN, (9, CIN, STEM_C1), jnp.bfloat16),
        "conv1_b": uni(ks[1], 9 * CIN, (1, STEM_C1)),
        "conv2_w": uni(ks[2], 9 * STEM_C1, (9, STEM_C1, IN_FEATURES), jnp.bfloat16),
        "conv2_b": uni(ks[3], 9 * STEM_C1, (1, IN_FEATURES)),
        # custom head
        "ln1_g": jnp.ones((1, IN_FEATURES), jnp.float32),
        "ln1_b": jnp.zeros((1, IN_FEATURES), jnp.float32),
        "fc1_w": uni(ks[4], IN_FEATURES, (IN_FEATURES, HIDDEN), jnp.bfloat16),
        "fc1_b": uni(ks[5], IN_FEATURES, (1, HIDDEN)),
        "ln2_g": jnp.ones((1, HIDDEN), jnp.float32),
        "ln2_b": jnp.zeros((1, HIDDEN), jnp.float32),
        "fc2_w": uni(ks[6], HIDDEN, (NUM_CLASSES, HIDDEN)),      # PyTorch layout
        "fc2_b": uni(ks[7], HIDDEN, (1, NUM_CLASSES)),
    }


def mamba_vision_forward(x_nchw, params):
    """Full forward: NCHW image -> [B, NUM_CLASSES] logits."""
    x = jnp.transpose(x_nchw, (0, 2, 3, 1)).astype(jnp.bfloat16)    # NCHW -> NHWC
    batch, h, w, c = x.shape
    ho1, wo1 = h // 2, w // 2

    # Conv1: wrapper im2col (K = 9*3 = 27, tiny) lane-padded to 128; one matmul.
    im = _im2col_s2(x)                                              # [B, ho1*wo1, 27]
    im = jnp.pad(im, ((0, 0), (0, 0), (0, K1_PAD - im.shape[-1])))
    w1k = jnp.pad(params["conv1_w"].reshape(9 * c, STEM_C1),
                  ((0, K1_PAD - 9 * c), (0, 0)))
    y1 = conv1_matmul(im, w1k, params["conv1_b"])                   # [B, ho1*wo1, 128]
    y1 = y1.reshape(batch, ho1, wo1, STEM_C1)

    # Conv2 + global-avg-pool + head, fused in one kernel.
    # TODO(synk): the stride-2 phase split of y1 is still an XLA-side relayout;
    # at 224x224 it could be folded into conv1's out_spec to save an HBM pass.
    ph = _phase_split(y1)                                           # [B*4, ho2+1, wo2+1, 128]
    w2k = params["conv2_w"].reshape(9 * STEM_C1, IN_FEATURES)       # K-folded weight
    return stage2_pool_head(ph, w2k, params, batch, ho1 // 2, wo1 // 2)


# -------------------------- pure-JAX reference check -------------------------
def _reference(x_nchw, params):
    x = jnp.transpose(x_nchw, (0, 2, 3, 1)).astype(jnp.bfloat16)

    def conv(x, w9, bias):
        cin, cout = w9.shape[1], w9.shape[2]
        w_hwio = w9.reshape(3, 3, cin, cout)
        y = jax.lax.conv_general_dilated(
            x, w_hwio, window_strides=(2, 2), padding=((1, 1), (1, 1)),
            dimension_numbers=("NHWC", "HWIO", "NHWC"),
            preferred_element_type=jnp.float32)
        return jnp.maximum(y + bias.reshape(1, 1, 1, -1), 0.0)

    y1 = conv(x, params["conv1_w"], params["conv1_b"]).astype(jnp.bfloat16)
    y2 = conv(y1, params["conv2_w"], params["conv2_b"])
    feat = jnp.mean(y2.reshape(y2.shape[0], -1, y2.shape[-1]), axis=1)

    def ln(h, g, be):
        mu = jnp.mean(h, -1, keepdims=True)
        var = jnp.mean((h - mu) ** 2, -1, keepdims=True)
        return (h - mu) * jax.lax.rsqrt(var + LN_EPS) * g + be

    h = ln(feat, params["ln1_g"], params["ln1_b"])
    h = jnp.dot(h.astype(jnp.bfloat16), params["fc1_w"],
                preferred_element_type=jnp.float32) + params["fc1_b"]
    h = jax.nn.gelu(h)
    h = ln(h, params["ln2_g"], params["ln2_b"])
    return jnp.dot(h, params["fc2_w"].T) + params["fc2_b"]


if __name__ == "__main__":
    key = jax.random.PRNGKey(0)
    k_x, k_p = jax.random.split(key)
    x = jax.random.normal(k_x, (2, 3, 64, 64), jnp.float32)   # NCHW, like PyTorch
    params = init_params(k_p)

    fwd = jax.jit(mamba_vision_forward)
    out = jax.block_until_ready(fwd(x, params))
    ref = jax.block_until_ready(_reference(x, params))

    assert out.shape == (2, NUM_CLASSES), out.shape
    assert jnp.allclose(out, ref, atol=1e-2, rtol=1e-2), (out, ref)
    print("KERNEL_OK")
</pallas_src>

<mosaic_0001>
module attributes {stable_mosaic.version = 11 : i64} {
  func.func @conv1_kernel(%arg0: i32, %arg1: memref<1x1024x128xbf16, #tpu.memory_space<vmem>>, %arg2: memref<128x128xbf16, #tpu.memory_space<vmem>>, %arg3: memref<1x128xf32, #tpu.memory_space<vmem>>, %arg4: memref<1x1024x128xbf16, #tpu.memory_space<vmem>>) attributes {dimension_semantics = [#tpu.dimension_semantics<parallel>], iteration_bounds = array<i64: 2>, scalar_prefetch = 0 : i64, scratch_operands = 0 : i64, tpu.core_type = #tpu.core_type<tc>, window_params = [{transform_indices = @transform_0, window_bounds = array<i64: 1, 1024, 128>}, {pipeline_mode = #tpu.pipeline_mode<synchronous>, transform_indices = @transform_1, window_bounds = array<i64: 128, 128>}, {pipeline_mode = #tpu.pipeline_mode<synchronous>, transform_indices = @transform_2, window_bounds = array<i64: 1, 128>}, {transform_indices = @transform_3, window_bounds = array<i64: 1, 1024, 128>}]} {
    %c0 = arith.constant 0 : index
    %c0_0 = arith.constant 0 : index
    %c0_1 = arith.constant 0 : index
    %0 = vector.load %arg1[%c0, %c0_0, %c0_1] : memref<1x1024x128xbf16, #tpu.memory_space<vmem>>, vector<1x1024x128xbf16>
    %1 = vector.shape_cast %0 : vector<1x1024x128xbf16> to vector<1024x128xbf16>
    %c0_2 = arith.constant 0 : index
    %c0_3 = arith.constant 0 : index
    %2 = vector.load %arg2[%c0_2, %c0_3] : memref<128x128xbf16, #tpu.memory_space<vmem>>, vector<128x128xbf16>
    %cst = arith.constant dense<0.000000e+00> : vector<1024x128xf32>
    %3 = tpu.matmul %1, %2, %cst {dimension_numbers = #tpu.dot_dimension_numbers<[1], [0], [0], [1], [0, 0, 1, 1], [], []>} : vector<1024x128xbf16>, vector<128x128xbf16>, vector<1024x128xf32> -> vector<1024x128xf32>
    %c0_4 = arith.constant 0 : index
    %c0_5 = arith.constant 0 : index
    %4 = vector.load %arg3[%c0_4, %c0_5] : memref<1x128xf32, #tpu.memory_space<vmem>>, vector<1x128xf32>
    %5 = vector.broadcast %4 : vector<1x128xf32> to vector<1024x128xf32>
    %6 = arith.addf %3, %5 : vector<1024x128xf32>
    %cst_6 = arith.constant 0.000000e+00 : f32
    %7 = vector.broadcast %cst_6 : f32 to vector<1024x128xf32>
    %8 = arith.maximumf %6, %7 : vector<1024x128xf32>
    %9 = arith.truncf %8 : vector<1024x128xf32> to vector<1024x128xbf16>
    %c0_7 = arith.constant 0 : index
    %c0_8 = arith.constant 0 : index
    %c0_9 = arith.constant 0 : index
    %10 = vector.load %arg4[%c0_7, %c0_8, %c0_9] : memref<1x1024x128xbf16, #tpu.memory_space<vmem>>, vector<1x1024x128xbf16>
    %11 = vector.shape_cast %10 : vector<1x1024x128xbf16> to vector<1024x128xbf16>
    %12 = vector.shape_cast %9 : vector<1024x128xbf16> to vector<1x1024x128xbf16>
    tpu.vector_store %arg4[%c0_7, %c0_8, %c0_9], %12 {strides = array<i32>} : memref<1x1024x128xbf16, #tpu.memory_space<vmem>>, vector<1x1024x128xbf16>,
    return
  }
  func.func @transform_0(%arg0: i32) -> (i32, i32, i32) {
    %c0_i32 = arith.constant 0 : i32
    %c0_i32_0 = arith.constant 0 : i32
    %c0_i32_1 = arith.constant 0 : i32
    return %arg0, %c0_i32, %c0_i32_0 : i32, i32, i32
  }
  func.func @transform_1(%arg0: i32) -> (i32, i32) {
    %c0_i32 = arith.constant 0 : i32
    %c0_i32_0 = arith.constant 0 : i32
    %c0_i32_1 = arith.constant 0 : i32
    return %c0_i32, %c0_i32_0 : i32, i32
  }
  func.func @transform_2(%arg0: i32) -> (i32, i32) {
    %c0_i32 = arith.constant 0 : i32
    %c0_i32_0 = arith.constant 0 : i32
    %c0_i32_1 = arith.constant 0 : i32
    return %c0_i32, %c0_i32_0 : i32, i32
  }
  func.func @transform_3(%arg0: i32) -> (i32, i32, i32) {
    %c0_i32 = arith.constant 0 : i32
    %c0_i32_0 = arith.constant 0 : i32
    %c0_i32_1 = arith.constant 0 : i32
    return %arg0, %c0_i32, %c0_i32_0 : i32, i32, i32
  }
}

module attributes {stable_mosaic.version = 11 : i64} {
  func.func @kernel(%arg0: i32, %arg1: memref<4x17x17x128xbf16, #tpu.memory_space<vmem>>, %arg2: memref<1152x640xbf16, #tpu.memory_space<vmem>>, %arg3: memref<1x640xf32, #tpu.memory_space<vmem>>, %arg4: memref<1x640xf32, #tpu.memory_space<vmem>>, %arg5: memref<1x640xf32, #tpu.memory_space<vmem>>, %arg6: memref<640x512xbf16, #tpu.memory_space<vmem>>, %arg7: memref<1x512xf32, #tpu.memory_space<vmem>>, %arg8: memref<1x512xf32, #tpu.memory_space<vmem>>, %arg9: memref<1x512xf32, #tpu.memory_space<vmem>>, %arg10: memref<1x512xf32, #tpu.memory_space<vmem>>, %arg11: memref<1x1xf32, #tpu.memory_space<vmem>>, %arg12: memref<1x1x1xf32, #tpu.memory_space<vmem>>, %arg13: memref<256x1152xbf16, #tpu.memory_space<vmem>>) attributes {dimension_semantics = [#tpu.dimension_semantics<parallel>], iteration_bounds = array<i64: 2>, scalar_prefetch = 0 : i64, scratch_operands = 1 : i64, tpu.core_type = #tpu.core_type<tc>, window_params = [{transform_indices = @transform_0, window_bounds = array<i64: 4, 17, 17, 128>}, {pipeline_mode = #tpu.pipeline_mode<synchronous>, transform_indices = @transform_1, window_bounds = array<i64: 1152, 640>}, {pipeline_mode = #tpu.pipeline_mode<synchronous>, transform_indices = @transform_2, window_bounds = array<i64: 1, 640>}, {pipeline_mode = #tpu.pipeline_mode<synchronous>, transform_indices = @transform_3, window_bounds = array<i64: 1, 640>}, {pipeline_mode = #tpu.pipeline_mode<synchronous>, transform_indices = @transform_4, window_bounds = array<i64: 1, 640>}, {pipeline_mode = #tpu.pipeline_mode<synchronous>, transform_indices = @transform_5, window_bounds = array<i64: 640, 512>}, {pipeline_mode = #tpu.pipeline_mode<synchronous>, transform_indices = @transform_6, window_bounds = array<i64: 1, 512>}, {pipeline_mode = #tpu.pipeline_mode<synchronous>, transform_indices = @transform_7, window_bounds = array<i64: 1, 512>}, {pipeline_mode = #tpu.pipeline_mode<synchronous>, transform_indices = @transform_8, window_bounds = array<i64: 1, 512>}, {pipeline_mode = #tpu.pipeline_mode<synchronous>, transform_indices = @transform_9, window_bounds = array<i64: 1, 512>}, {pipeline_mode = #tpu.pipeline_mode<synchronous>, transform_indices = @transform_10, window_bounds = array<i64: 1, 1>}, {transform_indices = @transform_11, window_bounds = array<i64: 1, 1, 1>}]} {
    %c0 = arith.constant 0 : index
    %c0_0 = arith.constant 0 : index
    %c0_1 = arith.constant 0 : index
    %c0_2 = arith.constant 0 : index
    %0 = vector.load %arg1[%c0, %c0_0, %c0_1, %c0_2] : memref<4x17x17x128xbf16, #tpu.memory_space<vmem>>, vector<1x16x16x128xbf16>
    %1 = vector.shape_cast %0 : vector<1x16x16x128xbf16> to vector<16x16x128xbf16>
    %2 = vector.shape_cast %1 : vector<16x16x128xbf16> to vector<256x128xbf16>
    %c0_3 = arith.constant 0 : index
    %c0_4 = arith.constant 0 : index
    %3 = vector.load %arg13[%c0_3, %c0_4] : memref<256x1152xbf16, #tpu.memory_space<vmem>>, vector<256x128xbf16>
    tpu.vector_store %arg13[%c0_3, %c0_4], %2 {strides = array<i32>} : memref<256x1152xbf16, #tpu.memory_space<vmem>>, vector<256x128xbf16>,
    %c1 = arith.constant 1 : index
    %c0_5 = arith.constant 0 : index
    %c0_6 = arith.constant 0 : index
    %c0_7 = arith.constant 0 : index
    %4 = vector.load %arg1[%c1, %c0_5, %c0_6, %c0_7] : memref<4x17x17x128xbf16, #tpu.memory_space<vmem>>, vector<1x16x16x128xbf16>
    %5 = vector.shape_cast %4 : vector<1x16x16x128xbf16> to vector<16x16x128xbf16>
    %6 = vector.shape_cast %5 : vector<16x16x128xbf16> to vector<256x128xbf16>
    %c0_8 = arith.constant 0 : index
    %c128 = arith.constant 128 : index
    %7 = vector.load %arg13[%c0_8, %c128] : memref<256x1152xbf16, #tpu.memory_space<vmem>>, vector<256x128xbf16>
    tpu.vector_store %arg13[%c0_8, %c128], %6 {strides = array<i32>} : memref<256x1152xbf16, #tpu.memory_space<vmem>>, vector<256x128xbf16>,
    %c0_9 = arith.constant 0 : index
    %c0_10 = arith.constant 0 : index
    %c1_11 = arith.constant 1 : index
    %c0_12 = arith.constant 0 : index
    %8 = vector.load %arg1[%c0_9, %c0_10, %c1_11, %c0_12] : memref<4x17x17x128xbf16, #tpu.memory_space<vmem>>, vector<1x16x16x128xbf16>
    %9 = vector.shape_cast %8 : vector<1x16x16x128xbf16> to vector<16x16x128xbf16>
    %10 = vector.shape_cast %9 : vector<16x16x128xbf16> to vector<256x128xbf16>
    %c0_13 = arith.constant 0 : index
    %c256 = arith.constant 256 : index
    %11 = vector.load %arg13[%c0_13, %c256] : memref<256x1152xbf16, #tpu.memory_space<vmem>>, vector<256x128xbf16>
    tpu.vector_store %arg13[%c0_13, %c256], %10 {strides = array<i32>} : memref<256x1152xbf16, #tpu.memory_space<vmem>>, vector<256x128xbf16>,
    %c2 = arith.constant 2 : index
    %c0_14 = arith.constant 0 : index
    %c0_15 = arith.constant 0 : index
    %c0_16 = arith.constant 0 : index
    %12 = vector.load %arg1[%c2, %c0_14, %c0_15, %c0_16] : memref<4x17x17x128xbf16, #tpu.memory_space<vmem>>, vector<1x16x16x128xbf16>
    %13 = vector.shape_cast %12 : vector<1x16x16x128xbf16> to vector<16x16x128xbf16>
    %14 = vector.shape_cast %13 : vector<16x16x128xbf16> to vector<256x128xbf16>
    %c0_17 = arith.constant 0 : index
    %c384 = arith.constant 384 : index
    %15 = vector.load %arg13[%c0_17, %c384] : memref<256x1152xbf16, #tpu.memory_space<vmem>>, vector<256x128xbf16>
    tpu.vector_store %arg13[%c0_17, %c384], %14 {strides = array<i32>} : memref<256x1152xbf16, #tpu.memory_space<vmem>>, vector<256x128xbf16>,
    %c3 = arith.constant 3 : index
    %c0_18 = arith.constant 0 : index
    %c0_19 = arith.constant 0 : index
    %c0_20 = arith.constant 0 : index
    %16 = vector.load %arg1[%c3, %c0_18, %c0_19, %c0_20] : memref<4x17x17x128xbf16, #tpu.memory_space<vmem>>, vector<1x16x16x128xbf16>
    %17 = vector.shape_cast %16 : vector<1x16x16x128xbf16> to vector<16x16x128xbf16>
    %18 = vector.shape_cast %17 : vector<16x16x128xbf16> to vector<256x128xbf16>
    %c0_21 = arith.constant 0 : index
    %c512 = arith.constant 512 : index
    %19 = vector.load %arg13[%c0_21, %c512] : memref<256x1152xbf16, #tpu.memory_space<vmem>>, vector<256x128xbf16>
    tpu.vector_store %arg13[%c0_21, %c512], %18 {strides = array<i32>} : memref<256x1152xbf16, #tpu.memory_space<vmem>>, vector<256x128xbf16>,
    %c2_22 = arith.constant 2 : index
    %c0_23 = arith.constant 0 : index
    %c1_24 = arith.constant 1 : index
    %c0_25 = arith.constant 0 : index
    %20 = vector.load %arg1[%c2_22, %c0_23, %c1_24, %c0_25] : memref<4x17x17x128xbf16, #tpu.memory_space<vmem>>, vector<1x16x16x128xbf16>
    %21 = vector.shape_cast %20 : vector<1x16x16x128xbf16> to vector<16x16x128xbf16>
    %22 = vector.shape_cast %21 : vector<16x16x128xbf16> to vector<256x128xbf16>
    %c0_26 = arith.constant 0 : index
    %c640 = arith.constant 640 : index
    %23 = vector.load %arg13[%c0_26, %c640] : memref<256x1152xbf16, #tpu.memory_space<vmem>>, vector<256x128xbf16>
    tpu.vector_store %arg13[%c0_26, %c640], %22 {strides = array<i32>} : memref<256x1152xbf16, #tpu.memory_space<vmem>>, vector<256x128xbf16>,
    %c0_27 = arith.constant 0 : index
    %c1_28 = arith.constant 1 : index
    %c0_29 = arith.constant 0 : index
    %c0_30 = arith.constant 0 : index
    %24 = vector.load %arg1[%c0_27, %c1_28, %c0_29, %c0_30] : memref<4x17x17x128xbf16, #tpu.memory_space<vmem>>, vector<1x16x16x128xbf16>
    %25 = vector.shape_cast %24 : vector<1x16x16x128xbf16> to vector<16x16x128xbf16>
    %26 = vector.shape_cast %25 : vector<16x16x128xbf16> to vector<256x128xbf16>
    %c0_31 = arith.constant 0 : index
    %c768 = arith.constant 768 : index
    %27 = vector.load %arg13[%c0_31, %c768] : memref<256x1152xbf16, #tpu.memory_space<vmem>>, vector<256x128xbf16>
    tpu.vector_store %arg13[%c0_31, %c768], %26 {strides = array<i32>} : memref<256x1152xbf16, #tpu.memory_space<vmem>>, vector<256x128xbf16>,
    %c1_32 = arith.constant 1 : index
    %c1_33 = arith.constant 1 : index
    %c0_34 = arith.constant 0 : index
    %c0_35 = arith.constant 0 : index
    %28 = vector.load %arg1[%c1_32, %c1_33, %c0_34, %c0_35] : memref<4x17x17x128xbf16, #tpu.memory_space<vmem>>, vector<1x16x16x128xbf16>
    %29 = vector.shape_cast %28 : vector<1x16x16x128xbf16> to vector<16x16x128xbf16>
    %30 = vector.shape_cast %29 : vector<16x16x128xbf16> to vector<256x128xbf16>
    %c0_36 = arith.constant 0 : index
    %c896 = arith.constant 896 : index
    %31 = vector.load %arg13[%c0_36, %c896] : memref<256x1152xbf16, #tpu.memory_space<vmem>>, vector<256x128xbf16>
    tpu.vector_store %arg13[%c0_36, %c896], %30 {strides = array<i32>} : memref<256x1152xbf16, #tpu.memory_space<vmem>>, vector<256x128xbf16>,
    %c0_37 = arith.constant 0 : index
    %c1_38 = arith.constant 1 : index
    %c1_39 = arith.constant 1 : index
    %c0_40 = arith.constant 0 : index
    %32 = vector.load %arg1[%c0_37, %c1_38, %c1_39, %c0_40] : memref<4x17x17x128xbf16, #tpu.memory_space<vmem>>, vector<1x16x16x128xbf16>
    %33 = vector.shape_cast %32 : vector<1x16x16x128xbf16> to vector<16x16x128xbf16>
    %34 = vector.shape_cast %33 : vector<16x16x128xbf16> to vector<256x128xbf16>
    %c0_41 = arith.constant 0 : index
    %c1024 = arith.constant 1024 : index
    %35 = vector.load %arg13[%c0_41, %c1024] : memref<256x1152xbf16, #tpu.memory_space<vmem>>, vector<256x128xbf16>
    tpu.vector_store %arg13[%c0_41, %c1024], %34 {strides = array<i32>} : memref<256x1152xbf16, #tpu.memory_space<vmem>>, vector<256x128xbf16>,
    %c0_42 = arith.constant 0 : index
    %c0_43 = arith.constant 0 : index
    %36 = vector.load %arg13[%c0_42, %c0_43] : memref<256x1152xbf16, #tpu.memory_space<vmem>>, vector<256x1152xbf16>
    %c0_44 = arith.constant 0 : index
    %c0_45 = arith.constant 0 : index
    %37 = vector.load %arg2[%c0_44, %c0_45] : memref<1152x640xbf16, #tpu.memory_space<vmem>>, vector<1152x640xbf16>
    %cst = arith.constant dense<0.000000e+00> : vector<256x640xf32>
    %38 = tpu.matmul %36, %37, %cst {dimension_numbers = #tpu.dot_dimension_numbers<[1], [0], [0], [1], [0, 0, 1, 1], [], []>} : vector<256x1152xbf16>, vector<1152x640xbf16>, vector<256x640xf32> -> vector<256x640xf32>
    %c0_46 = arith.constant 0 : index
    %c0_47 = arith.constant 0 : index
    %39 = vector.load %arg3[%c0_46, %c0_47] : memref<1x640xf32, #tpu.memory_space<vmem>>, vector<1x640xf32>
    %40 = vector.broadcast %39 : vector<1x640xf32> to vector<256x640xf32>
    %41 = arith.addf %38, %40 : vector<256x640xf32>
    %cst_48 = arith.constant 0.000000e+00 : f32
    %42 = vector.broadcast %cst_48 : f32 to vector<256x640xf32>
    %43 = arith.maximumf %41, %42 : vector<256x640xf32>
    %cst_49 = arith.constant dense<0.000000e+00> : vector<640xf32>
    %44 = vector.multi_reduction <add>, %43, %cst_49 [0] : vector<256x640xf32> to vector<640xf32>
    %45 = vector.shape_cast %44 : vector<640xf32> to vector<1x640xf32>
    %cst_50 = arith.constant 2.560000e+02 : f32
    %46 = vector.broadcast %cst_50 : f32 to vector<1x640xf32>
    %47 = arith.divf %45, %46 : vector<1x640xf32>
    %48 = vector.shape_cast %47 : vector<1x640xf32> to vector<1x640xf32>
    %49 = vector.broadcast %48 : vector<1x640xf32> to vector<8x640xf32>
    %cst_51 = arith.constant dense<0.000000e+00> : vector<8xf32>
    %50 = vector.multi_reduction <add>, %49, %cst_51 [1] : vector<8x640xf32> to vector<8xf32>
    %51 = vector.shape_cast %50 : vector<8xf32> to vector<8x1xf32>
    %cst_52 = arith.constant 6.400000e+02 : f32
    %52 = vector.broadcast %cst_52 : f32 to vector<8x1xf32>
    %53 = arith.divf %51, %52 : vector<8x1xf32>
    %54 = vector.broadcast %53 : vector<8x1xf32> to vector<8x640xf32>
    %55 = arith.subf %49, %54 : vector<8x640xf32>
    %56 = arith.mulf %55, %55 : vector<8x640xf32>
    %cst_53 = arith.constant dense<0.000000e+00> : vector<8xf32>
    %57 = vector.multi_reduction <add>, %56, %cst_53 [1] : vector<8x640xf32> to vector<8xf32>
    %58 = vector.shape_cast %57 : vector<8xf32> to vector<8x1xf32>
    %cst_54 = arith.constant 6.400000e+02 : f32
    %59 = vector.broadcast %cst_54 : f32 to vector<8x1xf32>
    %60 = arith.divf %58, %59 : vector<8x1xf32>
    %61 = vector.broadcast %53 : vector<8x1xf32> to vector<8x640xf32>
    %62 = arith.subf %49, %61 : vector<8x640xf32>
    %cst_55 = arith.constant 9.99999974E-6 : f32
    %63 = vector.broadcast %cst_55 : f32 to vector<8x1xf32>
    %64 = arith.addf %60, %63 : vector<8x1xf32>
    %65 = math.rsqrt %64 : vector<8x1xf32>
    %66 = vector.broadcast %65 : vector<8x1xf32> to vector<8x640xf32>
    %67 = arith.mulf %62, %66 : vector<8x640xf32>
    %c0_56 = arith.constant 0 : index
    %c0_57 = arith.constant 0 : index
    %68 = vector.load %arg4[%c0_56, %c0_57] : memref<1x640xf32, #tpu.memory_space<vmem>>, vector<1x640xf32>
    %69 = vector.broadcast %68 : vector<1x640xf32> to vector<8x640xf32>
    %70 = arith.mulf %67, %69 : vector<8x640xf32>
    %c0_58 = arith.constant 0 : index
    %c0_59 = arith.constant 0 : index
    %71 = vector.load %arg5[%c0_58, %c0_59] : memref<1x640xf32, #tpu.memory_space<vmem>>, vector<1x640xf32>
    %72 = vector.broadcast %71 : vector<1x640xf32> to vector<8x640xf32>
    %73 = arith.addf %70, %72 : vector<8x640xf32>
    %74 = arith.truncf %73 : vector<8x640xf32> to vector<8x640xbf16>
    %c0_60 = arith.constant 0 : index
    %c0_61 = arith.constant 0 : index
    %75 = vector.load %arg6[%c0_60, %c0_61] : memref<640x512xbf16, #tpu.memory_space<vmem>>, vector<640x512xbf16>
    %cst_62 = arith.constant dense<0.000000e+00> : vector<8x512xf32>
    %76 = tpu.matmul %74, %75, %cst_62 {dimension_numbers = #tpu.dot_dimension_numbers<[1], [0], [0], [1], [0, 0, 1, 1], [], []>} : vector<8x640xbf16>, vector<640x512xbf16>, vector<8x512xf32> -> vector<8x512xf32>
    %c0_63 = arith.constant 0 : index
    %c0_64 = arith.constant 0 : index
    %77 = vector.load %arg7[%c0_63, %c0_64] : memref<1x512xf32, #tpu.memory_space<vmem>>, vector<1x512xf32>
    %78 = vector.broadcast %77 : vector<1x512xf32> to vector<8x512xf32>
    %79 = arith.addf %76, %78 : vector<8x512xf32>
    %80 = arith.mulf %79, %79 : vector<8x512xf32>
    %81 = arith.mulf %79, %80 : vector<8x512xf32>
    %cst_65 = arith.constant 4.471500e-02 : f32
    %82 = vector.broadcast %cst_65 : f32 to vector<8x512xf32>
    %83 = arith.mulf %82, %81 : vector<8x512xf32>
    %84 = arith.addf %79, %83 : vector<8x512xf32>
    %cst_66 = arith.constant 0.797884583 : f32
    %85 = vector.broadcast %cst_66 : f32 to vector<8x512xf32>
    %86 = arith.mulf %85, %84 : vector<8x512xf32>
    %87 = math.tanh %86 : vector<8x512xf32>
    %cst_67 = arith.constant 1.000000e+00 : f32
    %88 = vector.broadcast %cst_67 : f32 to vector<8x512xf32>
    %89 = arith.addf %88, %87 : vector<8x512xf32>
    %cst_68 = arith.constant 5.000000e-01 : f32
    %90 = vector.broadcast %cst_68 : f32 to vector<8x512xf32>
    %91 = arith.mulf %90, %89 : vector<8x512xf32>
    %92 = arith.mulf %79, %91 : vector<8x512xf32>
    %cst_69 = arith.constant dense<0.000000e+00> : vector<8xf32>
    %93 = vector.multi_reduction <add>, %92, %cst_69 [1] : vector<8x512xf32> to vector<8xf32>
    %94 = vector.shape_cast %93 : vector<8xf32> to vector<8x1xf32>
    %cst_70 = arith.constant 5.120000e+02 : f32
    %95 = vector.broadcast %cst_70 : f32 to vector<8x1xf32>
    %96 = arith.divf %94, %95 : vector<8x1xf32>
    %97 = vector.broadcast %96 : vector<8x1xf32> to vector<8x512xf32>
    %98 = arith.subf %92, %97 : vector<8x512xf32>
    %99 = arith.mulf %98, %98 : vector<8x512xf32>
    %cst_71 = arith.constant dense<0.000000e+00> : vector<8xf32>
    %100 = vector.multi_reduction <add>, %99, %cst_71 [1] : vector<8x512xf32> to vector<8xf32>
    %101 = vector.shape_cast %100 : vector<8xf32> to vector<8x1xf32>
    %cst_72 = arith.constant 5.120000e+02 : f32
    %102 = vector.broadcast %cst_72 : f32 to vector<8x1xf32>
    %103 = arith.divf %101, %102 : vector<8x1xf32>
    %104 = vector.broadcast %96 : vector<8x1xf32> to vector<8x512xf32>
    %105 = arith.subf %92, %104 : vector<8x512xf32>
    %cst_73 = arith.constant 9.99999974E-6 : f32
    %106 = vector.broadcast %cst_73 : f32 to vector<8x1xf32>
    %107 = arith.addf %103, %106 : vector<8x1xf32>
    %108 = math.rsqrt %107 : vector<8x1xf32>
    %109 = vector.broadcast %108 : vector<8x1xf32> to vector<8x512xf32>
    %110 = arith.mulf %105, %109 : vector<8x512xf32>
    %c0_74 = arith.constant 0 : index
    %c0_75 = arith.constant 0 : index
    %111 = vector.load %arg8[%c0_74, %c0_75] : memref<1x512xf32, #tpu.memory_space<vmem>>, vector<1x512xf32>
    %112 = vector.broadcast %111 : vector<1x512xf32> to vector<8x512xf32>
    %113 = arith.mulf %110, %112 : vector<8x512xf32>
    %c0_76 = arith.constant 0 : index
    %c0_77 = arith.constant 0 : index
    %114 = vector.load %arg9[%c0_76, %c0_77] : memref<1x512xf32, #tpu.memory_space<vmem>>, vector<1x512xf32>
    %115 = vector.broadcast %114 : vector<1x512xf32> to vector<8x512xf32>
    %116 = arith.addf %113, %115 : vector<8x512xf32>
    %c0_78 = arith.constant 0 : index
    %c0_79 = arith.constant 0 : index
    %117 = vector.load %arg10[%c0_78, %c0_79] : memref<1x512xf32, #tpu.memory_space<vmem>>, vector<1x512xf32>
    %118 = vector.broadcast %117 : vector<1x512xf32> to vector<8x512xf32>
    %119 = arith.mulf %116, %118 : vector<8x512xf32>
    %cst_80 = arith.constant dense<0.000000e+00> : vector<8xf32>
    %120 = vector.multi_reduction <add>, %119, %cst_80 [1] : vector<8x512xf32> to vector<8xf32>
    %121 = vector.shape_cast %120 : vector<8xf32> to vector<8x1xf32>
    %122 = vector.extract_strided_slice %121 {offsets = [0, 0], sizes = [1, 1], strides = [1, 1]} : vector<8x1xf32> to vector<1x1xf32>
    %c0_81 = arith.constant 0 : index
    %c0_82 = arith.constant 0 : index
    %123 = vector.load %arg11[%c0_81, %c0_82] : memref<1x1xf32, #tpu.memory_space<vmem>>, vector<1x1xf32>
    %124 = arith.addf %122, %123 : vector<1x1xf32>
    %c0_83 = arith.constant 0 : index
    %c0_84 = arith.constant 0 : index
    %c0_85 = arith.constant 0 : index
    %125 = vector.load %arg12[%c0_83, %c0_84, %c0_85] : memref<1x1x1xf32, #tpu.memory_space<vmem>>, vector<1x1x1xf32>
    %126 = vector.shape_cast %125 : vector<1x1x1xf32> to vector<1x1xf32>
    %127 = vector.shape_cast %124 : vector<1x1xf32> to vector<1x1x1xf32>
    tpu.vector_store %arg12[%c0_83, %c0_84, %c0_85], %127 {strides = array<i32>} : memref<1x1x1xf32, #tpu.memory_space<vmem>>, vector<1x1x1xf32>,
    return
  }
  func.func @transform_0(%arg0: i32) -> (i32, i32, i32, i32) {
    %c0_i32 = arith.constant 0 : i32
    %c0_i32_0 = arith.constant 0 : i32
    %c0_i32_1 = arith.constant 0 : i32
    %c0_i32_2 = arith.constant 0 : i32
    return %arg0, %c0_i32, %c0_i32_0, %c0_i32_1 : i32, i32, i32, i32
  }
  func.func @transform_1(%arg0: i32) -> (i32, i32) {
    %c0_i32 = arith.constant 0 : i32
    %c0_i32_0 = arith.constant 0 : i32
    %c0_i32_1 = arith.constant 0 : i32
    return %c0_i32, %c0_i32_0 : i32, i32
  }
  func.func @transform_2(%arg0: i32) -> (i32, i32) {
    %c0_i32 = arith.constant 0 : i32
    %c0_i32_0 = arith.constant 0 : i32
    %c0_i32_1 = arith.constant 0 : i32
    return %c0_i32, %c0_i32_0 : i32, i32
  }
  func.func @transform_3(%arg0: i32) -> (i32, i32) {
    %c0_i32 = arith.constant 0 : i32
    %c0_i32_0 = arith.constant 0 : i32
    %c0_i32_1 = arith.constant 0 : i32
    return %c0_i32, %c0_i32_0 : i32, i32
  }
  func.func @transform_4(%arg0: i32) -> (i32, i32) {
    %c0_i32 = arith.constant 0 : i32
    %c0_i32_0 = arith.constant 0 : i32
    %c0_i32_1 = arith.constant 0 : i32
    return %c0_i32, %c0_i32_0 : i32, i32
  }
  func.func @transform_5(%arg0: i32) -> (i32, i32) {
    %c0_i32 = arith.constant 0 : i32
    %c0_i32_0 = arith.constant 0 : i32
    %c0_i32_1 = arith.constant 0 : i32
    return %c0_i32, %c0_i32_0 : i32, i32
  }
  func.func @transform_6(%arg0: i32) -> (i32, i32) {
    %c0_i32 = arith.constant 0 : i32
    %c0_i32_0 = arith.constant 0 : i32
    %c0_i32_1 = arith.constant 0 : i32
    return %c0_i32, %c0_i32_0 : i32, i32
  }
  func.func @transform_7(%arg0: i32) -> (i32, i32) {
    %c0_i32 = arith.constant 0 : i32
    %c0_i32_0 = arith.constant 0 : i32
    %c0_i32_1 = arith.constant 0 : i32
    return %c0_i32, %c0_i32_0 : i32, i32
  }
  func.func @transform_8(%arg0: i32) -> (i32, i32) {
    %c0_i32 = arith.constant 0 : i32
    %c0_i32_0 = arith.constant 0 : i32
    %c0_i32_1 = arith.constant 0 : i32
    return %c0_i32, %c0_i32_0 : i32, i32
  }
  func.func @transform_9(%arg0: i32) -> (i32, i32) {
    %c0_i32 = arith.constant 0 : i32
    %c0_i32_0 = arith.constant 0 : i32
    %c0_i32_1 = arith.constant 0 : i32
    return %c0_i32, %c0_i32_0 : i32, i32
  }
  func.func @transform_10(%arg0: i32) -> (i32, i32) {
    %c0_i32 = arith.constant 0 : i32
    %c0_i32_0 = arith.constant 0 : i32
    %c0_i32_1 = arith.constant 0 : i32
    return %c0_i32, %c0_i32_0 : i32, i32
  }
  func.func @transform_11(%arg0: i32) -> (i32, i32, i32) {
    %c0_i32 = arith.constant 0 : i32
    %c0_i32_0 = arith.constant 0 : i32
    %c0_i32_1 = arith.constant 0 : i32
    return %arg0, %c0_i32, %c0_i32_0 : i32, i32, i32
  }
}

</mosaic_0001>

<bundles_post_ra>
// kernel: mamba_vision_forward.2
= control target key start
LH: loop header
LB: loop body
LE: loop exit
PB: predicated region body
PF: predicated region fallthrough
CT: control target
= control target key end

     0   :  { %s3188_s12 = smov 0   ;;  %s3501_s0 = inlined_call_operand.vmem [shape: bf16[2,1024,128], index: 0, kind: input, shape index: {}]   ;;  %s3502_s1 = inlined_call_operand.vmem [shape: bf16[128,128], index: 1, kind: input, shape index: {}]   ;;  %s3503_s2 = inlined_call_operand.vmem [shape: f32[1,128], index: 2, kind: input, shape index: {}]   ;;  %s3504_s3 = inlined_call_operand.vmem [shape: bf16[2,1024,128], index: 3, kind: output, shape index: {}]  }
   0x1 LB: > { %s2123_s13 = sadd.s32 4294967295, %s3166_s12   ;;  %p2127_p0 = scmp.ge.s32.totalorder %s3166_s12, 1  ;;  %s3166_s12 = sphi %s3188_s12, %s13_s12  }
   0x2   : > { %p137_p1 = scmp.lt.s32.totalorder %s3166_s12, 3 }
   0x4   : > { %p138_p2 = pnand %p2127_p0, %p137_p1 }
   0x5   : > { %p161_p3 = scmp.lt.s32.totalorder (!%p138_p2), %s2123_s13, 1 }
   0x6   : > { %141 = sbr.rel (%p138_p2) target bundleno = 370 (0x172), region = 32 }
   0xb   : > { %v3088_v0 = vld [vmem:[%s3502_s1 + $0x38] sm:$0xff]   ;;  %v3089_v1 = vld [vmem:[%s3502_s1 + $0x30] sm:$0xff]   ;;  %s3506_s13 = smov (!%p161_p3, %s2123_s13), 1  ;;  %v3090_v2 = vld [vmem:[%s3502_s1 + $0x28] sm:$0xff]  }
   0xc   : > { %2920 = vmatprep.subr.bf16.mxu0 %v3088_v0  ;;  %3064 = vmatprep.subr.bf16.mxu1 %v3088_v0  ;;  %s2335_s20 = sshll.u32 %s3506_s13, 9  ;;  %v3091_v3 = vld [vmem:[%s3502_s1 + $0x20] sm:$0xff]   ;;  %v3092_v6 = vld [vmem:[%s3502_s1 + $0x18] sm:$0xff]   ;;  %v3093_v7 = vld [vmem:[%s3502_s1 + $0x10] sm:$0xff]  }
   0xd   : > { %2921 = vmatpush3.bf16.msra.mxu0 %v3088_v0  ;;  %3072 = vmatpush3.bf16.msra.mxu1 %v3088_v0  ;;  %s3213_s23 = scalar_lea.vmem %s3501_s0, %s2335_s20  ;;  %v3094_v8 = vld [vmem:[%s3502_s1 + $0x8] sm:$0xff]   ;;  %v3095_v9 = vld [vmem:[%s3502_s1] sm:$0xff]   ;;  %s3312_s11 = scalar_lea.vmem %s3504_s3, %s2335_s20 }
   0xe   : > { %2922 = vmatprep.subr.bf16.mxu0 %v3089_v1  ;;  %3065 = vmatprep.subr.bf16.mxu1 %v3089_v1  ;;  %v3096_v4 = vld [vmem:[%s3213_s23] sm:$0xff]   ;;  %v3098_v10 = vld [vmem:[%s3213_s23 + $0x8] sm:$0xff]   ;;  %v3100_v12 = vld [vmem:[%s3213_s23 + $0x10] sm:$0xff]  }
   0xf   : > { %v3097_v5 = vld [vmem:[%s3213_s23 + $0x100] sm:$0xff]   ;;  %2936 = vmatprep.mubr.bf16.mxu0 %v3096_v4  ;;  %v3099_v11 = vld [vmem:[%s3213_s23 + $0x108] sm:$0xff]   ;;  %v3101_v13 = vld [vmem:[%s3213_s23 + $0x110] sm:$0xff]  }
  0x10   : > { %3000 = vmatprep.mubr.bf16.mxu1 %v3097_v5  ;;  %v3102_v14 = vld [vmem:[%s3213_s23 + $0x18] sm:$0xff]   ;;  %v3104_v16 = vld [vmem:[%s3213_s23 + $0x20] sm:$0xff]   ;;  %v3106_v18 = vld [vmem:[%s3213_s23 + $0x28] sm:$0xff]  }
  0x11   : > { %2923 = vmatpush3.bf16.msra.mxu0 %v3089_v1  ;;  %3073 = vmatpush3.bf16.msra.mxu1 %v3089_v1  ;;  %v3103_v15 = vld [vmem:[%s3213_s23 + $0x118] sm:$0xff]   ;;  %v3105_v17 = vld [vmem:[%s3213_s23 + $0x120] sm:$0xff]   ;;  %v3107_v19 = vld [vmem:[%s3213_s23 + $0x128] sm:$0xff]  }
  0x12   : > { %2924 = vmatprep.subr.bf16.mxu0 %v3090_v2  ;;  %3066 = vmatprep.subr.bf16.mxu1 %v3090_v2  ;;  %v3108_v20 = vld [vmem:[%s3213_s23 + $0x30] sm:$0xff]   ;;  %v3110_v22 = vld [vmem:[%s3213_s23 + $0x38] sm:$0xff]   ;;  %v3112_v24 = vld [vmem:[%s3213_s23 + $0x40] sm:$0xff]  }
  0x13   : > { %v3109_v21 = vld [vmem:[%s3213_s23 + $0x130] sm:$0xff]   ;;  %v3111_v23 = vld [vmem:[%s3213_s23 + $0x138] sm:$0xff]   ;;  %v3113_v25 = vld [vmem:[%s3213_s23 + $0x140] sm:$0xff]  }
  0x14   : > { %v3114_v26 = vld [vmem:[%s3213_s23 + $0x48] sm:$0xff]   ;;  %v3116_v28 = vld [vmem:[%s3213_s23 + $0x50] sm:$0xff]   ;;  %v3118_v30 = vld [vmem:[%s3213_s23 + $0x58] sm:$0xff]  }
  0x15   : > { %2925 = vmatpush3.bf16.msra.mxu0 %v3090_v2  ;;  %3074 = vmatpush3.bf16.msra.mxu1 %v3090_v2  ;;  %v3115_v27 = vld [vmem:[%s3213_s23 + $0x148] sm:$0xff]   ;;  %v3117_v29 = vld [vmem:[%s3213_s23 + $0x150] sm:$0xff]   ;;  %v3119_v31 = vld [vmem:[%s3213_s23 + $0x158] sm:$0xff]  }
  0x16   : > { %2926 = vmatprep.subr.bf16.mxu0 %v3091_v3  ;;  %3067 = vmatprep.subr.bf16.mxu1 %v3091_v3  ;;  %v3120_v32 = vld [vmem:[%s3213_s23 + $0x60] sm:$0xff]   ;;  %v3122_v34 = vld [vmem:[%s3213_s23 + $0x68] sm:$0xff]   ;;  %v3124_v36 = vld [vmem:[%s3213_s23 + $0x70] sm:$0xff]  }
  0x17   : > { %v3121_v33 = vld [vmem:[%s3213_s23 + $0x160] sm:$0xff]   ;;  %v3123_v35 = vld [vmem:[%s3213_s23 + $0x168] sm:$0xff]   ;;  %v3125_v37 = vld [vmem:[%s3213_s23 + $0x170] sm:$0xff]  }
  0x18   : > { %v3126_v38 = vld [vmem:[%s3213_s23 + $0x78] sm:$0xff]   ;;  %v3128_v40 = vld [vmem:[%s3213_s23 + $0x80] sm:$0xff]   ;;  %v3130_v42 = vld [vmem:[%s3213_s23 + $0x88] sm:$0xff]  }
  0x19   : > { %2927 = vmatpush3.bf16.msra.mxu0 %v3091_v3  ;;  %3075 = vmatpush3.bf16.msra.mxu1 %v3091_v3  ;;  %v3127_v39 = vld [vmem:[%s3213_s23 + $0x178] sm:$0xff]   ;;  %v3129_v41 = vld [vmem:[%s3213_s23 + $0x180] sm:$0xff]   ;;  %v3131_v43 = vld [vmem:[%s3213_s23 + $0x188] sm:$0xff]  }
  0x1a   : > { %2928 = vmatprep.subr.bf16.mxu0 %v3092_v6  ;;  %3068 = vmatprep.subr.bf16.mxu1 %v3092_v6  ;;  %v3132_v44 = vld [vmem:[%s3213_s23 + $0x90] sm:$0xff]   ;;  %v3134_v46 = vld [vmem:[%s3213_s23 + $0x98] sm:$0xff]   ;;  %v3136_v48 = vld [vmem:[%s3213_s23 + $0xa0] sm:$0xff]  }
  0x1b   : > { %v3133_v45 = vld [vmem:[%s3213_s23 + $0x190] sm:$0xff]   ;;  %v3135_v47 = vld [vmem:[%s3213_s23 + $0x198] sm:$0xff]   ;;  %v3137_v49 = vld [vmem:[%s3213_s23 + $0x1a0] sm:$0xff]  }
  0x1c   : > { %v3138_v50 = vld [vmem:[%s3213_s23 + $0xa8] sm:$0xff]   ;;  %v3140_v52 = vld [vmem:[%s3213_s23 + $0xb0] sm:$0xff]   ;;  %v3142_v54 = vld [vmem:[%s3213_s23 + $0xb8] sm:$0xff]  }
  0x1d   : > { %2929 = vmatpush3.bf16.msra.mxu0 %v3092_v6  ;;  %3076 = vmatpush3.bf16.msra.mxu1 %v3092_v6  ;;  %v3139_v51 = vld [vmem:[%s3213_s23 + $0x1a8] sm:$0xff]   ;;  %v3141_v53 = vld [vmem:[%s3213_s23 + $0x1b0] sm:$0xff]   ;;  %v3143_v55 = vld [vmem:[%s3213_s23 + $0x1b8] sm:$0xff]  }
  0x1e   : > { %2930 = vmatprep.subr.bf16.mxu0 %v3093_v7  ;;  %3069 = vmatprep.subr.bf16.mxu1 %v3093_v7  ;;  %v3144_v56 = vld [vmem:[%s3213_s23 + $0xc0] sm:$0xff]   ;;  %v3146_v58 = vld [vmem:[%s3213_s23 + $0xc8] sm:$0xff]   ;;  %v3148_v60 = vld [vmem:[%s3213_s23 + $0xd0] sm:$0xff]  }
  0x1f   : > { %v3145_v57 = vld [vmem:[%s3213_s23 + $0x1c0] sm:$0xff]   ;;  %v3147_v59 = vld [vmem:[%s3213_s23 + $0x1c8] sm:$0xff]   ;;  %v3149_v61 = vld [vmem:[%s3213_s23 + $0x1d0] sm:$0xff]  }
  0x20   : > { %v3150_v62 = vld [vmem:[%s3213_s23 + $0xd8] sm:$0xff]   ;;  %v3152_v0 = vld [vmem:[%s3213_s23 + $0xe0] sm:$0xff]   ;;  %v3154_v2 = vld [vmem:[%s3213_s23 + $0xe8] sm:$0xff]  }
  0x21   : > { %2931 = vmatpush3.bf16.msra.mxu0 %v3093_v7  ;;  %3077 = vmatpush3.bf16.msra.mxu1 %v3093_v7  ;;  %v3151_v63 = vld [vmem:[%s3213_s23 + $0x1d8] sm:$0xff]   ;;  %v3153_v1 = vld [vmem:[%s3213_s23 + $0x1e0] sm:$0xff]   ;;  %v3155_v3 = vld [vmem:[%s3213_s23 + $0x1e8] sm:$0xff]  }
  0x22   : > { %2932 = vmatprep.subr.bf16.mxu0 %v3094_v8  ;;  %3070 = vmatprep.subr.bf16.mxu1 %v3094_v8  ;;  %v3156_v4 = vld [vmem:[%s3213_s23 + $0xf0] sm:$0xff]   ;;  %v3158_v6 = vld [vmem:[%s3213_s23 + $0xf8] sm:$0xff]  }
  0x23   : > { %v3157_v5 = vld [vmem:[%s3213_s23 + $0x1f0] sm:$0xff]   ;;  %v3159_v7 = vld [vmem:[%s3213_s23 + $0x1f8] sm:$0xff]  }
  0x25   : > { %2933 = vmatpush3.bf16.msra.mxu0 %v3094_v8  ;;  %3078 = vmatpush3.bf16.msra.mxu1 %v3094_v8  ;;  %v3297_v8 = vld [vmem:[%s3503_s2] ss:$0 sm:$0xff] }
  0x26   : > { %2934 = vmatprep.subr.bf16.mxu0 %v3095_v9  ;;  %3071 = vmatprep.subr.bf16.mxu1 %v3095_v9 }
  0x29   : > { %2935 = vmatpush3.bf16.msra.mxu0 %v3095_v9  ;;  %3079 = vmatpush3.bf16.msra.mxu1 %v3095_v9 }
  0x2c   : > { %2937 = vmatmul.mubr.bf16.vlgmr.msra.gmra.mxu0 %v3098_v10  ;;  %3001 = vmatmul.mubr.bf16.vlgmr.msra.gmra.mxu1 %v3099_v11 }
  0x2d   : > { %2940 = vmatprep.mubr.bf16.mxu0 %v3100_v12  ;;  %3004 = vmatprep.mubr.bf16.mxu1 %v3101_v13 }
  0x34   : > { %2941 = vmatmul.mubr.bf16.gmra.mxu0 %v3102_v14  ;;  %3005 = vmatmul.mubr.bf16.gmra.mxu1 %v3103_v15 }
  0x35   : > { %2944 = vmatprep.mubr.bf16.mxu0 %v3104_v16  ;;  %3008 = vmatprep.mubr.bf16.mxu1 %v3105_v17 }
  0x3c   : > { %2945 = vmatmul.mubr.bf16.gmra.mxu0 %v3106_v18  ;;  %3009 = vmatmul.mubr.bf16.gmra.mxu1 %v3107_v19 }
  0x3d   : > { %2948 = vmatprep.mubr.bf16.mxu0 %v3108_v20  ;;  %3012 = vmatprep.mubr.bf16.mxu1 %v3109_v21 }
  0x44   : > { %2949 = vmatmul.mubr.bf16.gmra.mxu0 %v3110_v22  ;;  %3013 = vmatmul.mubr.bf16.gmra.mxu1 %v3111_v23 }
  0x45   : > { %2952 = vmatprep.mubr.bf16.mxu0 %v3112_v24  ;;  %3016 = vmatprep.mubr.bf16.mxu1 %v3113_v25 }
  0x4c   : > { %2953 = vmatmul.mubr.bf16.gmra.mxu0 %v3114_v26  ;;  %3017 = vmatmul.mubr.bf16.gmra.mxu1 %v3115_v27 }
  0x4d   : > { %2956 = vmatprep.mubr.bf16.mxu0 %v3116_v28  ;;  %3020 = vmatprep.mubr.bf16.mxu1 %v3117_v29 }
  0x54   : > { %2957 = vmatmul.mubr.bf16.gmra.mxu0 %v3118_v30  ;;  %3021 = vmatmul.mubr.bf16.gmra.mxu1 %v3119_v31 }
  0x55   : > { %2960 = vmatprep.mubr.bf16.mxu0 %v3120_v32  ;;  %3024 = vmatprep.mubr.bf16.mxu1 %v3121_v33 }
  0x5c   : > { %2961 = vmatmul.mubr.bf16.gmra.mxu0 %v3122_v34  ;;  %3025 = vmatmul.mubr.bf16.gmra.mxu1 %v3123_v35 }
  0x5d   : > { %2964 = vmatprep.mubr.bf16.mxu0 %v3124_v36  ;;  %3028 = vmatprep.mubr.bf16.mxu1 %v3125_v37 }
  0x64   : > { %2965 = vmatmul.mubr.bf16.gmra.mxu0 %v3126_v38  ;;  %3029 = vmatmul.mubr.bf16.gmra.mxu1 %v3127_v39 }
  0x65   : > { %2968 = vmatprep.mubr.bf16.mxu0 %v3128_v40  ;;  %3032 = vmatprep.mubr.bf16.mxu1 %v3129_v41 }
  0x6c   : > { %2969 = vmatmul.mubr.bf16.gmra.mxu0 %v3130_v42  ;;  %3033 = vmatmul.mubr.bf16.gmra.mxu1 %v3131_v43 }
  0x6d   : > { %2972 = vmatprep.mubr.bf16.mxu0 %v3132_v44  ;;  %3036 = vmatprep.mubr.bf16.mxu1 %v3133_v45 }
  0x74   : > { %2973 = vmatmul.mubr.bf16.gmra.mxu0 %v3134_v46  ;;  %3037 = vmatmul.mubr.bf16.gmra.mxu1 %v3135_v47 }
  0x75   : > { %2976 = vmatprep.mubr.bf16.mxu0 %v3136_v48  ;;  %3040 = vmatprep.mubr.bf16.mxu1 %v3137_v49 }
  0x7c   : > { %2977 = vmatmul.mubr.bf16.gmra.mxu0 %v3138_v50  ;;  %3041 = vmatmul.mubr.bf16.gmra.mxu1 %v3139_v51 }
  0x7d   : > { %2980 = vmatprep.mubr.bf16.mxu0 %v3140_v52  ;;  %3044 = vmatprep.mubr.bf16.mxu1 %v3141_v53 }
  0x84   : > { %2981 = vmatmul.mubr.bf16.gmra.mxu0 %v3142_v54  ;;  %3045 = vmatmul.mubr.bf16.gmra.mxu1 %v3143_v55 }
  0x85   : > { %2984 = vmatprep.mubr.bf16.mxu0 %v3144_v56  ;;  %3048 = vmatprep.mubr.bf16.mxu1 %v3145_v57 }
  0x8c   : > { %2985 = vmatmul.mubr.bf16.gmra.mxu0 %v3146_v58  ;;  %3049 = vmatmul.mubr.bf16.gmra.mxu1 %v3147_v59 }
  0x8d   : > { %2988 = vmatprep.mubr.bf16.mxu0 %v3148_v60  ;;  %3052 = vmatprep.mubr.bf16.mxu1 %v3149_v61 }
  0x94   : > { %2989 = vmatmul.mubr.bf16.gmra.mxu0 %v3150_v62  ;;  %3053 = vmatmul.mubr.bf16.gmra.mxu1 %v3151_v63 }
  0x95   : > { %2992 = vmatprep.mubr.bf16.mxu0 %v3152_v0  ;;  %3056 = vmatprep.mubr.bf16.mxu1 %v3153_v1 }
  0x9c   : > { %2993 = vmatmul.mubr.bf16.gmra.mxu0 %v3154_v2  ;;  %3057 = vmatmul.mubr.bf16.gmra.mxu1 %v3155_v3 }
  0x9d   : > { %2996 = vmatprep.mubr.bf16.mxu0 %v3156_v4  ;;  %3060 = vmatprep.mubr.bf16.mxu1 %v3157_v5 }
  0xa4   : > { %2997 = vmatmul.mubr.bf16.gmra.mxu0 %v3158_v6  ;;  %3061 = vmatmul.mubr.bf16.gmra.mxu1 %v3159_v7 }
  0xec   : > { %v2938_v9 = vpop.f32.mrf.mxu0  ;;  %v3002_v10 = vpop.f32.mrf.mxu1 }
  0xed   : > { %v798_v11 = vadd.f32 %v2938_v9, %v3297_v8  ;;  %v1054_v12 = vadd.f32 %v3002_v10, %v3297_v8 }
  0xee   : > { %v789_v13 = vpop.f32.mrf.mxu0  ;;  %v1045_v14 = vpop.f32.mrf.mxu1 }
  0xef   : > { %v790_v15 = vadd.f32 %v3297_v8, %v789_v13  ;;  %v1046_v16 = vadd.f32 %v3297_v8, %v1045_v14  ;;  %v1302_v21 = vmax.f32 %v798_v11, 0.0  ;;  %v1366_v22 = vmax.f32 %v1054_v12, 0.0 }
  0xf0   : > { %v2939_v17 = vpop.f32.mrf.mxu0  ;;  %v3003_v18 = vpop.f32.mrf.mxu1 }
  0xf1   : > { %v801_v19 = vadd.f32 %v2939_v17, %v3297_v8  ;;  %v1057_v20 = vadd.f32 %v3003_v18, %v3297_v8  ;;  %v1300_v29 = vmax.f32 %v790_v15, 0.0  ;;  %v1364_v30 = vmax.f32 %v1046_v16, 0.0 }
  0xf2   : > { %v792_v23 = vpop.f32.mrf.mxu0  ;;  %v1048_v24 = vpop.f32.mrf.mxu1 }
  0xf3   : > { %v1303_v25 = vmax.f32 %v801_v19, 0.0  ;;  %v1367_v26 = vmax.f32 %v1057_v20, 0.0  ;;  %v793_v27 = vadd.f32 %v3297_v8, %v792_v23  ;;  %v1049_v28 = vadd.f32 %v3297_v8, %v1048_v24 }
  0xf4   : > { %v2942_v31 = vpop.f32.mrf.mxu0  ;;  %v3006_v32 = vpop.f32.mrf.mxu1 }
  0xf5   : > { %v2473_v33 = vpack.c.bf16 %v1303_v25, %v1302_v21  ;;  %v2633_v34 = vpack.c.bf16 %v1367_v26, %v1366_v22  ;;  %v1301_v35 = vmax.f32 %v793_v27, 0.0  ;;  %v1365_v36 = vmax.f32 %v1049_v28, 0.0 }
  0xf6   : > { %v814_v37 = vadd.f32 %v2942_v31, %v3297_v8  ;;  %v1070_v38 = vadd.f32 %v3006_v32, %v3297_v8  ;;  %v805_v39 = vpop.f32.mrf.mxu0  ;;  %v1061_v40 = vpop.f32.mrf.mxu1 }
  0xf7   : > { %2785 = vst [vmem:[%s3312_s11 + $0x8] sm:$0xff] %v2473_v33   ;;  %2817 = vst [vmem:[%s3312_s11 + $0x108] sm:$0xff] %v2633_v34   ;;  %v2468_v41 = vpack.c.bf16 %v1301_v35, %v1300_v29  ;;  %v2628_v42 = vpack.c.bf16 %v1365_v36, %v1364_v30  ;;  %v806_v43 = vadd.f32 %v3297_v8, %v805_v39 }
  0xf8   : > { %v1062_v44 = vadd.f32 %v3297_v8, %v1061_v40  ;;  %v2943_v45 = vpop.f32.mrf.mxu0  ;;  %v3007_v46 = vpop.f32.mrf.mxu1  ;;  %v1306_v49 = vmax.f32 %v814_v37, 0.0  ;;  %v1370_v50 = vmax.f32 %v1070_v38, 0.0 }
  0xf9   : > { %2469 = vst [vmem:[%s3312_s11] sm:$0xff] %v2468_v41   ;;  %2816 = vst [vmem:[%s3312_s11 + $0x100] sm:$0xff] %v2628_v42   ;;  %v817_v47 = vadd.f32 %v2943_v45, %v3297_v8  ;;  %v1073_v48 = vadd.f32 %v3007_v46, %v3297_v8  ;;  %v1304_v57 = vmax.f32 %v806_v43, 0.0 }
  0xfa   : > { %v808_v51 = vpop.f32.mrf.mxu0  ;;  %v1064_v52 = vpop.f32.mrf.mxu1  ;;  %v1368_v58 = vmax.f32 %v1062_v44, 0.0 }
  0xfb   : > { %v1307_v53 = vmax.f32 %v817_v47, 0.0  ;;  %v1371_v54 = vmax.f32 %v1073_v48, 0.0  ;;  %v809_v55 = vadd.f32 %v3297_v8, %v808_v51  ;;  %v1065_v56 = vadd.f32 %v3297_v8, %v1064_v52 }
  0xfc   : > { %v2946_v59 = vpop.f32.mrf.mxu0  ;;  %v3010_v60 = vpop.f32.mrf.mxu1 }
  0xfd   : > { %v2483_v61 = vpack.c.bf16 %v1307_v53, %v1306_v49  ;;  %v2643_v62 = vpack.c.bf16 %v1371_v54, %v1370_v50  ;;  %v1305_v63 = vmax.f32 %v809_v55, 0.0  ;;  %v1369_v0 = vmax.f32 %v1065_v56, 0.0 }
  0xfe   : > { %v830_v1 = vadd.f32 %v2946_v59, %v3297_v8  ;;  %v1086_v2 = vadd.f32 %v3010_v60, %v3297_v8  ;;  %v821_v3 = vpop.f32.mrf.mxu0  ;;  %v1077_v4 = vpop.f32.mrf.mxu1 }
  0xff   : > { %2787 = vst [vmem:[%s3312_s11 + $0x18] sm:$0xff] %v2483_v61   ;;  %2819 = vst [vmem:[%s3312_s11 + $0x118] sm:$0xff] %v2643_v62   ;;  %v2478_v5 = vpack.c.bf16 %v1305_v63, %v1304_v57  ;;  %v2638_v6 = vpack.c.bf16 %v1369_v0, %v1368_v58  ;;  %v822_v7 = vadd.f32 %v3297_v8, %v821_v3 }
 0x100   : > { %v1078_v9 = vadd.f32 %v3297_v8, %v1077_v4  ;;  %v2947_v10 = vpop.f32.mrf.mxu0  ;;  %v3011_v11 = vpop.f32.mrf.mxu1  ;;  %v1310_v14 = vmax.f32 %v830_v1, 0.0  ;;  %v1374_v15 = vmax.f32 %v1086_v2, 0.0 }
 0x101   : > { %2786 = vst [vmem:[%s3312_s11 + $0x10] sm:$0xff] %v2478_v5   ;;  %2818 = vst [vmem:[%s3312_s11 + $0x110] sm:$0xff] %v2638_v6   ;;  %v833_v12 = vadd.f32 %v2947_v10, %v3297_v8  ;;  %v1089_v13 = vadd.f32 %v3011_v11, %v3297_v8  ;;  %v1308_v22 = vmax.f32 %v822_v7, 0.0 }
 0x102   : > { %v824_v16 = vpop.f32.mrf.mxu0  ;;  %v1080_v17 = vpop.f32.mrf.mxu1  ;;  %v1372_v23 = vmax.f32 %v1078_v9, 0.0 }
 0x103   : > { %v1311_v18 = vmax.f32 %v833_v12, 0.0  ;;  %v1375_v19 = vmax.f32 %v1089_v13, 0.0  ;;  %v825_v20 = vadd.f32 %v3297_v8, %v824_v16  ;;  %v1081_v21 = vadd.f32 %v3297_v8, %v1080_v17 }
 0x104   : > { %v2950_v24 = vpop.f32.mrf.mxu0  ;;  %v3014_v25 = vpop.f32.mrf.mxu1 }
 0x105   : > { %v2493_v26 = vpack.c.bf16 %v1311_v18, %v1310_v14  ;;  %v2653_v27 = vpack.c.bf16 %v1375_v19, %v1374_v15  ;;  %v1309_v28 = vmax.f32 %v825_v20, 0.0  ;;  %v1373_v29 = vmax.f32 %v1081_v21, 0.0 }
 0x106   : > { %v846_v30 = vadd.f32 %v2950_v24, %v3297_v8  ;;  %v1102_v31 = vadd.f32 %v3014_v25, %v3297_v8  ;;  %v837_v32 = vpop.f32.mrf.mxu0  ;;  %v1093_v33 = vpop.f32.mrf.mxu1 }
 0x107   : > { %2789 = vst [vmem:[%s3312_s11 + $0x28] sm:$0xff] %v2493_v26   ;;  %2821 = vst [vmem:[%s3312_s11 + $0x128] sm:$0xff] %v2653_v27   ;;  %v2488_v34 = vpack.c.bf16 %v1309_v28, %v1308_v22  ;;  %v2648_v35 = vpack.c.bf16 %v1373_v29, %v1372_v23  ;;  %v838_v36 = vadd.f32 %v3297_v8, %v837_v32 }
 0x108   : > { %v1094_v37 = vadd.f32 %v3297_v8, %v1093_v33  ;;  %v2951_v38 = vpop.f32.mrf.mxu0  ;;  %v3015_v39 = vpop.f32.mrf.mxu1  ;;  %v1314_v42 = vmax.f32 %v846_v30, 0.0  ;;  %v1378_v43 = vmax.f32 %v1102_v31, 0.0 }
 0x109   : > { %2788 = vst [vmem:[%s3312_s11 + $0x20] sm:$0xff] %v2488_v34   ;;  %2820 = vst [vmem:[%s3312_s11 + $0x120] sm:$0xff] %v2648_v35   ;;  %v849_v40 = vadd.f32 %v2951_v38, %v3297_v8  ;;  %v1105_v41 = vadd.f32 %v3015_v39, %v3297_v8  ;;  %v1312_v50 = vmax.f32 %v838_v36, 0.0 }
 0x10a   : > { %v840_v44 = vpop.f32.mrf.mxu0  ;;  %v1096_v45 = vpop.f32.mrf.mxu1  ;;  %v1376_v51 = vmax.f32 %v1094_v37, 0.0 }
 0x10b   : > { %v1315_v46 = vmax.f32 %v849_v40, 0.0  ;;  %v1379_v47 = vmax.f32 %v1105_v41, 0.0  ;;  %v841_v48 = vadd.f32 %v3297_v8, %v840_v44  ;;  %v1097_v49 = vadd.f32 %v3297_v8, %v1096_v45 }
 0x10c   : > { %v2954_v52 = vpop.f32.mrf.mxu0  ;;  %v3018_v53 = vpop.f32.mrf.mxu1 }
 0x10d   : > { %v2503_v54 = vpack.c.bf16 %v1315_v46, %v1314_v42  ;;  %v2663_v55 = vpack.c.bf16 %v1379_v47, %v1378_v43  ;;  %v1313_v56 = vmax.f32 %v841_v48, 0.0  ;;  %v1377_v57 = vmax.f32 %v1097_v49, 0.0 }
 0x10e   : > { %v862_v58 = vadd.f32 %v2954_v52, %v3297_v8  ;;  %v1118_v59 = vadd.f32 %v3018_v53, %v3297_v8  ;;  %v853_v60 = vpop.f32.mrf.mxu0  ;;  %v1109_v61 = vpop.f32.mrf.mxu1 }
 0x10f   : > { %2791 = vst [vmem:[%s3312_s11 + $0x38] sm:$0xff] %v2503_v54   ;;  %2823 = vst [vmem:[%s3312_s11 + $0x138] sm:$0xff] %v2663_v55   ;;  %v2498_v62 = vpack.c.bf16 %v1313_v56, %v1312_v50  ;;  %v2658_v63 = vpack.c.bf16 %v1377_v57, %v1376_v51  ;;  %v854_v0 = vadd.f32 %v3297_v8, %v853_v60 }
 0x110   : > { %v1110_v1 = vadd.f32 %v3297_v8, %v1109_v61  ;;  %v2955_v2 = vpop.f32.mrf.mxu0  ;;  %v3019_v3 = vpop.f32.mrf.mxu1  ;;  %v1318_v6 = vmax.f32 %v862_v58, 0.0  ;;  %v1382_v7 = vmax.f32 %v1118_v59, 0.0 }
 0x111   : > { %2790 = vst [vmem:[%s3312_s11 + $0x30] sm:$0xff] %v2498_v62   ;;  %2822 = vst [vmem:[%s3312_s11 + $0x130] sm:$0xff] %v2658_v63   ;;  %v865_v4 = vadd.f32 %v2955_v2, %v3297_v8  ;;  %v1121_v5 = vadd.f32 %v3019_v3, %v3297_v8  ;;  %v1316_v15 = vmax.f32 %v854_v0, 0.0 }
 0x112   : > { %v856_v9 = vpop.f32.mrf.mxu0  ;;  %v1112_v10 = vpop.f32.mrf.mxu1  ;;  %v1380_v16 = vmax.f32 %v1110_v1, 0.0 }
 0x113   : > { %v1319_v11 = vmax.f32 %v865_v4, 0.0  ;;  %v1383_v12 = vmax.f32 %v1121_v5, 0.0  ;;  %v857_v13 = vadd.f32 %v3297_v8, %v856_v9  ;;  %v1113_v14 = vadd.f32 %v3297_v8, %v1112_v10 }
 0x114   : > { %v2958_v17 = vpop.f32.mrf.mxu0  ;;  %v3022_v18 = vpop.f32.mrf.mxu1 }
 0x115   : > { %v2513_v19 = vpack.c.bf16 %v1319_v11, %v1318_v6  ;;  %v2673_v20 = vpack.c.bf16 %v1383_v12, %v1382_v7  ;;  %v1317_v21 = vmax.f32 %v857_v13, 0.0  ;;  %v1381_v22 = vmax.f32 %v1113_v14, 0.0 }
 0x116   : > { %v878_v23 = vadd.f32 %v2958_v17, %v3297_v8  ;;  %v1134_v24 = vadd.f32 %v3022_v18, %v3297_v8  ;;  %v869_v25 = vpop.f32.mrf.mxu0  ;;  %v1125_v26 = vpop.f32.mrf.mxu1 }
 0x117   : > { %2793 = vst [vmem:[%s3312_s11 + $0x48] sm:$0xff] %v2513_v19   ;;  %2825 = vst [vmem:[%s3312_s11 + $0x148] sm:$0xff] %v2673_v20   ;;  %v2508_v27 = vpack.c.bf16 %v1317_v21, %v1316_v15  ;;  %v2668_v28 = vpack.c.bf16 %v1381_v22, %v1380_v16  ;;  %v870_v29 = vadd.f32 %v3297_v8, %v869_v25 }
 0x118   : > { %v1126_v30 = vadd.f32 %v3297_v8, %v1125_v26  ;;  %v2959_v31 = vpop.f32.mrf.mxu0  ;;  %v3023_v32 = vpop.f32.mrf.mxu1  ;;  %v1322_v35 = vmax.f32 %v878_v23, 0.0  ;;  %v1386_v36 = vmax.f32 %v1134_v24, 0.0 }
 0x119   : > { %2792 = vst [vmem:[%s3312_s11 + $0x40] sm:$0xff] %v2508_v27   ;;  %2824 = vst [vmem:[%s3312_s11 + $0x140] sm:$0xff] %v2668_v28   ;;  %v881_v33 = vadd.f32 %v2959_v31, %v3297_v8  ;;  %v1137_v34 = vadd.f32 %v3023_v32, %v3297_v8  ;;  %v1320_v43 = vmax.f32 %v870_v29, 0.0 }
 0x11a   : > { %v872_v37 = vpop.f32.mrf.mxu0  ;;  %v1128_v38 = vpop.f32.mrf.mxu1  ;;  %v1384_v44 = vmax.f32 %v1126_v30, 0.0 }
 0x11b   : > { %v1323_v39 = vmax.f32 %v881_v33, 0.0  ;;  %v1387_v40 = vmax.f32 %v1137_v34, 0.0  ;;  %v873_v41 = vadd.f32 %v3297_v8, %v872_v37  ;;  %v1129_v42 = vadd.f32 %v3297_v8, %v1128_v38 }
 0x11c   : > { %v2962_v45 = vpop.f32.mrf.mxu0  ;;  %v3026_v46 = vpop.f32.mrf.mxu1 }
 0x11d   : > { %v2523_v47 = vpack.c.bf16 %v1323_v39, %v1322_v35  ;;  %v2683_v48 = vpack.c.bf16 %v1387_v40, %v1386_v36  ;;  %v1321_v49 = vmax.f32 %v873_v41, 0.0  ;;  %v1385_v50 = vmax.f32 %v1129_v42, 0.0 }
 0x11e   : > { %v894_v51 = vadd.f32 %v2962_v45, %v3297_v8  ;;  %v1150_v52 = vadd.f32 %v3026_v46, %v3297_v8  ;;  %v885_v53 = vpop.f32.mrf.mxu0  ;;  %v1141_v54 = vpop.f32.mrf.mxu1 }
 0x11f   : > { %2795 = vst [vmem:[%s3312_s11 + $0x58] sm:$0xff] %v2523_v47   ;;  %2827 = vst [vmem:[%s3312_s11 + $0x158] sm:$0xff] %v2683_v48   ;;  %v2518_v55 = vpack.c.bf16 %v1321_v49, %v1320_v43  ;;  %v2678_v56 = vpack.c.bf16 %v1385_v50, %v1384_v44  ;;  %v886_v57 = vadd.f32 %v3297_v8, %v885_v53 }
 0x120   : > { %v1142_v58 = vadd.f32 %v3297_v8, %v1141_v54  ;;  %v2963_v59 = vpop.f32.mrf.mxu0  ;;  %v3027_v60 = vpop.f32.mrf.mxu1  ;;  %v1326_v63 = vmax.f32 %v894_v51, 0.0  ;;  %v1390_v0 = vmax.f32 %v1150_v52, 0.0 }
 0x121   : > { %2794 = vst [vmem:[%s3312_s11 + $0x50] sm:$0xff] %v2518_v55   ;;  %2826 = vst [vmem:[%s3312_s11 + $0x150] sm:$0xff] %v2678_v56   ;;  %v897_v61 = vadd.f32 %v2963_v59, %v3297_v8  ;;  %v1153_v62 = vadd.f32 %v3027_v60, %v3297_v8  ;;  %v1324_v7 = vmax.f32 %v886_v57, 0.0 }
 0x122   : > { %v888_v1 = vpop.f32.mrf.mxu0  ;;  %v1144_v2 = vpop.f32.mrf.mxu1  ;;  %v1388_v9 = vmax.f32 %v1142_v58, 0.0 }
 0x123   : > { %v1327_v3 = vmax.f32 %v897_v61, 0.0  ;;  %v1391_v4 = vmax.f32 %v1153_v62, 0.0  ;;  %v889_v5 = vadd.f32 %v3297_v8, %v888_v1  ;;  %v1145_v6 = vadd.f32 %v3297_v8, %v1144_v2 }
 0x124   : > { %v2966_v10 = vpop.f32.mrf.mxu0  ;;  %v3030_v11 = vpop.f32.mrf.mxu1 }
 0x125   : > { %v2533_v12 = vpack.c.bf16 %v1327_v3, %v1326_v63  ;;  %v2693_v13 = vpack.c.bf16 %v1391_v4, %v1390_v0  ;;  %v1325_v14 = vmax.f32 %v889_v5, 0.0  ;;  %v1389_v15 = vmax.f32 %v1145_v6, 0.0 }
 0x126   : > { %v910_v16 = vadd.f32 %v2966_v10, %v3297_v8  ;;  %v1166_v17 = vadd.f32 %v3030_v11, %v3297_v8  ;;  %v901_v18 = vpop.f32.mrf.mxu0  ;;  %v1157_v19 = vpop.f32.mrf.mxu1 }
 0x127   : > { %2797 = vst [vmem:[%s3312_s11 + $0x68] sm:$0xff] %v2533_v12   ;;  %2829 = vst [vmem:[%s3312_s11 + $0x168] sm:$0xff] %v2693_v13   ;;  %v2528_v20 = vpack.c.bf16 %v1325_v14, %v1324_v7  ;;  %v2688_v21 = vpack.c.bf16 %v1389_v15, %v1388_v9  ;;  %v902_v22 = vadd.f32 %v3297_v8, %v901_v18 }
 0x128   : > { %v1158_v23 = vadd.f32 %v3297_v8, %v1157_v19  ;;  %v2967_v24 = vpop.f32.mrf.mxu0  ;;  %v3031_v25 = vpop.f32.mrf.mxu1  ;;  %v1330_v28 = vmax.f32 %v910_v16, 0.0  ;;  %v1394_v29 = vmax.f32 %v1166_v17, 0.0 }
 0x129   : > { %2796 = vst [vmem:[%s3312_s11 + $0x60] sm:$0xff] %v2528_v20   ;;  %2828 = vst [vmem:[%s3312_s11 + $0x160] sm:$0xff] %v2688_v21   ;;  %v913_v26 = vadd.f32 %v2967_v24, %v3297_v8  ;;  %v1169_v27 = vadd.f32 %v3031_v25, %v3297_v8  ;;  %v1328_v36 = vmax.f32 %v902_v22, 0.0 }
 0x12a   : > { %v904_v30 = vpop.f32.mrf.mxu0  ;;  %v1160_v31 = vpop.f32.mrf.mxu1  ;;  %v1392_v37 = vmax.f32 %v1158_v23, 0.0 }
 0x12b   : > { %v1331_v32 = vmax.f32 %v913_v26, 0.0  ;;  %v1395_v33 = vmax.f32 %v1169_v27, 0.0  ;;  %v905_v34 = vadd.f32 %v3297_v8, %v904_v30  ;;  %v1161_v35 = vadd.f32 %v3297_v8, %v1160_v31 }
 0x12c   : > { %v2970_v38 = vpop.f32.mrf.mxu0  ;;  %v3034_v39 = vpop.f32.mrf.mxu1 }
 0x12d   : > { %v2543_v40 = vpack.c.bf16 %v1331_v32, %v1330_v28  ;;  %v2703_v41 = vpack.c.bf16 %v1395_v33, %v1394_v29  ;;  %v1329_v42 = vmax.f32 %v905_v34, 0.0  ;;  %v1393_v43 = vmax.f32 %v1161_v35, 0.0 }
 0x12e   : > { %v926_v44 = vadd.f32 %v2970_v38, %v3297_v8  ;;  %v1182_v45 = vadd.f32 %v3034_v39, %v3297_v8  ;;  %v917_v46 = vpop.f32.mrf.mxu0  ;;  %v1173_v47 = vpop.f32.mrf.mxu1 }
 0x12f   : > { %2799 = vst [vmem:[%s3312_s11 + $0x78] sm:$0xff] %v2543_v40   ;;  %2831 = vst [vmem:[%s3312_s11 + $0x178] sm:$0xff] %v2703_v41   ;;  %v2538_v48 = vpack.c.bf16 %v1329_v42, %v1328_v36  ;;  %v2698_v49 = vpack.c.bf16 %v1393_v43, %v1392_v37  ;;  %v918_v50 = vadd.f32 %v3297_v8, %v917_v46 }
 0x130   : > { %v1174_v51 = vadd.f32 %v3297_v8, %v1173_v47  ;;  %v2971_v52 = vpop.f32.mrf.mxu0  ;;  %v3035_v53 = vpop.f32.mrf.mxu1  ;;  %v1334_v56 = vmax.f32 %v926_v44, 0.0  ;;  %v1398_v57 = vmax.f32 %v1182_v45, 0.0 }
 0x131   : > { %2798 = vst [vmem:[%s3312_s11 + $0x70] sm:$0xff] %v2538_v48   ;;  %2830 = vst [vmem:[%s3312_s11 + $0x170] sm:$0xff] %v2698_v49   ;;  %v929_v54 = vadd.f32 %v2971_v52, %v3297_v8  ;;  %v1185_v55 = vadd.f32 %v3035_v53, %v3297_v8  ;;  %v1332_v0 = vmax.f32 %v918_v50, 0.0 }
 0x132   : > { %v920_v58 = vpop.f32.mrf.mxu0  ;;  %v1176_v59 = vpop.f32.mrf.mxu1  ;;  %v1396_v1 = vmax.f32 %v1174_v51, 0.0 }
 0x133   : > { %v1335_v60 = vmax.f32 %v929_v54, 0.0  ;;  %v1399_v61 = vmax.f32 %v1185_v55, 0.0  ;;  %v921_v62 = vadd.f32 %v3297_v8, %v920_v58  ;;  %v1177_v63 = vadd.f32 %v3297_v8, %v1176_v59 }
 0x134   : > { %v2974_v2 = vpop.f32.mrf.mxu0  ;;  %v3038_v3 = vpop.f32.mrf.mxu1 }
 0x135   : > { %v2553_v4 = vpack.c.bf16 %v1335_v60, %v1334_v56  ;;  %v2713_v5 = vpack.c.bf16 %v1399_v61, %v1398_v57  ;;  %v1333_v6 = vmax.f32 %v921_v62, 0.0  ;;  %v1397_v7 = vmax.f32 %v1177_v63, 0.0 }
 0x136   : > { %v942_v9 = vadd.f32 %v2974_v2, %v3297_v8  ;;  %v1198_v10 = vadd.f32 %v3038_v3, %v3297_v8  ;;  %v933_v11 = vpop.f32.mrf.mxu0  ;;  %v1189_v12 = vpop.f32.mrf.mxu1 }
 0x137   : > { %2801 = vst [vmem:[%s3312_s11 + $0x88] sm:$0xff] %v2553_v4   ;;  %2833 = vst [vmem:[%s3312_s11 + $0x188] sm:$0xff] %v2713_v5   ;;  %v2548_v13 = vpack.c.bf16 %v1333_v6, %v1332_v0  ;;  %v2708_v14 = vpack.c.bf16 %v1397_v7, %v1396_v1  ;;  %v934_v15 = vadd.f32 %v3297_v8, %v933_v11 }
 0x138   : > { %v1190_v16 = vadd.f32 %v3297_v8, %v1189_v12  ;;  %v2975_v17 = vpop.f32.mrf.mxu0  ;;  %v3039_v18 = vpop.f32.mrf.mxu1  ;;  %v1338_v21 = vmax.f32 %v942_v9, 0.0  ;;  %v1402_v22 = vmax.f32 %v1198_v10, 0.0 }
 0x139   : > { %2800 = vst [vmem:[%s3312_s11 + $0x80] sm:$0xff] %v2548_v13   ;;  %2832 = vst [vmem:[%s3312_s11 + $0x180] sm:$0xff] %v2708_v14   ;;  %v945_v19 = vadd.f32 %v2975_v17, %v3297_v8  ;;  %v1201_v20 = vadd.f32 %v3039_v18, %v3297_v8  ;;  %v1336_v29 = vmax.f32 %v934_v15, 0.0 }
 0x13a   : > { %v936_v23 = vpop.f32.mrf.mxu0  ;;  %v1192_v24 = vpop.f32.mrf.mxu1  ;;  %v1400_v30 = vmax.f32 %v1190_v16, 0.0 }
 0x13b   : > { %v1339_v25 = vmax.f32 %v945_v19, 0.0  ;;  %v1403_v26 = vmax.f32 %v1201_v20, 0.0  ;;  %v937_v27 = vadd.f32 %v3297_v8, %v936_v23  ;;  %v1193_v28 = vadd.f32 %v3297_v8, %v1192_v24 }
 0x13c   : > { %v2978_v31 = vpop.f32.mrf.mxu0  ;;  %v3042_v32 = vpop.f32.mrf.mxu1 }
 0x13d   : > { %v2563_v33 = vpack.c.bf16 %v1339_v25, %v1338_v21  ;;  %v2723_v34 = vpack.c.bf16 %v1403_v26, %v1402_v22  ;;  %v1337_v35 = vmax.f32 %v937_v27, 0.0  ;;  %v1401_v36 = vmax.f32 %v1193_v28, 0.0 }
 0x13e   : > { %v958_v37 = vadd.f32 %v2978_v31, %v3297_v8  ;;  %v1214_v38 = vadd.f32 %v3042_v32, %v3297_v8  ;;  %v949_v39 = vpop.f32.mrf.mxu0  ;;  %v1205_v40 = vpop.f32.mrf.mxu1 }
 0x13f   : > { %2803 = vst [vmem:[%s3312_s11 + $0x98] sm:$0xff] %v2563_v33   ;;  %2835 = vst [vmem:[%s3312_s11 + $0x198] sm:$0xff] %v2723_v34   ;;  %v2558_v41 = vpack.c.bf16 %v1337_v35, %v1336_v29  ;;  %v2718_v42 = vpack.c.bf16 %v1401_v36, %v1400_v30  ;;  %v950_v43 = vadd.f32 %v3297_v8, %v949_v39 }
 0x140   : > { %v1206_v44 = vadd.f32 %v3297_v8, %v1205_v40  ;;  %v2979_v45 = vpop.f32.mrf.mxu0  ;;  %v3043_v46 = vpop.f32.mrf.mxu1  ;;  %v1342_v49 = vmax.f32 %v958_v37, 0.0  ;;  %v1406_v50 = vmax.f32 %v1214_v38, 0.0 }
 0x141   : > { %2802 = vst [vmem:[%s3312_s11 + $0x90] sm:$0xff] %v2558_v41   ;;  %2834 = vst [vmem:[%s3312_s11 + $0x190] sm:$0xff] %v2718_v42   ;;  %v961_v47 = vadd.f32 %v2979_v45, %v3297_v8  ;;  %v1217_v48 = vadd.f32 %v3043_v46, %v3297_v8  ;;  %v1340_v57 = vmax.f32 %v950_v43, 0.0 }
 0x142   : > { %v952_v51 = vpop.f32.mrf.mxu0  ;;  %v1208_v52 = vpop.f32.mrf.mxu1  ;;  %v1404_v58 = vmax.f32 %v1206_v44, 0.0 }
 0x143   : > { %v1343_v53 = vmax.f32 %v961_v47, 0.0  ;;  %v1407_v54 = vmax.f32 %v1217_v48, 0.0  ;;  %v953_v55 = vadd.f32 %v3297_v8, %v952_v51  ;;  %v1209_v56 = vadd.f32 %v3297_v8, %v1208_v52 }
 0x144   : > { %v2982_v59 = vpop.f32.mrf.mxu0  ;;  %v3046_v60 = vpop.f32.mrf.mxu1 }
 0x145   : > { %v2573_v61 = vpack.c.bf16 %v1343_v53, %v1342_v49  ;;  %v2733_v62 = vpack.c.bf16 %v1407_v54, %v1406_v50  ;;  %v1341_v63 = vmax.f32 %v953_v55, 0.0  ;;  %v1405_v0 = vmax.f32 %v1209_v56, 0.0 }
 0x146   : > { %v974_v1 = vadd.f32 %v2982_v59, %v3297_v8  ;;  %v1230_v2 = vadd.f32 %v3046_v60, %v3297_v8  ;;  %v965_v3 = vpop.f32.mrf.mxu0  ;;  %v1221_v4 = vpop.f32.mrf.mxu1 }
 0x147   : > { %2805 = vst [vmem:[%s3312_s11 + $0xa8] sm:$0xff] %v2573_v61   ;;  %2837 = vst [vmem:[%s3312_s11 + $0x1a8] sm:$0xff] %v2733_v62   ;;  %v2568_v5 = vpack.c.bf16 %v1341_v63, %v1340_v57  ;;  %v2728_v6 = vpack.c.bf16 %v1405_v0, %v1404_v58  ;;  %v966_v7 = vadd.f32 %v3297_v8, %v965_v3 }
 0x148   : > { %v1222_v9 = vadd.f32 %v3297_v8, %v1221_v4  ;;  %v2983_v10 = vpop.f32.mrf.mxu0  ;;  %v3047_v11 = vpop.f32.mrf.mxu1  ;;  %v1346_v14 = vmax.f32 %v974_v1, 0.0  ;;  %v1410_v15 = vmax.f32 %v1230_v2, 0.0 }
 0x149   : > { %2804 = vst [vmem:[%s3312_s11 + $0xa0] sm:$0xff] %v2568_v5   ;;  %2836 = vst [vmem:[%s3312_s11 + $0x1a0] sm:$0xff] %v2728_v6   ;;  %v977_v12 = vadd.f32 %v2983_v10, %v3297_v8  ;;  %v1233_v13 = vadd.f32 %v3047_v11, %v3297_v8  ;;  %v1344_v22 = vmax.f32 %v966_v7, 0.0 }
 0x14a   : > { %v968_v16 = vpop.f32.mrf.mxu0  ;;  %v1224_v17 = vpop.f32.mrf.mxu1  ;;  %v1408_v23 = vmax.f32 %v1222_v9, 0.0 }
 0x14b   : > { %v1347_v18 = vmax.f32 %v977_v12, 0.0  ;;  %v1411_v19 = vmax.f32 %v1233_v13, 0.0  ;;  %v969_v20 = vadd.f32 %v3297_v8, %v968_v16  ;;  %v1225_v21 = vadd.f32 %v3297_v8, %v1224_v17 }
 0x14c   : > { %v2986_v24 = vpop.f32.mrf.mxu0  ;;  %v3050_v25 = vpop.f32.mrf.mxu1 }
 0x14d   : > { %v2583_v26 = vpack.c.bf16 %v1347_v18, %v1346_v14  ;;  %v2743_v27 = vpack.c.bf16 %v1411_v19, %v1410_v15  ;;  %v1345_v28 = vmax.f32 %v969_v20, 0.0  ;;  %v1409_v29 = vmax.f32 %v1225_v21, 0.0 }
 0x14e   : > { %v990_v30 = vadd.f32 %v2986_v24, %v3297_v8  ;;  %v1246_v31 = vadd.f32 %v3050_v25, %v3297_v8  ;;  %v981_v32 = vpop.f32.mrf.mxu0  ;;  %v1237_v33 = vpop.f32.mrf.mxu1 }
 0x14f   : > { %2807 = vst [vmem:[%s3312_s11 + $0xb8] sm:$0xff] %v2583_v26   ;;  %2839 = vst [vmem:[%s3312_s11 + $0x1b8] sm:$0xff] %v2743_v27   ;;  %v2578_v34 = vpack.c.bf16 %v1345_v28, %v1344_v22  ;;  %v2738_v35 = vpack.c.bf16 %v1409_v29, %v1408_v23  ;;  %v982_v36 = vadd.f32 %v3297_v8, %v981_v32 }
 0x150   : > { %v1238_v37 = vadd.f32 %v3297_v8, %v1237_v33  ;;  %v2987_v38 = vpop.f32.mrf.mxu0  ;;  %v3051_v39 = vpop.f32.mrf.mxu1  ;;  %v1350_v42 = vmax.f32 %v990_v30, 0.0  ;;  %v1414_v43 = vmax.f32 %v1246_v31, 0.0 }
 0x151   : > { %2806 = vst [vmem:[%s3312_s11 + $0xb0] sm:$0xff] %v2578_v34   ;;  %2838 = vst [vmem:[%s3312_s11 + $0x1b0] sm:$0xff] %v2738_v35   ;;  %v993_v40 = vadd.f32 %v2987_v38, %v3297_v8  ;;  %v1249_v41 = vadd.f32 %v3051_v39, %v3297_v8  ;;  %v1348_v50 = vmax.f32 %v982_v36, 0.0 }
 0x152   : > { %v984_v44 = vpop.f32.mrf.mxu0  ;;  %v1240_v45 = vpop.f32.mrf.mxu1  ;;  %v1412_v51 = vmax.f32 %v1238_v37, 0.0 }
 0x153   : > { %v1351_v46 = vmax.f32 %v993_v40, 0.0  ;;  %v1415_v47 = vmax.f32 %v1249_v41, 0.0  ;;  %v985_v48 = vadd.f32 %v3297_v8, %v984_v44  ;;  %v1241_v49 = vadd.f32 %v3297_v8, %v1240_v45 }
 0x154   : > { %v2990_v52 = vpop.f32.mrf.mxu0  ;;  %v3054_v53 = vpop.f32.mrf.mxu1 }
 0x155   : > { %v2593_v54 = vpack.c.bf16 %v1351_v46, %v1350_v42  ;;  %v2753_v55 = vpack.c.bf16 %v1415_v47, %v1414_v43  ;;  %v1349_v56 = vmax.f32 %v985_v48, 0.0  ;;  %v1413_v57 = vmax.f32 %v1241_v49, 0.0 }
 0x156   : > { %v1006_v58 = vadd.f32 %v2990_v52, %v3297_v8  ;;  %v1262_v59 = vadd.f32 %v3054_v53, %v3297_v8  ;;  %v997_v60 = vpop.f32.mrf.mxu0  ;;  %v1253_v61 = vpop.f32.mrf.mxu1 }
 0x157   : > { %2809 = vst [vmem:[%s3312_s11 + $0xc8] sm:$0xff] %v2593_v54   ;;  %2841 = vst [vmem:[%s3312_s11 + $0x1c8] sm:$0xff] %v2753_v55   ;;  %v2588_v62 = vpack.c.bf16 %v1349_v56, %v1348_v50  ;;  %v2748_v63 = vpack.c.bf16 %v1413_v57, %v1412_v51  ;;  %v998_v0 = vadd.f32 %v3297_v8, %v997_v60 }
 0x158   : > { %v1254_v1 = vadd.f32 %v3297_v8, %v1253_v61  ;;  %v2991_v2 = vpop.f32.mrf.mxu0  ;;  %v3055_v3 = vpop.f32.mrf.mxu1  ;;  %v1354_v6 = vmax.f32 %v1006_v58, 0.0  ;;  %v1418_v7 = vmax.f32 %v1262_v59, 0.0 }
 0x159   : > { %2808 = vst [vmem:[%s3312_s11 + $0xc0] sm:$0xff] %v2588_v62   ;;  %2840 = vst [vmem:[%s3312_s11 + $0x1c0] sm:$0xff] %v2748_v63   ;;  %v1009_v4 = vadd.f32 %v2991_v2, %v3297_v8  ;;  %v1265_v5 = vadd.f32 %v3055_v3, %v3297_v8  ;;  %v1352_v15 = vmax.f32 %v998_v0, 0.0 }
 0x15a   : > { %v1000_v9 = vpop.f32.mrf.mxu0  ;;  %v1256_v10 = vpop.f32.mrf.mxu1  ;;  %v1416_v16 = vmax.f32 %v1254_v1, 0.0 }
 0x15b   : > { %v1355_v11 = vmax.f32 %v1009_v4, 0.0  ;;  %v1419_v12 = vmax.f32 %v1265_v5, 0.0  ;;  %v1001_v13 = vadd.f32 %v3297_v8, %v1000_v9  ;;  %v1257_v14 = vadd.f32 %v3297_v8, %v1256_v10 }
 0x15c   : > { %v2994_v17 = vpop.f32.mrf.mxu0  ;;  %v3058_v18 = vpop.f32.mrf.mxu1 }
 0x15d   : > { %v2603_v19 = vpack.c.bf16 %v1355_v11, %v1354_v6  ;;  %v2763_v20 = vpack.c.bf16 %v1419_v12, %v1418_v7  ;;  %v1353_v21 = vmax.f32 %v1001_v13, 0.0  ;;  %v1417_v22 = vmax.f32 %v1257_v14, 0.0 }
 0x15e   : > { %v1022_v23 = vadd.f32 %v2994_v17, %v3297_v8  ;;  %v1278_v24 = vadd.f32 %v3058_v18, %v3297_v8  ;;  %v1013_v25 = vpop.f32.mrf.mxu0  ;;  %v1269_v26 = vpop.f32.mrf.mxu1 }
 0x15f   : > { %2811 = vst [vmem:[%s3312_s11 + $0xd8] sm:$0xff] %v2603_v19   ;;  %2843 = vst [vmem:[%s3312_s11 + $0x1d8] sm:$0xff] %v2763_v20   ;;  %v2598_v27 = vpack.c.bf16 %v1353_v21, %v1352_v15  ;;  %v2758_v28 = vpack.c.bf16 %v1417_v22, %v1416_v16  ;;  %v1014_v29 = vadd.f32 %v3297_v8, %v1013_v25 }
 0x160   : > { %v1270_v30 = vadd.f32 %v3297_v8, %v1269_v26  ;;  %v2995_v31 = vpop.f32.mrf.mxu0  ;;  %v3059_v32 = vpop.f32.mrf.mxu1  ;;  %v1358_v35 = vmax.f32 %v1022_v23, 0.0  ;;  %v1422_v36 = vmax.f32 %v1278_v24, 0.0 }
 0x161   : > { %2810 = vst [vmem:[%s3312_s11 + $0xd0] sm:$0xff] %v2598_v27   ;;  %2842 = vst [vmem:[%s3312_s11 + $0x1d0] sm:$0xff] %v2758_v28   ;;  %v1025_v33 = vadd.f32 %v2995_v31, %v3297_v8  ;;  %v1281_v34 = vadd.f32 %v3059_v32, %v3297_v8  ;;  %v1356_v43 = vmax.f32 %v1014_v29, 0.0 }
 0x162   : > { %v1016_v37 = vpop.f32.mrf.mxu0  ;;  %v1272_v38 = vpop.f32.mrf.mxu1  ;;  %v1420_v44 = vmax.f32 %v1270_v30, 0.0 }
 0x163   : > { %v1359_v39 = vmax.f32 %v1025_v33, 0.0  ;;  %v1423_v40 = vmax.f32 %v1281_v34, 0.0  ;;  %v1017_v41 = vadd.f32 %v3297_v8, %v1016_v37  ;;  %v1273_v42 = vadd.f32 %v3297_v8, %v1272_v38 }
 0x164   : > { %v2998_v45 = vpop.f32.mrf.mxu0  ;;  %v3062_v46 = vpop.f32.mrf.mxu1 }
 0x165   : > { %v2613_v47 = vpack.c.bf16 %v1359_v39, %v1358_v35  ;;  %v2773_v48 = vpack.c.bf16 %v1423_v40, %v1422_v36  ;;  %v1357_v49 = vmax.f32 %v1017_v41, 0.0  ;;  %v1421_v50 = vmax.f32 %v1273_v42, 0.0 }
 0x166   : > { %v1038_v51 = vadd.f32 %v2998_v45, %v3297_v8  ;;  %v1294_v52 = vadd.f32 %v3062_v46, %v3297_v8  ;;  %v1029_v53 = vpop.f32.mrf.mxu0  ;;  %v1285_v54 = vpop.f32.mrf.mxu1 }
 0x167   : > { %2813 = vst [vmem:[%s3312_s11 + $0xe8] sm:$0xff] %v2613_v47   ;;  %2845 = vst [vmem:[%s3312_s11 + $0x1e8] sm:$0xff] %v2773_v48   ;;  %v2608_v55 = vpack.c.bf16 %v1357_v49, %v1356_v43  ;;  %v2768_v56 = vpack.c.bf16 %v1421_v50, %v1420_v44  ;;  %v1030_v57 = vadd.f32 %v3297_v8, %v1029_v53 }
 0x168   : > { %v1286_v58 = vadd.f32 %v3297_v8, %v1285_v54  ;;  %v2999_v59 = vpop.f32.mrf.mxu0  ;;  %v3063_v60 = vpop.f32.mrf.mxu1  ;;  %v1362_v63 = vmax.f32 %v1038_v51, 0.0  ;;  %v1426_v0 = vmax.f32 %v1294_v52, 0.0 }
 0x169   : > { %2812 = vst [vmem:[%s3312_s11 + $0xe0] sm:$0xff] %v2608_v55   ;;  %2844 = vst [vmem:[%s3312_s11 + $0x1e0] sm:$0xff] %v2768_v56   ;;  %v1041_v61 = vadd.f32 %v2999_v59, %v3297_v8  ;;  %v1297_v62 = vadd.f32 %v3063_v60, %v3297_v8  ;;  %v1360_v7 = vmax.f32 %v1030_v57, 0.0 }
 0x16a   : > { %v1032_v1 = vpop.f32.mrf.mxu0  ;;  %v1288_v2 = vpop.f32.mrf.mxu1  ;;  %v1424_v9 = vmax.f32 %v1286_v58, 0.0 }
 0x16b   : > { %v1363_v3 = vmax.f32 %v1041_v61, 0.0  ;;  %v1427_v4 = vmax.f32 %v1297_v62, 0.0  ;;  %v1033_v5 = vadd.f32 %v3297_v8, %v1032_v1  ;;  %v1289_v6 = vadd.f32 %v3297_v8, %v1288_v2 }
 0x16d   : > { %v2623_v10 = vpack.c.bf16 %v1363_v3, %v1362_v63  ;;  %v2783_v11 = vpack.c.bf16 %v1427_v4, %v1426_v0  ;;  %v1361_v12 = vmax.f32 %v1033_v5, 0.0  ;;  %v1425_v13 = vmax.f32 %v1289_v6, 0.0 }
 0x16f   : > { %2815 = vst [vmem:[%s3312_s11 + $0xf8] sm:$0xff] %v2623_v10   ;;  %2847 = vst [vmem:[%s3312_s11 + $0x1f8] sm:$0xff] %v2783_v11   ;;  %v2618_v14 = vpack.c.bf16 %v1361_v12, %v1360_v7  ;;  %v2778_v15 = vpack.c.bf16 %v1425_v13, %v1424_v9 }
 0x171   : > { %2814 = vst [vmem:[%s3312_s11 + $0xf0] sm:$0xff] %v2618_v14   ;;  %2846 = vst [vmem:[%s3312_s11 + $0x1f0] sm:$0xff] %v2778_v15  }
 0x172 PF: > { %s13_s12 = sadd.s32 1, %s3166_s12  }
 0x173   : > { %p10_p4 = scmp.ge.s32.totalorder %s13_s12, 4  }
 0x175   :  { %12 = sbr.rel (!%p10_p4) target bundleno = 1 (0x1), region = 62 }

// kernel: mamba_vision_forward.3
= control target key start
LH: loop header
LB: loop body
LE: loop exit
PB: predicated region body
PF: predicated region fallthrough
CT: control target
= control target key end

     0   :  { %s12895_s19 = smov 0   ;;  %s16542_s0 = inlined_call_operand.vmem [shape: bf16[8,17,17,128], index: 0, kind: input, shape index: {}]   ;;  %s16543_s1 = inlined_call_operand.vmem [shape: bf16[1152,640], index: 1, kind: input, shape index: {}]   ;;  %s16544_s2 = inlined_call_operand.vmem [shape: f32[1,640], index: 2, kind: input, shape index: {}]   ;;  %s16545_s3 = inlined_call_operand.vmem [shape: f32[1,640], index: 3, kind: input, shape index: {}]   ;;  %s16546_s4 = inlined_call_operand.vmem [shape: f32[1,640], index: 4, kind: input, shape index: {}]   ;;  %s16547_s5 = inlined_call_operand.vmem [shape: bf16[640,512], index: 5, kind: input, shape index: {}]   ;;  %s16548_s6 = inlined_call_operand.vmem [shape: f32[1,512], index: 6, kind: input, shape index: {}]   ;;  %s16549_s7 = inlined_call_operand.vmem [shape: f32[1,512], index: 7, kind: input, shape index: {}]   ;;  %s16550_s8 = inlined_call_operand.vmem [shape: f32[1,512], index: 8, kind: input, shape index: {}]   ;;  %s16551_s9 = inlined_call_operand.vmem [shape: f32[1,512], index: 9, kind: input, shape index: {}]   ;;  %s16552_s10 = inlined_call_operand.<no memory space> [shape: f32[1,1], index: 10, kind: input, shape index: {}]   ;;  %s16553_s11 = inlined_call_operand.vmem [shape: f32[2,1,1], index: 11, kind: output, shape index: {}]  }
   0x1   :  { %v16_v0 = vstv %s16552_s10 }
   0x2   :  { %17 = vst [vmem:[#allocation3] sm:$0x1] %v16_v0 }
   0x3 LB: > { %s12901_s20 = sadd.s32 4294967295, %s12829_s19   ;;  %p10114_p0 = scmp.ge.s32.totalorder %s12829_s19, 1  ;;  %s12829_s19 = sphi %s12895_s19, %s23_s19  }
   0x4   : > { %p341_p1 = scmp.lt.s32.totalorder %s12829_s19, 3 }
   0x6   : > { %p342_p2 = pnand %p10114_p0, %p341_p1 }
   0x8   : > { %345 = sbr.rel (%p342_p2) target bundleno = 2453 (0x995), region = 64 }
   0xd   : > { %v11569_v1 = vld [vmem:[%s16543_s1 + $0x11c] ss:$20 sps:$4 sm:$0xff]   ;;  %v11571_v2 = vld [vmem:[%s16543_s1 + $0x118] ss:$20 sps:$4 sm:$0xff]   ;;  %v11575_v5 = vld [vmem:[%s16543_s1 + $0xf4] ss:$20 sps:$4 sm:$0xff]  }
   0xe   : > { %5498 = vmatprep.subr.bf16.mxu0 %v11569_v1  ;;  %v11572_v3 = vld [vmem:[%s16543_s1 + $0x39c] ss:$20 sps:$4 sm:$0xff]   ;;  %v11574_v4 = vld [vmem:[%s16543_s1 + $0x398] ss:$20 sps:$4 sm:$0xff]   ;;  %v11578_v7 = vld [vmem:[%s16543_s1 + $0x374] ss:$20 sps:$4 sm:$0xff]  }
   0xf   : > { %5499 = vmatpush1.bf16.msra.mxu0 %v11571_v2  ;;  %v11577_v6 = vld [vmem:[%s16543_s1 + $0xf0] ss:$20 sps:$4 sm:$0xff]   ;;  %5691 = vmatprep.subr.bf16.mxu1 %v11572_v3  ;;  %v11581_v9 = vld [vmem:[%s16543_s1 + $0xcc] ss:$20 sps:$4 sm:$0xff]   ;;  %v11583_v10 = vld [vmem:[%s16543_s1 + $0xc8] ss:$20 sps:$4 sm:$0xff]  }
  0x10   : > { %5692 = vmatpush1.bf16.msra.mxu1 %v11574_v4  ;;  %5500 = vmatprep.subr.bf16.mxu0 %v11575_v5  ;;  %v11580_v8 = vld [vmem:[%s16543_s1 + $0x370] ss:$20 sps:$4 sm:$0xff]   ;;  %v11584_v11 = vld [vmem:[%s16543_s1 + $0x34c] ss:$20 sps:$4 sm:$0xff]   ;;  %v11586_v13 = vld [vmem:[%s16543_s1 + $0x348] ss:$20 sps:$4 sm:$0xff]  }
  0x11   : > { %5693 = vmatprep.subr.bf16.mxu1 %v11578_v7  ;;  %v11587_v12 = vld [vmem:[%s16543_s1 + $0xa4] ss:$20 sps:$4 sm:$0xff]   ;;  %v11589_v15 = vld [vmem:[%s16543_s1 + $0xa0] ss:$20 sps:$4 sm:$0xff]   ;;  %v11593_v16 = vld [vmem:[%s16543_s1 + $0x7c] ss:$20 sps:$4 sm:$0xff]  }
  0x12   : > { %v11590_v14 = vld [vmem:[%s16543_s1 + $0x324] ss:$20 sps:$4 sm:$0xff]   ;;  %v11592_v17 = vld [vmem:[%s16543_s1 + $0x320] ss:$20 sps:$4 sm:$0xff]   ;;  %v11596_v18 = vld [vmem:[%s16543_s1 + $0x2fc] ss:$20 sps:$4 sm:$0xff]  }
  0x13   : > { %5501 = vmatpush1.bf16.msra.mxu0 %v11577_v6  ;;  %v11595_v19 = vld [vmem:[%s16543_s1 + $0x78] ss:$20 sps:$4 sm:$0xff]   ;;  %v11599_v20 = vld [vmem:[%s16543_s1 + $0x54] ss:$20 sps:$4 sm:$0xff]   ;;  %v11601_v23 = vld [vmem:[%s16543_s1 + $0x50] ss:$20 sps:$4 sm:$0xff]  }
  0x14   : > { %5502 = vmatprep.subr.bf16.mxu0 %v11581_v9  ;;  %5694 = vmatpush1.bf16.msra.mxu1 %v11580_v8  ;;  %v11598_v21 = vld [vmem:[%s16543_s1 + $0x2f8] ss:$20 sps:$4 sm:$0xff]   ;;  %v11602_v22 = vld [vmem:[%s16543_s1 + $0x2d4] ss:$20 sps:$4 sm:$0xff]   ;;  %v11604_v25 = vld [vmem:[%s16543_s1 + $0x2d0] ss:$20 sps:$4 sm:$0xff]  }
  0x15   : > { %5695 = vmatprep.subr.bf16.mxu1 %v11584_v11  ;;  %v11605_v24 = vld [vmem:[%s16543_s1 + $0x2c] ss:$20 sps:$4 sm:$0xff]   ;;  %v11607_v27 = vld [vmem:[%s16543_s1 + $0x28] ss:$20 sps:$4 sm:$0xff]   ;;  %v11611_v28 = vld [vmem:[%s16543_s1 + $0x4] ss:$20 sps:$4 sm:$0xff]  }
  0x16   : > { %v11608_v26 = vld [vmem:[%s16543_s1 + $0x2ac] ss:$20 sps:$4 sm:$0xff]   ;;  %v11610_v29 = vld [vmem:[%s16543_s1 + $0x2a8] ss:$20 sps:$4 sm:$0xff]   ;;  %v11614_v30 = vld [vmem:[%s16543_s1 + $0x284] ss:$20 sps:$4 sm:$0xff]  }
  0x17   : > { %5503 = vmatpush1.bf16.msra.mxu0 %v11583_v10  ;;  %s10115_s26 = sshll.u32 %s12901_s20, 2  ;;  %v11613_v31 = vld [vmem:[%s16543_s1] ss:$20 sps:$4 sm:$0xff]   ;;  %v11617_v32 = vld [vmem:[%s16543_s1 + $0x25c] ss:$20 sps:$4 sm:$0xff]   ;;  %p387_p4 = scmp.lt.s32.totalorder %s12901_s20, 1 }
  0x18   : > { %5504 = vmatprep.subr.bf16.mxu0 %v11587_v12  ;;  %5696 = vmatpush1.bf16.msra.mxu1 %v11586_v13  ;;  %v11616_v33 = vld [vmem:[%s16543_s1 + $0x280] ss:$20 sps:$4 sm:$0xff]   ;;  %p381_p3 = scmp.lt.s32.totalorder %s10115_s26, 7  ;;  %v11620_v34 = vld [vmem:[%s16543_s1 + $0x4dc] ss:$20 sps:$4 sm:$0xff]   ;;  %vm10061_vm3 = vcmask 0  }
  0x19   : > { %5697 = vmatprep.subr.bf16.mxu1 %v11590_v14  ;;  %v11619_v35 = vld [vmem:[%s16543_s1 + $0x258] ss:$20 sps:$4 sm:$0xff]   ;;  %v11623_v36 = vld [vmem:[%s16543_s1 + $0x234] ss:$20 sps:$4 sm:$0xff]   ;;  %v11625_v39 = vld [vmem:[%s16543_s1 + $0x230] ss:$20 sps:$4 sm:$0xff]  }
  0x1a   : > { %v11622_v37 = vld [vmem:[%s16543_s1 + $0x4d8] ss:$20 sps:$4 sm:$0xff]   ;;  %s16848_s26 = smov (!%p381_p3, %s10115_s26), 7  ;;  %v11626_v38 = vld [vmem:[%s16543_s1 + $0x4b4] ss:$20 sps:$4 sm:$0xff]   ;;  %s16850_s20 = smov (!%p387_p4, %s12901_s20), 1 }
  0x1b   : > { %5505 = vmatpush1.bf16.msra.mxu0 %v11589_v15  ;;  %v11629_v40 = vld [vmem:[%s16543_s1 + $0x20c] ss:$20 sps:$4 sm:$0xff]   ;;  %v11628_v41 = vld [vmem:[%s16543_s1 + $0x4b0] ss:$20 sps:$4 sm:$0xff]   ;;  %s11559_s13 = smul.u32 204, %s16848_s26  ;;  %s389_s28 = scalar_lea.vmem %s16553_s11, %s16850_s20 }
  0x1c   : > { %5506 = vmatprep.subr.bf16.mxu0 %v11593_v16  ;;  %5698 = vmatpush1.bf16.msra.mxu1 %v11592_v17  ;;  %v11632_v42 = vld [vmem:[%s16543_s1 + $0x48c] ss:$20 sps:$4 sm:$0xff]   ;;  %v11631_v43 = vld [vmem:[%s16543_s1 + $0x208] ss:$20 sps:$4 sm:$0xff]   ;;  %v11635_v45 = vld [vmem:[%s16543_s1 + $0x1e4] ss:$20 sps:$4 sm:$0xff]  }
  0x1d   : > { %5699 = vmatprep.subr.bf16.mxu1 %v11596_v18  ;;  %v11634_v44 = vld [vmem:[%s16543_s1 + $0x488] ss:$20 sps:$4 sm:$0xff]   ;;  %v11637_v46 = vld [vmem:[%s16543_s1 + $0x1e0] ss:$20 sps:$4 sm:$0xff]   ;;  %s13047_s27 = scalar_lea.vmem %s16542_s0, %s11559_s13  ;;  %vm568_vm0 = vsmask.f32 3328 }
  0x1e   : > { %v11638_v47 = vld [vmem:[%s16543_s1 + $0x464] ss:$20 sps:$4 sm:$0xff]   ;;  %v391_v48 = vld [vmem:[%s13047_s27] sm:$0xf]  ;;  %v10117_v51 = vld [vmem:[%s13047_s27 + $0xcc] sm:$0xf] }
  0x1f   : > { %5507 = vmatpush1.bf16.msra.mxu0 %v11595_v19  ;;  %v392_v49 = vld [vmem:[%s13047_s27 + $0x4] sm:$0xf]  ;;  %v11640_v50 = vld [vmem:[%s16543_s1 + $0x460] ss:$20 sps:$4 sm:$0xff]   ;;  %423 = vst [vmem:[#allocation2] sm:$0xf] %v391_v48 }
  0x20   : > { %5508 = vmatprep.subr.bf16.mxu0 %v11599_v20  ;;  %5700 = vmatpush1.bf16.msra.mxu1 %v11598_v21  ;;  %424 = vst [vmem:[#allocation2 + $0x24] sm:$0xf] %v392_v49  ;;  %v10118_v52 = vld [vmem:[%s13047_s27 + $0xd0] sm:$0xf]  ;;  %488 = vst [vmem:[#allocation2 + $0x4] sm:$0xf] %v10117_v51 }
  0x21   : > { %5701 = vmatprep.subr.bf16.mxu1 %v11602_v22  ;;  %v11641_v53 = vld [vmem:[%s16543_s1 + $0x1bc] ss:$20 sps:$4 sm:$0xff]   ;;  %489 = vst [vmem:[#allocation2 + $0x28] sm:$0xf] %v10118_v52  ;;  %vm569_vm1 = vsmask.f32 7440 }
  0x22   : > { %v11643_v54 = vld [vmem:[%s16543_s1 + $0x1b8] ss:$20 sps:$4 sm:$0xff]   ;;  %v11644_v55 = vld [vmem:[%s16543_s1 + $0x43c] ss:$20 sps:$4 sm:$0xff]   ;;  %v520_v56 = vld [vmem:[%s13047_s27] sm:$0xf] }
  0x23   : > { %5509 = vmatpush1.bf16.msra.mxu0 %v11601_v23  ;;  %v521_v57 = vld [vmem:[%s13047_s27 + $0x4] sm:$0xf]  ;;  %v11647_v58 = vld [vmem:[%s16543_s1 + $0x194] ss:$20 sps:$4 sm:$0xff]   ;;  %v572_v60 = vshrl.u32 %v520_v56, 16  ;;  %v575_v61 = vshll.u32 %v520_v56, 16  ;;  %vm13093_vm2 = vmor %vm568_vm0, %vm569_vm1 }
  0x24   : > { %5510 = vmatprep.subr.bf16.mxu0 %v11605_v24  ;;  %5702 = vmatpush1.bf16.msra.mxu1 %v11604_v25  ;;  %v522_v59 = vld [vmem:[%s13047_s27 + $0x8] sm:$0x1]  ;;  %v581_v62 = vshll.u32 %v521_v57, 16  ;;  %v585_v63 = vshrl.u32 %v521_v57, 16  ;;  %v11646_v0 = vld [vmem:[%s16543_s1 + $0x438] ss:$20 sps:$4 sm:$0xff]  }
  0x25   : > { %5703 = vmatprep.subr.bf16.mxu1 %v11608_v26  ;;  %v591_v1 = vshll.u32 %v522_v59, 16  ;;  %v10149_v2 = vld [vmem:[%s13047_s27 + $0x198] sm:$0xf]  ;;  %v10150_v3 = vld [vmem:[%s13047_s27 + $0x19c] sm:$0xf]  ;;  %v574_v5 = vrot.slane %v572_v60, 4 }
  0x26   : > { %v11650_v4 = vld [vmem:[%s16543_s1 + $0x414] ss:$20 sps:$4 sm:$0xff]   ;;  %v577_v6 = vrot.slane %v575_v61, 5  ;;  %v583_v7 = vrot.slane %v581_v62, 5  ;;  %v587_v8 = vrot.slane %v585_v63, 4 }
  0x27   : > { %5511 = vmatpush1.bf16.msra.mxu0 %v11607_v27  ;;  %1052 = vst [vmem:[#allocation2 + $0xc] sm:$0xf] %v10149_v2  ;;  %1053 = vst [vmem:[#allocation2 + $0x30] sm:$0xf] %v10150_v3  ;;  %v393_v9 = vld [vmem:[%s13047_s27 + $0xc] sm:$0xf] }
  0x28   : > { %5512 = vmatprep.subr.bf16.mxu0 %v11611_v28  ;;  %5704 = vmatpush1.bf16.msra.mxu1 %v11610_v29  ;;  %v11649_v10 = vld [vmem:[%s16543_s1 + $0x190] ss:$20 sps:$4 sm:$0xff]   ;;  %425 = vst [vmem:[#allocation2 + $0x48] sm:$0xf] %v393_v9  ;;  %v10119_v12 = vld [vmem:[%s13047_s27 + $0xd8] sm:$0xf]  ;;  %v578_v15 = vor.u32 %v577_v6, %v574_v5  ;;  %v588_v16 = vor.u32 %v587_v8, %v583_v7 }
  0x29   : > { %5705 = vmatprep.subr.bf16.mxu1 %v11614_v30  ;;  %v394_v11 = vld [vmem:[%s13047_s27 + $0x10] sm:$0xf]  ;;  %v11653_v13 = vld [vmem:[%s16543_s1 + $0x16c] ss:$20 sps:$4 sm:$0xff]   ;;  %v593_v17 = vrot.slane %v591_v1, 5 }
  0x2a   : > { %426 = vst [vmem:[#allocation2 + $0x6c] sm:$0xf] %v394_v11  ;;  %v10120_v18 = vld [vmem:[%s13047_s27 + $0xdc] sm:$0xf]  ;;  %490 = vst [vmem:[#allocation2 + $0x4c] sm:$0xf] %v10119_v12 }
  0x2b   : > { %5513 = vmatpush1.bf16.msra.mxu0 %v11613_v31  ;;  %v11652_v19 = vld [vmem:[%s16543_s1 + $0x410] ss:$20 sps:$4 sm:$0xff]   ;;  %491 = vst [vmem:[#allocation2 + $0x70] sm:$0xf] %v10120_v18  ;;  %v11656_v21 = vld [vmem:[%s16543_s1 + $0x3ec] ss:$20 sps:$4 sm:$0xff]  }
  0x2c   : > { %5514 = vmatprep.subr.bf16.mxu0 %v11617_v32  ;;  %5706 = vmatpush1.bf16.msra.mxu1 %v11616_v33  ;;  %v11664_v20 = vld [vmem:[#allocation2 + $0x4] ss:$36 sps:$4 sm:$0xff]   ;;  %v579_v22 = vrot.slane %v578_v15, 4  ;;  %v589_v23 = vrot.slane %v588_v16, 4  ;;  %v523_v24 = vld [vmem:[%s13047_s27 + $0xc] sm:$0xf] }
  0x2d   : > { %5707 = vmatprep.subr.bf16.mxu1 %v11620_v34  ;;  %v11655_v25 = vld [vmem:[%s16543_s1 + $0x168] ss:$20 sps:$4 sm:$0xff]   ;;  %5530 = vmatprep.mubr.bf16.mxu0 %v11664_v20  ;;  %v524_v26 = vld [vmem:[%s13047_s27 + $0x10] sm:$0xf]  ;;  %v525_v27 = vld [vmem:[%s13047_s27 + $0x14] sm:$0x1] }
  0x2e   : > { %v596_v28 = vshrl.u32 %v523_v24, 16  ;;  %v599_v29 = vshll.u32 %v523_v24, 16  ;;  %v11659_v30 = vld [vmem:[%s16543_s1 + $0x144] ss:$20 sps:$4 sm:$0xff]   ;;  %v584_v31 = vsel %vm13093_vm2, %v579_v22, %v583_v7  ;;  %v594_v32 = vsel %vm13093_vm2, %v589_v23, %v593_v17  ;;  %v11661_v48 = vld [vmem:[%s16543_s1 + $0x140] ss:$20 sps:$4 sm:$0xff]  }
  0x2f   : > { %5515 = vmatpush2.bf16.msra.mxu0 %v11619_v35  ;;  %v605_v33 = vshll.u32 %v524_v26, 16  ;;  %v609_v34 = vshrl.u32 %v524_v26, 16  ;;  %v10151_v35 = vld [vmem:[%s13047_s27 + $0x1a4] sm:$0xf]  ;;  %987 = vst [vmem:[#allocation2 + $0x8] sm:$0xf] %v584_v31 }
  0x30   : > { %5516 = vmatprep.subr.bf16.mxu0 %v11623_v36  ;;  %5708 = vmatpush2.bf16.msra.mxu1 %v11622_v37  ;;  %v10152_v36 = vld [vmem:[%s13047_s27 + $0x1a8] sm:$0xf]  ;;  %988 = vst [vmem:[#allocation2 + $0x2c] sm:$0xf] %v594_v32  ;;  %1054 = vst [vmem:[#allocation2 + $0x54] sm:$0xf] %v10151_v35 }
  0x31   : > { %5709 = vmatprep.subr.bf16.mxu1 %v11626_v38  ;;  %v11658_v37 = vld [vmem:[%s16543_s1 + $0x3e8] ss:$20 sps:$4 sm:$0xff]   ;;  %v598_v38 = vrot.slane %v596_v28, 4  ;;  %1055 = vst [vmem:[#allocation2 + $0x78] sm:$0xf] %v10152_v36 }
  0x32   : > { %v11662_v49 = vld [vmem:[%s16543_s1 + $0x3c4] ss:$20 sps:$4 sm:$0xff]   ;;  %v11666_v52 = vld [vmem:[%s16543_s1 + $0x3c0] ss:$20 sps:$4 sm:$0xff]   ;;  %v11674_v60 = vld [vmem:[#allocation2 + $0x4c] ss:$36 sps:$4 sm:$0xff]  }
  0x33   : > { %5517 = vmatpush2.bf16.msra.mxu0 %v11625_v39  ;;  %v601_v39 = vrot.slane %v599_v29, 5  ;;  %v526_v57 = vld [vmem:[%s13047_s27 + $0x18] sm:$0xf]  ;;  %v528_v62 = vld [vmem:[%s13047_s27 + $0x20] sm:$0x1] }
  0x34   : > { %5518 = vmatprep.subr.bf16.mxu0 %v11629_v40  ;;  %5710 = vmatpush2.bf16.msra.mxu1 %v11628_v41  ;;  %v615_v40 = vshll.u32 %v525_v27, 16  ;;  %v395_v41 = vld [vmem:[%s13047_s27 + $0x18] sm:$0xf]  ;;  %v620_v63 = vshrl.u32 %v526_v57, 16  ;;  %v11671_v2 = vld [vmem:[#allocation2 + $0xc] ss:$36 sps:$4 sm:$0xff]  }
  0x35   : > { %5711 = vmatprep.subr.bf16.mxu1 %v11632_v42  ;;  %v607_v42 = vrot.slane %v605_v33, 5  ;;  %427 = vst [vmem:[#allocation2 + $0x90] sm:$0xf] %v395_v41  ;;  %v11668_v59 = vld [vmem:[%s16543_s1 + $0x618] ss:$20 sps:$4 sm:$0xff]   ;;  %v639_v6 = vshll.u32 %v528_v62, 16  ;;  %5723 = vmatprep.mubr.bf16.mxu1 %v11671_v2 }
  0x36   : > { %v617_v51 = vrot.slane %v615_v40, 5  ;;  %v11679_v3 = vld [vmem:[%s16543_s1 + $0x5f4] ss:$20 sps:$4 sm:$0xff]   ;;  %v622_v8 = vrot.slane %v620_v63, 4  ;;  %v10153_v12 = vld [vmem:[%s13047_s27 + $0x1b0] sm:$0xf] }
  0x37   : > { %5519 = vmatpush2.bf16.msra.mxu0 %v11631_v43  ;;  %v611_v43 = vrot.slane %v609_v34, 4  ;;  %v11673_v7 = vld [vmem:[#allocation2 + $0x8] ss:$36 sps:$4 sm:$0xff]   ;;  %v641_v16 = vrot.slane %v639_v6, 5  ;;  %1056 = vst [vmem:[#allocation2 + $0x9c] sm:$0xf] %v10153_v12 }
  0x38   : > { %5520 = vmatprep.subr.bf16.mxu0 %v11635_v45  ;;  %5712 = vmatpush2.bf16.msra.mxu1 %v11634_v44  ;;  %v396_v44 = vld [vmem:[%s13047_s27 + $0x1c] sm:$0xf]  ;;  %v10121_v45 = vld [vmem:[%s13047_s27 + $0xe4] sm:$0xf]  ;;  %v10154_v18 = vld [vmem:[%s13047_s27 + $0x1b4] sm:$0xf] }
  0x39   : > { %5713 = vmatprep.subr.bf16.mxu1 %v11638_v47  ;;  %428 = vst [vmem:[#allocation2 + $0xb4] sm:$0xf] %v396_v44  ;;  %v10122_v47 = vld [vmem:[%s13047_s27 + $0xe8] sm:$0xf]  ;;  %492 = vst [vmem:[#allocation2 + $0x94] sm:$0xf] %v10121_v45 }
  0x3a   : > { %493 = vst [vmem:[#allocation2 + $0xb8] sm:$0xf] %v10122_v47  ;;  %v398_v20 = vld [vmem:[%s13047_s27 + $0x28] sm:$0xf]  ;;  %1057 = vst [vmem:[#allocation2 + $0xc0] sm:$0xf] %v10154_v18 }
  0x3b   : > { %5521 = vmatpush2.bf16.msra.mxu0 %v11637_v46  ;;  %v602_v46 = vor.u32 %v601_v39, %v598_v38  ;;  %430 = vst [vmem:[#allocation2 + $0xfc] sm:$0xf] %v398_v20  ;;  %v10123_v22 = vld [vmem:[%s13047_s27 + $0xf0] sm:$0xf]  ;;  %v10124_v23 = vld [vmem:[%s13047_s27 + $0xf4] sm:$0xf] }
  0x3c   : > { %5522 = vmatprep.subr.bf16.mxu0 %v11641_v53  ;;  %5714 = vmatpush2.bf16.msra.mxu1 %v11640_v50  ;;  %v612_v50 = vor.u32 %v611_v43, %v607_v42  ;;  %v11670_v53 = vld [vmem:[%s16543_s1 + $0x61c] ss:$20 sps:$4 sm:$0xff]   ;;  %v11676_v24 = vld [vmem:[#allocation2 + $0x48] ss:$36 sps:$4 sm:$0xff]   ;;  %494 = vst [vmem:[#allocation2 + $0xdc] sm:$0xf] %v10123_v22 }
  0x3d   : > { %5715 = vmatprep.subr.bf16.mxu1 %v11644_v55  ;;  %v11667_v55 = vld [vmem:[#allocation2] ss:$36 sps:$4 sm:$0xff]   ;;  %495 = vst [vmem:[#allocation2 + $0x100] sm:$0xf] %v10124_v23  ;;  %v11686_v28 = vld [vmem:[%s16543_s1 + $0x5c8] ss:$20 sps:$4 sm:$0xff]  }
  0x3e   : > { %v613_v56 = vrot.slane %v612_v50, 4  ;;  %v530_v31 = vld [vmem:[%s13047_s27 + $0x28] sm:$0xf]  ;;  %v11680_v32 = vld [vmem:[#allocation2 + $0x54] ss:$36 sps:$4 sm:$0xff]  }
  0x3f   : > { %5523 = vmatpush2.bf16.msra.mxu0 %v11643_v54  ;;  %v603_v54 = vrot.slane %v602_v46, 4  ;;  %v11697_v35 = vld [vmem:[%s16543_s1 + $0x5a4] ss:$20 sps:$4 sm:$0xff]   ;;  %v653_v39 = vshll.u32 %v530_v31, 16  ;;  %v657_v40 = vshrl.u32 %v530_v31, 16 }
  0x40   : > { %5524 = vmatprep.subr.bf16.mxu0 %v11647_v58  ;;  %5716 = vmatpush2.bf16.msra.mxu1 %v11646_v0  ;;  %v527_v58 = vld [vmem:[%s13047_s27 + $0x1c] sm:$0xf]  ;;  %v623_v0 = vshll.u32 %v526_v57, 16  ;;  %v10156_v44 = vld [vmem:[%s13047_s27 + $0x1c0] sm:$0xf] }
  0x41   : > { %5717 = vmatprep.subr.bf16.mxu1 %v11650_v4  ;;  %v608_v61 = vsel %vm13093_vm2, %v603_v54, %v607_v42  ;;  %v629_v1 = vshll.u32 %v527_v58, 16  ;;  %v618_v4 = vsel %vm13093_vm2, %v613_v56, %v617_v51  ;;  %v633_v5 = vshrl.u32 %v527_v58, 16  ;;  %v11683_v27 = vld [vmem:[#allocation2 + $0x94] ss:$36 sps:$4 sm:$0xff]   ;;  %v10155_v43 = vld [vmem:[%s13047_s27 + $0x1bc] sm:$0xf] }
  0x42   : > { %989 = vst [vmem:[#allocation2 + $0x50] sm:$0xf] %v608_v61  ;;  %990 = vst [vmem:[#allocation2 + $0x74] sm:$0xf] %v618_v4  ;;  %v625_v9 = vrot.slane %v623_v0, 5  ;;  %v655_v46 = vrot.slane %v653_v39, 5 }
  0x43   : > { %5525 = vmatpush2.bf16.msra.mxu0 %v11649_v10  ;;  %v631_v10 = vrot.slane %v629_v1, 5  ;;  %v635_v11 = vrot.slane %v633_v5, 4  ;;  %v659_v47 = vrot.slane %v657_v40, 4  ;;  %1058 = vst [vmem:[#allocation2 + $0xe4] sm:$0xf] %v10155_v43 }
  0x44   : > { %5526 = vmatprep.subr.bf16.mxu0 %v11653_v13  ;;  %5718 = vmatpush2.bf16.msra.mxu1 %v11652_v19  ;;  %v11677_v13 = vld [vmem:[%s16543_s1 + $0x5f0] ss:$20 sps:$4 sm:$0xff]   ;;  %v626_v15 = vor.u32 %v625_v9, %v622_v8  ;;  %1059 = vst [vmem:[#allocation2 + $0x108] sm:$0xf] %v10156_v44  ;;  %v10125_v50 = vld [vmem:[%s13047_s27 + $0xfc] sm:$0xf] }
  0x45   : > { %5719 = vmatprep.subr.bf16.mxu1 %v11656_v21  ;;  %v636_v17 = vor.u32 %v635_v11, %v631_v10  ;;  %v397_v19 = vld [vmem:[%s13047_s27 + $0x24] sm:$0xf]  ;;  %v11695_v51 = vld [vmem:[%s16543_s1 + $0x5a0] ss:$20 sps:$4 sm:$0xff]   ;;  %496 = vst [vmem:[#allocation2 + $0x124] sm:$0xf] %v10125_v50 }
  0x46   : > { %v627_v21 = vrot.slane %v626_v15, 4  ;;  %429 = vst [vmem:[#allocation2 + $0xd8] sm:$0xf] %v397_v19  ;;  %v10126_v56 = vld [vmem:[%s13047_s27 + $0x100] sm:$0xf] }
  0x47   : > { %5527 = vmatpush2.bf16.msra.mxu0 %v11655_v25  ;;  %v11688_v25 = vld [vmem:[%s16543_s1 + $0x5cc] ss:$20 sps:$4 sm:$0xff]   ;;  %v637_v26 = vrot.slane %v636_v17, 4  ;;  %497 = vst [vmem:[#allocation2 + $0x148] sm:$0xf] %v10126_v56 }
  0x48   : > { %5528 = vmatprep.subr.bf16.mxu0 %v11659_v30  ;;  %5720 = vmatpush2.bf16.msra.mxu1 %v11658_v37  ;;  %v632_v29 = vsel %vm13093_vm2, %v627_v21, %v631_v10  ;;  %v529_v30 = vld [vmem:[%s13047_s27 + $0x24] sm:$0xf]  ;;  %v531_v37 = vld [vmem:[%s13047_s27 + $0x2c] sm:$0x1]  ;;  %v11692_v57 = vld [vmem:[#allocation2 + $0xdc] ss:$36 sps:$4 sm:$0xff]  }
  0x49   : > { %5721 = vmatprep.subr.bf16.mxu1 %v11662_v49  ;;  %v11682_v33 = vld [vmem:[#allocation2 + $0x50] ss:$36 sps:$4 sm:$0xff]   ;;  %v642_v34 = vsel %vm13093_vm2, %v637_v26, %v641_v16  ;;  %991 = vst [vmem:[#allocation2 + $0x98] sm:$0xf] %v632_v29  ;;  %v644_v36 = vshrl.u32 %v529_v30, 16  ;;  %v647_v38 = vshll.u32 %v529_v30, 16 }
  0x4a   : > { %992 = vst [vmem:[#allocation2 + $0xbc] sm:$0xf] %v642_v34  ;;  %v663_v42 = vshll.u32 %v531_v37, 16  ;;  %v400_v49 = vld [vmem:[%s13047_s27 + $0x34] sm:$0xf] }
  0x4b   : > { %5529 = vmatpush2.bf16.msra.mxu0 %v11661_v48  ;;  %v646_v41 = vrot.slane %v644_v36, 4  ;;  %v649_v45 = vrot.slane %v647_v38, 5  ;;  %v399_v48 = vld [vmem:[%s13047_s27 + $0x30] sm:$0xf]  ;;  %432 = vst [vmem:[#allocation2 + $0x144] sm:$0xf] %v400_v49 }
  0x4c   : > { %5884 = vmatprep.subr.bf16.mxu0 %v11670_v53  ;;  %5722 = vmatpush2.bf16.msra.mxu1 %v11666_v52  ;;  %431 = vst [vmem:[#allocation2 + $0x120] sm:$0xf] %v399_v48  ;;  %v660_v53 = vor.u32 %v659_v47, %v655_v46  ;;  %v665_v54 = vrot.slane %v663_v42, 5  ;;  %v11706_v61 = vld [vmem:[%s16543_s1 + $0x57c] ss:$20 sps:$4 sm:$0xff]  }
  0x4d   : > { %v650_v52 = vor.u32 %v649_v45, %v646_v41  ;;  %v11689_v62 = vld [vmem:[#allocation2 + $0x9c] ss:$36 sps:$4 sm:$0xff]   ;;  %v532_v2 = vld [vmem:[%s13047_s27 + $0x30] sm:$0xf]  ;;  %v534_v4 = vld [vmem:[%s13047_s27 + $0x38] sm:$0x1] }
  0x4e   : > { %5531 = vmatmul.mubr.bf16.vlgmr.msra.gmra.mxu0 %v11667_v55  ;;  %v11685_v55 = vld [vmem:[#allocation2 + $0x90] ss:$36 sps:$4 sm:$0xff]   ;;  %v668_v5 = vshrl.u32 %v532_v2, 16  ;;  %v671_v6 = vshll.u32 %v532_v2, 16  ;;  %v10157_v9 = vld [vmem:[%s13047_s27 + $0x1c8] sm:$0xf] }
  0x4f   : > { %5885 = vmatpush1.bf16.msra.mxu0 %v11668_v59  ;;  %5540 = vmatprep.mubr.bf16.mxu0 %v11674_v60  ;;  %v651_v58 = vrot.slane %v650_v52, 4  ;;  %v661_v59 = vrot.slane %v660_v53, 4  ;;  %v11704_v60 = vld [vmem:[%s16543_s1 + $0x578] ss:$20 sps:$4 sm:$0xff]   ;;  %v687_v10 = vshll.u32 %v534_v4, 16 }
  0x50   : > { %5724 = vmatmul.mubr.bf16.vlgmr.msra.gmra.mxu1 %v11673_v7  ;;  %5886 = vmatprep.subr.bf16.mxu0 %v11679_v3  ;;  %v533_v3 = vld [vmem:[%s13047_s27 + $0x34] sm:$0xf]  ;;  %v10158_v11 = vld [vmem:[%s13047_s27 + $0x1cc] sm:$0xf]  ;;  %1060 = vst [vmem:[#allocation2 + $0x12c] sm:$0xf] %v10157_v9 }
  0x51   : > { %5733 = vmatprep.mubr.bf16.mxu1 %v11680_v32  ;;  %v11691_v63 = vld [vmem:[#allocation2 + $0x98] ss:$36 sps:$4 sm:$0xff]   ;;  %v656_v0 = vsel %vm13093_vm2, %v651_v58, %v655_v46  ;;  %v666_v1 = vsel %vm13093_vm2, %v661_v59, %v665_v54  ;;  %v677_v7 = vshll.u32 %v533_v3, 16  ;;  %v681_v8 = vshrl.u32 %v533_v3, 16  ;;  %1061 = vst [vmem:[#allocation2 + $0x150] sm:$0xf] %v10158_v11 }
  0x52   : > { %993 = vst [vmem:[#allocation2 + $0xe0] sm:$0xf] %v656_v0  ;;  %994 = vst [vmem:[#allocation2 + $0x104] sm:$0xf] %v666_v1  ;;  %v401_v12 = vld [vmem:[%s13047_s27 + $0x3c] sm:$0xf] }
  0x53   : > { %5887 = vmatpush1.bf16.msra.mxu0 %v11677_v13  ;;  %v670_v13 = vrot.slane %v668_v5, 4  ;;  %v673_v15 = vrot.slane %v671_v6, 5  ;;  %v679_v16 = vrot.slane %v677_v7, 5  ;;  %v683_v17 = vrot.slane %v681_v8, 4  ;;  %433 = vst [vmem:[#allocation2 + $0x168] sm:$0xf] %v401_v12 }
  0x54   : > { %5888 = vmatprep.subr.bf16.mxu0 %v11688_v25  ;;  %v402_v18 = vld [vmem:[%s13047_s27 + $0x40] sm:$0xf]  ;;  %v10127_v19 = vld [vmem:[%s13047_s27 + $0x108] sm:$0xf]  ;;  %v11694_v20 = vld [vmem:[#allocation2 + $0xd8] ss:$36 sps:$4 sm:$0xff]  }
  0x55   : > { %v674_v21 = vor.u32 %v673_v15, %v670_v13  ;;  %v684_v22 = vor.u32 %v683_v17, %v679_v16  ;;  %v689_v23 = vrot.slane %v687_v10, 5  ;;  %434 = vst [vmem:[#allocation2 + $0x18c] sm:$0xf] %v402_v18  ;;  %498 = vst [vmem:[#allocation2 + $0x16c] sm:$0xf] %v10127_v19 }
  0x56   : > { %5541 = vmatmul.mubr.bf16.gmra.mxu0 %v11676_v24  ;;  %v11701_v24 = vld [vmem:[#allocation2 + $0x124] ss:$36 sps:$4 sm:$0xff]   ;;  %v10128_v25 = vld [vmem:[%s13047_s27 + $0x10c] sm:$0xf]  ;;  %v535_v30 = vld [vmem:[%s13047_s27 + $0x3c] sm:$0xf] }
  0x57   : > { %5550 = vmatprep.mubr.bf16.mxu0 %v11683_v27  ;;  %5889 = vmatpush1.bf16.msra.mxu0 %v11686_v28  ;;  %v11713_v26 = vld [vmem:[%s16543_s1 + $0x550] ss:$20 sps:$4 sm:$0xff]   ;;  %v11715_v27 = vld [vmem:[%s16543_s1 + $0x554] ss:$20 sps:$4 sm:$0xff]   ;;  %v675_v28 = vrot.slane %v674_v21, 4  ;;  %v685_v29 = vrot.slane %v684_v22, 4 }
  0x58   : > { %5734 = vmatmul.mubr.bf16.gmra.mxu1 %v11682_v33  ;;  %5890 = vmatprep.subr.bf16.mxu0 %v11697_v35  ;;  %499 = vst [vmem:[#allocation2 + $0x190] sm:$0xf] %v10128_v25  ;;  %v536_v31 = vld [vmem:[%s13047_s27 + $0x40] sm:$0xf]  ;;  %v11698_v32 = vld [vmem:[#allocation2 + $0xe4] ss:$36 sps:$4 sm:$0xff]  }
  0x59   : > { %5743 = vmatprep.mubr.bf16.mxu1 %v11689_v62  ;;  %v692_v33 = vshrl.u32 %v535_v30, 16  ;;  %v695_v34 = vshll.u32 %v535_v30, 16  ;;  %v11700_v35 = vld [vmem:[#allocation2 + $0xe0] ss:$36 sps:$4 sm:$0xff]   ;;  %v680_v36 = vsel %vm13093_vm2, %v675_v28, %v679_v16  ;;  %v690_v37 = vsel %vm13093_vm2, %v685_v29, %v689_v23  ;;  %v10159_v44 = vld [vmem:[%s13047_s27 + $0x1d4] sm:$0xf] }
  0x5a   : > { %v537_v38 = vld [vmem:[%s13047_s27 + $0x44] sm:$0x1]  ;;  %v701_v39 = vshll.u32 %v536_v31, 16  ;;  %v705_v40 = vshrl.u32 %v536_v31, 16  ;;  %995 = vst [vmem:[#allocation2 + $0x128] sm:$0xf] %v680_v36 }
  0x5b   : > { %5891 = vmatpush1.bf16.msra.mxu0 %v11695_v51  ;;  %996 = vst [vmem:[#allocation2 + $0x14c] sm:$0xf] %v690_v37  ;;  %v694_v41 = vrot.slane %v692_v33, 4  ;;  %v697_v42 = vrot.slane %v695_v34, 5  ;;  %v711_v43 = vshll.u32 %v537_v38, 16 }
  0x5c   : > { %5892 = vmatprep.subr.bf16.mxu0 %v11706_v61  ;;  %v703_v45 = vrot.slane %v701_v39, 5  ;;  %v707_v46 = vrot.slane %v705_v40, 4  ;;  %v10160_v47 = vld [vmem:[%s13047_s27 + $0x1d8] sm:$0xf]  ;;  %1062 = vst [vmem:[#allocation2 + $0x174] sm:$0xf] %v10159_v44 }
  0x5d   : > { %v403_v48 = vld [vmem:[%s13047_s27 + $0x48] sm:$0xf]  ;;  %v698_v49 = vor.u32 %v697_v42, %v694_v41  ;;  %v713_v50 = vrot.slane %v711_v43, 5  ;;  %1063 = vst [vmem:[#allocation2 + $0x198] sm:$0xf] %v10160_v47 }
  0x5e   : > { %5551 = vmatmul.mubr.bf16.gmra.mxu0 %v11685_v55  ;;  %v404_v51 = vld [vmem:[%s13047_s27 + $0x4c] sm:$0xf]  ;;  %435 = vst [vmem:[#allocation2 + $0x1b0] sm:$0xf] %v403_v48  ;;  %v10129_v52 = vld [vmem:[%s13047_s27 + $0x114] sm:$0xf]  ;;  %v708_v53 = vor.u32 %v707_v46, %v703_v45 }
  0x5f   : > { %5560 = vmatprep.mubr.bf16.mxu0 %v11692_v57  ;;  %5893 = vmatpush1.bf16.msra.mxu0 %v11704_v60  ;;  %436 = vst [vmem:[#allocation2 + $0x1d4] sm:$0xf] %v404_v51  ;;  %v10130_v54 = vld [vmem:[%s13047_s27 + $0x118] sm:$0xf]  ;;  %500 = vst [vmem:[#allocation2 + $0x1b4] sm:$0xf] %v10129_v52 }
  0x60   : > { %5744 = vmatmul.mubr.bf16.gmra.mxu1 %v11691_v63  ;;  %5894 = vmatprep.subr.bf16.mxu0 %v11715_v27  ;;  %v11722_v55 = vld [vmem:[%s16543_s1 + $0x528] ss:$20 sps:$4 sm:$0xff]   ;;  %v11724_v56 = vld [vmem:[%s16543_s1 + $0x52c] ss:$20 sps:$4 sm:$0xff]   ;;  %v699_v59 = vrot.slane %v698_v49, 4  ;;  %v709_v60 = vrot.slane %v708_v53, 4 }
  0x61   : > { %5753 = vmatprep.mubr.bf16.mxu1 %v11698_v32  ;;  %v11703_v57 = vld [vmem:[#allocation2 + $0x120] ss:$36 sps:$4 sm:$0xff]   ;;  %v11710_v58 = vld [vmem:[#allocation2 + $0x16c] ss:$36 sps:$4 sm:$0xff]   ;;  %501 = vst [vmem:[#allocation2 + $0x1d8] sm:$0xf] %v10130_v54 }
  0x62   : > { %v538_v61 = vld [vmem:[%s13047_s27 + $0x48] sm:$0xf]  ;;  %v539_v62 = vld [vmem:[%s13047_s27 + $0x4c] sm:$0xf]  ;;  %v704_v63 = vsel %vm13093_vm2, %v699_v59, %v703_v45  ;;  %v540_v0 = vld [vmem:[%s13047_s27 + $0x50] sm:$0x1]  ;;  %v714_v5 = vsel %vm13093_vm2, %v709_v60, %v713_v50 }
  0x63   : > { %5895 = vmatpush1.bf16.msra.mxu0 %v11713_v26  ;;  %v716_v1 = vshrl.u32 %v538_v61, 16  ;;  %v719_v2 = vshll.u32 %v538_v61, 16  ;;  %v725_v3 = vshll.u32 %v539_v62, 16  ;;  %v11707_v4 = vld [vmem:[#allocation2 + $0x12c] ss:$36 sps:$4 sm:$0xff]   ;;  %v729_v6 = vshrl.u32 %v539_v62, 16 }
  0x64   : > { %5896 = vmatprep.subr.bf16.mxu0 %v11724_v56  ;;  %997 = vst [vmem:[#allocation2 + $0x170] sm:$0xf] %v704_v63  ;;  %v735_v7 = vshll.u32 %v540_v0, 16  ;;  %v11709_v8 = vld [vmem:[#allocation2 + $0x128] ss:$36 sps:$4 sm:$0xff]  }
  0x65   : > { %998 = vst [vmem:[#allocation2 + $0x194] sm:$0xf] %v714_v5  ;;  %v718_v9 = vrot.slane %v716_v1, 4  ;;  %v721_v10 = vrot.slane %v719_v2, 5  ;;  %v727_v11 = vrot.slane %v725_v3, 5  ;;  %v731_v12 = vrot.slane %v729_v6, 4 }
  0x66   : > { %5561 = vmatmul.mubr.bf16.gmra.mxu0 %v11694_v20  ;;  %v10161_v13 = vld [vmem:[%s13047_s27 + $0x1e0] sm:$0xf]  ;;  %v10162_v15 = vld [vmem:[%s13047_s27 + $0x1e4] sm:$0xf]  ;;  %v405_v17 = vld [vmem:[%s13047_s27 + $0x54] sm:$0xf] }
  0x67   : > { %5570 = vmatprep.mubr.bf16.mxu0 %v11701_v24  ;;  %5897 = vmatpush1.bf16.msra.mxu0 %v11722_v55  ;;  %v722_v16 = vor.u32 %v721_v10, %v718_v9  ;;  %1064 = vst [vmem:[#allocation2 + $0x1bc] sm:$0xf] %v10161_v13  ;;  %1065 = vst [vmem:[#allocation2 + $0x1e0] sm:$0xf] %v10162_v15  ;;  %v406_v18 = vld [vmem:[%s13047_s27 + $0x58] sm:$0xf]  ;;  %v732_v20 = vor.u32 %v731_v12, %v727_v11 }
  0x68   : > { %5754 = vmatmul.mubr.bf16.gmra.mxu1 %v11700_v35  ;;  %v11712_v19 = vld [vmem:[#allocation2 + $0x168] ss:$36 sps:$4 sm:$0xff]   ;;  %v737_v21 = vrot.slane %v735_v7, 5  ;;  %437 = vst [vmem:[#allocation2 + $0x1f8] sm:$0xf] %v405_v17 }
  0x69   : > { %5763 = vmatprep.mubr.bf16.mxu1 %v11707_v4  ;;  %438 = vst [vmem:[#allocation2 + $0x21c] sm:$0xf] %v406_v18  ;;  %v11719_v22 = vld [vmem:[#allocation2 + $0x1b4] ss:$36 sps:$4 sm:$0xff]   ;;  %v723_v23 = vrot.slane %v722_v16, 4  ;;  %v733_v26 = vrot.slane %v732_v20, 4 }
  0x6a   : > { %v10131_v24 = vld [vmem:[%s13047_s27 + $0x120] sm:$0xf]  ;;  %v10132_v25 = vld [vmem:[%s13047_s27 + $0x124] sm:$0xf]  ;;  %v541_v30 = vld [vmem:[%s13047_s27 + $0x54] sm:$0xf] }
  0x6b   : > { %502 = vst [vmem:[#allocation2 + $0x1fc] sm:$0xf] %v10131_v24  ;;  %503 = vst [vmem:[#allocation2 + $0x220] sm:$0xf] %v10132_v25  ;;  %v11731_v27 = vld [vmem:[%s16543_s1 + $0x500] ss:$20 sps:$4 sm:$0xff]   ;;  %v728_v29 = vsel %vm13093_vm2, %v723_v23, %v727_v11  ;;  %v738_v34 = vsel %vm13093_vm2, %v733_v26, %v737_v21 }
  0x6c   : > { %v11733_v28 = vld [vmem:[%s16543_s1 + $0x504] ss:$20 sps:$4 sm:$0xff]   ;;  %v11718_v33 = vld [vmem:[#allocation2 + $0x170] ss:$36 sps:$4 sm:$0xff]   ;;  %999 = vst [vmem:[#allocation2 + $0x1b8] sm:$0xf] %v728_v29 }
  0x6d   : > { %v542_v31 = vld [vmem:[%s13047_s27 + $0x58] sm:$0xf]  ;;  %5898 = vmatprep.subr.bf16.mxu0 %v11733_v28  ;;  %v740_v35 = vshrl.u32 %v541_v30, 16  ;;  %1000 = vst [vmem:[#allocation2 + $0x1dc] sm:$0xf] %v738_v34  ;;  %v743_v37 = vshll.u32 %v541_v30, 16 }
  0x6e   : > { %5571 = vmatmul.mubr.bf16.gmra.mxu0 %v11703_v57  ;;  %v11716_v32 = vld [vmem:[#allocation2 + $0x174] ss:$36 sps:$4 sm:$0xff]   ;;  %v543_v36 = vld [vmem:[%s13047_s27 + $0x5c] sm:$0x1]  ;;  %v749_v38 = vshll.u32 %v542_v31, 16  ;;  %v753_v39 = vshrl.u32 %v542_v31, 16 }
  0x6f   : > { %5580 = vmatprep.mubr.bf16.mxu0 %v11710_v58  ;;  %5899 = vmatpush1.bf16.msra.mxu0 %v11731_v27  ;;  %v742_v40 = vrot.slane %v740_v35, 4  ;;  %v759_v41 = vshll.u32 %v543_v36, 16  ;;  %v10163_v42 = vld [vmem:[%s13047_s27 + $0x1ec] sm:$0xf]  ;;  %v10164_v43 = vld [vmem:[%s13047_s27 + $0x1f0] sm:$0xf] }
  0x70   : > { %5764 = vmatmul.mubr.bf16.gmra.mxu1 %v11709_v8  ;;  %v745_v44 = vrot.slane %v743_v37, 5  ;;  %v751_v45 = vrot.slane %v749_v38, 5  ;;  %v755_v46 = vrot.slane %v753_v39, 4  ;;  %1066 = vst [vmem:[#allocation2 + $0x204] sm:$0xf] %v10163_v42 }
  0x71   : > { %5773 = vmatprep.mubr.bf16.mxu1 %v11716_v32  ;;  %1067 = vst [vmem:[#allocation2 + $0x228] sm:$0xf] %v10164_v43  ;;  %v407_v47 = vld [vmem:[%s13047_s27 + $0x60] sm:$0xf]  ;;  %v408_v48 = vld [vmem:[%s13047_s27 + $0x64] sm:$0xf] }
  0x72   : > { %439 = vst [vmem:[#allocation2 + $0x240] sm:$0xf] %v407_v47  ;;  %v10133_v49 = vld [vmem:[%s13047_s27 + $0x12c] sm:$0xf]  ;;  %v11721_v50 = vld [vmem:[#allocation2 + $0x1b0] ss:$36 sps:$4 sm:$0xff]   ;;  %v746_v51 = vor.u32 %v745_v44, %v742_v40  ;;  %v756_v52 = vor.u32 %v755_v46, %v751_v45 }
  0x73   : > { %v761_v53 = vrot.slane %v759_v41, 5  ;;  %440 = vst [vmem:[#allocation2 + $0x264] sm:$0xf] %v408_v48  ;;  %504 = vst [vmem:[#allocation2 + $0x244] sm:$0xf] %v10133_v49 }
  0x74   : > { %v11728_v54 = vld [vmem:[#allocation2 + $0x1fc] ss:$36 sps:$4 sm:$0xff]   ;;  %v10134_v55 = vld [vmem:[%s13047_s27 + $0x130] sm:$0xf]  ;;  %v11740_v56 = vld [vmem:[%s16543_s1 + $0x758] ss:$20 sps:$4 sm:$0xff]  }
  0x75   : > { %v747_v57 = vrot.slane %v746_v51, 4  ;;  %v757_v58 = vrot.slane %v756_v52, 4  ;;  %505 = vst [vmem:[#allocation2 + $0x268] sm:$0xf] %v10134_v55  ;;  %v11742_v59 = vld [vmem:[%s16543_s1 + $0x75c] ss:$20 sps:$4 sm:$0xff]  }
  0x76   : > { %5581 = vmatmul.mubr.bf16.gmra.mxu0 %v11712_v19  ;;  %v11725_v60 = vld [vmem:[#allocation2 + $0x1bc] ss:$36 sps:$4 sm:$0xff]   ;;  %5900 = vmatprep.subr.bf16.mxu0 %v11742_v59  ;;  %v11743_v0 = vld [vmem:[%s16543_s1 + $0x898] ss:$20 sps:$4 sm:$0xff]   ;;  %v545_v3 = vld [vmem:[%s13047_s27 + $0x64] sm:$0xf] }
  0x77   : > { %5590 = vmatprep.mubr.bf16.mxu0 %v11719_v22  ;;  %v11727_v61 = vld [vmem:[#allocation2 + $0x1b8] ss:$36 sps:$4 sm:$0xff]   ;;  %v752_v62 = vsel %vm13093_vm2, %v747_v57, %v751_v45  ;;  %v762_v63 = vsel %vm13093_vm2, %v757_v58, %v761_v53  ;;  %v544_v2 = vld [vmem:[%s13047_s27 + $0x60] sm:$0xf]  ;;  %v546_v4 = vld [vmem:[%s13047_s27 + $0x68] sm:$0x1]  ;;  %5901 = vmatpush2.bf16.msra.mxu0 %v11740_v56 }
  0x78   : > { %5774 = vmatmul.mubr.bf16.gmra.mxu1 %v11718_v33  ;;  %v11745_v1 = vld [vmem:[%s16543_s1 + $0x89c] ss:$20 sps:$4 sm:$0xff]   ;;  %1001 = vst [vmem:[#allocation2 + $0x200] sm:$0xf] %v752_v62  ;;  %1002 = vst [vmem:[#allocation2 + $0x224] sm:$0xf] %v762_v63 }
  0x79   : > { %5783 = vmatprep.mubr.bf16.mxu1 %v11725_v60  ;;  %v764_v5 = vshrl.u32 %v544_v2, 16  ;;  %v767_v6 = vshll.u32 %v544_v2, 16  ;;  %6077 = vmatprep.subr.bf16.mxu1 %v11745_v1  ;;  %v773_v7 = vshll.u32 %v545_v3, 16  ;;  %v777_v8 = vshrl.u32 %v545_v3, 16  ;;  %v10165_v10 = vld [vmem:[%s13047_s27 + $0x1f8] sm:$0xf] }
  0x7a   : > { %v783_v9 = vshll.u32 %v546_v4, 16  ;;  %v10166_v13 = vld [vmem:[%s13047_s27 + $0x1fc] sm:$0xf]  ;;  %1068 = vst [vmem:[#allocation2 + $0x24c] sm:$0xf] %v10165_v10  ;;  %6078 = vmatpush1.bf16.msra.mxu1 %v11743_v0 }
  0x7b   : > { %v766_v11 = vrot.slane %v764_v5, 4  ;;  %v769_v12 = vrot.slane %v767_v6, 5  ;;  %v11730_v15 = vld [vmem:[#allocation2 + $0x1f8] ss:$36 sps:$4 sm:$0xff]   ;;  %v775_v16 = vrot.slane %v773_v7, 5  ;;  %v779_v17 = vrot.slane %v777_v8, 4 }
  0x7c   : > { %1069 = vst [vmem:[#allocation2 + $0x270] sm:$0xf] %v10166_v13  ;;  %v11737_v18 = vld [vmem:[#allocation2 + $0x244] ss:$36 sps:$4 sm:$0xff]   ;;  %v785_v20 = vrot.slane %v783_v9, 5 }
  0x7d   : > { %v770_v19 = vor.u32 %v769_v12, %v766_v11  ;;  %v11749_v21 = vld [vmem:[%s16543_s1 + $0x870] ss:$20 sps:$4 sm:$0xff]   ;;  %v780_v22 = vor.u32 %v779_v17, %v775_v16  ;;  %v11751_v23 = vld [vmem:[%s16543_s1 + $0x874] ss:$20 sps:$4 sm:$0xff]   ;;  %v409_v24 = vld [vmem:[%s13047_s27 + $0x6c] sm:$0xf] }
  0x7e   : > { %5591 = vmatmul.mubr.bf16.gmra.mxu0 %v11721_v50  ;;  %v410_v25 = vld [vmem:[%s13047_s27 + $0x70] sm:$0xf]  ;;  %441 = vst [vmem:[#allocation2 + $0x288] sm:$0xf] %v409_v24  ;;  %v10135_v27 = vld [vmem:[%s13047_s27 + $0x138] sm:$0xf]  ;;  %6079 = vmatprep.subr.bf16.mxu1 %v11751_v23 }
  0x7f   : > { %5600 = vmatprep.mubr.bf16.mxu0 %v11728_v54  ;;  %v771_v26 = vrot.slane %v770_v19, 4  ;;  %442 = vst [vmem:[#allocation2 + $0x2ac] sm:$0xf] %v410_v25  ;;  %v10136_v28 = vld [vmem:[%s13047_s27 + $0x13c] sm:$0xf]  ;;  %v781_v30 = vrot.slane %v780_v22, 4  ;;  %6080 = vmatpush1.bf16.msra.mxu1 %v11749_v21 }
  0x80   : > { %5784 = vmatmul.mubr.bf16.gmra.mxu1 %v11727_v61  ;;  %v11734_v29 = vld [vmem:[#allocation2 + $0x204] ss:$36 sps:$4 sm:$0xff]   ;;  %506 = vst [vmem:[#allocation2 + $0x28c] sm:$0xf] %v10135_v27  ;;  %507 = vst [vmem:[#allocation2 + $0x2b0] sm:$0xf] %v10136_v28 }
  0x81   : > { %v11736_v31 = vld [vmem:[#allocation2 + $0x200] ss:$36 sps:$4 sm:$0xff]   ;;  %v776_v32 = vsel %vm13093_vm2, %v771_v26, %v775_v16  ;;  %v11757_v34 = vld [vmem:[%s16543_s1 + $0x734] ss:$20 sps:$4 sm:$0xff]   ;;  %5793 = vmatprep.mubr.bf16.mxu1 %v11734_v29  ;;  %v786_v35 = vsel %vm13093_vm2, %v781_v30, %v785_v20  ;;  %v547_v36 = vld [vmem:[%s13047_s27 + $0x6c] sm:$0xf] }
  0x82   : > { %v11755_v33 = vld [vmem:[%s16543_s1 + $0x730] ss:$20 sps:$4 sm:$0xff]   ;;  %1003 = vst [vmem:[#allocation2 + $0x248] sm:$0xf] %v776_v32  ;;  %v549_v38 = vld [vmem:[%s13047_s27 + $0x74] sm:$0x1]  ;;  %5902 = vmatprep.subr.bf16.mxu0 %v11757_v34 }
  0x83   : > { %v548_v37 = vld [vmem:[%s13047_s27 + $0x70] sm:$0xf]  ;;  %v11739_v39 = vld [vmem:[#allocation2 + $0x240] ss:$36 sps:$4 sm:$0xff]   ;;  %1004 = vst [vmem:[#allocation2 + $0x26c] sm:$0xf] %v786_v35  ;;  %5903 = vmatpush2.bf16.msra.mxu0 %v11755_v33 }
  0x84   : > { %v788_v40 = vshrl.u32 %v547_v36, 16  ;;  %v791_v41 = vshll.u32 %v547_v36, 16  ;;  %v797_v42 = vshll.u32 %v548_v37, 16  ;;  %v801_v43 = vshrl.u32 %v548_v37, 16  ;;  %v10167_v44 = vld [vmem:[%s13047_s27 + $0x204] sm:$0xf] }
  0x85   : > { %v807_v45 = vshll.u32 %v549_v38, 16  ;;  %v10168_v46 = vld [vmem:[%s13047_s27 + $0x208] sm:$0xf]  ;;  %1070 = vst [vmem:[#allocation2 + $0x294] sm:$0xf] %v10167_v44 }
  0x86   : > { %5601 = vmatmul.mubr.bf16.gmra.mxu0 %v11730_v15  ;;  %v11761_v47 = vld [vmem:[%s16543_s1 + $0x848] ss:$20 sps:$4 sm:$0xff]   ;;  %v790_v48 = vrot.slane %v788_v40, 4  ;;  %v793_v49 = vrot.slane %v791_v41, 5  ;;  %v799_v50 = vrot.slane %v797_v42, 5  ;;  %v803_v51 = vrot.slane %v801_v43, 4 }
  0x87   : > { %5610 = vmatprep.mubr.bf16.mxu0 %v11737_v18  ;;  %1071 = vst [vmem:[#allocation2 + $0x2b8] sm:$0xf] %v10168_v46  ;;  %v11763_v52 = vld [vmem:[%s16543_s1 + $0x84c] ss:$20 sps:$4 sm:$0xff]   ;;  %v11766_v53 = vld [vmem:[%s16543_s1 + $0x824] ss:$20 sps:$4 sm:$0xff]  }
  0x88   : > { %5794 = vmatmul.mubr.bf16.gmra.mxu1 %v11736_v31  ;;  %v11752_v54 = vld [vmem:[#allocation2 + $0x28c] ss:$36 sps:$4 sm:$0xff]   ;;  %v794_v55 = vor.u32 %v793_v49, %v790_v48  ;;  %v804_v56 = vor.u32 %v803_v51, %v799_v50  ;;  %v809_v57 = vrot.slane %v807_v45, 5  ;;  %6081 = vmatprep.subr.bf16.mxu1 %v11763_v52  ;;  %v11764_v58 = vld [vmem:[%s16543_s1 + $0x820] ss:$20 sps:$4 sm:$0xff]  }
  0x89   : > { %6082 = vmatpush1.bf16.msra.mxu1 %v11761_v47  ;;  %v411_v59 = vld [vmem:[%s13047_s27 + $0x78] sm:$0xf]  ;;  %v412_v60 = vld [vmem:[%s13047_s27 + $0x7c] sm:$0xf]  ;;  %v10137_v63 = vld [vmem:[%s13047_s27 + $0x144] sm:$0xf] }
  0x8a   : > { %v795_v61 = vrot.slane %v794_v55, 4  ;;  %v805_v62 = vrot.slane %v804_v56, 4  ;;  %6083 = vmatprep.subr.bf16.mxu1 %v11766_v53  ;;  %443 = vst [vmem:[#allocation2 + $0x2d0] sm:$0xf] %v411_v59  ;;  %444 = vst [vmem:[#allocation2 + $0x2f4] sm:$0xf] %v412_v60 }
  0x8b   : > { %v11746_v0 = vld [vmem:[#allocation2 + $0x24c] ss:$36 sps:$4 sm:$0xff]   ;;  %508 = vst [vmem:[#allocation2 + $0x2d4] sm:$0xf] %v10137_v63  ;;  %v10138_v5 = vld [vmem:[%s13047_s27 + $0x148] sm:$0xf] }
  0x8c   : > { %v11748_v1 = vld [vmem:[#allocation2 + $0x248] ss:$36 sps:$4 sm:$0xff]   ;;  %v800_v3 = vsel %vm13093_vm2, %v795_v61, %v799_v50  ;;  %v810_v4 = vsel %vm13093_vm2, %v805_v62, %v809_v57  ;;  %5803 = vmatprep.mubr.bf16.mxu1 %v11746_v0  ;;  %509 = vst [vmem:[#allocation2 + $0x2f8] sm:$0xf] %v10138_v5  ;;  %v550_v8 = vld [vmem:[%s13047_s27 + $0x78] sm:$0xf] }
  0x8d   : > { %v11754_v2 = vld [vmem:[#allocation2 + $0x288] ss:$36 sps:$4 sm:$0xff]   ;;  %1005 = vst [vmem:[#allocation2 + $0x290] sm:$0xf] %v800_v3  ;;  %1006 = vst [vmem:[#allocation2 + $0x2b4] sm:$0xf] %v810_v4  ;;  %6084 = vmatpush1.bf16.msra.mxu1 %v11764_v58 }
  0x8e   : > { %5611 = vmatmul.mubr.bf16.gmra.mxu0 %v11739_v39  ;;  %v11770_v6 = vld [vmem:[%s16543_s1 + $0x708] ss:$20 sps:$4 sm:$0xff]   ;;  %v11772_v7 = vld [vmem:[%s16543_s1 + $0x70c] ss:$20 sps:$4 sm:$0xff]   ;;  %v812_v11 = vshrl.u32 %v550_v8, 16  ;;  %v815_v12 = vshll.u32 %v550_v8, 16 }
  0x8f   : > { %5620 = vmatprep.mubr.bf16.mxu0 %v11752_v54  ;;  %v551_v9 = vld [vmem:[%s13047_s27 + $0x7c] sm:$0xf]  ;;  %v552_v10 = vld [vmem:[%s13047_s27 + $0x80] sm:$0x1]  ;;  %5904 = vmatprep.subr.bf16.mxu0 %v11772_v7  ;;  %v10169_v16 = vld [vmem:[%s13047_s27 + $0x210] sm:$0xf] }
  0x90   : > { %5804 = vmatmul.mubr.bf16.gmra.mxu1 %v11748_v1  ;;  %v821_v13 = vshll.u32 %v551_v9, 16  ;;  %v825_v15 = vshrl.u32 %v551_v9, 16  ;;  %v831_v17 = vshll.u32 %v552_v10, 16  ;;  %v10170_v18 = vld [vmem:[%s13047_s27 + $0x214] sm:$0xf]  ;;  %5905 = vmatpush2.bf16.msra.mxu0 %v11770_v6  ;;  %v814_v20 = vrot.slane %v812_v11, 4 }
  0x91   : > { %1072 = vst [vmem:[#allocation2 + $0x2dc] sm:$0xf] %v10169_v16  ;;  %v11776_v19 = vld [vmem:[%s16543_s1 + $0x7f8] ss:$20 sps:$4 sm:$0xff]   ;;  %v817_v21 = vrot.slane %v815_v12, 5 }
  0x92   : > { %v823_v22 = vrot.slane %v821_v13, 5  ;;  %v827_v23 = vrot.slane %v825_v15, 4  ;;  %1073 = vst [vmem:[#allocation2 + $0x300] sm:$0xf] %v10170_v18  ;;  %v11778_v24 = vld [vmem:[%s16543_s1 + $0x7fc] ss:$20 sps:$4 sm:$0xff]  }
  0x93   : > { %v11781_v25 = vld [vmem:[%s16543_s1 + $0x7d4] ss:$20 sps:$4 sm:$0xff]   ;;  %v818_v26 = vor.u32 %v817_v21, %v814_v20  ;;  %v833_v28 = vrot.slane %v831_v17, 5  ;;  %6085 = vmatprep.subr.bf16.mxu1 %v11778_v24  ;;  %v11779_v29 = vld [vmem:[%s16543_s1 + $0x7d0] ss:$20 sps:$4 sm:$0xff]  }
  0x94   : > { %v828_v27 = vor.u32 %v827_v23, %v823_v22  ;;  %v413_v30 = vld [vmem:[%s13047_s27 + $0x84] sm:$0xf]  ;;  %v414_v31 = vld [vmem:[%s13047_s27 + $0x88] sm:$0xf]  ;;  %6086 = vmatpush1.bf16.msra.mxu1 %v11776_v19  ;;  %v10139_v32 = vld [vmem:[%s13047_s27 + $0x150] sm:$0xf] }
  0x95   : > { %445 = vst [vmem:[#allocation2 + $0x318] sm:$0xf] %v413_v30  ;;  %446 = vst [vmem:[#allocation2 + $0x33c] sm:$0xf] %v414_v31  ;;  %v10140_v33 = vld [vmem:[%s13047_s27 + $0x154] sm:$0xf]  ;;  %6087 = vmatprep.subr.bf16.mxu1 %v11781_v25 }
  0x96   : > { %5621 = vmatmul.mubr.bf16.gmra.mxu0 %v11754_v2  ;;  %v11785_v34 = vld [vmem:[%s16543_s1 + $0x6e0] ss:$20 sps:$4 sm:$0xff]   ;;  %v819_v36 = vrot.slane %v818_v26, 4  ;;  %v829_v37 = vrot.slane %v828_v27, 4  ;;  %510 = vst [vmem:[#allocation2 + $0x31c] sm:$0xf] %v10139_v32 }
  0x97   : > { %v11758_v35 = vld [vmem:[#allocation2 + $0x294] ss:$36 sps:$4 sm:$0xff]   ;;  %511 = vst [vmem:[#allocation2 + $0x340] sm:$0xf] %v10140_v33  ;;  %v553_v44 = vld [vmem:[%s13047_s27 + $0x84] sm:$0xf] }
  0x98   : > { %v11760_v38 = vld [vmem:[#allocation2 + $0x290] ss:$36 sps:$4 sm:$0xff]   ;;  %5813 = vmatprep.mubr.bf16.mxu1 %v11758_v35  ;;  %v824_v41 = vsel %vm13093_vm2, %v819_v36, %v823_v22  ;;  %v834_v42 = vsel %vm13093_vm2, %v829_v37, %v833_v28  ;;  %v11787_v43 = vld [vmem:[%s16543_s1 + $0x6e4] ss:$20 sps:$4 sm:$0xff]   ;;  %v554_v45 = vld [vmem:[%s13047_s27 + $0x88] sm:$0xf]  ;;  %6088 = vmatpush1.bf16.msra.mxu1 %v11779_v29 }
  0x99   : > { %v11767_v39 = vld [vmem:[#allocation2 + $0x2d4] ss:$36 sps:$4 sm:$0xff]   ;;  %5814 = vmatmul.mubr.bf16.gmra.mxu1 %v11760_v38  ;;  %1007 = vst [vmem:[#allocation2 + $0x2d8] sm:$0xf] %v824_v41  ;;  %1008 = vst [vmem:[#allocation2 + $0x2fc] sm:$0xf] %v834_v42  ;;  %5906 = vmatprep.subr.bf16.mxu0 %v11787_v43 }
  0x9a   : > { %v11769_v40 = vld [vmem:[#allocation2 + $0x2d0] ss:$36 sps:$4 sm:$0xff]   ;;  %5630 = vmatprep.mubr.bf16.mxu0 %v11767_v39  ;;  %v555_v46 = vld [vmem:[%s13047_s27 + $0x8c] sm:$0x1]  ;;  %v836_v47 = vshrl.u32 %v553_v44, 16  ;;  %v839_v48 = vshll.u32 %v553_v44, 16  ;;  %5907 = vmatpush2.bf16.msra.mxu0 %v11785_v34 }
  0x9b   : > { %v845_v49 = vshll.u32 %v554_v45, 16  ;;  %v849_v50 = vshrl.u32 %v554_v45, 16  ;;  %v855_v51 = vshll.u32 %v555_v46, 16  ;;  %v10171_v52 = vld [vmem:[%s13047_s27 + $0x21c] sm:$0xf] }
  0x9c   : > { %v838_v53 = vrot.slane %v836_v47, 4  ;;  %v841_v54 = vrot.slane %v839_v48, 5  ;;  %v10172_v55 = vld [vmem:[%s13047_s27 + $0x220] sm:$0xf]  ;;  %1074 = vst [vmem:[#allocation2 + $0x324] sm:$0xf] %v10171_v52 }
  0x9d   : > { %v11791_v56 = vld [vmem:[%s16543_s1 + $0x7a8] ss:$20 sps:$4 sm:$0xff]   ;;  %v847_v57 = vrot.slane %v845_v49, 5  ;;  %v851_v58 = vrot.slane %v849_v50, 4  ;;  %1075 = vst [vmem:[#allocation2 + $0x348] sm:$0xf] %v10172_v55 }
  0x9e   : > { %5631 = vmatmul.mubr.bf16.gmra.mxu0 %v11769_v40  ;;  %v11793_v59 = vld [vmem:[%s16543_s1 + $0x7ac] ss:$20 sps:$4 sm:$0xff]   ;;  %v842_v61 = vor.u32 %v841_v54, %v838_v53  ;;  %v857_v62 = vrot.slane %v855_v51, 5  ;;  %v11784_v63 = vld [vmem:[#allocation2 + $0x318] ss:$36 sps:$4 sm:$0xff]  }
  0x9f   : > { %v11782_v60 = vld [vmem:[#allocation2 + $0x31c] ss:$36 sps:$4 sm:$0xff]   ;;  %v852_v0 = vor.u32 %v851_v58, %v847_v57  ;;  %6089 = vmatprep.subr.bf16.mxu1 %v11793_v59  ;;  %v11796_v2 = vld [vmem:[%s16543_s1 + $0x784] ss:$20 sps:$4 sm:$0xff]   ;;  %v415_v4 = vld [vmem:[%s13047_s27 + $0x90] sm:$0xf] }
  0xa0   : > { %v11794_v1 = vld [vmem:[%s16543_s1 + $0x780] ss:$20 sps:$4 sm:$0xff]   ;;  %5640 = vmatprep.mubr.bf16.mxu0 %v11782_v60  ;;  %v843_v3 = vrot.slane %v842_v61, 4  ;;  %6090 = vmatpush1.bf16.msra.mxu1 %v11791_v56  ;;  %447 = vst [vmem:[#allocation2 + $0x360] sm:$0xf] %v415_v4 }
  0xa1   : > { %v416_v5 = vld [vmem:[%s13047_s27 + $0x94] sm:$0xf]  ;;  %v11773_v6 = vld [vmem:[#allocation2 + $0x2dc] ss:$36 sps:$4 sm:$0xff]   ;;  %v853_v7 = vrot.slane %v852_v0, 4  ;;  %6091 = vmatprep.subr.bf16.mxu1 %v11796_v2 }
  0xa2   : > { %448 = vst [vmem:[#allocation2 + $0x384] sm:$0xf] %v416_v5  ;;  %v11775_v8 = vld [vmem:[#allocation2 + $0x2d8] ss:$36 sps:$4 sm:$0xff]   ;;  %v848_v9 = vsel %vm13093_vm2, %v843_v3, %v847_v57  ;;  %v10142_v11 = vld [vmem:[%s13047_s27 + $0x160] sm:$0xf]  ;;  %5823 = vmatprep.mubr.bf16.mxu1 %v11773_v6 }
  0xa3   : > { %v10141_v10 = vld [vmem:[%s13047_s27 + $0x15c] sm:$0xf]  ;;  %v858_v12 = vsel %vm13093_vm2, %v853_v7, %v857_v62  ;;  %1009 = vst [vmem:[#allocation2 + $0x320] sm:$0xf] %v848_v9  ;;  %513 = vst [vmem:[#allocation2 + $0x388] sm:$0xf] %v10142_v11  ;;  %5824 = vmatmul.mubr.bf16.gmra.mxu1 %v11775_v8 }
  0xa4   : > { %512 = vst [vmem:[#allocation2 + $0x364] sm:$0xf] %v10141_v10  ;;  %v11800_v13 = vld [vmem:[%s16543_s1 + $0x6b8] ss:$20 sps:$4 sm:$0xff]   ;;  %v11802_v15 = vld [vmem:[%s16543_s1 + $0x6bc] ss:$20 sps:$4 sm:$0xff]   ;;  %6092 = vmatpush1.bf16.msra.mxu1 %v11794_v1 }
  0xa5   : > { %v556_v16 = vld [vmem:[%s13047_s27 + $0x90] sm:$0xf]  ;;  %1010 = vst [vmem:[#allocation2 + $0x344] sm:$0xf] %v858_v12  ;;  %v557_v17 = vld [vmem:[%s13047_s27 + $0x94] sm:$0xf]  ;;  %5908 = vmatprep.subr.bf16.mxu0 %v11802_v15 }
  0xa6   : > { %v558_v18 = vld [vmem:[%s13047_s27 + $0x98] sm:$0x1]  ;;  %v860_v19 = vshrl.u32 %v556_v16, 16  ;;  %v863_v20 = vshll.u32 %v556_v16, 16  ;;  %5641 = vmatmul.mubr.bf16.gmra.mxu0 %v11784_v63  ;;  %v869_v21 = vshll.u32 %v557_v17, 16  ;;  %v873_v22 = vshrl.u32 %v557_v17, 16 }
  0xa7   : > { %v879_v23 = vshll.u32 %v558_v18, 16  ;;  %v10173_v24 = vld [vmem:[%s13047_s27 + $0x228] sm:$0xf]  ;;  %v10174_v27 = vld [vmem:[%s13047_s27 + $0x22c] sm:$0xf]  ;;  %5909 = vmatpush2.bf16.msra.mxu0 %v11800_v13 }
  0xa8   : > { %v862_v25 = vrot.slane %v860_v19, 4  ;;  %v865_v26 = vrot.slane %v863_v20, 5  ;;  %1076 = vst [vmem:[#allocation2 + $0x36c] sm:$0xf] %v10173_v24  ;;  %v871_v28 = vrot.slane %v869_v21, 5  ;;  %v875_v29 = vrot.slane %v873_v22, 4 }
  0xa9   : > { %1077 = vst [vmem:[#allocation2 + $0x390] sm:$0xf] %v10174_v27  ;;  %v11806_v30 = vld [vmem:[%s16543_s1 + $0x9d8] ss:$20 sps:$4 sm:$0xff]   ;;  %v881_v32 = vrot.slane %v879_v23, 5 }
  0xaa   : > { %v866_v31 = vor.u32 %v865_v26, %v862_v25  ;;  %v11808_v33 = vld [vmem:[%s16543_s1 + $0x9dc] ss:$20 sps:$4 sm:$0xff]   ;;  %v11811_v34 = vld [vmem:[%s16543_s1 + $0x9b4] ss:$20 sps:$4 sm:$0xff]   ;;  %v876_v35 = vor.u32 %v875_v29, %v871_v28  ;;  %v418_v38 = vld [vmem:[%s13047_s27 + $0xa0] sm:$0xf] }
  0xab   : > { %v11809_v36 = vld [vmem:[%s16543_s1 + $0x9b0] ss:$20 sps:$4 sm:$0xff]   ;;  %v417_v37 = vld [vmem:[%s13047_s27 + $0x9c] sm:$0xf]  ;;  %v10143_v39 = vld [vmem:[%s13047_s27 + $0x168] sm:$0xf]  ;;  %6093 = vmatprep.subr.bf16.mxu1 %v11808_v33 }
  0xac   : > { %v867_v40 = vrot.slane %v866_v31, 4  ;;  %449 = vst [vmem:[#allocation2 + $0x3a8] sm:$0xf] %v417_v37  ;;  %450 = vst [vmem:[#allocation2 + $0x3cc] sm:$0xf] %v418_v38  ;;  %v877_v43 = vrot.slane %v876_v35, 4  ;;  %6094 = vmatpush2.bf16.msra.mxu1 %v11806_v30 }
  0xad   : > { %514 = vst [vmem:[#allocation2 + $0x3ac] sm:$0xf] %v10143_v39  ;;  %v11788_v41 = vld [vmem:[#allocation2 + $0x324] ss:$36 sps:$4 sm:$0xff]   ;;  %6095 = vmatprep.subr.bf16.mxu1 %v11811_v34  ;;  %v10144_v47 = vld [vmem:[%s13047_s27 + $0x16c] sm:$0xf] }
  0xae   : > { %v11790_v42 = vld [vmem:[#allocation2 + $0x320] ss:$36 sps:$4 sm:$0xff]   ;;  %v872_v46 = vsel %vm13093_vm2, %v867_v40, %v871_v28  ;;  %5833 = vmatprep.mubr.bf16.mxu1 %v11788_v41  ;;  %v882_v48 = vsel %vm13093_vm2, %v877_v43, %v881_v32  ;;  %515 = vst [vmem:[#allocation2 + $0x3d0] sm:$0xf] %v10144_v47  ;;  %v11817_v50 = vld [vmem:[%s16543_s1 + $0x694] ss:$20 sps:$4 sm:$0xff]  }
  0xaf   : > { %v11797_v44 = vld [vmem:[#allocation2 + $0x364] ss:$36 sps:$4 sm:$0xff]   ;;  %1011 = vst [vmem:[#allocation2 + $0x368] sm:$0xf] %v872_v46  ;;  %5834 = vmatmul.mubr.bf16.gmra.mxu1 %v11790_v42  ;;  %1012 = vst [vmem:[#allocation2 + $0x38c] sm:$0xf] %v882_v48  ;;  %5910 = vmatprep.subr.bf16.mxu0 %v11817_v50 }
  0xb0   : > { %v11799_v45 = vld [vmem:[#allocation2 + $0x360] ss:$36 sps:$4 sm:$0xff]   ;;  %5650 = vmatprep.mubr.bf16.mxu0 %v11797_v44  ;;  %v559_v51 = vld [vmem:[%s13047_s27 + $0x9c] sm:$0xf]  ;;  %6096 = vmatpush2.bf16.msra.mxu1 %v11809_v36  ;;  %v10175_v59 = vld [vmem:[%s13047_s27 + $0x234] sm:$0xf] }
  0xb1   : > { %v11815_v49 = vld [vmem:[%s16543_s1 + $0x690] ss:$20 sps:$4 sm:$0xff]   ;;  %v560_v52 = vld [vmem:[%s13047_s27 + $0xa0] sm:$0xf]  ;;  %5651 = vmatmul.mubr.bf16.gmra.mxu0 %v11799_v45  ;;  %v884_v54 = vshrl.u32 %v559_v51, 16  ;;  %v887_v55 = vshll.u32 %v559_v51, 16 }
  0xb2   : > { %v561_v53 = vld [vmem:[%s13047_s27 + $0xa4] sm:$0x1]  ;;  %v893_v56 = vshll.u32 %v560_v52, 16  ;;  %v897_v57 = vshrl.u32 %v560_v52, 16  ;;  %v10176_v60 = vld [vmem:[%s13047_s27 + $0x238] sm:$0xf]  ;;  %5911 = vmatpush2.bf16.msra.mxu0 %v11815_v49 }
  0xb3   : > { %v903_v58 = vshll.u32 %v561_v53, 16  ;;  %v886_v61 = vrot.slane %v884_v54, 4  ;;  %v889_v62 = vrot.slane %v887_v55, 5  ;;  %1078 = vst [vmem:[#allocation2 + $0x3b4] sm:$0xf] %v10175_v59 }
  0xb4   : > { %v895_v63 = vrot.slane %v893_v56, 5  ;;  %v899_v0 = vrot.slane %v897_v57, 4  ;;  %1079 = vst [vmem:[#allocation2 + $0x3d8] sm:$0xf] %v10176_v60  ;;  %v11821_v1 = vld [vmem:[%s16543_s1 + $0x988] ss:$20 sps:$4 sm:$0xff]  }
  0xb5   : > { %v11823_v2 = vld [vmem:[%s16543_s1 + $0x98c] ss:$20 sps:$4 sm:$0xff]   ;;  %v890_v3 = vor.u32 %v889_v62, %v886_v61  ;;  %v11826_v6 = vld [vmem:[%s16543_s1 + $0x964] ss:$20 sps:$4 sm:$0xff]   ;;  %v905_v8 = vrot.slane %v903_v58, 5 }
  0xb6   : > { %v900_v4 = vor.u32 %v899_v0, %v895_v63  ;;  %v11824_v5 = vld [vmem:[%s16543_s1 + $0x960] ss:$20 sps:$4 sm:$0xff]   ;;  %v11812_v7 = vld [vmem:[#allocation2 + $0x3ac] ss:$36 sps:$4 sm:$0xff]   ;;  %6097 = vmatprep.subr.bf16.mxu1 %v11823_v2  ;;  %v419_v15 = vld [vmem:[%s13047_s27 + $0xa8] sm:$0xf] }
  0xb7   : > { %v11803_v9 = vld [vmem:[#allocation2 + $0x36c] ss:$36 sps:$4 sm:$0xff]   ;;  %v891_v11 = vrot.slane %v890_v3, 4  ;;  %6098 = vmatpush2.bf16.msra.mxu1 %v11821_v1  ;;  %5660 = vmatprep.mubr.bf16.mxu0 %v11812_v7  ;;  %451 = vst [vmem:[#allocation2 + $0x3f0] sm:$0xf] %v419_v15 }
  0xb8   : > { %v11805_v10 = vld [vmem:[#allocation2 + $0x368] ss:$36 sps:$4 sm:$0xff]   ;;  %v901_v13 = vrot.slane %v900_v4, 4  ;;  %6099 = vmatprep.subr.bf16.mxu1 %v11826_v6  ;;  %5843 = vmatprep.mubr.bf16.mxu1 %v11803_v9  ;;  %v10145_v18 = vld [vmem:[%s13047_s27 + $0x174] sm:$0xf] }
  0xb9   : > { %v11814_v12 = vld [vmem:[#allocation2 + $0x3a8] ss:$36 sps:$4 sm:$0xff]   ;;  %v896_v16 = vsel %vm13093_vm2, %v891_v11, %v895_v63  ;;  %v10146_v19 = vld [vmem:[%s13047_s27 + $0x178] sm:$0xf]  ;;  %5844 = vmatmul.mubr.bf16.gmra.mxu1 %v11805_v10  ;;  %516 = vst [vmem:[#allocation2 + $0x3f4] sm:$0xf] %v10145_v18 }
  0xba   : > { %v420_v17 = vld [vmem:[%s13047_s27 + $0xac] sm:$0xf]  ;;  %5661 = vmatmul.mubr.bf16.gmra.mxu0 %v11814_v12  ;;  %v906_v20 = vsel %vm13093_vm2, %v901_v13, %v905_v8  ;;  %1013 = vst [vmem:[#allocation2 + $0x3b0] sm:$0xf] %v896_v16  ;;  %517 = vst [vmem:[#allocation2 + $0x418] sm:$0xf] %v10146_v19 }
  0xbb   : > { %452 = vst [vmem:[#allocation2 + $0x414] sm:$0xf] %v420_v17  ;;  %v11830_v21 = vld [vmem:[%s16543_s1 + $0x668] ss:$20 sps:$4 sm:$0xff]   ;;  %v11832_v22 = vld [vmem:[%s16543_s1 + $0x66c] ss:$20 sps:$4 sm:$0xff]   ;;  %6100 = vmatpush2.bf16.msra.mxu1 %v11824_v5 }
  0xbc   : > { %1014 = vst [vmem:[#allocation2 + $0x3d4] sm:$0xf] %v906_v20  ;;  %v562_v23 = vld [vmem:[%s13047_s27 + $0xa8] sm:$0xf]  ;;  %v563_v24 = vld [vmem:[%s13047_s27 + $0xac] sm:$0xf]  ;;  %5912 = vmatprep.subr.bf16.mxu0 %v11832_v22 }
  0xbd   : > { %v564_v25 = vld [vmem:[%s13047_s27 + $0xb0] sm:$0x1]  ;;  %v908_v26 = vshrl.u32 %v562_v23, 16  ;;  %v911_v27 = vshll.u32 %v562_v23, 16  ;;  %v917_v28 = vshll.u32 %v563_v24, 16  ;;  %v921_v29 = vshrl.u32 %v563_v24, 16  ;;  %5913 = vmatpush2.bf16.msra.mxu0 %v11830_v21 }
  0xbe   : > { %v10177_v30 = vld [vmem:[%s13047_s27 + $0x240] sm:$0xf]  ;;  %v927_v31 = vshll.u32 %v564_v25, 16  ;;  %v10178_v32 = vld [vmem:[%s13047_s27 + $0x244] sm:$0xf] }
  0xbf   : > { %1080 = vst [vmem:[#allocation2 + $0x3fc] sm:$0xf] %v10177_v30  ;;  %v910_v33 = vrot.slane %v908_v26, 4  ;;  %v913_v34 = vrot.slane %v911_v27, 5  ;;  %v919_v35 = vrot.slane %v917_v28, 5  ;;  %v923_v36 = vrot.slane %v921_v29, 4 }
  0xc0   : > { %1081 = vst [vmem:[#allocation2 + $0x420] sm:$0xf] %v10178_v32  ;;  %v11836_v37 = vld [vmem:[%s16543_s1 + $0x938] ss:$20 sps:$4 sm:$0xff]   ;;  %v11838_v38 = vld [vmem:[%s16543_s1 + $0x93c] ss:$20 sps:$4 sm:$0xff]  }
  0xc1   : > { %v914_v39 = vor.u32 %v913_v34, %v910_v33  ;;  %v924_v40 = vor.u32 %v923_v36, %v919_v35  ;;  %v11839_v41 = vld [vmem:[%s16543_s1 + $0x910] ss:$20 sps:$4 sm:$0xff]   ;;  %v11841_v42 = vld [vmem:[%s16543_s1 + $0x914] ss:$20 sps:$4 sm:$0xff]   ;;  %v929_v44 = vrot.slane %v927_v31, 5  ;;  %6101 = vmatprep.subr.bf16.mxu1 %v11838_v38 }
  0xc2   : > { %v421_v43 = vld [vmem:[%s13047_s27 + $0xb4] sm:$0xf]  ;;  %6102 = vmatpush2.bf16.msra.mxu1 %v11836_v37  ;;  %v422_v52 = vld [vmem:[%s13047_s27 + $0xb8] sm:$0xf]  ;;  %v10147_v53 = vld [vmem:[%s13047_s27 + $0x180] sm:$0xf] }
  0xc3   : > { %453 = vst [vmem:[#allocation2 + $0x438] sm:$0xf] %v421_v43  ;;  %v11818_v45 = vld [vmem:[#allocation2 + $0x3b4] ss:$36 sps:$4 sm:$0xff]   ;;  %v915_v47 = vrot.slane %v914_v39, 4  ;;  %v925_v50 = vrot.slane %v924_v40, 4  ;;  %6103 = vmatprep.subr.bf16.mxu1 %v11841_v42 }
  0xc4   : > { %v11820_v46 = vld [vmem:[#allocation2 + $0x3b0] ss:$36 sps:$4 sm:$0xff]   ;;  %5853 = vmatprep.mubr.bf16.mxu1 %v11818_v45  ;;  %v10148_v54 = vld [vmem:[%s13047_s27 + $0x184] sm:$0xf]  ;;  %454 = vst [vmem:[#allocation2 + $0x45c] sm:$0xf] %v422_v52 }
  0xc5   : > { %v11827_v48 = vld [vmem:[#allocation2 + $0x3f4] ss:$36 sps:$4 sm:$0xff]   ;;  %v920_v51 = vsel %vm13093_vm2, %v915_v47, %v919_v35  ;;  %5854 = vmatmul.mubr.bf16.gmra.mxu1 %v11820_v46  ;;  %v930_v55 = vsel %vm13093_vm2, %v925_v50, %v929_v44  ;;  %518 = vst [vmem:[#allocation2 + $0x43c] sm:$0xf] %v10147_v53  ;;  %519 = vst [vmem:[#allocation2 + $0x460] sm:$0xf] %v10148_v54 }
  0xc6   : > { %v11829_v49 = vld [vmem:[#allocation2 + $0x3f0] ss:$36 sps:$4 sm:$0xff]   ;;  %5670 = vmatprep.mubr.bf16.mxu0 %v11827_v48  ;;  %1015 = vst [vmem:[#allocation2 + $0x3f8] sm:$0xf] %v920_v51  ;;  %v11847_v57 = vld [vmem:[%s16543_s1 + $0x644] ss:$20 sps:$4 sm:$0xff]   ;;  %6104 = vmatpush2.bf16.msra.mxu1 %v11839_v41 }
  0xc7   : > { %v11845_v56 = vld [vmem:[%s16543_s1 + $0x640] ss:$20 sps:$4 sm:$0xff]   ;;  %5671 = vmatmul.mubr.bf16.gmra.mxu0 %v11829_v49  ;;  %1016 = vst [vmem:[#allocation2 + $0x41c] sm:$0xf] %v930_v55  ;;  %v566_v59 = vld [vmem:[%s13047_s27 + $0xb8] sm:$0xf]  ;;  %5914 = vmatprep.subr.bf16.mxu0 %v11847_v57 }
  0xc8   : > { %v565_v58 = vld [vmem:[%s13047_s27 + $0xb4] sm:$0xf]  ;;  %v567_v60 = vld [vmem:[%s13047_s27 + $0xbc] sm:$0x1]  ;;  %v941_v63 = vshll.u32 %v566_v59, 16  ;;  %v945_v0 = vshrl.u32 %v566_v59, 16  ;;  %5915 = vmatpush2.bf16.msra.mxu0 %v11845_v56 }
  0xc9   : > { %v932_v61 = vshrl.u32 %v565_v58, 16  ;;  %v935_v62 = vshll.u32 %v565_v58, 16  ;;  %v10179_v1 = vld [vmem:[%s13047_s27 + $0x24c] sm:$0xf]  ;;  %v951_v2 = vshll.u32 %v567_v60, 16 }
  0xca   : > { %v10180_v3 = vld [vmem:[%s13047_s27 + $0x250] sm:$0xf]  ;;  %1082 = vst [vmem:[#allocation2 + $0x444] sm:$0xf] %v10179_v1  ;;  %v943_v6 = vrot.slane %v941_v63, 5  ;;  %v947_v7 = vrot.slane %v945_v0, 4 }
  0xcb   : > { %v934_v4 = vrot.slane %v932_v61, 4  ;;  %v937_v5 = vrot.slane %v935_v62, 5  ;;  %1083 = vst [vmem:[#allocation2 + $0x468] sm:$0xf] %v10180_v3  ;;  %v11851_v8 = vld [vmem:[%s16543_s1 + $0x8e8] ss:$20 sps:$4 sm:$0xff]  }
  0xcc   : > { %v11853_v9 = vld [vmem:[%s16543_s1 + $0x8ec] ss:$20 sps:$4 sm:$0xff]   ;;  %v948_v11 = vor.u32 %v947_v7, %v943_v6  ;;  %v11856_v13 = vld [vmem:[%s16543_s1 + $0x8c4] ss:$20 sps:$4 sm:$0xff]   ;;  %v953_v16 = vrot.slane %v951_v2, 5 }
  0xcd   : > { %v938_v10 = vor.u32 %v937_v5, %v934_v4  ;;  %v11854_v12 = vld [vmem:[%s16543_s1 + $0x8c0] ss:$20 sps:$4 sm:$0xff]   ;;  %v10181_v15 = vld [vmem:[%s13047_s27 + $0x264] sm:$0xf]  ;;  %6105 = vmatprep.subr.bf16.mxu1 %v11853_v9  ;;  %v11844_v21 = vld [vmem:[#allocation2 + $0x438] ss:$36 sps:$4 sm:$0xff]  }
  0xce   : > { %1117 = vst [vmem:[#allocation2 + $0x10] sm:$0xf] %v10181_v15  ;;  %v11833_v17 = vld [vmem:[#allocation2 + $0x3fc] ss:$36 sps:$4 sm:$0xff]   ;;  %6106 = vmatpush2.bf16.msra.mxu1 %v11851_v8  ;;  %v949_v22 = vrot.slane %v948_v11, 4 }
  0xcf   : > { %v11835_v18 = vld [vmem:[#allocation2 + $0x3f8] ss:$36 sps:$4 sm:$0xff]   ;;  %v939_v19 = vrot.slane %v938_v10, 4  ;;  %6107 = vmatprep.subr.bf16.mxu1 %v11856_v13  ;;  %5863 = vmatprep.mubr.bf16.mxu1 %v11833_v17  ;;  %v10182_v24 = vld [vmem:[%s13047_s27 + $0x268] sm:$0xf] }
  0xd0   : > { %v11842_v20 = vld [vmem:[#allocation2 + $0x43c] ss:$36 sps:$4 sm:$0xff]   ;;  %v10213_v25 = vld [vmem:[%s13047_s27 + $0x198] sm:$0xf]  ;;  %5864 = vmatmul.mubr.bf16.gmra.mxu1 %v11835_v18  ;;  %v954_v27 = vsel %vm13093_vm2, %v949_v22, %v953_v16  ;;  %1118 = vst [vmem:[#allocation2 + $0x34] sm:$0xf] %v10182_v24 }
  0xd1   : > { %v944_v23 = vsel %vm13093_vm2, %v939_v19, %v943_v6  ;;  %v10214_v26 = vld [vmem:[%s13047_s27 + $0x19c] sm:$0xf]  ;;  %5680 = vmatprep.mubr.bf16.mxu0 %v11842_v20  ;;  %v10215_v28 = vld [vmem:[%s13047_s27 + $0x1a0] sm:$0x1]  ;;  %v1198_v29 = vshrl.u32 %v10213_v25, 16  ;;  %v1201_v30 = vshll.u32 %v10213_v25, 16 }
  0xd2   : > { %1017 = vst [vmem:[#allocation2 + $0x440] sm:$0xf] %v944_v23  ;;  %v1207_v31 = vshll.u32 %v10214_v26, 16  ;;  %5681 = vmatmul.mubr.bf16.gmra.mxu0 %v11844_v21  ;;  %1018 = vst [vmem:[#allocation2 + $0x464] sm:$0xf] %v954_v27  ;;  %v1211_v32 = vshrl.u32 %v10214_v26, 16  ;;  %6108 = vmatpush2.bf16.msra.mxu1 %v11854_v12 }
  0xd3   : > { %v1217_v33 = vshll.u32 %v10215_v28, 16  ;;  %v11862_v34 = vld [vmem:[%s16543_s1 + $0xb1c] ss:$20 sps:$4 sm:$0xff]   ;;  %v1200_v35 = vrot.slane %v1198_v29, 4  ;;  %v1203_v36 = vrot.slane %v1201_v30, 5 }
  0xd4   : > { %v1209_v37 = vrot.slane %v1207_v31, 5  ;;  %v10261_v38 = vld [vmem:[%s13047_s27 + $0xc] sm:$0xf]  ;;  %v1213_v39 = vrot.slane %v1211_v32, 4  ;;  %6270 = vmatprep.subr.bf16.mxu0 %v11862_v34  ;;  %v10262_v41 = vld [vmem:[%s13047_s27 + $0x10] sm:$0xf] }
  0xd5   : > { %v1219_v40 = vrot.slane %v1217_v33, 5  ;;  %1678 = vst [vmem:[#allocation2 + $0x18] sm:$0xf] %v10261_v38  ;;  %v10293_v42 = vld [vmem:[%s13047_s27 + $0xd8] sm:$0xf]  ;;  %v1204_v43 = vor.u32 %v1203_v36, %v1200_v35 }
  0xd6   : > { %1679 = vst [vmem:[#allocation2 + $0x3c] sm:$0xf] %v10262_v41  ;;  %v10294_v44 = vld [vmem:[%s13047_s27 + $0xdc] sm:$0xf]  ;;  %1743 = vst [vmem:[#allocation2 + $0x1c] sm:$0xf] %v10293_v42  ;;  %v1214_v47 = vor.u32 %v1213_v39, %v1209_v37 }
  0xd7   : > { %v10183_v45 = vld [vmem:[%s13047_s27 + $0x270] sm:$0xf]  ;;  %v10184_v46 = vld [vmem:[%s13047_s27 + $0x274] sm:$0xf]  ;;  %1744 = vst [vmem:[#allocation2 + $0x40] sm:$0xf] %v10294_v44 }
  0xd8   : > { %1119 = vst [vmem:[#allocation2 + $0x58] sm:$0xf] %v10183_v45  ;;  %1120 = vst [vmem:[#allocation2 + $0x7c] sm:$0xf] %v10184_v46  ;;  %v10216_v48 = vld [vmem:[%s13047_s27 + $0x1a4] sm:$0xf] }
  0xd9   : > { %v10217_v49 = vld [vmem:[%s13047_s27 + $0x1a8] sm:$0xf]  ;;  %v10218_v50 = vld [vmem:[%s13047_s27 + $0x1ac] sm:$0x1]  ;;  %v1205_v51 = vrot.slane %v1204_v43, 4  ;;  %v1222_v52 = vshrl.u32 %v10216_v48, 16 }
  0xda   : > { %v1225_v53 = vshll.u32 %v10216_v48, 16  ;;  %v1231_v54 = vshll.u32 %v10217_v49, 16  ;;  %v10263_v55 = vld [vmem:[%s13047_s27 + $0x18] sm:$0xf]  ;;  %v1215_v56 = vrot.slane %v1214_v47, 4  ;;  %v1235_v57 = vshrl.u32 %v10217_v49, 16 }
  0xdb   : > { %v1241_v58 = vshll.u32 %v10218_v50, 16  ;;  %v10264_v59 = vld [vmem:[%s13047_s27 + $0x1c] sm:$0xf]  ;;  %1680 = vst [vmem:[#allocation2 + $0x60] sm:$0xf] %v10263_v55  ;;  %v1210_v62 = vsel %vm13093_vm2, %v1205_v51, %v1209_v37  ;;  %v1224_v63 = vrot.slane %v1222_v52, 4 }
  0xdc   : > { %v11848_v60 = vld [vmem:[#allocation2 + $0x444] ss:$36 sps:$4 sm:$0xff]   ;;  %1681 = vst [vmem:[#allocation2 + $0x84] sm:$0xf] %v10264_v59  ;;  %v1220_v0 = vsel %vm13093_vm2, %v1215_v56, %v1219_v40  ;;  %1613 = vst [vmem:[#allocation2 + $0x14] sm:$0xf] %v1210_v62 }
  0xdd   : > { %v11850_v61 = vld [vmem:[#allocation2 + $0x440] ss:$36 sps:$4 sm:$0xff]   ;;  %v1227_v1 = vrot.slane %v1225_v53, 5  ;;  %v1233_v2 = vrot.slane %v1231_v54, 5  ;;  %v1237_v3 = vrot.slane %v1235_v57, 4  ;;  %5873 = vmatprep.mubr.bf16.mxu1 %v11848_v60  ;;  %v1243_v9 = vrot.slane %v1241_v58, 5 }
  0xde   : > { %v10295_v4 = vld [vmem:[%s13047_s27 + $0xe4] sm:$0xf]  ;;  %1614 = vst [vmem:[#allocation2 + $0x38] sm:$0xf] %v1220_v0  ;;  %v10296_v5 = vld [vmem:[%s13047_s27 + $0xe8] sm:$0xf]  ;;  %5874 = vmatmul.mubr.bf16.gmra.mxu1 %v11850_v61 }
  0xdf   : > { %1745 = vst [vmem:[#allocation2 + $0x64] sm:$0xf] %v10295_v4  ;;  %v10185_v6 = vld [vmem:[%s13047_s27 + $0x27c] sm:$0xf]  ;;  %v1228_v7 = vor.u32 %v1227_v1, %v1224_v63  ;;  %v1238_v8 = vor.u32 %v1237_v3, %v1233_v2  ;;  %1746 = vst [vmem:[#allocation2 + $0x88] sm:$0xf] %v10296_v5 }
  0xe0   : > { %v10186_v10 = vld [vmem:[%s13047_s27 + $0x280] sm:$0xf]  ;;  %1121 = vst [vmem:[#allocation2 + $0xa0] sm:$0xf] %v10185_v6  ;;  %v10219_v11 = vld [vmem:[%s13047_s27 + $0x1b0] sm:$0xf] }
  0xe1   : > { %v11865_v12 = vld [vmem:[#allocation2 + $0x1c] ss:$36 sps:$4 sm:$0xff]   ;;  %1122 = vst [vmem:[#allocation2 + $0xc4] sm:$0xf] %v10186_v10  ;;  %v1246_v13 = vshrl.u32 %v10219_v11, 16  ;;  %v1229_v15 = vrot.slane %v1228_v7, 4 }
  0xe2   : > { %v1239_v16 = vrot.slane %v1238_v8, 4  ;;  %v10220_v17 = vld [vmem:[%s13047_s27 + $0x1b4] sm:$0xf]  ;;  %v10221_v18 = vld [vmem:[%s13047_s27 + $0x1b8] sm:$0x1]  ;;  %6109 = vmatprep.mubr.bf16.mxu1 %v11865_v12  ;;  %v1249_v20 = vshll.u32 %v10219_v11, 16 }
  0xe3   : > { %v1248_v19 = vrot.slane %v1246_v13, 4  ;;  %v1255_v21 = vshll.u32 %v10220_v17, 16  ;;  %v1259_v22 = vshrl.u32 %v10220_v17, 16  ;;  %v11860_v23 = vld [vmem:[%s16543_s1 + $0xb18] ss:$20 sps:$4 sm:$0xff]   ;;  %v1234_v25 = vsel %vm13093_vm2, %v1229_v15, %v1233_v2 }
  0xe4   : > { %v11863_v24 = vld [vmem:[#allocation2 + $0x18] ss:$36 sps:$4 sm:$0xff]   ;;  %v1244_v26 = vsel %vm13093_vm2, %v1239_v16, %v1243_v9  ;;  %v1265_v27 = vshll.u32 %v10221_v18, 16  ;;  %v10265_v28 = vld [vmem:[%s13047_s27 + $0x24] sm:$0xf]  ;;  %v1251_v29 = vrot.slane %v1249_v20, 5 }
  0xe5   : > { %1615 = vst [vmem:[#allocation2 + $0x5c] sm:$0xf] %v1234_v25  ;;  %1616 = vst [vmem:[#allocation2 + $0x80] sm:$0xf] %v1244_v26  ;;  %v1257_v30 = vrot.slane %v1255_v21, 5  ;;  %v1261_v31 = vrot.slane %v1259_v22, 4 }
  0xe6   : > { %v11877_v32 = vld [vmem:[%s16543_s1 + $0xaf4] ss:$20 sps:$4 sm:$0xff]   ;;  %1682 = vst [vmem:[#allocation2 + $0xa8] sm:$0xf] %v10265_v28  ;;  %v1252_v37 = vor.u32 %v1251_v29, %v1248_v19  ;;  %v1267_v39 = vrot.slane %v1265_v27, 5  ;;  %6110 = vmatmul.mubr.bf16.vlgmr.msra.gmra.mxu1 %v11863_v24 }
  0xe7   : > { %v10266_v33 = vld [vmem:[%s13047_s27 + $0x28] sm:$0xf]  ;;  %v11857_v34 = vld [vmem:[#allocation2 + $0x10] ss:$36 sps:$4 sm:$0xff]   ;;  %v1262_v38 = vor.u32 %v1261_v31, %v1257_v30  ;;  %v10188_v46 = vld [vmem:[%s13047_s27 + $0x28c] sm:$0xf] }
  0xe8   : > { %v11859_v35 = vld [vmem:[#allocation2 + $0x14] ss:$36 sps:$4 sm:$0xff]   ;;  %1683 = vst [vmem:[#allocation2 + $0xcc] sm:$0xf] %v10266_v33  ;;  %v11869_v36 = vld [vmem:[#allocation2 + $0x64] ss:$36 sps:$4 sm:$0xff]  }
  0xe9   : > { %5916 = vmatprep.mubr.bf16.mxu0 %v11859_v35  ;;  %v11875_v40 = vld [vmem:[%s16543_s1 + $0xaf0] ss:$20 sps:$4 sm:$0xff]   ;;  %v10298_v42 = vld [vmem:[%s13047_s27 + $0xf4] sm:$0xf]  ;;  %6119 = vmatprep.mubr.bf16.mxu1 %v11869_v36  ;;  %v1253_v43 = vrot.slane %v1252_v37, 4  ;;  %v1263_v44 = vrot.slane %v1262_v38, 4 }
  0xea   : > { %v10297_v41 = vld [vmem:[%s13047_s27 + $0xf0] sm:$0xf]  ;;  %5917 = vmatmul.mubr.bf16.vlgmr.msra.gmra.mxu0 %v11857_v34  ;;  %1748 = vst [vmem:[#allocation2 + $0xd0] sm:$0xf] %v10298_v42  ;;  %v10187_v45 = vld [vmem:[%s13047_s27 + $0x288] sm:$0xf] }
  0xeb   : > { %1747 = vst [vmem:[#allocation2 + $0xac] sm:$0xf] %v10297_v41  ;;  %6271 = vmatpush1.bf16.msra.mxu0 %v11860_v23  ;;  %v11871_v47 = vld [vmem:[#allocation2 + $0x60] ss:$36 sps:$4 sm:$0xff]   ;;  %1123 = vst [vmem:[#allocation2 + $0xe8] sm:$0xf] %v10187_v45  ;;  %v1258_v51 = vsel %vm13093_vm2, %v1253_v43, %v1257_v30  ;;  %v1268_v52 = vsel %vm13093_vm2, %v1263_v44, %v1267_v39 }
  0xec   : > { %1124 = vst [vmem:[#allocation2 + $0x10c] sm:$0xf] %v10188_v46  ;;  %v10222_v48 = vld [vmem:[%s13047_s27 + $0x1bc] sm:$0xf]  ;;  %v10223_v49 = vld [vmem:[%s13047_s27 + $0x1c0] sm:$0xf]  ;;  %6272 = vmatprep.subr.bf16.mxu0 %v11877_v32 }
  0xed   : > { %v10224_v50 = vld [vmem:[%s13047_s27 + $0x1c4] sm:$0x1]  ;;  %v1270_v53 = vshrl.u32 %v10222_v48, 16  ;;  %v1273_v54 = vshll.u32 %v10222_v48, 16  ;;  %v10267_v55 = vld [vmem:[%s13047_s27 + $0x30] sm:$0xf] }
  0xee   : > { %v10268_v56 = vld [vmem:[%s13047_s27 + $0x34] sm:$0xf]  ;;  %v11866_v57 = vld [vmem:[#allocation2 + $0x5c] ss:$36 sps:$4 sm:$0xff]   ;;  %1617 = vst [vmem:[#allocation2 + $0xa4] sm:$0xf] %v1258_v51  ;;  %6120 = vmatmul.mubr.bf16.gmra.mxu1 %v11871_v47 }
  0xef   : > { %1618 = vst [vmem:[#allocation2 + $0xc8] sm:$0xf] %v1268_v52  ;;  %v1279_v58 = vshll.u32 %v10223_v49, 16  ;;  %v1283_v59 = vshrl.u32 %v10223_v49, 16  ;;  %1684 = vst [vmem:[#allocation2 + $0xf0] sm:$0xf] %v10267_v55  ;;  %5926 = vmatprep.mubr.bf16.mxu0 %v11866_v57  ;;  %6273 = vmatpush1.bf16.msra.mxu0 %v11875_v40 }
  0xf0   : > { %1685 = vst [vmem:[#allocation2 + $0x114] sm:$0xf] %v10268_v56  ;;  %v11868_v60 = vld [vmem:[#allocation2 + $0x58] ss:$36 sps:$4 sm:$0xff]   ;;  %v1272_v61 = vrot.slane %v1270_v53, 4  ;;  %v1275_v62 = vrot.slane %v1273_v54, 5 }
  0xf1   : > { %v1289_v63 = vshll.u32 %v10224_v50, 16  ;;  %v1281_v0 = vrot.slane %v1279_v58, 5  ;;  %v1285_v1 = vrot.slane %v1283_v59, 4  ;;  %v10299_v2 = vld [vmem:[%s13047_s27 + $0xfc] sm:$0xf]  ;;  %v2865_v58 = vlaneseq }
  0xf2   : > { %v10300_v3 = vld [vmem:[%s13047_s27 + $0x100] sm:$0xf]  ;;  %v1276_v4 = vor.u32 %v1275_v62, %v1272_v61  ;;  %1749 = vst [vmem:[#allocation2 + $0xf4] sm:$0xf] %v10299_v2  ;;  %v10189_v5 = vld [vmem:[%s13047_s27 + $0x294] sm:$0xf]  ;;  %5927 = vmatmul.mubr.bf16.gmra.mxu0 %v11868_v60 }
  0xf3   : > { %1750 = vst [vmem:[#allocation2 + $0x118] sm:$0xf] %v10300_v3  ;;  %v10190_v6 = vld [vmem:[%s13047_s27 + $0x298] sm:$0xf]  ;;  %v11878_v7 = vld [vmem:[#allocation2 + $0xac] ss:$36 sps:$4 sm:$0xff]   ;;  %v1286_v8 = vor.u32 %v1285_v1, %v1281_v0 }
  0xf4   : > { %v1291_v9 = vrot.slane %v1289_v63, 5  ;;  %1125 = vst [vmem:[#allocation2 + $0x130] sm:$0xf] %v10189_v5  ;;  %1126 = vst [vmem:[#allocation2 + $0x154] sm:$0xf] %v10190_v6  ;;  %v1277_v10 = vrot.slane %v1276_v4, 4  ;;  %6129 = vmatprep.mubr.bf16.mxu1 %v11878_v7 }
  0xf5   : > { %v10225_v11 = vld [vmem:[%s13047_s27 + $0x1c8] sm:$0xf]  ;;  %v1287_v13 = vrot.slane %v1286_v8, 4  ;;  %v10226_v15 = vld [vmem:[%s13047_s27 + $0x1cc] sm:$0xf] }
  0xf6   : > { %v11880_v12 = vld [vmem:[#allocation2 + $0xa8] ss:$36 sps:$4 sm:$0xff]   ;;  %v10227_v16 = vld [vmem:[%s13047_s27 + $0x1d0] sm:$0x1]  ;;  %v1294_v17 = vshrl.u32 %v10225_v11, 16  ;;  %v1282_v19 = vsel %vm13093_vm2, %v1277_v10, %v1281_v0  ;;  %v1297_v20 = vshll.u32 %v10225_v11, 16 }
  0xf7   : > { %v11872_v18 = vld [vmem:[#allocation2 + $0xa4] ss:$36 sps:$4 sm:$0xff]   ;;  %v1303_v21 = vshll.u32 %v10226_v15, 16  ;;  %v1292_v23 = vsel %vm13093_vm2, %v1287_v13, %v1291_v9  ;;  %1619 = vst [vmem:[#allocation2 + $0xec] sm:$0xf] %v1282_v19  ;;  %v1307_v25 = vshrl.u32 %v10226_v15, 16  ;;  %6130 = vmatmul.mubr.bf16.gmra.mxu1 %v11880_v12 }
  0xf8   : > { %v11874_v22 = vld [vmem:[#allocation2 + $0xa0] ss:$36 sps:$4 sm:$0xff]   ;;  %v1296_v24 = vrot.slane %v1294_v17, 4  ;;  %v1313_v26 = vshll.u32 %v10227_v16, 16  ;;  %5936 = vmatprep.mubr.bf16.mxu0 %v11872_v18  ;;  %1620 = vst [vmem:[#allocation2 + $0x110] sm:$0xf] %v1292_v23 }
  0xf9   : > { %v1299_v27 = vrot.slane %v1297_v20, 5  ;;  %v1305_v28 = vrot.slane %v1303_v21, 5  ;;  %v11890_v29 = vld [vmem:[%s16543_s1 + $0xac8] ss:$20 sps:$4 sm:$0xff]   ;;  %v11892_v30 = vld [vmem:[%s16543_s1 + $0xacc] ss:$20 sps:$4 sm:$0xff]  }
  0xfa   : > { %v11884_v31 = vld [vmem:[#allocation2 + $0xf4] ss:$36 sps:$4 sm:$0xff]   ;;  %v1309_v32 = vrot.slane %v1307_v25, 4  ;;  %v1315_v34 = vrot.slane %v1313_v26, 5  ;;  %6274 = vmatprep.subr.bf16.mxu0 %v11892_v30  ;;  %v10269_v35 = vld [vmem:[%s13047_s27 + $0x3c] sm:$0xf]  ;;  %5937 = vmatmul.mubr.bf16.gmra.mxu0 %v11874_v22 }
  0xfb   : > { %v1300_v33 = vor.u32 %v1299_v27, %v1296_v24  ;;  %v10270_v36 = vld [vmem:[%s13047_s27 + $0x40] sm:$0xf]  ;;  %1686 = vst [vmem:[#allocation2 + $0x138] sm:$0xf] %v10269_v35  ;;  %v10301_v38 = vld [vmem:[%s13047_s27 + $0x108] sm:$0xf]  ;;  %6275 = vmatpush1.bf16.msra.mxu0 %v11890_v29  ;;  %6139 = vmatprep.mubr.bf16.mxu1 %v11884_v31 }
  0xfc   : > { %v1310_v37 = vor.u32 %v1309_v32, %v1305_v28  ;;  %1687 = vst [vmem:[#allocation2 + $0x15c] sm:$0xf] %v10270_v36  ;;  %v10302_v39 = vld [vmem:[%s13047_s27 + $0x10c] sm:$0xf]  ;;  %v10191_v40 = vld [vmem:[%s13047_s27 + $0x2a0] sm:$0xf] }
  0xfd   : > { %v1301_v41 = vrot.slane %v1300_v33, 4  ;;  %1751 = vst [vmem:[#allocation2 + $0x13c] sm:$0xf] %v10301_v38  ;;  %1752 = vst [vmem:[#allocation2 + $0x160] sm:$0xf] %v10302_v39  ;;  %v13605_v15 = vshrl.u32 %v2865_v58, 7 }
  0xfe   : > { %v10192_v42 = vld [vmem:[%s13047_s27 + $0x2a4] sm:$0xf]  ;;  %1127 = vst [vmem:[#allocation2 + $0x178] sm:$0xf] %v10191_v40  ;;  %v10228_v43 = vld [vmem:[%s13047_s27 + $0x1d4] sm:$0xf] }
  0xff   : > { %v11886_v44 = vld [vmem:[#allocation2 + $0xf0] ss:$36 sps:$4 sm:$0xff]   ;;  %v1311_v45 = vrot.slane %v1310_v37, 4  ;;  %1128 = vst [vmem:[#allocation2 + $0x19c] sm:$0xf] %v10192_v42  ;;  %v1318_v48 = vshrl.u32 %v10228_v43, 16  ;;  %v1306_v49 = vsel %vm13093_vm2, %v1301_v41, %v1305_v28 }
 0x100   : > { %v10229_v46 = vld [vmem:[%s13047_s27 + $0x1d8] sm:$0xf]  ;;  %v10230_v47 = vld [vmem:[%s13047_s27 + $0x1dc] sm:$0x1]  ;;  %v1321_v50 = vshll.u32 %v10228_v43, 16  ;;  %6140 = vmatmul.mubr.bf16.gmra.mxu1 %v11886_v44  ;;  %16576 = vst [vmem:[#allocation4_spill] sm:$0xff] %v13605_v15 }
 0x101   : > { %v1327_v51 = vshll.u32 %v10229_v46, 16  ;;  %v1331_v52 = vshrl.u32 %v10229_v46, 16  ;;  %v10271_v53 = vld [vmem:[%s13047_s27 + $0x48] sm:$0xf]  ;;  %v11881_v54 = vld [vmem:[#allocation2 + $0xec] ss:$36 sps:$4 sm:$0xff]   ;;  %v1316_v56 = vsel %vm13093_vm2, %v1311_v45, %v1315_v34 }
 0x102   : > { %v11883_v55 = vld [vmem:[#allocation2 + $0xe8] ss:$36 sps:$4 sm:$0xff]   ;;  %1621 = vst [vmem:[#allocation2 + $0x134] sm:$0xf] %v1306_v49  ;;  %v1320_v57 = vrot.slane %v1318_v48, 4  ;;  %v1323_v59 = vrot.slane %v1321_v50, 5  ;;  %5946 = vmatprep.mubr.bf16.mxu0 %v11881_v54 }
 0x103   : > { %1688 = vst [vmem:[#allocation2 + $0x180] sm:$0xf] %v10271_v53  ;;  %1622 = vst [vmem:[#allocation2 + $0x158] sm:$0xf] %v1316_v56  ;;  %v1329_v60 = vrot.slane %v1327_v51, 5  ;;  %v1333_v61 = vrot.slane %v1331_v52, 4  ;;  %5947 = vmatmul.mubr.bf16.gmra.mxu0 %v11883_v55 }
 0x104   : > { %v1337_v62 = vshll.u32 %v10230_v47, 16  ;;  %v10272_v63 = vld [vmem:[%s13047_s27 + $0x4c] sm:$0xf]  ;;  %v10303_v0 = vld [vmem:[%s13047_s27 + $0x114] sm:$0xf]  ;;  %v1324_v3 = vor.u32 %v1323_v59, %v1320_v57  ;;  %v13623_v40 = vsub.s32 0, %v13605_v15 }
 0x105   : > { %1689 = vst [vmem:[#allocation2 + $0x1a4] sm:$0xf] %v10272_v63  ;;  %v10304_v1 = vld [vmem:[%s13047_s27 + $0x118] sm:$0xf]  ;;  %v10193_v2 = vld [vmem:[%s13047_s27 + $0x2ac] sm:$0xf]  ;;  %v1334_v4 = vor.u32 %v1333_v61, %v1329_v60 }
 0x106   : > { %v1339_v5 = vrot.slane %v1337_v62, 5  ;;  %1753 = vst [vmem:[#allocation2 + $0x184] sm:$0xf] %v10303_v0  ;;  %1754 = vst [vmem:[#allocation2 + $0x1a8] sm:$0xf] %v10304_v1  ;;  %v1325_v11 = vrot.slane %v1324_v3, 4 }
 0x107   : > { %v10194_v6 = vld [vmem:[%s13047_s27 + $0x2b0] sm:$0xf]  ;;  %1129 = vst [vmem:[#allocation2 + $0x1c0] sm:$0xf] %v10193_v2  ;;  %v10231_v7 = vld [vmem:[%s13047_s27 + $0x1e0] sm:$0xf] }
 0x108   : > { %v11893_v8 = vld [vmem:[#allocation2 + $0x13c] ss:$36 sps:$4 sm:$0xff]   ;;  %1130 = vst [vmem:[#allocation2 + $0x1e4] sm:$0xf] %v10194_v6  ;;  %v1342_v9 = vshrl.u32 %v10231_v7, 16  ;;  %v1345_v10 = vshll.u32 %v10231_v7, 16  ;;  %v1330_v22 = vsel %vm13093_vm2, %v1325_v11, %v1329_v60 }
 0x109   : > { %v1335_v12 = vrot.slane %v1334_v4, 4  ;;  %v10232_v13 = vld [vmem:[%s13047_s27 + $0x1e4] sm:$0xf]  ;;  %6149 = vmatprep.mubr.bf16.mxu1 %v11893_v8  ;;  %v11895_v16 = vld [vmem:[#allocation2 + $0x138] ss:$36 sps:$4 sm:$0xff]   ;;  %16577 = vst [vmem:[#allocation5_spill] sm:$0xff] %v13623_v40 }
 0x10a   : > { %v10233_v17 = vld [vmem:[%s13047_s27 + $0x1e8] sm:$0x1]  ;;  %v1344_v18 = vrot.slane %v1342_v9, 4  ;;  %v1347_v19 = vrot.slane %v1345_v10, 5  ;;  %v1351_v20 = vshll.u32 %v10232_v13, 16  ;;  %v1355_v21 = vshrl.u32 %v10232_v13, 16  ;;  %6150 = vmatmul.mubr.bf16.gmra.mxu1 %v11895_v16 }
 0x10b   : > { %v1340_v23 = vsel %vm13093_vm2, %v1335_v12, %v1339_v5  ;;  %v1361_v24 = vshll.u32 %v10233_v17, 16  ;;  %v11905_v25 = vld [vmem:[%s16543_s1 + $0xaa0] ss:$20 sps:$4 sm:$0xff]   ;;  %v11907_v26 = vld [vmem:[%s16543_s1 + $0xaa4] ss:$20 sps:$4 sm:$0xff]   ;;  %v13636_v58 = vsub.s32 1, %v13605_v15 }
 0x10c   : > { %v11887_v27 = vld [vmem:[#allocation2 + $0x134] ss:$36 sps:$4 sm:$0xff]   ;;  %1623 = vst [vmem:[#allocation2 + $0x17c] sm:$0xf] %v1330_v22  ;;  %1624 = vst [vmem:[#allocation2 + $0x1a0] sm:$0xf] %v1340_v23  ;;  %v1348_v29 = vor.u32 %v1347_v19, %v1344_v18  ;;  %6276 = vmatprep.subr.bf16.mxu0 %v11907_v26 }
 0x10d   : > { %v11889_v28 = vld [vmem:[#allocation2 + $0x130] ss:$36 sps:$4 sm:$0xff]   ;;  %v1353_v30 = vrot.slane %v1351_v20, 5  ;;  %v1357_v31 = vrot.slane %v1355_v21, 4  ;;  %v10274_v33 = vld [vmem:[%s13047_s27 + $0x58] sm:$0xf]  ;;  %5956 = vmatprep.mubr.bf16.mxu0 %v11887_v27  ;;  %6277 = vmatpush1.bf16.msra.mxu0 %v11905_v25 }
 0x10e   : > { %v10273_v32 = vld [vmem:[%s13047_s27 + $0x54] sm:$0xf]  ;;  %v11899_v34 = vld [vmem:[#allocation2 + $0x184] ss:$36 sps:$4 sm:$0xff]   ;;  %v1349_v35 = vrot.slane %v1348_v29, 4  ;;  %v1363_v37 = vrot.slane %v1361_v24, 5  ;;  %5957 = vmatmul.mubr.bf16.gmra.mxu0 %v11889_v28 }
 0x10f   : > { %1690 = vst [vmem:[#allocation2 + $0x1c8] sm:$0xf] %v10273_v32  ;;  %1691 = vst [vmem:[#allocation2 + $0x1ec] sm:$0xf] %v10274_v33  ;;  %v1358_v36 = vor.u32 %v1357_v31, %v1353_v30  ;;  %v10305_v38 = vld [vmem:[%s13047_s27 + $0x120] sm:$0xf]  ;;  %6159 = vmatprep.mubr.bf16.mxu1 %v11899_v34  ;;  %v5532_v34 = vpop.f32.mrf.mxu0 }
 0x110   : > { %v10306_v39 = vld [vmem:[%s13047_s27 + $0x124] sm:$0xf]  ;;  %v1354_v41 = vsel %vm13093_vm2, %v1349_v35, %v1353_v30  ;;  %1755 = vst [vmem:[#allocation2 + $0x1cc] sm:$0xf] %v10305_v38  ;;  %v10195_v42 = vld [vmem:[%s13047_s27 + $0x2b8] sm:$0xf] }
 0x111   : > { %1756 = vst [vmem:[#allocation2 + $0x1f0] sm:$0xf] %v10306_v39  ;;  %v10196_v43 = vld [vmem:[%s13047_s27 + $0x2bc] sm:$0xf]  ;;  %v10234_v44 = vld [vmem:[%s13047_s27 + $0x1ec] sm:$0xf] }
 0x112   : > { %v1359_v45 = vrot.slane %v1358_v36, 4  ;;  %1625 = vst [vmem:[#allocation2 + $0x1c4] sm:$0xf] %v1354_v41  ;;  %1131 = vst [vmem:[#allocation2 + $0x208] sm:$0xf] %v10195_v42  ;;  %v1366_v48 = vshrl.u32 %v10234_v44, 16 }
 0x113   : > { %1132 = vst [vmem:[#allocation2 + $0x22c] sm:$0xf] %v10196_v43  ;;  %v10235_v46 = vld [vmem:[%s13047_s27 + $0x1f0] sm:$0xf]  ;;  %v10236_v47 = vld [vmem:[%s13047_s27 + $0x1f4] sm:$0x1] }
 0x114   : > { %v11901_v49 = vld [vmem:[#allocation2 + $0x180] ss:$36 sps:$4 sm:$0xff]   ;;  %v1369_v50 = vshll.u32 %v10234_v44, 16  ;;  %v1375_v51 = vshll.u32 %v10235_v46, 16  ;;  %v1379_v52 = vshrl.u32 %v10235_v46, 16  ;;  %v1385_v53 = vshll.u32 %v10236_v47, 16  ;;  %v5725_v46 = vpop.f32.mrf.mxu1 }
 0x115   : > { %v10275_v54 = vld [vmem:[%s13047_s27 + $0x60] sm:$0xf]  ;;  %v1364_v56 = vsel %vm13093_vm2, %v1359_v45, %v1363_v37  ;;  %v1368_v57 = vrot.slane %v1366_v48, 4  ;;  %16578 = vst [vmem:[#allocation6_spill] sm:$0xff] %v13636_v58  ;;  %v11898_v59 = vld [vmem:[#allocation2 + $0x178] ss:$36 sps:$4 sm:$0xff]   ;;  %6160 = vmatmul.mubr.bf16.gmra.mxu1 %v11901_v49  ;;  %v5534_v45 = vpop.f32.mrf.mxu0 }
 0x116   : > { %v11896_v55 = vld [vmem:[#allocation2 + $0x17c] ss:$36 sps:$4 sm:$0xff]   ;;  %1692 = vst [vmem:[#allocation2 + $0x210] sm:$0xf] %v10275_v54  ;;  %1626 = vst [vmem:[#allocation2 + $0x1e8] sm:$0xf] %v1364_v56 }
 0x117   : > { %v1371_v60 = vrot.slane %v1369_v50, 5  ;;  %v1377_v61 = vrot.slane %v1375_v51, 5  ;;  %v1381_v62 = vrot.slane %v1379_v52, 4  ;;  %v1387_v63 = vrot.slane %v1385_v53, 5  ;;  %5966 = vmatprep.mubr.bf16.mxu0 %v11896_v55  ;;  %v10276_v0 = vld [vmem:[%s13047_s27 + $0x64] sm:$0xf]  ;;  %v5536_v54 = vpop.f32.mrf.mxu0  ;;  %v5727_v55 = vpop.f32.mrf.mxu1 }
 0x118   : > { %v10307_v1 = vld [vmem:[%s13047_s27 + $0x12c] sm:$0xf]  ;;  %v10308_v2 = vld [vmem:[%s13047_s27 + $0x130] sm:$0xf]  ;;  %1693 = vst [vmem:[#allocation2 + $0x234] sm:$0xf] %v10276_v0  ;;  %5967 = vmatmul.mubr.bf16.gmra.mxu0 %v11898_v59 }
 0x119   : > { %v1372_v3 = vor.u32 %v1371_v60, %v1368_v57  ;;  %v1382_v4 = vor.u32 %v1381_v62, %v1377_v61  ;;  %1757 = vst [vmem:[#allocation2 + $0x214] sm:$0xf] %v10307_v1  ;;  %1758 = vst [vmem:[#allocation2 + $0x238] sm:$0xf] %v10308_v2  ;;  %v10197_v5 = vld [vmem:[%s13047_s27 + $0x2c4] sm:$0xf] }
 0x11a   : > { %v10198_v6 = vld [vmem:[%s13047_s27 + $0x2c8] sm:$0xf]  ;;  %v10237_v7 = vld [vmem:[%s13047_s27 + $0x1f8] sm:$0xf]  ;;  %v11908_v8 = vld [vmem:[#allocation2 + $0x1cc] ss:$36 sps:$4 sm:$0xff]  }
 0x11b   : > { %1133 = vst [vmem:[#allocation2 + $0x250] sm:$0xf] %v10197_v5  ;;  %1134 = vst [vmem:[#allocation2 + $0x274] sm:$0xf] %v10198_v6  ;;  %v1390_v9 = vshrl.u32 %v10237_v7, 16  ;;  %v1393_v10 = vshll.u32 %v10237_v7, 16  ;;  %6169 = vmatprep.mubr.bf16.mxu1 %v11908_v8 }
 0x11c   : > { %v1373_v11 = vrot.slane %v1372_v3, 4  ;;  %v1383_v12 = vrot.slane %v1382_v4, 4  ;;  %v10238_v13 = vld [vmem:[%s13047_s27 + $0x1fc] sm:$0xf]  ;;  %v10239_v16 = vld [vmem:[%s13047_s27 + $0x200] sm:$0x1]  ;;  %v5538_v3 = vpop.f32.mrf.mxu0  ;;  %v5729_v4 = vpop.f32.mrf.mxu1 }
 0x11d   : > { %v1392_v17 = vrot.slane %v1390_v9, 4  ;;  %v1395_v18 = vrot.slane %v1393_v10, 5  ;;  %v11910_v19 = vld [vmem:[#allocation2 + $0x1c8] ss:$36 sps:$4 sm:$0xff]   ;;  %v1399_v22 = vshll.u32 %v10238_v13, 16  ;;  %v1403_v23 = vshrl.u32 %v10238_v13, 16 }
 0x11e   : > { %v1378_v20 = vsel %vm13093_vm2, %v1373_v11, %v1377_v61  ;;  %v1388_v21 = vsel %vm13093_vm2, %v1383_v12, %v1387_v63  ;;  %v2863_v24 = vld [vmem:[%s16544_s2] sm:$0x1f]  ;;  %v11920_v25 = vld [vmem:[%s16543_s1 + $0xa78] ss:$20 sps:$4 sm:$0xff]   ;;  %v1409_v29 = vshll.u32 %v10239_v16, 16  ;;  %6170 = vmatmul.mubr.bf16.gmra.mxu1 %v11910_v19  ;;  %v5731_v19 = vpop.f32.mrf.mxu1 }
 0x11f   : > { %v11902_v26 = vld [vmem:[#allocation2 + $0x1c4] ss:$36 sps:$4 sm:$0xff]   ;;  %1627 = vst [vmem:[#allocation2 + $0x20c] sm:$0xf] %v1378_v20  ;;  %1628 = vst [vmem:[#allocation2 + $0x230] sm:$0xf] %v1388_v21  ;;  %v1396_v28 = vor.u32 %v1395_v18, %v1392_v17  ;;  %v13657_v30 = vrot.slane %v2863_v24, %v13623_v40  ;;  %v13660_v31 = vrot.slane %v2863_v24, %v13636_v58  ;;  %v5542_v18 = vpop.f32.mrf.mxu0 }
 0x120   : > { %v11904_v27 = vld [vmem:[#allocation2 + $0x1c0] ss:$36 sps:$4 sm:$0xff]   ;;  %v1401_v32 = vrot.slane %v1399_v22, 5  ;;  %v1405_v33 = vrot.slane %v1403_v23, 4  ;;  %v11922_v35 = vld [vmem:[%s16543_s1 + $0xa7c] ss:$20 sps:$4 sm:$0xff]   ;;  %5976 = vmatprep.mubr.bf16.mxu0 %v11902_v26 }
 0x121   : > { %v11923_v36 = vld [vmem:[%s16543_s1 + $0x120] ss:$20 sps:$4 sm:$0xff]   ;;  %v1397_v38 = vrot.slane %v1396_v28, 4  ;;  %v5533_v39 = vadd.f32 %v5532_v34, %v13657_v30  ;;  %v1411_v42 = vrot.slane %v1409_v29, 5  ;;  %6278 = vmatprep.subr.bf16.mxu0 %v11922_v35  ;;  %v11925_v43 = vld [vmem:[%s16543_s1 + $0x124] ss:$20 sps:$4 sm:$0xff]   ;;  %v5535_v51 = vadd.f32 %v5534_v45, %v13660_v31  ;;  %5977 = vmatmul.mubr.bf16.gmra.mxu0 %v11904_v27 }
 0x122   : > { %v11914_v37 = vld [vmem:[#allocation2 + $0x214] ss:$36 sps:$4 sm:$0xff]   ;;  %v1406_v41 = vor.u32 %v1405_v33, %v1401_v32  ;;  %v10277_v44 = vld [vmem:[%s13047_s27 + $0x6c] sm:$0xf]  ;;  %v10278_v48 = vld [vmem:[%s13047_s27 + $0x70] sm:$0xf]  ;;  %6279 = vmatpush1.bf16.msra.mxu0 %v11920_v25  ;;  %6463 = vmatprep.subr.bf16.mxu1 %v11925_v43  ;;  %v5537_v59 = vadd.f32 %v5536_v54, %v13657_v30  ;;  %v5539_v8 = vadd.f32 %v5538_v3, %v13660_v31  ;;  %v5735_v33 = vpop.f32.mrf.mxu1 }
 0x123   : > { %v1402_v47 = vsel %vm13093_vm2, %v1397_v38, %v1401_v32  ;;  %1694 = vst [vmem:[#allocation2 + $0x258] sm:$0xf] %v10277_v44  ;;  %v10309_v49 = vld [vmem:[%s13047_s27 + $0x138] sm:$0xf]  ;;  %v10310_v50 = vld [vmem:[%s13047_s27 + $0x13c] sm:$0xf]  ;;  %v13679_v52 = vadd.f32 %v5725_v46, %v5533_v39  ;;  %6179 = vmatprep.mubr.bf16.mxu1 %v11914_v37  ;;  %v13688_v60 = vadd.f32 %v5727_v55, %v5535_v51  ;;  %v5544_v32 = vpop.f32.mrf.mxu0 }
 0x124   : > { %v1407_v53 = vrot.slane %v1406_v41, 4  ;;  %1629 = vst [vmem:[#allocation2 + $0x254] sm:$0xf] %v1402_v47  ;;  %1695 = vst [vmem:[#allocation2 + $0x27c] sm:$0xf] %v10278_v48  ;;  %6464 = vmatpush1.bf16.msra.mxu1 %v11923_v36  ;;  %v13696_v9 = vadd.f32 %v5729_v4, %v5537_v59  ;;  %v5543_v22 = vadd.f32 %v5542_v18, %v13657_v30 }
 0x125   : > { %1759 = vst [vmem:[#allocation2 + $0x25c] sm:$0xf] %v10309_v49  ;;  %1760 = vst [vmem:[#allocation2 + $0x280] sm:$0xf] %v10310_v50  ;;  %v11929_v56 = vld [vmem:[%s16543_s1 + $0xf8] ss:$20 sps:$4 sm:$0xff]   ;;  %v13702_v23 = vadd.f32 %v5731_v19, %v5539_v8  ;;  %v5545_v34 = vadd.f32 %v5544_v32, %v13660_v31  ;;  %v5546_v41 = vpop.f32.mrf.mxu0 }
 0x126   : > { %v11931_v57 = vld [vmem:[%s16543_s1 + $0xfc] ss:$20 sps:$4 sm:$0xff]   ;;  %v10200_v62 = vld [vmem:[%s13047_s27 + $0x2d4] sm:$0xf]  ;;  %v10240_v63 = vld [vmem:[%s13047_s27 + $0x204] sm:$0xf]  ;;  %v1412_v2 = vsel %vm13093_vm2, %v1407_v53, %v1411_v42  ;;  %v13708_v35 = vadd.f32 %v5735_v33, %v5543_v22  ;;  %v5737_v42 = vpop.f32.mrf.mxu1  ;;  %v5547_v45 = vadd.f32 %v5546_v41, %v13657_v30 }
 0x127   : > { %v10199_v61 = vld [vmem:[%s13047_s27 + $0x2d0] sm:$0xf]  ;;  %1136 = vst [vmem:[#allocation2 + $0x2bc] sm:$0xf] %v10200_v62  ;;  %v1414_v5 = vshrl.u32 %v10240_v63, 16  ;;  %v1417_v6 = vshll.u32 %v10240_v63, 16  ;;  %6465 = vmatprep.subr.bf16.mxu1 %v11931_v57  ;;  %v13717_v46 = vadd.f32 %v5737_v42, %v5545_v34  ;;  %v5548_v51 = vpop.f32.mrf.mxu0 }
 0x128   : > { %v11911_v0 = vld [vmem:[#allocation2 + $0x20c] ss:$36 sps:$4 sm:$0xff]   ;;  %1135 = vst [vmem:[#allocation2 + $0x298] sm:$0xf] %v10199_v61  ;;  %1630 = vst [vmem:[#allocation2 + $0x278] sm:$0xf] %v1412_v2  ;;  %6466 = vmatpush1.bf16.msra.mxu1 %v11929_v56  ;;  %v5739_v53 = vpop.f32.mrf.mxu1  ;;  %v5549_v55 = vadd.f32 %v5548_v51, %v13660_v31 }
 0x129   : > { %v11916_v1 = vld [vmem:[#allocation2 + $0x210] ss:$36 sps:$4 sm:$0xff]   ;;  %v11913_v7 = vld [vmem:[#allocation2 + $0x208] ss:$36 sps:$4 sm:$0xff]   ;;  %5986 = vmatprep.mubr.bf16.mxu0 %v11911_v0  ;;  %v1416_v12 = vrot.slane %v1414_v5, 4  ;;  %v1419_v13 = vrot.slane %v1417_v6, 5  ;;  %v13722_v56 = vadd.f32 %v5739_v53, %v5547_v45  ;;  %v5552_v2 = vpop.f32.mrf.mxu0 }
 0x12a   : > { %v10241_v10 = vld [vmem:[%s13047_s27 + $0x208] sm:$0xf]  ;;  %v10242_v11 = vld [vmem:[%s13047_s27 + $0x20c] sm:$0x1]  ;;  %v10279_v20 = vld [vmem:[%s13047_s27 + $0x78] sm:$0xf]  ;;  %6180 = vmatmul.mubr.bf16.gmra.mxu1 %v11916_v1  ;;  %5987 = vmatmul.mubr.bf16.gmra.mxu0 %v11913_v7  ;;  %v5741_v3 = vpop.f32.mrf.mxu1 }
 0x12b   : > { %v1423_v16 = vshll.u32 %v10241_v10, 16  ;;  %v1427_v17 = vshrl.u32 %v10241_v10, 16  ;;  %v1433_v21 = vshll.u32 %v10242_v11, 16  ;;  %v10280_v24 = vld [vmem:[%s13047_s27 + $0x7c] sm:$0xf]  ;;  %v1420_v26 = vor.u32 %v1419_v13, %v1416_v12 }
 0x12c   : > { %1696 = vst [vmem:[#allocation2 + $0x2a0] sm:$0xf] %v10279_v20  ;;  %v10311_v25 = vld [vmem:[%s13047_s27 + $0x144] sm:$0xf]  ;;  %1697 = vst [vmem:[#allocation2 + $0x2c4] sm:$0xf] %v10280_v24  ;;  %v5553_v12 = vadd.f32 %v5552_v2, %v13657_v30  ;;  %v13738_v13 = vadd.f32 %v5741_v3, %v5549_v55 }
 0x12d   : > { %v1425_v27 = vrot.slane %v1423_v16, 5  ;;  %v1429_v28 = vrot.slane %v1427_v17, 4  ;;  %v10312_v29 = vld [vmem:[%s13047_s27 + $0x148] sm:$0xf]  ;;  %1761 = vst [vmem:[#allocation2 + $0x2a4] sm:$0xf] %v10311_v25  ;;  %v5554_v16 = vpop.f32.mrf.mxu0  ;;  %v5745_v17 = vpop.f32.mrf.mxu1 }
 0x12e   : > { %1762 = vst [vmem:[#allocation2 + $0x2c8] sm:$0xf] %v10312_v29  ;;  %v11926_v36 = vld [vmem:[#allocation2 + $0x25c] ss:$36 sps:$4 sm:$0xff]   ;;  %v1421_v37 = vrot.slane %v1420_v26, 4  ;;  %v1435_v39 = vrot.slane %v1433_v21, 5  ;;  %v5555_v26 = vadd.f32 %v5554_v16, %v13660_v31 }
 0x12f   : > { %v1430_v38 = vor.u32 %v1429_v28, %v1425_v27  ;;  %v11938_v43 = vld [vmem:[%s16543_s1 + $0xd0] ss:$20 sps:$4 sm:$0xff]   ;;  %v11940_v44 = vld [vmem:[%s16543_s1 + $0xd4] ss:$20 sps:$4 sm:$0xff]   ;;  %6189 = vmatprep.mubr.bf16.mxu1 %v11926_v36  ;;  %v11928_v48 = vld [vmem:[#allocation2 + $0x258] ss:$36 sps:$4 sm:$0xff]   ;;  %v5556_v28 = vpop.f32.mrf.mxu0  ;;  %v5747_v29 = vpop.f32.mrf.mxu1 }
 0x130   : > { %v11917_v47 = vld [vmem:[#allocation2 + $0x254] ss:$36 sps:$4 sm:$0xff]   ;;  %v1426_v49 = vsel %vm13093_vm2, %v1421_v37, %v1425_v27  ;;  %6467 = vmatprep.subr.bf16.mxu1 %v11940_v44  ;;  %v11943_v57 = vld [vmem:[%s16543_s1 + $0xac] ss:$20 sps:$4 sm:$0xff]   ;;  %v10201_v59 = vld [vmem:[%s13047_s27 + $0x2dc] sm:$0xf]  ;;  %v13747_v27 = vadd.f32 %v5745_v17, %v5553_v12 }
 0x131   : > { %v1431_v50 = vrot.slane %v1430_v38, 4  ;;  %v11919_v54 = vld [vmem:[#allocation2 + $0x250] ss:$36 sps:$4 sm:$0xff]   ;;  %1631 = vst [vmem:[#allocation2 + $0x29c] sm:$0xf] %v1426_v49  ;;  %5996 = vmatprep.mubr.bf16.mxu0 %v11917_v47  ;;  %6468 = vmatpush1.bf16.msra.mxu1 %v11938_v43  ;;  %v5557_v38 = vadd.f32 %v5556_v28, %v13657_v30  ;;  %v13757_v43 = vadd.f32 %v5747_v29, %v5555_v26  ;;  %v5558_v44 = vpop.f32.mrf.mxu0  ;;  %v5749_v45 = vpop.f32.mrf.mxu1 }
 0x132   : > { %v10202_v61 = vld [vmem:[%s13047_s27 + $0x2e0] sm:$0xf]  ;;  %1137 = vst [vmem:[#allocation2 + $0x2e0] sm:$0xf] %v10201_v59  ;;  %v10243_v63 = vld [vmem:[%s13047_s27 + $0x210] sm:$0xf]  ;;  %6469 = vmatprep.subr.bf16.mxu1 %v11943_v57  ;;  %6190 = vmatmul.mubr.bf16.gmra.mxu1 %v11928_v48 }
 0x133   : > { %v1436_v62 = vsel %vm13093_vm2, %v1431_v50, %v1435_v39  ;;  %1138 = vst [vmem:[#allocation2 + $0x304] sm:$0xf] %v10202_v61  ;;  %v10244_v0 = vld [vmem:[%s13047_s27 + $0x214] sm:$0xf]  ;;  %v10245_v1 = vld [vmem:[%s13047_s27 + $0x218] sm:$0x1]  ;;  %5997 = vmatmul.mubr.bf16.gmra.mxu0 %v11919_v54  ;;  %v5559_v50 = vadd.f32 %v5558_v44, %v13660_v31  ;;  %v13763_v51 = vadd.f32 %v5749_v45, %v5557_v38  ;;  %v5562_v55 = vpop.f32.mrf.mxu0  ;;  %v5751_v57 = vpop.f32.mrf.mxu1 }
 0x134   : > { %1632 = vst [vmem:[#allocation2 + $0x2c0] sm:$0xf] %v1436_v62  ;;  %v1438_v4 = vshrl.u32 %v10243_v63, 16  ;;  %v1441_v5 = vshll.u32 %v10243_v63, 16  ;;  %v1447_v6 = vshll.u32 %v10244_v0, 16  ;;  %v1451_v7 = vshrl.u32 %v10244_v0, 16 }
 0x135   : > { %v11935_v8 = vld [vmem:[#allocation2 + $0x2a4] ss:$36 sps:$4 sm:$0xff]   ;;  %v1457_v11 = vshll.u32 %v10245_v1, 16  ;;  %v10313_v37 = vld [vmem:[%s13047_s27 + $0x150] sm:$0xf]  ;;  %v5563_v1 = vadd.f32 %v5562_v55, %v13657_v30  ;;  %v13777_v2 = vadd.f32 %v5751_v57, %v5559_v50 }
 0x136   : > { %v11941_v10 = vld [vmem:[%s16543_s1 + $0xa8] ss:$20 sps:$4 sm:$0xff]   ;;  %v1440_v18 = vrot.slane %v1438_v4, 4  ;;  %v1443_v19 = vrot.slane %v1441_v5, 5  ;;  %v1449_v20 = vrot.slane %v1447_v6, 5  ;;  %v1453_v21 = vrot.slane %v1451_v7, 4  ;;  %6199 = vmatprep.mubr.bf16.mxu1 %v11935_v8  ;;  %v5564_v6 = vpop.f32.mrf.mxu0  ;;  %v5755_v7 = vpop.f32.mrf.mxu1 }
 0x137   : > { %v1459_v22 = vrot.slane %v1457_v11, 5  ;;  %v11947_v24 = vld [vmem:[%s16543_s1 + $0xa50] ss:$20 sps:$4 sm:$0xff]   ;;  %v11949_v25 = vld [vmem:[%s16543_s1 + $0xa54] ss:$20 sps:$4 sm:$0xff]   ;;  %6470 = vmatpush1.bf16.msra.mxu1 %v11941_v10 }
 0x138   : > { %v1444_v32 = vor.u32 %v1443_v19, %v1440_v18  ;;  %v1454_v33 = vor.u32 %v1453_v21, %v1449_v20  ;;  %v10281_v34 = vld [vmem:[%s13047_s27 + $0x84] sm:$0xf]  ;;  %v10282_v36 = vld [vmem:[%s13047_s27 + $0x88] sm:$0xf]  ;;  %6280 = vmatprep.subr.bf16.mxu0 %v11949_v25  ;;  %v10314_v41 = vld [vmem:[%s13047_s27 + $0x154] sm:$0xf]  ;;  %v13786_v21 = vadd.f32 %v5755_v7, %v5563_v1 }
 0x139   : > { %v11937_v39 = vld [vmem:[#allocation2 + $0x2a0] ss:$36 sps:$4 sm:$0xff]   ;;  %1698 = vst [vmem:[#allocation2 + $0x2e8] sm:$0xf] %v10281_v34  ;;  %1699 = vst [vmem:[#allocation2 + $0x30c] sm:$0xf] %v10282_v36  ;;  %6281 = vmatpush1.bf16.msra.mxu0 %v11947_v24  ;;  %v5757_v24 = vpop.f32.mrf.mxu1 }
 0x13a   : > { %1763 = vst [vmem:[#allocation2 + $0x2ec] sm:$0xf] %v10313_v37  ;;  %v11953_v42 = vld [vmem:[%s16543_s1 + $0x80] ss:$20 sps:$4 sm:$0xff]   ;;  %v1445_v47 = vrot.slane %v1444_v32, 4  ;;  %v1455_v48 = vrot.slane %v1454_v33, 4  ;;  %6200 = vmatmul.mubr.bf16.gmra.mxu1 %v11937_v39 }
 0x13b   : > { %1764 = vst [vmem:[#allocation2 + $0x310] sm:$0xf] %v10314_v41  ;;  %v11955_v49 = vld [vmem:[%s16543_s1 + $0x84] ss:$20 sps:$4 sm:$0xff]   ;;  %v11932_v53 = vld [vmem:[#allocation2 + $0x29c] ss:$36 sps:$4 sm:$0xff]   ;;  %v5759_v39 = vpop.f32.mrf.mxu1 }
 0x13c   : > { %v11934_v54 = vld [vmem:[#allocation2 + $0x298] ss:$36 sps:$4 sm:$0xff]   ;;  %v1450_v59 = vsel %vm13093_vm2, %v1445_v47, %v1449_v20  ;;  %v1460_v61 = vsel %vm13093_vm2, %v1455_v48, %v1459_v22  ;;  %6471 = vmatprep.subr.bf16.mxu1 %v11955_v49  ;;  %v10203_v0 = vld [vmem:[%s13047_s27 + $0x2e8] sm:$0xf]  ;;  %6006 = vmatprep.mubr.bf16.mxu0 %v11932_v53  ;;  %v10204_v3 = vld [vmem:[%s13047_s27 + $0x2ec] sm:$0xf]  ;;  %v5565_v20 = vadd.f32 %v5564_v6, %v13660_v31  ;;  %v5566_v22 = vpop.f32.mrf.mxu0 }
 0x13d   : > { %v11956_v62 = vld [vmem:[%s16543_s1 + $0x58] ss:$20 sps:$4 sm:$0xff]   ;;  %v11958_v63 = vld [vmem:[%s16543_s1 + $0x5c] ss:$20 sps:$4 sm:$0xff]   ;;  %1633 = vst [vmem:[#allocation2 + $0x2e4] sm:$0xf] %v1450_v59  ;;  %6472 = vmatpush1.bf16.msra.mxu1 %v11953_v42  ;;  %6007 = vmatmul.mubr.bf16.gmra.mxu0 %v11934_v54  ;;  %v5567_v36 = vadd.f32 %v5566_v22, %v13657_v30  ;;  %v5761_v54 = vpop.f32.mrf.mxu1 }
 0x13e   : > { %1634 = vst [vmem:[#allocation2 + $0x308] sm:$0xf] %v1460_v61  ;;  %1139 = vst [vmem:[#allocation2 + $0x328] sm:$0xf] %v10203_v0  ;;  %v10246_v4 = vld [vmem:[%s13047_s27 + $0x21c] sm:$0xf]  ;;  %6473 = vmatprep.subr.bf16.mxu1 %v11958_v63  ;;  %v13789_v37 = vadd.f32 %v5757_v24, %v5565_v20  ;;  %v5568_v38 = vpop.f32.mrf.mxu0 }
 0x13f   : > { %v10247_v5 = vld [vmem:[%s13047_s27 + $0x220] sm:$0xf]  ;;  %1140 = vst [vmem:[#allocation2 + $0x34c] sm:$0xf] %v10204_v3  ;;  %v10248_v8 = vld [vmem:[%s13047_s27 + $0x224] sm:$0x1]  ;;  %v5569_v48 = vadd.f32 %v5568_v38, %v13660_v31  ;;  %v13800_v50 = vadd.f32 %v5759_v39, %v5567_v36 }
 0x140   : > { %v1462_v10 = vshrl.u32 %v10246_v4, 16  ;;  %v1465_v11 = vshll.u32 %v10246_v4, 16  ;;  %v1471_v12 = vshll.u32 %v10247_v5, 16  ;;  %v1475_v16 = vshrl.u32 %v10247_v5, 16  ;;  %v10283_v18 = vld [vmem:[%s13047_s27 + $0x90] sm:$0xf]  ;;  %v5572_v53 = vpop.f32.mrf.mxu0  ;;  %v5765_v4 = vpop.f32.mrf.mxu1 }
 0x141   : > { %v1481_v17 = vshll.u32 %v10248_v8, 16  ;;  %v10284_v19 = vld [vmem:[%s13047_s27 + $0x94] sm:$0xf]  ;;  %1700 = vst [vmem:[#allocation2 + $0x330] sm:$0xf] %v10283_v18  ;;  %6474 = vmatpush1.bf16.msra.mxu1 %v11956_v62  ;;  %v5573_v61 = vadd.f32 %v5572_v53, %v13657_v30  ;;  %v13803_v62 = vadd.f32 %v5761_v54, %v5569_v48 }
 0x142   : > { %v1464_v25 = vrot.slane %v1462_v10, 4  ;;  %v1467_v26 = vrot.slane %v1465_v11, 5  ;;  %v1473_v28 = vrot.slane %v1471_v12, 5  ;;  %v1477_v29 = vrot.slane %v1475_v16, 4  ;;  %1701 = vst [vmem:[#allocation2 + $0x354] sm:$0xf] %v10284_v19  ;;  %v5574_v3 = vpop.f32.mrf.mxu0  ;;  %v5767_v22 = vpop.f32.mrf.mxu1 }
 0x143   : > { %v11950_v32 = vld [vmem:[#allocation2 + $0x2ec] ss:$36 sps:$4 sm:$0xff]   ;;  %v1483_v34 = vrot.slane %v1481_v17, 5  ;;  %v10315_v44 = vld [vmem:[%s13047_s27 + $0x15c] sm:$0xf]  ;;  %v5575_v11 = vadd.f32 %v5574_v3, %v13660_v31  ;;  %v13821_v19 = vadd.f32 %v5765_v4, %v5573_v61 }
 0x144   : > { %v11952_v33 = vld [vmem:[#allocation2 + $0x2e8] ss:$36 sps:$4 sm:$0xff]   ;;  %v1468_v41 = vor.u32 %v1467_v26, %v1464_v25  ;;  %v1478_v42 = vor.u32 %v1477_v29, %v1473_v28  ;;  %v10316_v45 = vld [vmem:[%s13047_s27 + $0x160] sm:$0xf]  ;;  %v11965_v47 = vld [vmem:[%s16543_s1 + $0x30] ss:$20 sps:$4 sm:$0xff]   ;;  %6209 = vmatprep.mubr.bf16.mxu1 %v11950_v32  ;;  %v5576_v20 = vpop.f32.mrf.mxu0  ;;  %v5769_v39 = vpop.f32.mrf.mxu1 }
 0x145   : > { %1765 = vst [vmem:[#allocation2 + $0x334] sm:$0xf] %v10315_v44  ;;  %1766 = vst [vmem:[#allocation2 + $0x358] sm:$0xf] %v10316_v45  ;;  %v11967_v49 = vld [vmem:[%s16543_s1 + $0x34] ss:$20 sps:$4 sm:$0xff]   ;;  %6210 = vmatmul.mubr.bf16.gmra.mxu1 %v11952_v33  ;;  %v13830_v36 = vadd.f32 %v5767_v22, %v5575_v11 }
 0x146   : > { %v11944_v55 = vld [vmem:[#allocation2 + $0x2e4] ss:$36 sps:$4 sm:$0xff]   ;;  %v1469_v57 = vrot.slane %v1468_v41, 4  ;;  %v1479_v59 = vrot.slane %v1478_v42, 4  ;;  %6475 = vmatprep.subr.bf16.mxu1 %v11967_v49  ;;  %v11970_v1 = vld [vmem:[%s16543_s1 + $0xc] ss:$20 sps:$4 sm:$0xff]   ;;  %v5578_v38 = vpop.f32.mrf.mxu0 }
 0x147   : > { %v11946_v63 = vld [vmem:[#allocation2 + $0x2e0] ss:$36 sps:$4 sm:$0xff]   ;;  %v11968_v0 = vld [vmem:[%s16543_s1 + $0x8] ss:$20 sps:$4 sm:$0xff]   ;;  %6016 = vmatprep.mubr.bf16.mxu0 %v11944_v55  ;;  %6476 = vmatpush1.bf16.msra.mxu1 %v11965_v47  ;;  %v10205_v7 = vld [vmem:[%s13047_s27 + $0x2f4] sm:$0xf]  ;;  %v5579_v45 = vadd.f32 %v5578_v38, %v13660_v31 }
 0x148   : > { %v1474_v5 = vsel %vm13093_vm2, %v1469_v57, %v1473_v28  ;;  %v1484_v6 = vsel %vm13093_vm2, %v1479_v59, %v1483_v34  ;;  %v10206_v8 = vld [vmem:[%s13047_s27 + $0x2f8] sm:$0xf]  ;;  %v10249_v10 = vld [vmem:[%s13047_s27 + $0x228] sm:$0xf]  ;;  %6477 = vmatprep.subr.bf16.mxu1 %v11970_v1  ;;  %1141 = vst [vmem:[#allocation2 + $0x370] sm:$0xf] %v10205_v7  ;;  %6017 = vmatmul.mubr.bf16.gmra.mxu0 %v11946_v63  ;;  %v5582_v55 = vpop.f32.mrf.mxu0  ;;  %v5771_v57 = vpop.f32.mrf.mxu1 }
 0x149   : > { %1635 = vst [vmem:[#allocation2 + $0x32c] sm:$0xf] %v1474_v5  ;;  %1636 = vst [vmem:[#allocation2 + $0x350] sm:$0xf] %v1484_v6  ;;  %v10250_v12 = vld [vmem:[%s13047_s27 + $0x22c] sm:$0xf]  ;;  %v5577_v28 = vadd.f32 %v5576_v20, %v13657_v30  ;;  %v13840_v3 = vadd.f32 %v5771_v57, %v5579_v45 }
 0x14a   : > { %1142 = vst [vmem:[#allocation2 + $0x394] sm:$0xf] %v10206_v8  ;;  %v10251_v16 = vld [vmem:[%s13047_s27 + $0x230] sm:$0x1]  ;;  %v1486_v17 = vshrl.u32 %v10249_v10, 16  ;;  %v1489_v18 = vshll.u32 %v10249_v10, 16  ;;  %v5584_v7 = vpop.f32.mrf.mxu0  ;;  %v5775_v8 = vpop.f32.mrf.mxu1 }
 0x14b   : > { %v1495_v24 = vshll.u32 %v10250_v12, 16  ;;  %v1499_v25 = vshrl.u32 %v10250_v12, 16  ;;  %v1505_v26 = vshll.u32 %v10251_v16, 16  ;;  %v11974_v33 = vld [vmem:[%s16543_s1 + $0xa28] ss:$20 sps:$4 sm:$0xff]   ;;  %6478 = vmatpush1.bf16.msra.mxu1 %v11968_v0  ;;  %v13833_v47 = vadd.f32 %v5769_v39, %v5577_v28 }
 0x14c   : > { %v1488_v29 = vrot.slane %v1486_v17, 4  ;;  %v1491_v32 = vrot.slane %v1489_v18, 5  ;;  %v11976_v34 = vld [vmem:[%s16543_s1 + $0xa2c] ss:$20 sps:$4 sm:$0xff]   ;;  %v11962_v41 = vld [vmem:[#allocation2 + $0x334] ss:$36 sps:$4 sm:$0xff]   ;;  %v5583_v0 = vadd.f32 %v5582_v55, %v13657_v30  ;;  %v5585_v12 = vadd.f32 %v5584_v7, %v13660_v31  ;;  %v5586_v22 = vpop.f32.mrf.mxu0 }
 0x14d   : > { %v1497_v42 = vrot.slane %v1495_v24, 5  ;;  %v1501_v44 = vrot.slane %v1499_v25, 4  ;;  %v11964_v48 = vld [vmem:[#allocation2 + $0x330] ss:$36 sps:$4 sm:$0xff]   ;;  %v1507_v53 = vrot.slane %v1505_v26, 5  ;;  %6282 = vmatprep.subr.bf16.mxu0 %v11976_v34  ;;  %6219 = vmatprep.mubr.bf16.mxu1 %v11962_v41  ;;  %v5777_v24 = vpop.f32.mrf.mxu1 }
 0x14e   : > { %v1492_v49 = vor.u32 %v1491_v32, %v1488_v29  ;;  %v10285_v54 = vld [vmem:[%s13047_s27 + $0x9c] sm:$0xf]  ;;  %v10286_v61 = vld [vmem:[%s13047_s27 + $0xa0] sm:$0xf]  ;;  %v10317_v63 = vld [vmem:[%s13047_s27 + $0x168] sm:$0xf]  ;;  %6283 = vmatpush1.bf16.msra.mxu0 %v11974_v33  ;;  %v13849_v16 = vadd.f32 %v5775_v8, %v5583_v0  ;;  %6220 = vmatmul.mubr.bf16.gmra.mxu1 %v11964_v48  ;;  %v5587_v32 = vadd.f32 %v5586_v22, %v13657_v30  ;;  %v5588_v41 = vpop.f32.mrf.mxu0 }
 0x14f   : > { %v1502_v59 = vor.u32 %v1501_v44, %v1497_v42  ;;  %1702 = vst [vmem:[#allocation2 + $0x378] sm:$0xf] %v10285_v54  ;;  %v10318_v1 = vld [vmem:[%s13047_s27 + $0x16c] sm:$0xf]  ;;  %1703 = vst [vmem:[#allocation2 + $0x39c] sm:$0xf] %v10286_v61  ;;  %v13864_v33 = vadd.f32 %v5777_v24, %v5585_v12 }
 0x150   : > { %v1493_v4 = vrot.slane %v1492_v49, 4  ;;  %1767 = vst [vmem:[#allocation2 + $0x37c] sm:$0xf] %v10317_v63  ;;  %1768 = vst [vmem:[#allocation2 + $0x3a0] sm:$0xf] %v10318_v1  ;;  %v5592_v63 = vpop.f32.mrf.mxu0 }
 0x151   : > { %v11980_v5 = vld [vmem:[%s16543_s1 + $0x260] ss:$20 sps:$4 sm:$0xff]   ;;  %v11982_v6 = vld [vmem:[%s16543_s1 + $0x264] ss:$20 sps:$4 sm:$0xff]   ;;  %v11959_v10 = vld [vmem:[#allocation2 + $0x32c] ss:$36 sps:$4 sm:$0xff]  }
 0x152   : > { %v1503_v11 = vrot.slane %v1502_v59, 4  ;;  %v11961_v17 = vld [vmem:[#allocation2 + $0x328] ss:$36 sps:$4 sm:$0xff]   ;;  %v1498_v18 = vsel %vm13093_vm2, %v1493_v4, %v1497_v42  ;;  %6479 = vmatprep.subr.bf16.mxu1 %v11982_v6  ;;  %6026 = vmatprep.mubr.bf16.mxu0 %v11959_v10  ;;  %v11985_v26 = vld [vmem:[%s16543_s1 + $0x23c] ss:$20 sps:$4 sm:$0xff]   ;;  %v5779_v42 = vpop.f32.mrf.mxu1  ;;  %v5589_v59 = vadd.f32 %v5588_v41, %v13660_v31  ;;  %v5593_v6 = vadd.f32 %v5592_v63, %v13657_v30  ;;  %v5594_v12 = vpop.f32.mrf.mxu0 }
 0x153   : > { %v11983_v20 = vld [vmem:[%s16543_s1 + $0x238] ss:$20 sps:$4 sm:$0xff]   ;;  %1637 = vst [vmem:[#allocation2 + $0x374] sm:$0xf] %v1498_v18  ;;  %6480 = vmatpush2.bf16.msra.mxu1 %v11980_v5  ;;  %v10207_v28 = vld [vmem:[%s13047_s27 + $0x300] sm:$0xf]  ;;  %6027 = vmatmul.mubr.bf16.gmra.mxu0 %v11961_v17  ;;  %v13873_v61 = vadd.f32 %v5779_v42, %v5587_v32 }
 0x154   : > { %v1508_v25 = vsel %vm13093_vm2, %v1503_v11, %v1507_v53  ;;  %v10208_v29 = vld [vmem:[%s13047_s27 + $0x304] sm:$0xf]  ;;  %1143 = vst [vmem:[#allocation2 + $0x3b8] sm:$0xf] %v10207_v28  ;;  %v10252_v34 = vld [vmem:[%s13047_s27 + $0x234] sm:$0xf]  ;;  %6481 = vmatprep.subr.bf16.mxu1 %v11985_v26  ;;  %v5781_v1 = vpop.f32.mrf.mxu1  ;;  %v5596_v32 = vpop.f32.mrf.mxu0 }
 0x155   : > { %1638 = vst [vmem:[#allocation2 + $0x398] sm:$0xf] %v1508_v25  ;;  %1144 = vst [vmem:[#allocation2 + $0x3dc] sm:$0xf] %v10208_v29  ;;  %v10253_v38 = vld [vmem:[%s13047_s27 + $0x238] sm:$0xf]  ;;  %v13876_v11 = vadd.f32 %v5781_v1, %v5589_v59  ;;  %v5595_v25 = vadd.f32 %v5594_v12, %v13660_v31  ;;  %v5597_v42 = vadd.f32 %v5596_v32, %v13657_v30 }
 0x156   : > { %v10254_v39 = vld [vmem:[%s13047_s27 + $0x23c] sm:$0x1]  ;;  %v1510_v44 = vshrl.u32 %v10252_v34, 16  ;;  %v1513_v45 = vshll.u32 %v10252_v34, 16  ;;  %v1519_v48 = vshll.u32 %v10253_v38, 16  ;;  %v1523_v49 = vshrl.u32 %v10253_v38, 16  ;;  %v5785_v17 = vpop.f32.mrf.mxu1 }
 0x157   : > { %v10287_v53 = vld [vmem:[%s13047_s27 + $0xa8] sm:$0xf]  ;;  %v1529_v54 = vshll.u32 %v10254_v39, 16  ;;  %v10288_v55 = vld [vmem:[%s13047_s27 + $0xac] sm:$0xf]  ;;  %6482 = vmatpush2.bf16.msra.mxu1 %v11983_v20  ;;  %v13886_v26 = vadd.f32 %v5785_v17, %v5593_v6 }
 0x158   : > { %1704 = vst [vmem:[#allocation2 + $0x3c0] sm:$0xf] %v10287_v53  ;;  %v10319_v57 = vld [vmem:[%s13047_s27 + $0x174] sm:$0xf]  ;;  %v11977_v0 = vld [vmem:[#allocation2 + $0x378] ss:$36 sps:$4 sm:$0xff]   ;;  %v5787_v34 = vpop.f32.mrf.mxu1  ;;  %v5598_v53 = vpop.f32.mrf.mxu0 }
 0x159   : > { %v1512_v4 = vrot.slane %v1510_v44, 4  ;;  %v1515_v5 = vrot.slane %v1513_v45, 5  ;;  %1705 = vst [vmem:[#allocation2 + $0x3e4] sm:$0xf] %v10288_v55  ;;  %1769 = vst [vmem:[#allocation2 + $0x3c4] sm:$0xf] %v10319_v57  ;;  %v13889_v44 = vadd.f32 %v5787_v34, %v5595_v25  ;;  %v5599_v1 = vadd.f32 %v5598_v53, %v13660_v31 }
 0x15a   : > { %v11979_v7 = vld [vmem:[#allocation2 + $0x37c] ss:$36 sps:$4 sm:$0xff]   ;;  %v1521_v8 = vrot.slane %v1519_v48, 5  ;;  %v1525_v10 = vrot.slane %v1523_v49, 4  ;;  %v10320_v22 = vld [vmem:[%s13047_s27 + $0x178] sm:$0xf] }
 0x15b   : > { %v1516_v18 = vor.u32 %v1515_v5, %v1512_v4  ;;  %v11992_v24 = vld [vmem:[%s16543_s1 + $0x210] ss:$20 sps:$4 sm:$0xff]   ;;  %v11994_v20 = vld [vmem:[%s16543_s1 + $0x214] ss:$20 sps:$4 sm:$0xff]   ;;  %6229 = vmatprep.mubr.bf16.mxu1 %v11979_v7  ;;  %v1531_v29 = vrot.slane %v1529_v54, 5  ;;  %v5789_v54 = vpop.f32.mrf.mxu1 }
 0x15c   : > { %v1526_v28 = vor.u32 %v1525_v10, %v1521_v8  ;;  %1770 = vst [vmem:[#allocation2 + $0x3e8] sm:$0xf] %v10320_v22  ;;  %v11971_v38 = vld [vmem:[#allocation2 + $0x370] ss:$36 sps:$4 sm:$0xff]   ;;  %6230 = vmatmul.mubr.bf16.gmra.mxu1 %v11977_v0  ;;  %6483 = vmatprep.subr.bf16.mxu1 %v11994_v20  ;;  %v11995_v48 = vld [vmem:[%s16543_s1 + $0x1e8] ss:$20 sps:$4 sm:$0xff]   ;;  %v13903_v0 = vadd.f32 %v5789_v54, %v5597_v42  ;;  %v5602_v10 = vpop.f32.mrf.mxu0 }
 0x15d   : > { %v11973_v39 = vld [vmem:[#allocation2 + $0x374] ss:$36 sps:$4 sm:$0xff]   ;;  %v1517_v41 = vrot.slane %v1516_v18, 4  ;;  %6484 = vmatpush2.bf16.msra.mxu1 %v11992_v24  ;;  %v11997_v49 = vld [vmem:[%s16543_s1 + $0x1ec] ss:$20 sps:$4 sm:$0xff]  }
 0x15e   : > { %v1527_v45 = vrot.slane %v1526_v28, 4  ;;  %6036 = vmatprep.mubr.bf16.mxu0 %v11973_v39  ;;  %v10209_v57 = vld [vmem:[%s13047_s27 + $0x30c] sm:$0xf]  ;;  %v10210_v59 = vld [vmem:[%s13047_s27 + $0x310] sm:$0xf]  ;;  %6485 = vmatprep.subr.bf16.mxu1 %v11997_v49  ;;  %v5603_v28 = vadd.f32 %v5602_v10, %v13657_v30  ;;  %v5604_v32 = vpop.f32.mrf.mxu0 }
 0x15f   : > { %v1522_v55 = vsel %vm13093_vm2, %v1517_v41, %v1521_v8  ;;  %v10255_v63 = vld [vmem:[%s13047_s27 + $0x240] sm:$0xf]  ;;  %6037 = vmatmul.mubr.bf16.gmra.mxu0 %v11971_v38  ;;  %1145 = vst [vmem:[#allocation2 + $0x400] sm:$0xf] %v10209_v57  ;;  %1146 = vst [vmem:[#allocation2 + $0x424] sm:$0xf] %v10210_v59  ;;  %v5791_v8 = vpop.f32.mrf.mxu1  ;;  %v5605_v42 = vadd.f32 %v5604_v32, %v13660_v31 }
 0x160   : > { %v1532_v4 = vsel %vm13093_vm2, %v1527_v45, %v1531_v29  ;;  %1639 = vst [vmem:[#allocation2 + $0x3bc] sm:$0xf] %v1522_v55  ;;  %v10256_v5 = vld [vmem:[%s13047_s27 + $0x244] sm:$0xf]  ;;  %v10257_v6 = vld [vmem:[%s13047_s27 + $0x248] sm:$0x1]  ;;  %v13916_v29 = vadd.f32 %v5791_v8, %v5599_v1  ;;  %v5606_v54 = vpop.f32.mrf.mxu0 }
 0x161   : > { %v1534_v7 = vshrl.u32 %v10255_v63, 16  ;;  %1640 = vst [vmem:[#allocation2 + $0x3e0] sm:$0xf] %v1532_v4  ;;  %v1537_v12 = vshll.u32 %v10255_v63, 16  ;;  %v1543_v17 = vshll.u32 %v10256_v5, 16  ;;  %v1547_v18 = vshrl.u32 %v10256_v5, 16  ;;  %6486 = vmatpush2.bf16.msra.mxu1 %v11995_v48  ;;  %v5795_v34 = vpop.f32.mrf.mxu1 }
 0x162   : > { %v1553_v22 = vshll.u32 %v10257_v6, 16  ;;  %v12001_v20 = vld [vmem:[%s16543_s1 + $0xa00] ss:$20 sps:$4 sm:$0xff]   ;;  %v12003_v25 = vld [vmem:[%s16543_s1 + $0xa04] ss:$20 sps:$4 sm:$0xff]   ;;  %16579 = vst [vmem:[#allocation7_spill] sm:$0xff] %v13916_v29  ;;  %v13920_v53 = vadd.f32 %v5795_v34, %v5603_v28  ;;  %v5607_v4 = vadd.f32 %v5606_v54, %v13657_v30 }
 0x163   : > { %v1536_v24 = vrot.slane %v1534_v7, 4  ;;  %v11989_v38 = vld [vmem:[#allocation2 + $0x3c0] ss:$36 sps:$4 sm:$0xff]   ;;  %v1539_v41 = vrot.slane %v1537_v12, 5  ;;  %v1545_v45 = vrot.slane %v1543_v17, 5  ;;  %v1549_v48 = vrot.slane %v1547_v18, 4  ;;  %6284 = vmatprep.subr.bf16.mxu0 %v12003_v25  ;;  %v5797_v55 = vpop.f32.mrf.mxu1  ;;  %v5608_v12 = vpop.f32.mrf.mxu0 }
 0x164   : > { %v11991_v39 = vld [vmem:[#allocation2 + $0x3c4] ss:$36 sps:$4 sm:$0xff]   ;;  %v10289_v49 = vld [vmem:[%s13047_s27 + $0xb4] sm:$0xf]  ;;  %16580 = vst [vmem:[#allocation8_spill] sm:$0xff] %v13920_v53  ;;  %6285 = vmatpush1.bf16.msra.mxu0 %v12001_v20  ;;  %v13926_v5 = vadd.f32 %v5797_v55, %v5605_v42  ;;  %v1555_v7 = vrot.slane %v1553_v22, 5  ;;  %v5609_v20 = vadd.f32 %v5608_v12, %v13660_v31 }
 0x165   : > { %6239 = vmatprep.mubr.bf16.mxu1 %v11991_v39  ;;  %v1540_v57 = vor.u32 %v1539_v41, %v1536_v24  ;;  %v10290_v59 = vld [vmem:[%s13047_s27 + $0xb8] sm:$0xf]  ;;  %1706 = vst [vmem:[#allocation2 + $0x408] sm:$0xf] %v10289_v49  ;;  %v10321_v63 = vld [vmem:[%s13047_s27 + $0x180] sm:$0xf]  ;;  %v1550_v6 = vor.u32 %v1549_v48, %v1545_v45  ;;  %v5799_v17 = vpop.f32.mrf.mxu1 }
 0x166   : > { %v10322_v1 = vld [vmem:[%s13047_s27 + $0x184] sm:$0xf]  ;;  %16581 = vst [vmem:[#allocation9_spill] sm:$0xff] %v13926_v5  ;;  %6240 = vmatmul.mubr.bf16.gmra.mxu1 %v11989_v38  ;;  %1707 = vst [vmem:[#allocation2 + $0x42c] sm:$0xf] %v10290_v59  ;;  %v13941_v25 = vadd.f32 %v5799_v17, %v5607_v4  ;;  %v5612_v38 = vpop.f32.mrf.mxu0 }
 0x167   : > { %1771 = vst [vmem:[#allocation2 + $0x40c] sm:$0xf] %v10321_v63  ;;  %1772 = vst [vmem:[#allocation2 + $0x430] sm:$0xf] %v10322_v1  ;;  %v12007_v10 = vld [vmem:[%s16543_s1 + $0x1c0] ss:$20 sps:$4 sm:$0xff]   ;;  %v5801_v39 = vpop.f32.mrf.mxu1  ;;  %v5613_v54 = vadd.f32 %v5612_v38, %v13657_v30 }
 0x168   : > { %v12009_v8 = vld [vmem:[%s16543_s1 + $0x1c4] ss:$20 sps:$4 sm:$0xff]   ;;  %v1541_v18 = vrot.slane %v1540_v57, 4  ;;  %v12012_v24 = vld [vmem:[%s16543_s1 + $0x19c] ss:$20 sps:$4 sm:$0xff]   ;;  %16582 = vst [vmem:[#allocation10_spill] sm:$0xff] %v13941_v25  ;;  %v13949_v55 = vadd.f32 %v5801_v39, %v5609_v20  ;;  %v5614_v4 = vpop.f32.mrf.mxu0 }
 0x169   : > { %v12010_v22 = vld [vmem:[%s16543_s1 + $0x198] ss:$20 sps:$4 sm:$0xff]   ;;  %v11988_v32 = vld [vmem:[#allocation2 + $0x3bc] ss:$36 sps:$4 sm:$0xff]   ;;  %v1551_v34 = vrot.slane %v1550_v6, 4  ;;  %6487 = vmatprep.subr.bf16.mxu1 %v12009_v8  ;;  %v5615_v17 = vadd.f32 %v5614_v4, %v13660_v31 }
 0x16a   : > { %v11986_v28 = vld [vmem:[#allocation2 + $0x3b8] ss:$36 sps:$4 sm:$0xff]   ;;  %v1546_v41 = vsel %vm13093_vm2, %v1541_v18, %v1545_v45  ;;  %6488 = vmatpush2.bf16.msra.mxu1 %v12007_v10  ;;  %v10258_v49 = vld [vmem:[%s13047_s27 + $0x24c] sm:$0xf]  ;;  %16583 = vst [vmem:[#allocation11_spill] sm:$0xff] %v13949_v55  ;;  %6046 = vmatprep.mubr.bf16.mxu0 %v11988_v32  ;;  %v5805_v32 = vpop.f32.mrf.mxu1 }
 0x16b   : > { %v10211_v42 = vld [vmem:[%s13047_s27 + $0x318] sm:$0xf]  ;;  %v10212_v48 = vld [vmem:[%s13047_s27 + $0x31c] sm:$0xf]  ;;  %v1556_v57 = vsel %vm13093_vm2, %v1551_v34, %v1555_v7  ;;  %1641 = vst [vmem:[#allocation2 + $0x404] sm:$0xf] %v1546_v41  ;;  %6489 = vmatprep.subr.bf16.mxu1 %v12012_v24  ;;  %6047 = vmatmul.mubr.bf16.gmra.mxu0 %v11986_v28  ;;  %v5616_v34 = vpop.f32.mrf.mxu0  ;;  %v13959_v28 = vadd.f32 %v5805_v32, %v5613_v54 }
 0x16c   : > { %1147 = vst [vmem:[#allocation2 + $0x448] sm:$0xf] %v10211_v42  ;;  %1148 = vst [vmem:[#allocation2 + $0x46c] sm:$0xf] %v10212_v48  ;;  %v10259_v59 = vld [vmem:[%s13047_s27 + $0x250] sm:$0xf]  ;;  %v5617_v42 = vadd.f32 %v5616_v34, %v13657_v30 }
 0x16d   : > { %v10260_v45 = vld [vmem:[%s13047_s27 + $0x254] sm:$0x1]  ;;  %v1558_v63 = vshrl.u32 %v10258_v49, 16  ;;  %v1561_v1 = vshll.u32 %v10258_v49, 16  ;;  %1642 = vst [vmem:[#allocation2 + $0x428] sm:$0xf] %v1556_v57 }
 0x16e   : > { %v1567_v6 = vshll.u32 %v10259_v59, 16  ;;  %v1571_v10 = vshrl.u32 %v10259_v59, 16  ;;  %v1577_v8 = vshll.u32 %v10260_v45, 16  ;;  %v10291_v12 = vld [vmem:[%s13047_s27 + $0xc0] sm:$0xf]  ;;  %6490 = vmatpush2.bf16.msra.mxu1 %v12010_v22  ;;  %16584 = vst [vmem:[#allocation12_spill] sm:$0xff] %v13959_v28  ;;  %v5807_v59 = vpop.f32.mrf.mxu1  ;;  %v5618_v45 = vpop.f32.mrf.mxu0 }
 0x16f   : > { %v1560_v7 = vrot.slane %v1558_v63, 4  ;;  %v1563_v18 = vrot.slane %v1561_v1, 5  ;;  %v10292_v24 = vld [vmem:[%s13047_s27 + $0xc4] sm:$0xf]  ;;  %1708 = vst [vmem:[#allocation2 + $0x450] sm:$0xf] %v10291_v12  ;;  %v13969_v4 = vadd.f32 %v5807_v59, %v5615_v17  ;;  %v5619_v12 = vadd.f32 %v5618_v45, %v13660_v31 }
 0x170   : > { %v10323_v20 = vld [vmem:[%s13047_s27 + $0x18c] sm:$0xf]  ;;  %v1569_v39 = vrot.slane %v1567_v6, 5  ;;  %v1573_v41 = vrot.slane %v1571_v10, 4  ;;  %1709 = vst [vmem:[#allocation2 + $0x474] sm:$0xf] %v10292_v24 }
 0x171   : > { %v12004_v38 = vld [vmem:[#allocation2 + $0x408] ss:$36 sps:$4 sm:$0xff]   ;;  %1773 = vst [vmem:[#allocation2 + $0x454] sm:$0xf] %v10323_v20  ;;  %v1564_v49 = vor.u32 %v1563_v18, %v1560_v7  ;;  %v10324_v57 = vld [vmem:[%s13047_s27 + $0x190] sm:$0xf]  ;;  %v5809_v7 = vpop.f32.mrf.mxu1  ;;  %v5622_v18 = vpop.f32.mrf.mxu0 }
 0x172   : > { %v12006_v48 = vld [vmem:[#allocation2 + $0x40c] ss:$36 sps:$4 sm:$0xff]   ;;  %v1574_v63 = vor.u32 %v1573_v41, %v1569_v39  ;;  %v1579_v1 = vrot.slane %v1577_v8, 5  ;;  %1774 = vst [vmem:[#allocation2 + $0x478] sm:$0xf] %v10324_v57  ;;  %16585 = vst [vmem:[#allocation13_spill] sm:$0xff] %v13969_v4  ;;  %v13980_v32 = vadd.f32 %v5809_v7, %v5617_v42  ;;  %v5623_v57 = vadd.f32 %v5622_v18, %v13657_v30 }
 0x173   : > { %v12019_v22 = vld [vmem:[%s16543_s1 + $0x170] ss:$20 sps:$4 sm:$0xff]   ;;  %v12021_v54 = vld [vmem:[%s16543_s1 + $0x174] ss:$20 sps:$4 sm:$0xff]   ;;  %6249 = vmatprep.mubr.bf16.mxu1 %v12006_v48  ;;  %v1565_v6 = vrot.slane %v1564_v49, 4  ;;  %v5811_v59 = vpop.f32.mrf.mxu1  ;;  %v5624_v45 = vpop.f32.mrf.mxu0 }
 0x174   : > { %v12022_v10 = vld [vmem:[%s16543_s1 + $0x148] ss:$20 sps:$4 sm:$0xff]   ;;  %v12024_v8 = vld [vmem:[%s16543_s1 + $0x14c] ss:$20 sps:$4 sm:$0xff]   ;;  %6250 = vmatmul.mubr.bf16.gmra.mxu1 %v12004_v38  ;;  %v1575_v24 = vrot.slane %v1574_v63, 4  ;;  %6491 = vmatprep.subr.bf16.mxu1 %v12021_v54  ;;  %16586 = vst [vmem:[#allocation14_spill] sm:$0xff] %v13980_v32 }
 0x175   : > { %v10325_v17 = vld [vmem:[%s13047_s27 + $0xc] sm:$0xf]  ;;  %v10326_v20 = vld [vmem:[%s13047_s27 + $0x10] sm:$0xf]  ;;  %v11998_v34 = vld [vmem:[#allocation2 + $0x400] ss:$36 sps:$4 sm:$0xff]   ;;  %v1570_v48 = vsel %vm13093_vm2, %v1565_v6, %v1569_v39  ;;  %6492 = vmatpush2.bf16.msra.mxu1 %v12019_v22  ;;  %v13988_v39 = vadd.f32 %v5811_v59, %v5619_v12  ;;  %v5626_v22 = vpop.f32.mrf.mxu0 }
 0x176   : > { %v12000_v41 = vld [vmem:[#allocation2 + $0x404] ss:$36 sps:$4 sm:$0xff]   ;;  %v1824_v49 = vshrl.u32 %v10325_v17, 16  ;;  %v1580_v38 = vsel %vm13093_vm2, %v1575_v24, %v1579_v1  ;;  %1643 = vst [vmem:[#allocation2 + $0x44c] sm:$0xf] %v1570_v48  ;;  %6493 = vmatprep.subr.bf16.mxu1 %v12024_v8  ;;  %v1827_v54 = vshll.u32 %v10325_v17, 16  ;;  %v5625_v24 = vadd.f32 %v5624_v45, %v13660_v31  ;;  %v5815_v17 = vpop.f32.mrf.mxu1 }
 0x177   : > { %v10327_v63 = vld [vmem:[%s13047_s27 + $0x14] sm:$0x1]  ;;  %v1833_v42 = vshll.u32 %v10326_v20, 16  ;;  %v1837_v7 = vshrl.u32 %v10326_v20, 16  ;;  %6056 = vmatprep.mubr.bf16.mxu0 %v12000_v41  ;;  %1644 = vst [vmem:[#allocation2 + $0x470] sm:$0xf] %v1580_v38  ;;  %v13994_v48 = vadd.f32 %v5815_v17, %v5623_v57 }
 0x178   : > { %v1826_v58 = vrot.slane %v1824_v49, 4  ;;  %v1843_v40 = vshll.u32 %v10327_v63, 16  ;;  %16587 = vst [vmem:[#allocation15_spill] sm:$0xff] %v13988_v39  ;;  %6057 = vmatmul.mubr.bf16.gmra.mxu0 %v11998_v34  ;;  %v1829_v6 = vrot.slane %v1827_v54, 5  ;;  %v12028_v8 = vld [vmem:[%s16543_s1 + $0x3a4] ss:$20 sps:$4 sm:$0xff]   ;;  %v5628_v34 = vpop.f32.mrf.mxu0 }
 0x179   : > { %v1835_v18 = vrot.slane %v1833_v42, 5  ;;  %v1839_v1 = vrot.slane %v1837_v7, 4  ;;  %v12016_v20 = vld [vmem:[#allocation2 + $0x450] ss:$36 sps:$4 sm:$0xff]   ;;  %6494 = vmatpush2.bf16.msra.mxu1 %v12022_v10  ;;  %16588 = vst [vmem:[#allocation16_spill] sm:$0xff] %v13994_v48  ;;  %6656 = vmatprep.subr.bf16.mxu0 %v12028_v8  ;;  %v5627_v42 = vadd.f32 %v5626_v22, %v13657_v30  ;;  %v5817_v7 = vpop.f32.mrf.mxu1  ;;  %v5629_v15 = vadd.f32 %v5628_v34, %v13660_v31 }
 0x17a   : > { %v12018_v41 = vld [vmem:[#allocation2 + $0x454] ss:$36 sps:$4 sm:$0xff]   ;;  %v1845_v12 = vrot.slane %v1843_v40, 5  ;;  %v1830_v49 = vor.u32 %v1829_v6, %v1826_v58  ;;  %v10329_v63 = vld [vmem:[%s13047_s27 + $0x1c] sm:$0xf]  ;;  %v5632_v40 = vpop.f32.mrf.mxu0  ;;  %v14001_v6 = vadd.f32 %v5817_v7, %v5625_v24 }
 0x17b   : > { %v1840_v59 = vor.u32 %v1839_v1, %v1835_v18  ;;  %v10328_v38 = vld [vmem:[%s13047_s27 + $0x18] sm:$0xf]  ;;  %v10330_v54 = vld [vmem:[%s13047_s27 + $0x20] sm:$0x1]  ;;  %6259 = vmatprep.mubr.bf16.mxu1 %v12018_v41  ;;  %v1857_v32 = vshll.u32 %v10329_v63, 16  ;;  %v1861_v10 = vshrl.u32 %v10329_v63, 16  ;;  %v5819_v1 = vpop.f32.mrf.mxu1 }
 0x17c   : > { %v1848_v45 = vshrl.u32 %v10328_v38, 16  ;;  %v1851_v39 = vshll.u32 %v10328_v38, 16  ;;  %6260 = vmatmul.mubr.bf16.gmra.mxu1 %v12016_v20  ;;  %v1831_v57 = vrot.slane %v1830_v49, 4  ;;  %v1867_v58 = vshll.u32 %v10330_v54, 16  ;;  %16589 = vst [vmem:[#allocation17_spill] sm:$0xff] %v14001_v6  ;;  %v5634_v41 = vpop.f32.mrf.mxu0 }
 0x17d   : > { %v1841_v17 = vrot.slane %v1840_v59, 4  ;;  %v12533_v8 = vld [vmem:[#allocation2 + $0x4] ss:$36 sps:$4 sm:$0xff]   ;;  %v1859_v4 = vrot.slane %v1857_v32, 5  ;;  %v1863_v34 = vrot.slane %v1861_v10, 4  ;;  %v14007_v59 = vadd.f32 %v5819_v1, %v5627_v42  ;;  %v5821_v63 = vpop.f32.mrf.mxu1 }
 0x17e   : > { %6495 = vmatprep.mubr.bf16.mxu1 %v12533_v8  ;;  %v1850_v48 = vrot.slane %v1848_v45, 4  ;;  %v1853_v22 = vrot.slane %v1851_v39, 5  ;;  %v12013_v38 = vld [vmem:[#allocation2 + $0x448] ss:$36 sps:$4 sm:$0xff]   ;;  %v1836_v20 = vsel %vm13093_vm2, %v1831_v57, %v1835_v18  ;;  %v1869_v49 = vrot.slane %v1867_v58, 5  ;;  %v5636_v8 = vpop.f32.mrf.mxu0 }
 0x17f   : > { %v12015_v28 = vld [vmem:[#allocation2 + $0x44c] ss:$36 sps:$4 sm:$0xff]   ;;  %v1846_v24 = vsel %vm13093_vm2, %v1841_v17, %v1845_v12  ;;  %16590 = vst [vmem:[#allocation18_spill] sm:$0xff] %v14007_v59  ;;  %2239 = vst [vmem:[#allocation2 + $0x20] sm:$0xf] %v1836_v20  ;;  %v1864_v39 = vor.u32 %v1863_v34, %v1859_v4  ;;  %v5633_v54 = vadd.f32 %v5632_v40, %v13657_v30  ;;  %v16560_v40 = vmov 0  }
 0x180   : > { %2240 = vst [vmem:[#allocation2 + $0x44] sm:$0xf] %v1846_v24  ;;  %v1854_v32 = vor.u32 %v1853_v22, %v1850_v48  ;;  %v14010_v7 = vadd.f32 %v5821_v63, %v5629_v15  ;;  %v10331_v45 = vld [vmem:[%s13047_s27 + $0x24] sm:$0xf]  ;;  %v10332_v10 = vld [vmem:[%s13047_s27 + $0x28] sm:$0xf]  ;;  %6066 = vmatprep.mubr.bf16.mxu0 %v12015_v28  ;;  %v5635_v48 = vadd.f32 %v5634_v41, %v13660_v31  ;;  %v5638_v22 = vpop.f32.mrf.mxu0  ;;  %v5825_v24 = vpop.f32.mrf.mxu1 }
 0x181   : > { %v10333_v18 = vld [vmem:[%s13047_s27 + $0x2c] sm:$0x1]  ;;  %v1872_v57 = vshrl.u32 %v10331_v45, 16  ;;  %v1875_v6 = vshll.u32 %v10331_v45, 16  ;;  %v1881_v12 = vshll.u32 %v10332_v10, 16  ;;  %v1885_v17 = vshrl.u32 %v10332_v10, 16  ;;  %6067 = vmatmul.mubr.bf16.gmra.mxu0 %v12013_v38 }
 0x182   : > { %16591 = vst [vmem:[#allocation19_spill] sm:$0xff] %v14010_v7  ;;  %v1855_v42 = vrot.slane %v1854_v32, 4  ;;  %v1865_v58 = vrot.slane %v1864_v39, 4  ;;  %v1891_v1 = vshll.u32 %v10333_v18, 16  ;;  %6302 = vmatprep.mubr.bf16.mxu0 %v16560_v40  ;;  %v14021_v32 = vadd.f32 %v5825_v24, %v5633_v54  ;;  %v5642_v39 = vpop.f32.mrf.mxu0  ;;  %v10334_v41 = vld [vmem:[%s13047_s27 + $0x30] sm:$0xf] }
 0x183   : > { %v1874_v15 = vrot.slane %v1872_v57, 4  ;;  %v1877_v34 = vrot.slane %v1875_v6, 5  ;;  %v1883_v20 = vrot.slane %v1881_v12, 5  ;;  %v1887_v28 = vrot.slane %v1885_v17, 4  ;;  %v12026_v45 = vld [vmem:[%s16543_s1 + $0x3a0] ss:$20 sps:$4 sm:$0xff]  }
 0x184   : > { %v1860_v63 = vsel %vm13093_vm2, %v1855_v42, %v1859_v4  ;;  %v1870_v38 = vsel %vm13093_vm2, %v1865_v58, %v1869_v49  ;;  %16592 = vst [vmem:[#allocation20_spill] sm:$0xff] %v14021_v32  ;;  %v12534_v6 = vld [vmem:[#allocation2] ss:$36 sps:$4 sm:$0xff]   ;;  %v1893_v4 = vrot.slane %v1891_v1, 5  ;;  %v5637_v57 = vadd.f32 %v5636_v8, %v13657_v30  ;;  %v5827_v49 = vpop.f32.mrf.mxu1  ;;  %v12535_v54 = vld [vmem:[#allocation2 + $0x4c] ss:$36 sps:$4 sm:$0xff]   ;;  %v5644_v32 = vpop.f32.mrf.mxu0 }
 0x185   : > { %6496 = vmatmul.mubr.bf16.vlgmr.msra.gmra.mxu1 %v12534_v6  ;;  %2241 = vst [vmem:[#allocation2 + $0x68] sm:$0xf] %v1860_v63  ;;  %2242 = vst [vmem:[#allocation2 + $0x8c] sm:$0xf] %v1870_v38  ;;  %v1878_v10 = vor.u32 %v1877_v34, %v1874_v15  ;;  %v1888_v18 = vor.u32 %v1887_v28, %v1883_v20  ;;  %v14028_v12 = vadd.f32 %v5827_v49, %v5635_v48  ;;  %v10335_v42 = vld [vmem:[%s13047_s27 + $0x34] sm:$0xf] }
 0x186   : > { %6505 = vmatprep.mubr.bf16.mxu1 %v12535_v54  ;;  %v5639_v17 = vadd.f32 %v5638_v22, %v13660_v31  ;;  %v10336_v58 = vld [vmem:[%s13047_s27 + $0x38] sm:$0x1]  ;;  %v1896_v24 = vshrl.u32 %v10334_v41, 16  ;;  %v1899_v40 = vshll.u32 %v10334_v41, 16  ;;  %v5829_v63 = vpop.f32.mrf.mxu1  ;;  %v12032_v1 = vld [vmem:[%s16543_s1 + $0x37c] ss:$20 sps:$4 sm:$0xff]   ;;  %v5646_v28 = vpop.f32.mrf.mxu0  ;;  %v5645_v7 = vadd.f32 %v5644_v32, %v13660_v31 }
 0x187   : > { %16593 = vst [vmem:[#allocation21_spill] sm:$0xff] %v14028_v12  ;;  %v12025_v6 = vld [vmem:[#allocation2 + $0x20] ss:$36 sps:$4 sm:$0xff]   ;;  %v1879_v15 = vrot.slane %v1878_v10, 4  ;;  %v1889_v8 = vrot.slane %v1888_v18, 4  ;;  %v14036_v34 = vadd.f32 %v5829_v63, %v5637_v57  ;;  %v1905_v49 = vshll.u32 %v10335_v42, 16 }
 0x188   : > { %v1898_v48 = vrot.slane %v1896_v24, 4  ;;  %v12030_v22 = vld [vmem:[%s16543_s1 + $0x378] ss:$20 sps:$4 sm:$0xff]   ;;  %v5831_v38 = vpop.f32.mrf.mxu1  ;;  %v1901_v41 = vrot.slane %v1899_v40, 5  ;;  %v1909_v54 = vshrl.u32 %v10335_v42, 16  ;;  %v1915_v12 = vshll.u32 %v10336_v58, 16  ;;  %v5648_v40 = vpop.f32.mrf.mxu0 }
 0x189   : > { %16594 = vst [vmem:[#allocation22_spill] sm:$0xff] %v14036_v34  ;;  %6303 = vmatmul.mubr.bf16.vlgmr.msra.gmra.mxu0 %v12025_v6  ;;  %v1884_v10 = vsel %vm13093_vm2, %v1879_v15, %v1883_v20  ;;  %v1894_v18 = vsel %vm13093_vm2, %v1889_v8, %v1893_v4  ;;  %v12036_v57 = vld [vmem:[%s16543_s1 + $0x354] ss:$20 sps:$4 sm:$0xff]   ;;  %v5643_v24 = vadd.f32 %v5642_v39, %v13657_v30  ;;  %v10337_v34 = vld [vmem:[%s13047_s27 + $0x3c] sm:$0xf]  ;;  %v16596_v58 = vmov 0  }
 0x18a   : > { %v14049_v63 = vadd.f32 %v5831_v38, %v5639_v17  ;;  %v10338_v42 = vld [vmem:[%s13047_s27 + $0x40] sm:$0xf]  ;;  %6657 = vmatpush1.bf16.msra.mxu0 %v12026_v45  ;;  %6312 = vmatprep.mubr.bf16.mxu0 %v16596_v58  ;;  %2243 = vst [vmem:[#allocation2 + $0xb0] sm:$0xf] %v1884_v10  ;;  %2244 = vst [vmem:[#allocation2 + $0xd4] sm:$0xf] %v1894_v18  ;;  %v1902_v20 = vor.u32 %v1901_v41, %v1898_v48  ;;  %v5835_v45 = vpop.f32.mrf.mxu1  ;;  %v5652_v41 = vpop.f32.mrf.mxu0 }
 0x18b   : > { %v1907_v6 = vrot.slane %v1905_v49, 5  ;;  %v1911_v4 = vrot.slane %v1909_v54, 4  ;;  %v10339_v15 = vld [vmem:[%s13047_s27 + $0x44] sm:$0x1]  ;;  %6658 = vmatprep.subr.bf16.mxu0 %v12032_v1  ;;  %v1917_v8 = vrot.slane %v1915_v12, 5  ;;  %v5647_v39 = vadd.f32 %v5646_v28, %v13657_v30 }
 0x18c   : > { %16595 = vst [vmem:[#allocation23_spill] sm:$0xff] %v14049_v63  ;;  %v12536_v17 = vld [vmem:[#allocation2 + $0x48] ss:$36 sps:$4 sm:$0xff]   ;;  %v1903_v38 = vrot.slane %v1902_v20, 4  ;;  %v1920_v59 = vshrl.u32 %v10337_v34, 16  ;;  %v1923_v55 = vshll.u32 %v10337_v34, 16  ;;  %v14058_v48 = vadd.f32 %v5835_v45, %v5643_v24  ;;  %v5837_v54 = vpop.f32.mrf.mxu1 }
 0x18d   : > { %6506 = vmatmul.mubr.bf16.gmra.mxu1 %v12536_v17  ;;  %v1912_v63 = vor.u32 %v1911_v4, %v1907_v6  ;;  %v10340_v10 = vld [vmem:[%s13047_s27 + $0x48] sm:$0xf]  ;;  %v12537_v25 = vld [vmem:[#allocation2 + $0x94] ss:$36 sps:$4 sm:$0xff]   ;;  %v1929_v1 = vshll.u32 %v10338_v42, 16  ;;  %v1933_v12 = vshrl.u32 %v10338_v42, 16  ;;  %v5649_v24 = vadd.f32 %v5648_v40, %v13660_v31  ;;  %v5654_v17 = vpop.f32.mrf.mxu0 }
 0x18e   : > { %v12029_v18 = vld [vmem:[#allocation2 + $0x68] ss:$36 sps:$4 sm:$0xff]   ;;  %6515 = vmatprep.mubr.bf16.mxu1 %v12537_v25  ;;  %16597 = vst [vmem:[#allocation24_spill] sm:$0xff] %v14058_v48  ;;  %v1939_v49 = vshll.u32 %v10339_v15, 16  ;;  %6659 = vmatpush1.bf16.msra.mxu0 %v12030_v22  ;;  %v12034_v32 = vld [vmem:[%s16543_s1 + $0x350] ss:$20 sps:$4 sm:$0xff]   ;;  %v1908_v28 = vsel %vm13093_vm2, %v1903_v38, %v1907_v6  ;;  %v14069_v22 = vadd.f32 %v5837_v54, %v5645_v7  ;;  %v5839_v38 = vpop.f32.mrf.mxu1 }
 0x18f   : > { %v1913_v34 = vrot.slane %v1912_v63, 4  ;;  %v12040_v25 = vld [vmem:[%s16543_s1 + $0x32c] ss:$20 sps:$4 sm:$0xff]   ;;  %v1922_v42 = vrot.slane %v1920_v59, 4  ;;  %6660 = vmatprep.subr.bf16.mxu0 %v12036_v57  ;;  %2245 = vst [vmem:[#allocation2 + $0xf8] sm:$0xf] %v1908_v28  ;;  %v14078_v59 = vadd.f32 %v5839_v38, %v5647_v39 }
 0x190   : > { %16598 = vst [vmem:[#allocation25_spill] sm:$0xff] %v14069_v22  ;;  %v1925_v20 = vrot.slane %v1923_v55, 5  ;;  %v1931_v4 = vrot.slane %v1929_v1, 5  ;;  %v1935_v15 = vrot.slane %v1933_v12, 4  ;;  %v10341_v45 = vld [vmem:[%s13047_s27 + $0x4c] sm:$0xf]  ;;  %v5653_v12 = vadd.f32 %v5652_v41, %v13657_v30  ;;  %v5841_v28 = vpop.f32.mrf.mxu1 }
 0x191   : > { %v1918_v63 = vsel %vm13093_vm2, %v1913_v34, %v1917_v8  ;;  %v12038_v6 = vld [vmem:[%s16543_s1 + $0x328] ss:$20 sps:$4 sm:$0xff]   ;;  %v10342_v48 = vld [vmem:[%s13047_s27 + $0x50] sm:$0x1]  ;;  %v1944_v40 = vshrl.u32 %v10340_v10, 16  ;;  %6313 = vmatmul.mubr.bf16.gmra.mxu0 %v12029_v18  ;;  %16599 = vst [vmem:[#allocation26_spill] sm:$0xff] %v14078_v59  ;;  %v5656_v8 = vpop.f32.mrf.mxu0 }
 0x192   : > { %2246 = vst [vmem:[#allocation2 + $0x11c] sm:$0xf] %v1918_v63  ;;  %v1926_v55 = vor.u32 %v1925_v20, %v1922_v42  ;;  %v1936_v7 = vor.u32 %v1935_v15, %v1931_v4  ;;  %v1941_v57 = vrot.slane %v1939_v49, 5  ;;  %v12044_v1 = vld [vmem:[%s16543_s1 + $0x304] ss:$20 sps:$4 sm:$0xff]   ;;  %6322 = vmatprep.mubr.bf16.mxu0 %v16596_v58  ;;  %6661 = vmatpush1.bf16.msra.mxu0 %v12034_v32  ;;  %v1947_v18 = vshll.u32 %v10340_v10, 16 }
 0x193   : > { %v1946_v34 = vrot.slane %v1944_v40, 4  ;;  %v1953_v54 = vshll.u32 %v10341_v45, 16  ;;  %v10343_v39 = vld [vmem:[%s13047_s27 + $0x54] sm:$0xf]  ;;  %6662 = vmatprep.subr.bf16.mxu0 %v12040_v25  ;;  %v14086_v42 = vadd.f32 %v5841_v28, %v5649_v24  ;;  %v5658_v15 = vpop.f32.mrf.mxu0  ;;  %v1957_v63 = vshrl.u32 %v10341_v45, 16 }
 0x194   : > { %v1927_v49 = vrot.slane %v1926_v55, 4  ;;  %v1937_v20 = vrot.slane %v1936_v7, 4  ;;  %v14089_v38 = vld [vmem:[%s13047_s27 + $0x58] sm:$0xf]  ;;  %v12538_v59 = vld [vmem:[#allocation2 + $0x90] ss:$36 sps:$4 sm:$0xff]   ;;  %v5655_v32 = vadd.f32 %v5654_v17, %v13660_v31  ;;  %v5657_v17 = vadd.f32 %v5656_v8, %v13657_v30 }
 0x195   : > { %16600 = vst [vmem:[#allocation27_spill] sm:$0xff] %v14086_v42  ;;  %6516 = vmatmul.mubr.bf16.gmra.mxu1 %v12538_v59  ;;  %v12042_v41 = vld [vmem:[%s16543_s1 + $0x300] ss:$20 sps:$4 sm:$0xff]   ;;  %v1949_v10 = vrot.slane %v1947_v18, 5  ;;  %v1955_v40 = vrot.slane %v1953_v54, 5  ;;  %v1963_v22 = vshll.u32 %v10342_v48, 16  ;;  %v5845_v48 = vpop.f32.mrf.mxu1  ;;  %v5662_v18 = vpop.f32.mrf.mxu0 }
 0x196   : > { %v12033_v25 = vld [vmem:[#allocation2 + $0xb0] ss:$36 sps:$4 sm:$0xff]   ;;  %v12539_v24 = vld [vmem:[#allocation2 + $0xdc] ss:$36 sps:$4 sm:$0xff]   ;;  %v1932_v55 = vsel %vm13093_vm2, %v1927_v49, %v1931_v4  ;;  %v1942_v45 = vsel %vm13093_vm2, %v1937_v20, %v1941_v57  ;;  %v1959_v7 = vrot.slane %v1957_v63, 4  ;;  %v1968_v28 = vshrl.u32 %v10343_v39, 16  ;;  %6663 = vmatpush1.bf16.msra.mxu0 %v12038_v6 }
 0x197   : > { %6525 = vmatprep.mubr.bf16.mxu1 %v12539_v24  ;;  %v12048_v59 = vld [vmem:[%s16543_s1 + $0x2dc] ss:$20 sps:$4 sm:$0xff]   ;;  %2247 = vst [vmem:[#allocation2 + $0x140] sm:$0xf] %v1932_v55  ;;  %2248 = vst [vmem:[#allocation2 + $0x164] sm:$0xf] %v1942_v45  ;;  %v1950_v54 = vor.u32 %v1949_v10, %v1946_v34  ;;  %6664 = vmatprep.subr.bf16.mxu0 %v12044_v1  ;;  %v14104_v57 = vadd.f32 %v5845_v48, %v5653_v12  ;;  %v5847_v5 = vpop.f32.mrf.mxu1  ;;  %v5664_v55 = vpop.f32.mrf.mxu0 }
 0x198   : > { %v1971_v4 = vshll.u32 %v10343_v39, 16  ;;  %v1977_v49 = vshll.u32 %v14089_v38, 16  ;;  %v1960_v20 = vor.u32 %v1959_v7, %v1955_v40  ;;  %v1965_v63 = vrot.slane %v1963_v22, 5  ;;  %v10345_v24 = vld [vmem:[%s13047_s27 + $0x5c] sm:$0x1] }
 0x199   : > { %16601 = vst [vmem:[#allocation28_spill] sm:$0xff] %v14104_v57  ;;  %v1970_v42 = vrot.slane %v1968_v28, 4  ;;  %v1951_v6 = vrot.slane %v1950_v54, 4  ;;  %v10346_v53 = vld [vmem:[%s13047_s27 + $0x60] sm:$0xf]  ;;  %6323 = vmatmul.mubr.bf16.gmra.mxu0 %v12033_v25  ;;  %v14108_v8 = vadd.f32 %v5847_v5, %v5655_v32  ;;  %v5659_v34 = vadd.f32 %v5658_v15, %v13660_v31  ;;  %v5849_v10 = vpop.f32.mrf.mxu1  ;;  %v5666_v32 = vpop.f32.mrf.mxu0 }
 0x19a   : > { %v1973_v45 = vrot.slane %v1971_v4, 5  ;;  %v1961_v1 = vrot.slane %v1960_v20, 4  ;;  %v12046_v22 = vld [vmem:[%s16543_s1 + $0x2d8] ss:$20 sps:$4 sm:$0xff]   ;;  %v1979_v12 = vrot.slane %v1977_v49, 5  ;;  %6332 = vmatprep.mubr.bf16.mxu0 %v16596_v58  ;;  %6665 = vmatpush1.bf16.msra.mxu0 %v12042_v41  ;;  %v1981_v25 = vshrl.u32 %v14089_v38, 16 }
 0x19b   : > { %16602 = vst [vmem:[#allocation29_spill] sm:$0xff] %v14108_v8  ;;  %v12052_v39 = vld [vmem:[%s16543_s1 + $0x2b4] ss:$20 sps:$4 sm:$0xff]   ;;  %v1956_v5 = vsel %vm13093_vm2, %v1951_v6, %v1955_v40  ;;  %v1987_v7 = vshll.u32 %v10345_v24, 16  ;;  %v10347_v28 = vld [vmem:[%s13047_s27 + $0x64] sm:$0xf]  ;;  %v14126_v4 = vadd.f32 %v5849_v10, %v5657_v17  ;;  %6666 = vmatprep.subr.bf16.mxu0 %v12048_v59  ;;  %v5663_v17 = vadd.f32 %v5662_v18, %v13657_v30  ;;  %v5851_v6 = vpop.f32.mrf.mxu1  ;;  %v5668_v18 = vpop.f32.mrf.mxu0 }
 0x19c   : > { %v1974_v15 = vor.u32 %v1973_v45, %v1970_v42  ;;  %v14123_v48 = vld [vmem:[%s13047_s27 + $0x68] sm:$0x1]  ;;  %v10349_v54 = vld [vmem:[%s13047_s27 + $0x6c] sm:$0xf]  ;;  %v1966_v49 = vsel %vm13093_vm2, %v1961_v1, %v1965_v63  ;;  %2249 = vst [vmem:[#allocation2 + $0x188] sm:$0xf] %v1956_v5  ;;  %v14143_v5 = vadd.f32 %v5851_v6, %v5659_v34  ;;  %v14147_v8 = vadd.f32 %v5666_v32, %v13657_v30 }
 0x19d   : > { %16603 = vst [vmem:[#allocation30_spill] sm:$0xff] %v14126_v4  ;;  %v1992_v41 = vshrl.u32 %v10346_v53, 16  ;;  %v14131_v20 = vld [vmem:[%s13047_s27 + $0x70] sm:$0xf]  ;;  %v12061_v42 = vld [vmem:[%s16543_s1 + $0x620] ss:$20 sps:$4 sm:$0xff]   ;;  %v5665_v4 = vadd.f32 %v5664_v55, %v13660_v31 }
 0x19e   : > { %v12063_v38 = vld [vmem:[%s16543_s1 + $0x624] ss:$20 sps:$4 sm:$0xff]   ;;  %2250 = vst [vmem:[#allocation2 + $0x1ac] sm:$0xf] %v1966_v49  ;;  %v1975_v63 = vrot.slane %v1974_v15, 4  ;;  %v1983_v59 = vrot.slane %v1981_v25, 4  ;;  %6667 = vmatpush1.bf16.msra.mxu0 %v12046_v22 }
 0x19f   : > { %v12037_v40 = vld [vmem:[#allocation2 + $0xf8] ss:$36 sps:$4 sm:$0xff]   ;;  %v12050_v45 = vld [vmem:[%s16543_s1 + $0x2b0] ss:$20 sps:$4 sm:$0xff]   ;;  %v1995_v1 = vshll.u32 %v10346_v53, 16  ;;  %16604 = vst [vmem:[#allocation31_spill] sm:$0xff] %v14143_v5  ;;  %6849 = vmatprep.subr.bf16.mxu1 %v12063_v38  ;;  %6668 = vmatprep.subr.bf16.mxu0 %v12052_v39  ;;  %v5855_v39 = vpop.f32.mrf.mxu1 }
 0x1a0   : > { %v12540_v24 = vld [vmem:[#allocation2 + $0xd8] ss:$36 sps:$4 sm:$0xff]   ;;  %v12541_v10 = vld [vmem:[#allocation2 + $0x124] ss:$36 sps:$4 sm:$0xff]   ;;  %v1980_v15 = vsel %vm13093_vm2, %v1975_v63, %v1979_v12  ;;  %v1984_v25 = vor.u32 %v1983_v59, %v1979_v12  ;;  %v1994_v49 = vrot.slane %v1992_v41, 4  ;;  %6850 = vmatpush1.bf16.msra.mxu1 %v12061_v42  ;;  %v2001_v22 = vshll.u32 %v10347_v28, 16 }
 0x1a1   : > { %6526 = vmatmul.mubr.bf16.gmra.mxu1 %v12540_v24  ;;  %v1989_v24 = vrot.slane %v1987_v7, 5  ;;  %v1997_v53 = vrot.slane %v1995_v1, 5  ;;  %v12056_v34 = vld [vmem:[%s16543_s1 + $0x28c] ss:$20 sps:$4 sm:$0xff]   ;;  %v12066_v55 = vld [vmem:[%s16543_s1 + $0x5fc] ss:$20 sps:$4 sm:$0xff]   ;;  %6333 = vmatmul.mubr.bf16.gmra.mxu0 %v12037_v40 }
 0x1a2   : > { %6535 = vmatprep.mubr.bf16.mxu1 %v12541_v10  ;;  %2251 = vst [vmem:[#allocation2 + $0x1d0] sm:$0xf] %v1980_v15  ;;  %v2005_v32 = vshrl.u32 %v10347_v28, 16  ;;  %v2011_v7 = vshll.u32 %v14123_v48, 16  ;;  %v2016_v38 = vshrl.u32 %v10349_v54, 16  ;;  %v1985_v41 = vrot.slane %v1984_v25, 4  ;;  %6851 = vmatprep.subr.bf16.mxu1 %v12066_v55 }
 0x1a3   : > { %v12064_v12 = vld [vmem:[%s16543_s1 + $0x5f8] ss:$20 sps:$4 sm:$0xff]   ;;  %v1998_v6 = vor.u32 %v1997_v53, %v1994_v49  ;;  %v12054_v42 = vld [vmem:[%s16543_s1 + $0x288] ss:$20 sps:$4 sm:$0xff]   ;;  %v10351_v63 = vld [vmem:[%s13047_s27 + $0x74] sm:$0x1]  ;;  %v5669_v28 = vadd.f32 %v5668_v18, %v13660_v31  ;;  %6342 = vmatprep.mubr.bf16.mxu0 %v16596_v58  ;;  %v14171_v49 = vadd.f32 %v5855_v39, %v5663_v17  ;;  %6669 = vmatpush1.bf16.msra.mxu0 %v12050_v45 }
 0x1a4   : > { %v2019_v59 = vshll.u32 %v10349_v54, 16  ;;  %v2025_v1 = vshll.u32 %v14131_v20, 16  ;;  %v2003_v48 = vrot.slane %v2001_v22, 5  ;;  %v2007_v10 = vrot.slane %v2005_v32, 4  ;;  %v12060_v25 = vld [vmem:[%s16543_s1 + $0x4e4] ss:$20 sps:$4 sm:$0xff]   ;;  %v5672_v54 = vpop.f32.mrf.mxu0  ;;  %v5857_v32 = vpop.f32.mrf.mxu1  ;;  %6670 = vmatprep.subr.bf16.mxu0 %v12056_v34  ;;  %6852 = vmatpush1.bf16.msra.mxu1 %v12064_v12 }
 0x1a5   : > { %v2018_v15 = vrot.slane %v2016_v38, 4  ;;  %16605 = vst [vmem:[#allocation32_spill] sm:$0xff] %v14171_v49  ;;  %v1990_v53 = vsel %vm13093_vm2, %v1985_v41, %v1989_v24  ;;  %v1999_v40 = vrot.slane %v1998_v6, 4  ;;  %v10352_v18 = vld [vmem:[%s13047_s27 + $0x78] sm:$0xf]  ;;  %v2013_v5 = vrot.slane %v2011_v7, 5 }
 0x1a6   : > { %v2021_v55 = vrot.slane %v2019_v59, 5  ;;  %v12041_v22 = vld [vmem:[#allocation2 + $0x140] ss:$36 sps:$4 sm:$0xff]   ;;  %2252 = vst [vmem:[#allocation2 + $0x1f4] sm:$0xf] %v1990_v53  ;;  %v2008_v38 = vor.u32 %v2007_v10, %v2003_v48  ;;  %v2027_v57 = vrot.slane %v2025_v1, 5  ;;  %v14178_v29 = vadd.f32 %v5857_v32, %v5665_v4  ;;  %v5674_v45 = vpop.f32.mrf.mxu0  ;;  %v5859_v59 = vpop.f32.mrf.mxu1 }
 0x1a7   : > { %v2029_v17 = vshrl.u32 %v14131_v20, 16  ;;  %v10353_v39 = vld [vmem:[%s13047_s27 + $0x7c] sm:$0xf]  ;;  %v12542_v49 = vld [vmem:[#allocation2 + $0x120] ss:$36 sps:$4 sm:$0xff]   ;;  %v2004_v24 = vsel %vm13093_vm2, %v1999_v40, %v2003_v48  ;;  %v2035_v6 = vshll.u32 %v10351_v63, 16  ;;  %6671 = vmatpush1.bf16.msra.mxu0 %v12054_v42 }
 0x1a8   : > { %v2022_v41 = vor.u32 %v2021_v55, %v2018_v15  ;;  %v12058_v7 = vld [vmem:[%s16543_s1 + $0x4e0] ss:$20 sps:$4 sm:$0xff]   ;;  %v12071_v20 = vld [vmem:[%s16543_s1 + $0x5d0] ss:$20 sps:$4 sm:$0xff]   ;;  %v2009_v4 = vrot.slane %v2008_v38, 4  ;;  %v2040_v10 = vshrl.u32 %v10352_v18, 16  ;;  %v14196_v15 = vadd.f32 %v5859_v59, %v14147_v8  ;;  %v5676_v53 = vpop.f32.mrf.mxu0  ;;  %v5861_v32 = vpop.f32.mrf.mxu1  ;;  %6672 = vmatprep.subr.bf16.mxu0 %v12060_v25 }
 0x1a9   : > { %6536 = vmatmul.mubr.bf16.gmra.mxu1 %v12542_v49  ;;  %v10354_v34 = vld [vmem:[%s13047_s27 + $0x80] sm:$0x1]  ;;  %v12543_v12 = vld [vmem:[#allocation2 + $0x16c] ss:$36 sps:$4 sm:$0xff]   ;;  %2253 = vst [vmem:[#allocation2 + $0x218] sm:$0xf] %v2004_v24  ;;  %v5673_v49 = vadd.f32 %v5672_v54, %v13657_v30  ;;  %v14204_v59 = vadd.f32 %v5861_v32, %v5669_v28  ;;  %6343 = vmatmul.mubr.bf16.gmra.mxu0 %v12041_v22 }
 0x1aa   : > { %6545 = vmatprep.mubr.bf16.mxu1 %v12543_v12  ;;  %v2031_v1 = vrot.slane %v2029_v17, 4  ;;  %v12070_v63 = vld [vmem:[%s16543_s1 + $0x4bc] ss:$20 sps:$4 sm:$0xff]   ;;  %v12073_v48 = vld [vmem:[%s16543_s1 + $0x5d4] ss:$20 sps:$4 sm:$0xff]   ;;  %v2023_v40 = vrot.slane %v2022_v41, 4  ;;  %v2014_v38 = vsel %vm13093_vm2, %v2009_v4, %v2013_v5  ;;  %v5675_v28 = vadd.f32 %v5674_v45, %v13660_v31  ;;  %6352 = vmatprep.mubr.bf16.mxu0 %v16596_v58 }
 0x1ab   : > { %v2043_v55 = vshll.u32 %v10352_v18, 16  ;;  %v2037_v24 = vrot.slane %v2035_v6, 5  ;;  %v2042_v12 = vrot.slane %v2040_v10, 4  ;;  %6853 = vmatprep.subr.bf16.mxu1 %v12073_v48  ;;  %v12076_v8 = vld [vmem:[%s16543_s1 + $0x5ac] ss:$20 sps:$4 sm:$0xff]   ;;  %16606 = vst [vmem:[#allocation33_spill] sm:$0xff] %v14204_v59  ;;  %v5678_v6 = vpop.f32.mrf.mxu0  ;;  %6673 = vmatpush2.bf16.msra.mxu0 %v12058_v7 }
 0x1ac   : > { %v2032_v17 = vor.u32 %v2031_v1, %v2027_v57  ;;  %2254 = vst [vmem:[#allocation2 + $0x23c] sm:$0xf] %v2014_v38  ;;  %v2028_v42 = vsel %vm13093_vm2, %v2023_v40, %v2027_v57  ;;  %v2049_v18 = vshll.u32 %v10353_v39, 16  ;;  %v12068_v5 = vld [vmem:[%s16543_s1 + $0x4b8] ss:$20 sps:$4 sm:$0xff]   ;;  %6854 = vmatpush1.bf16.msra.mxu1 %v12071_v20  ;;  %v2053_v57 = vshrl.u32 %v10353_v39, 16  ;;  %6674 = vmatprep.subr.bf16.mxu0 %v12070_v63 }
 0x1ad   : > { %v2045_v54 = vrot.slane %v2043_v55, 5  ;;  %v12074_v25 = vld [vmem:[%s16543_s1 + $0x5a8] ss:$20 sps:$4 sm:$0xff]   ;;  %v10355_v41 = vld [vmem:[%s13047_s27 + $0x84] sm:$0xf]  ;;  %v2059_v1 = vshll.u32 %v10354_v34, 16  ;;  %6855 = vmatprep.subr.bf16.mxu1 %v12076_v8  ;;  %v5677_v20 = vadd.f32 %v5676_v53, %v13657_v30  ;;  %v5865_v8 = vpop.f32.mrf.mxu1 }
 0x1ae   : > { %v2033_v4 = vrot.slane %v2032_v17, 4  ;;  %2255 = vst [vmem:[#allocation2 + $0x260] sm:$0xf] %v2028_v42  ;;  %v10356_v10 = vld [vmem:[%s13047_s27 + $0x88] sm:$0xf]  ;;  %v2051_v40 = vrot.slane %v2049_v18, 5  ;;  %v14225_v18 = vadd.f32 %v5865_v8, %v5673_v49 }
 0x1af   : > { %v2046_v48 = vor.u32 %v2045_v54, %v2042_v12  ;;  %v10357_v55 = vld [vmem:[%s13047_s27 + $0x8c] sm:$0x1]  ;;  %v2064_v32 = vshrl.u32 %v10355_v41, 16  ;;  %v2055_v45 = vrot.slane %v2053_v57, 4  ;;  %v2061_v17 = vrot.slane %v2059_v1, 5  ;;  %v5867_v1 = vpop.f32.mrf.mxu1  ;;  %6675 = vmatpush2.bf16.msra.mxu0 %v12068_v5 }
 0x1b0   : > { %v12045_v38 = vld [vmem:[#allocation2 + $0x188] ss:$36 sps:$4 sm:$0xff]   ;;  %v2038_v22 = vsel %vm13093_vm2, %v2033_v4, %v2037_v24  ;;  %v2067_v39 = vshll.u32 %v10355_v41, 16  ;;  %v2073_v53 = vshll.u32 %v10356_v10, 16  ;;  %v2077_v7 = vshrl.u32 %v10356_v10, 16  ;;  %v5682_v24 = vpop.f32.mrf.mxu0  ;;  %6856 = vmatpush1.bf16.msra.mxu1 %v12074_v25 }
 0x1b1   : > { %v12544_v34 = vld [vmem:[#allocation2 + $0x168] ss:$36 sps:$4 sm:$0xff]   ;;  %2256 = vst [vmem:[#allocation2 + $0x284] sm:$0xf] %v2038_v22  ;;  %v2047_v42 = vrot.slane %v2046_v48, 4  ;;  %v2066_v59 = vrot.slane %v2064_v32, 4  ;;  %v2056_v4 = vor.u32 %v2055_v45, %v2051_v40  ;;  %v5679_v22 = vadd.f32 %v5678_v6, %v13660_v31  ;;  %v5869_v5 = vpop.f32.mrf.mxu1  ;;  %6353 = vmatmul.mubr.bf16.gmra.mxu0 %v12045_v38 }
 0x1b2   : > { %6546 = vmatmul.mubr.bf16.gmra.mxu1 %v12544_v34  ;;  %v12078_v12 = vld [vmem:[%s16543_s1 + $0x490] ss:$20 sps:$4 sm:$0xff]   ;;  %v12545_v54 = vld [vmem:[#allocation2 + $0x1b4] ss:$36 sps:$4 sm:$0xff]   ;;  %v2069_v63 = vrot.slane %v2067_v39, 5  ;;  %v2083_v41 = vshll.u32 %v10357_v55, 16  ;;  %v14238_v55 = vadd.f32 %v5867_v1, %v5675_v28  ;;  %v5684_v45 = vpop.f32.mrf.mxu0  ;;  %v14244_v28 = vadd.f32 %v5869_v5, %v5677_v20  ;;  %6362 = vmatprep.mubr.bf16.mxu0 %v16596_v58 }
 0x1b3   : > { %6555 = vmatprep.mubr.bf16.mxu1 %v12545_v54  ;;  %v12080_v57 = vld [vmem:[%s16543_s1 + $0x494] ss:$20 sps:$4 sm:$0xff]   ;;  %v2052_v10 = vsel %vm13093_vm2, %v2047_v42, %v2051_v40  ;;  %v2075_v48 = vrot.slane %v2073_v53, 5  ;;  %v2079_v32 = vrot.slane %v2077_v7, 4  ;;  %v12083_v25 = vld [vmem:[%s16543_s1 + $0x584] ss:$20 sps:$4 sm:$0xff]   ;;  %v5871_v54 = vpop.f32.mrf.mxu1 }
 0x1b4   : > { %v12081_v49 = vld [vmem:[%s16543_s1 + $0x580] ss:$20 sps:$4 sm:$0xff]   ;;  %v2057_v39 = vrot.slane %v2056_v4, 4  ;;  %2257 = vst [vmem:[#allocation2 + $0x2a8] sm:$0xf] %v2052_v10  ;;  %v2070_v40 = vor.u32 %v2069_v63, %v2066_v59  ;;  %6676 = vmatprep.subr.bf16.mxu0 %v12080_v57  ;;  %v2085_v8 = vrot.slane %v2083_v41, 5  ;;  %6857 = vmatprep.subr.bf16.mxu1 %v12083_v25  ;;  %v5686_v4 = vpop.f32.mrf.mxu0  ;;  %v14255_v1 = vadd.f32 %v5871_v54, %v5679_v22 }
 0x1b5   : > { %v2080_v34 = vor.u32 %v2079_v32, %v2075_v48  ;;  %v12084_v42 = vld [vmem:[%s16543_s1 + $0x558] ss:$20 sps:$4 sm:$0xff]   ;;  %6858 = vmatpush1.bf16.msra.mxu1 %v12081_v49  ;;  %v12086_v59 = vld [vmem:[%s16543_s1 + $0x55c] ss:$20 sps:$4 sm:$0xff]   ;;  %6677 = vmatpush2.bf16.msra.mxu0 %v12078_v12  ;;  %v10359_v38 = vld [vmem:[%s13047_s27 + $0x94] sm:$0xf]  ;;  %v5683_v25 = vadd.f32 %v5682_v24, %v13657_v30  ;;  %v5875_v54 = vpop.f32.mrf.mxu1 }
 0x1b6   : > { %v2062_v6 = vsel %vm13093_vm2, %v2057_v39, %v2061_v17  ;;  %v2071_v53 = vrot.slane %v2070_v40, 4  ;;  %v10358_v7 = vld [vmem:[%s13047_s27 + $0x90] sm:$0xf]  ;;  %v10360_v20 = vld [vmem:[%s13047_s27 + $0x98] sm:$0x1]  ;;  %6859 = vmatprep.subr.bf16.mxu1 %v12086_v59  ;;  %v2097_v32 = vshll.u32 %v10359_v38, 16 }
 0x1b7   : > { %2258 = vst [vmem:[#allocation2 + $0x2cc] sm:$0xf] %v2062_v6  ;;  %v2081_v63 = vrot.slane %v2080_v34, 4  ;;  %v2088_v41 = vshrl.u32 %v10358_v7, 16  ;;  %v12049_v57 = vld [vmem:[#allocation2 + $0x1d0] ss:$36 sps:$4 sm:$0xff]  }
 0x1b8   : > { %v2076_v17 = vsel %vm13093_vm2, %v2071_v53, %v2075_v48  ;;  %v2091_v10 = vshll.u32 %v10358_v7, 16  ;;  %v12546_v49 = vld [vmem:[#allocation2 + $0x1b0] ss:$36 sps:$4 sm:$0xff]   ;;  %v2101_v40 = vshrl.u32 %v10359_v38, 16  ;;  %v12088_v22 = vld [vmem:[%s16543_s1 + $0x468] ss:$20 sps:$4 sm:$0xff]   ;;  %v5688_v53 = vpop.f32.mrf.mxu0 }
 0x1b9   : > { %v2086_v39 = vsel %vm13093_vm2, %v2081_v63, %v2085_v8  ;;  %2259 = vst [vmem:[#allocation2 + $0x2f0] sm:$0xf] %v2076_v17  ;;  %v2090_v12 = vrot.slane %v2088_v41, 4  ;;  %v12547_v5 = vld [vmem:[#allocation2 + $0x1fc] ss:$36 sps:$4 sm:$0xff]   ;;  %6860 = vmatpush1.bf16.msra.mxu1 %v12084_v42  ;;  %v2099_v34 = vrot.slane %v2097_v32, 5  ;;  %v5685_v8 = vadd.f32 %v5684_v45, %v13660_v31  ;;  %6363 = vmatmul.mubr.bf16.gmra.mxu0 %v12049_v57 }
 0x1ba   : > { %6556 = vmatmul.mubr.bf16.gmra.mxu1 %v12546_v49  ;;  %2260 = vst [vmem:[#allocation2 + $0x314] sm:$0xf] %v2086_v39  ;;  %v2093_v48 = vrot.slane %v2091_v10, 5  ;;  %v2107_v6 = vshll.u32 %v10360_v20, 16  ;;  %v12090_v24 = vld [vmem:[%s16543_s1 + $0x46c] ss:$20 sps:$4 sm:$0xff]   ;;  %v14275_v20 = vadd.f32 %v5875_v54, %v5683_v25  ;;  %v5687_v41 = vadd.f32 %v5686_v4, %v13657_v30  ;;  %v5877_v49 = vpop.f32.mrf.mxu1  ;;  %6372 = vmatprep.mubr.bf16.mxu0 %v16596_v58 }
 0x1bb   : > { %6565 = vmatprep.mubr.bf16.mxu1 %v12547_v5  ;;  %v2103_v59 = vrot.slane %v2101_v40, 4  ;;  %v12091_v7 = vld [vmem:[%s16543_s1 + $0x530] ss:$20 sps:$4 sm:$0xff]   ;;  %6678 = vmatprep.subr.bf16.mxu0 %v12090_v24  ;;  %v12093_v38 = vld [vmem:[%s16543_s1 + $0x534] ss:$20 sps:$4 sm:$0xff]   ;;  %v5689_v39 = vadd.f32 %v5688_v53, %v13660_v31  ;;  %v14288_v4 = vadd.f32 %v5877_v49, %v5685_v8 }
 0x1bc   : > { %v2094_v63 = vor.u32 %v2093_v48, %v2090_v12  ;;  %v2109_v42 = vrot.slane %v2107_v6, 5  ;;  %6679 = vmatpush2.bf16.msra.mxu0 %v12088_v22  ;;  %v12096_v45 = vld [vmem:[%s16543_s1 + $0x50c] ss:$20 sps:$4 sm:$0xff]   ;;  %v10361_v10 = vld [vmem:[%s13047_s27 + $0x9c] sm:$0xf]  ;;  %6861 = vmatprep.subr.bf16.mxu1 %v12093_v38  ;;  %v5879_v57 = vpop.f32.mrf.mxu1 }
 0x1bd   : > { %v2104_v17 = vor.u32 %v2103_v59, %v2099_v34  ;;  %v10362_v32 = vld [vmem:[%s13047_s27 + $0xa0] sm:$0xf]  ;;  %v12094_v25 = vld [vmem:[%s16543_s1 + $0x508] ss:$20 sps:$4 sm:$0xff]   ;;  %v2112_v30 = vshrl.u32 %v10361_v10, 16  ;;  %6862 = vmatpush1.bf16.msra.mxu1 %v12091_v7  ;;  %v2115_v5 = vshll.u32 %v10361_v10, 16 }
 0x1be   : > { %v2095_v12 = vrot.slane %v2094_v63, 4  ;;  %v10363_v22 = vld [vmem:[%s13047_s27 + $0xa4] sm:$0x1]  ;;  %v2121_v48 = vshll.u32 %v10362_v32, 16  ;;  %6863 = vmatprep.subr.bf16.mxu1 %v12096_v45  ;;  %v2125_v24 = vshrl.u32 %v10362_v32, 16  ;;  %v14293_v63 = vadd.f32 %v5879_v57, %v5687_v41 }
 0x1bf   : > { %v2105_v40 = vrot.slane %v2104_v17, 4  ;;  %v2114_v6 = vrot.slane %v2112_v30, 4  ;;  %v2131_v53 = vshll.u32 %v10363_v22, 16  ;;  %v12053_v59 = vld [vmem:[#allocation2 + $0x218] ss:$36 sps:$4 sm:$0xff]   ;;  %v2117_v7 = vrot.slane %v2115_v5, 5  ;;  %v5881_v17 = vpop.f32.mrf.mxu1  ;;  %v5918_v5 = vpop.f32.mrf.mxu0 }
 0x1c0   : > { %v2100_v31 = vsel %vm13093_vm2, %v2095_v12, %v2099_v34  ;;  %v12548_v54 = vld [vmem:[#allocation2 + $0x1f8] ss:$36 sps:$4 sm:$0xff]   ;;  %v2123_v38 = vrot.slane %v2121_v48, 5  ;;  %v12549_v10 = vld [vmem:[#allocation2 + $0x244] ss:$36 sps:$4 sm:$0xff]   ;;  %v2127_v34 = vrot.slane %v2125_v24, 4  ;;  %v14303_v32 = vadd.f32 %v5881_v17, %v5689_v39 }
 0x1c1   : > { %v2110_v8 = vsel %vm13093_vm2, %v2105_v40, %v2109_v42  ;;  %2261 = vst [vmem:[#allocation2 + $0x338] sm:$0xf] %v2100_v31  ;;  %v12098_v45 = vld [vmem:[%s16543_s1 + $0x440] ss:$20 sps:$4 sm:$0xff]   ;;  %v12100_v41 = vld [vmem:[%s16543_s1 + $0x444] ss:$20 sps:$4 sm:$0xff]   ;;  %6864 = vmatpush1.bf16.msra.mxu1 %v12094_v25  ;;  %v2118_v42 = vor.u32 %v2117_v7, %v2114_v6  ;;  %v6111_v12 = vpop.f32.mrf.mxu1  ;;  %6373 = vmatmul.mubr.bf16.gmra.mxu0 %v12053_v59 }
 0x1c2   : > { %6566 = vmatmul.mubr.bf16.gmra.mxu1 %v12548_v54  ;;  %2262 = vst [vmem:[#allocation2 + $0x35c] sm:$0xf] %v2110_v8  ;;  %v12101_v49 = vld [vmem:[%s16543_s1 + $0x760] ss:$20 sps:$4 sm:$0xff]   ;;  %v2128_v30 = vor.u32 %v2127_v34, %v2123_v38  ;;  %v2133_v40 = vrot.slane %v2131_v53, 5  ;;  %6680 = vmatprep.subr.bf16.mxu0 %v12100_v41  ;;  %v5919_v25 = vadd.f32 %v5918_v5, %v13679_v52  ;;  %v5920_v53 = vpop.f32.mrf.mxu0 }
 0x1c3   : > { %6575 = vmatprep.mubr.bf16.mxu1 %v12549_v10  ;;  %v12103_v22 = vld [vmem:[%s16543_s1 + $0x764] ss:$20 sps:$4 sm:$0xff]   ;;  %v2119_v48 = vrot.slane %v2118_v42, 4  ;;  %6681 = vmatpush2.bf16.msra.mxu0 %v12098_v45  ;;  %v12106_v39 = vld [vmem:[%s16543_s1 + $0x73c] ss:$20 sps:$4 sm:$0xff]   ;;  %v6113_v57 = vpop.f32.mrf.mxu1  ;;  %v5921_v10 = vadd.f32 %v5920_v53, %v13688_v60 }
 0x1c4   : > { %v2129_v31 = vrot.slane %v2128_v30, 4  ;;  %6865 = vmatprep.subr.bf16.mxu1 %v12103_v22  ;;  %v10364_v6 = vld [vmem:[%s13047_s27 + $0xa8] sm:$0xf]  ;;  %v10365_v24 = vld [vmem:[%s13047_s27 + $0xac] sm:$0xf]  ;;  %6382 = vmatprep.mubr.bf16.mxu0 %v16596_v58  ;;  %v14324_v34 = vadd.f32 %v6111_v12, %v5919_v25  ;;  %v5922_v30 = vpop.f32.mrf.mxu0 }
 0x1c5   : > { %v2124_v54 = vsel %vm13093_vm2, %v2119_v48, %v2123_v38  ;;  %6866 = vmatpush2.bf16.msra.mxu1 %v12101_v49  ;;  %v12104_v8 = vld [vmem:[%s16543_s1 + $0x738] ss:$20 sps:$4 sm:$0xff]   ;;  %v2136_v59 = vshrl.u32 %v10364_v6, 16  ;;  %v2139_v7 = vshll.u32 %v10364_v6, 16  ;;  %v2145_v52 = vshll.u32 %v10365_v24, 16  ;;  %v6115_v45 = vpop.f32.mrf.mxu1 }
 0x1c6   : > { %v12057_v17 = vld [vmem:[#allocation2 + $0x260] ss:$36 sps:$4 sm:$0xff]   ;;  %v2134_v41 = vsel %vm13093_vm2, %v2129_v31, %v2133_v40  ;;  %2263 = vst [vmem:[#allocation2 + $0x380] sm:$0xf] %v2124_v54  ;;  %6867 = vmatprep.subr.bf16.mxu1 %v12106_v39  ;;  %v10366_v38 = vld [vmem:[%s13047_s27 + $0xb0] sm:$0x1]  ;;  %v5923_v12 = vadd.f32 %v5922_v30, %v13696_v9  ;;  %v14333_v48 = vadd.f32 %v6113_v57, %v5921_v10  ;;  %v5924_v53 = vpop.f32.mrf.mxu0 }
 0x1c7   : > { %v2149_v42 = vshrl.u32 %v10365_v24, 16  ;;  %v12550_v49 = vld [vmem:[#allocation2 + $0x240] ss:$36 sps:$4 sm:$0xff]   ;;  %2264 = vst [vmem:[#allocation2 + $0x3a4] sm:$0xf] %v2134_v41  ;;  %v2138_v22 = vrot.slane %v2136_v59, 4  ;;  %v6117_v25 = vpop.f32.mrf.mxu1  ;;  %v5925_v59 = vadd.f32 %v5924_v53, %v13702_v23 }
 0x1c8   : > { %v2141_v5 = vrot.slane %v2139_v7, 5  ;;  %v12108_v60 = vld [vmem:[%s16543_s1 + $0x418] ss:$20 sps:$4 sm:$0xff]   ;;  %v2147_v39 = vrot.slane %v2145_v52, 5  ;;  %v12110_v6 = vld [vmem:[%s16543_s1 + $0x41c] ss:$20 sps:$4 sm:$0xff]   ;;  %v14345_v7 = vadd.f32 %v6115_v45, %v5923_v12 }
 0x1c9   : > { %v12551_v40 = vld [vmem:[#allocation2 + $0x28c] ss:$36 sps:$4 sm:$0xff]   ;;  %v2151_v31 = vrot.slane %v2149_v42, 4  ;;  %6868 = vmatpush2.bf16.msra.mxu1 %v12104_v8  ;;  %v2155_v9 = vshll.u32 %v10366_v38, 16  ;;  %v12113_v57 = vld [vmem:[%s16543_s1 + $0x714] ss:$20 sps:$4 sm:$0xff]   ;;  %v6121_v52 = vpop.f32.mrf.mxu1  ;;  %6682 = vmatprep.subr.bf16.mxu0 %v12110_v6  ;;  %v5928_v42 = vpop.f32.mrf.mxu0 }
 0x1ca   : > { %6576 = vmatmul.mubr.bf16.gmra.mxu1 %v12550_v49  ;;  %v12111_v24 = vld [vmem:[%s16543_s1 + $0x710] ss:$20 sps:$4 sm:$0xff]   ;;  %v2142_v54 = vor.u32 %v2141_v5, %v2138_v22  ;;  %v12116_v41 = vld [vmem:[%s16543_s1 + $0x6ec] ss:$20 sps:$4 sm:$0xff]   ;;  %v10367_v8 = vld [vmem:[%s13047_s27 + $0xb4] sm:$0xf]  ;;  %6683 = vmatpush2.bf16.msra.mxu0 %v12108_v60  ;;  %v5929_v30 = vadd.f32 %v5928_v42, %v13708_v35  ;;  %v14356_v22 = vadd.f32 %v6117_v25, %v5925_v59 }
 0x1cb   : > { %6585 = vmatprep.mubr.bf16.mxu1 %v12551_v40  ;;  %v2152_v10 = vor.u32 %v2151_v31, %v2147_v39  ;;  %v2157_v38 = vrot.slane %v2155_v9, 5  ;;  %6869 = vmatprep.subr.bf16.mxu1 %v12113_v57  ;;  %v12114_v23 = vld [vmem:[%s16543_s1 + $0x6e8] ss:$20 sps:$4 sm:$0xff]   ;;  %v10368_v45 = vld [vmem:[%s13047_s27 + $0xb8] sm:$0xf]  ;;  %v6123_v5 = vpop.f32.mrf.mxu1  ;;  %v2160_v31 = vshrl.u32 %v10367_v8, 16  ;;  %v5930_v6 = vpop.f32.mrf.mxu0 }
 0x1cc   : > { %v2143_v49 = vrot.slane %v2142_v54, 4  ;;  %6383 = vmatmul.mubr.bf16.gmra.mxu0 %v12057_v17  ;;  %v10369_v40 = vld [vmem:[%s13047_s27 + $0xbc] sm:$0x1]  ;;  %v2163_v53 = vshll.u32 %v10367_v8, 16  ;;  %v2169_v54 = vshll.u32 %v10368_v45, 16  ;;  %v2173_v9 = vshrl.u32 %v10368_v45, 16 }
 0x1cd   : > { %v2153_v12 = vrot.slane %v2152_v10, 4  ;;  %6392 = vmatprep.mubr.bf16.mxu0 %v16596_v58  ;;  %6870 = vmatpush2.bf16.msra.mxu1 %v12111_v24  ;;  %v5931_v17 = vadd.f32 %v5930_v6, %v13717_v46  ;;  %v14363_v57 = vadd.f32 %v6121_v52, %v5929_v30  ;;  %v6125_v35 = vpop.f32.mrf.mxu1  ;;  %v2162_v59 = vrot.slane %v2160_v31, 4  ;;  %v12118_v10 = vld [vmem:[%s16543_s1 + $0x3f0] ss:$20 sps:$4 sm:$0xff]   ;;  %v5932_v24 = vpop.f32.mrf.mxu0 }
 0x1ce   : > { %v2148_v60 = vsel %vm13093_vm2, %v2143_v49, %v2147_v39  ;;  %6871 = vmatprep.subr.bf16.mxu1 %v12116_v41  ;;  %v12552_v39 = vld [vmem:[#allocation2 + $0x288] ss:$36 sps:$4 sm:$0xff]   ;;  %v2165_v8 = vrot.slane %v2163_v53, 5  ;;  %v2171_v42 = vrot.slane %v2169_v54, 5  ;;  %v2175_v46 = vrot.slane %v2173_v9, 4 }
 0x1cf   : > { %v2158_v25 = vsel %vm13093_vm2, %v2153_v12, %v2157_v38  ;;  %2265 = vst [vmem:[#allocation2 + $0x3c8] sm:$0xf] %v2148_v60  ;;  %v2179_v52 = vshll.u32 %v10369_v40, 16  ;;  %v12120_v49 = vld [vmem:[%s16543_s1 + $0x3f4] ss:$20 sps:$4 sm:$0xff]   ;;  %v5933_v41 = vadd.f32 %v5932_v24, %v13722_v56  ;;  %v14374_v45 = vadd.f32 %v6123_v5, %v5931_v17  ;;  %v6127_v30 = vpop.f32.mrf.mxu1  ;;  %v5934_v40 = vpop.f32.mrf.mxu0 }
 0x1d0   : > { %2266 = vst [vmem:[#allocation2 + $0x3ec] sm:$0xf] %v2158_v25  ;;  %v12067_v38 = vld [vmem:[#allocation2 + $0x2a8] ss:$36 sps:$4 sm:$0xff]   ;;  %v12553_v12 = vld [vmem:[#allocation2 + $0x2d4] ss:$36 sps:$4 sm:$0xff]   ;;  %v2166_v6 = vor.u32 %v2165_v8, %v2162_v59  ;;  %v2176_v60 = vor.u32 %v2175_v46, %v2171_v42  ;;  %6684 = vmatprep.subr.bf16.mxu0 %v12120_v49  ;;  %v5935_v54 = vadd.f32 %v5934_v40, %v13738_v13 }
 0x1d1   : > { %16607 = vst [vmem:[#allocation34_spill] sm:$0xff] %v14374_v45  ;;  %v12123_v31 = vld [vmem:[%s16543_s1 + $0x6c4] ss:$20 sps:$4 sm:$0xff]   ;;  %6872 = vmatpush2.bf16.msra.mxu1 %v12114_v23  ;;  %v2181_v53 = vrot.slane %v2179_v52, 5  ;;  %v12121_v56 = vld [vmem:[%s16543_s1 + $0x6c0] ss:$20 sps:$4 sm:$0xff]   ;;  %v14386_v9 = vadd.f32 %v6125_v35, %v5933_v41  ;;  %v6131_v17 = vpop.f32.mrf.mxu1  ;;  %6685 = vmatpush2.bf16.msra.mxu0 %v12118_v10 }
 0x1d2   : > { %6586 = vmatmul.mubr.bf16.gmra.mxu1 %v12552_v39  ;;  %v12126_v5 = vld [vmem:[%s16543_s1 + $0x69c] ss:$20 sps:$4 sm:$0xff]   ;;  %6873 = vmatprep.subr.bf16.mxu1 %v12123_v31  ;;  %v10370_v23 = vld [vmem:[%s13047_s27 + $0xc0] sm:$0xf]  ;;  %v10371_v25 = vld [vmem:[%s13047_s27 + $0xc4] sm:$0xf]  ;;  %v5938_v39 = vpop.f32.mrf.mxu0  ;;  %v14395_v35 = vadd.f32 %v6127_v30, %v5935_v54 }
 0x1d3   : > { %6595 = vmatprep.mubr.bf16.mxu1 %v12553_v12  ;;  %16608 = vst [vmem:[#allocation35_spill] sm:$0xff] %v14386_v9  ;;  %v10372_v59 = vld [vmem:[%s13047_s27 + $0xc8] sm:$0x1]  ;;  %v2167_v24 = vrot.slane %v2166_v6, 4  ;;  %v2177_v8 = vrot.slane %v2176_v60, 4  ;;  %v2184_v52 = vshrl.u32 %v10370_v23, 16  ;;  %v5939_v13 = vadd.f32 %v5938_v39, %v13747_v27  ;;  %v6133_v41 = vpop.f32.mrf.mxu1 }
 0x1d4   : > { %v12124_v46 = vld [vmem:[%s16543_s1 + $0x698] ss:$20 sps:$4 sm:$0xff]   ;;  %v2187_v49 = vshll.u32 %v10370_v23, 16  ;;  %6393 = vmatmul.mubr.bf16.gmra.mxu0 %v12067_v38  ;;  %16609 = vst [vmem:[#allocation36_spill] sm:$0xff] %v14395_v35  ;;  %v2193_v10 = vshll.u32 %v10371_v25, 16  ;;  %v2197_v12 = vshrl.u32 %v10371_v25, 16  ;;  %v5940_v6 = vpop.f32.mrf.mxu0 }
 0x1d5   : > { %v12128_v31 = vld [vmem:[%s16543_s1 + $0x3c8] ss:$20 sps:$4 sm:$0xff]   ;;  %v12130_v40 = vld [vmem:[%s16543_s1 + $0x3cc] ss:$20 sps:$4 sm:$0xff]   ;;  %6402 = vmatprep.mubr.bf16.mxu0 %v16596_v58  ;;  %v2172_v38 = vsel %vm13093_vm2, %v2167_v24, %v2171_v42  ;;  %v2182_v27 = vsel %vm13093_vm2, %v2177_v8, %v2181_v53  ;;  %6874 = vmatpush2.bf16.msra.mxu1 %v12121_v56  ;;  %v2186_v30 = vrot.slane %v2184_v52, 4  ;;  %v5941_v54 = vadd.f32 %v5940_v6, %v13757_v43  ;;  %v6135_v25 = vpop.f32.mrf.mxu1 }
 0x1d6   : > { %v2189_v60 = vrot.slane %v2187_v49, 5  ;;  %v14409_v23 = vadd.f32 %v6131_v17, %v5939_v13  ;;  %2267 = vst [vmem:[#allocation2 + $0x410] sm:$0xf] %v2172_v38  ;;  %2268 = vst [vmem:[#allocation2 + $0x434] sm:$0xf] %v2182_v27  ;;  %6875 = vmatprep.subr.bf16.mxu1 %v12126_v5  ;;  %v2195_v39 = vrot.slane %v2193_v10, 5  ;;  %6686 = vmatprep.subr.bf16.mxu0 %v12130_v40  ;;  %v5942_v42 = vpop.f32.mrf.mxu0 }
 0x1d7   : > { %v2199_v35 = vrot.slane %v2197_v12, 4  ;;  %v12554_v9 = vld [vmem:[#allocation2 + $0x2d0] ss:$36 sps:$4 sm:$0xff]   ;;  %v2203_v45 = vshll.u32 %v10372_v59, 16  ;;  %6687 = vmatpush2.bf16.msra.mxu0 %v12128_v31  ;;  %v5943_v56 = vadd.f32 %v5942_v42, %v13763_v51  ;;  %v14415_v17 = vadd.f32 %v6133_v41, %v5941_v54  ;;  %v6137_v8 = vpop.f32.mrf.mxu1  ;;  %v12555_v5 = vld [vmem:[#allocation2 + $0x31c] ss:$36 sps:$4 sm:$0xff]  }
 0x1d8   : > { %v2190_v24 = vor.u32 %v2189_v60, %v2186_v30  ;;  %v12133_v53 = vld [vmem:[%s16543_s1 + $0x674] ss:$20 sps:$4 sm:$0xff]   ;;  %v5944_v49 = vpop.f32.mrf.mxu0  ;;  %v12136_v10 = vld [vmem:[%s16543_s1 + $0x64c] ss:$20 sps:$4 sm:$0xff]  }
 0x1d9   : > { %v12077_v43 = vld [vmem:[#allocation2 + $0x2f0] ss:$36 sps:$4 sm:$0xff]   ;;  %v2200_v52 = vor.u32 %v2199_v35, %v2195_v39  ;;  %6876 = vmatpush2.bf16.msra.mxu1 %v12124_v46  ;;  %v2205_v13 = vrot.slane %v2203_v45, 5  ;;  %v5945_v51 = vadd.f32 %v5944_v49, %v13777_v2  ;;  %v14424_v41 = vadd.f32 %v6135_v25, %v5943_v56  ;;  %v6141_v12 = vpop.f32.mrf.mxu1  ;;  %v12139_v35 = vld [vmem:[%s16543_s1 + $0x8a4] ss:$20 sps:$4 sm:$0xff]  }
 0x1da   : > { %6596 = vmatmul.mubr.bf16.gmra.mxu1 %v12554_v9  ;;  %v12131_v9 = vld [vmem:[%s16543_s1 + $0x670] ss:$20 sps:$4 sm:$0xff]   ;;  %v2191_v59 = vrot.slane %v2190_v24, 4  ;;  %6877 = vmatprep.subr.bf16.mxu1 %v12133_v53  ;;  %v5948_v40 = vpop.f32.mrf.mxu0  ;;  %v12134_v30 = vld [vmem:[%s16543_s1 + $0x648] ss:$20 sps:$4 sm:$0xff]  }
 0x1db   : > { %6605 = vmatprep.mubr.bf16.mxu1 %v12555_v5  ;;  %v2201_v31 = vrot.slane %v2200_v52, 4  ;;  %v5949_v45 = vadd.f32 %v5948_v40, %v13786_v21  ;;  %v14432_v6 = vadd.f32 %v6137_v8, %v5945_v51  ;;  %v6143_v38 = vpop.f32.mrf.mxu1  ;;  %7042 = vmatprep.subr.bf16.mxu0 %v12139_v35  ;;  %v12556_v25 = vld [vmem:[#allocation2 + $0x318] ss:$36 sps:$4 sm:$0xff]  }
 0x1dc   : > { %v2196_v46 = vsel %vm13093_vm2, %v2191_v59, %v2195_v39  ;;  %6403 = vmatmul.mubr.bf16.gmra.mxu0 %v12077_v43  ;;  %v5950_v27 = vpop.f32.mrf.mxu0  ;;  %v12087_v39 = vld [vmem:[#allocation2 + $0x338] ss:$36 sps:$4 sm:$0xff]   ;;  %v12557_v43 = vld [vmem:[#allocation2 + $0x364] ss:$36 sps:$4 sm:$0xff]  }
 0x1dd   : > { %v2206_v2 = vsel %vm13093_vm2, %v2201_v31, %v2205_v13  ;;  %2269 = vst [vmem:[#allocation2 + $0x458] sm:$0xf] %v2196_v46  ;;  %6412 = vmatprep.mubr.bf16.mxu0 %v16596_v58  ;;  %6878 = vmatpush2.bf16.msra.mxu1 %v12131_v9  ;;  %v5951_v60 = vadd.f32 %v5950_v27, %v13789_v37  ;;  %v6145_v54 = vpop.f32.mrf.mxu1  ;;  %v12559_v46 = vld [vmem:[#allocation2 + $0x3ac] ss:$36 sps:$4 sm:$0xff]  }
 0x1de   : > { %2270 = vst [vmem:[#allocation2 + $0x47c] sm:$0xf] %v2206_v2  ;;  %v14441_v21 = vadd.f32 %v6141_v12, %v5949_v45  ;;  %6879 = vmatprep.subr.bf16.mxu1 %v12136_v10  ;;  %v5952_v14 = vpop.f32.mrf.mxu0  ;;  %v12097_v12 = vld [vmem:[#allocation2 + $0x380] ss:$36 sps:$4 sm:$0xff]  }
 0x1df   : > { %v5953_v42 = vadd.f32 %v5952_v14, %v13800_v50  ;;  %v14444_v24 = vadd.f32 %v6143_v38, %v5951_v60  ;;  %v6147_v53 = vpop.f32.mrf.mxu1  ;;  %v12166_v45 = vld [vmem:[%s16543_s1 + $0xb24] ss:$20 sps:$4 sm:$0xff]   ;;  %v12107_v14 = vld [vmem:[#allocation2 + $0x3c8] ss:$36 sps:$4 sm:$0xff]  }
 0x1e0   : > { %v5954_v56 = vpop.f32.mrf.mxu0 }
 0x1e1   : > { %6880 = vmatpush2.bf16.msra.mxu1 %v12134_v30  ;;  %v5955_v8 = vadd.f32 %v5954_v56, %v13803_v62  ;;  %v14447_v37 = vadd.f32 %v6145_v54, %v5953_v42  ;;  %v6151_v5 = vpop.f32.mrf.mxu1  ;;  %v12558_v62 = vld [vmem:[#allocation2 + $0x360] ss:$36 sps:$4 sm:$0xff]  }
 0x1e2   : > { %6606 = vmatmul.mubr.bf16.gmra.mxu1 %v12556_v25  ;;  %v5958_v52 = vpop.f32.mrf.mxu0  ;;  %7235 = vmatprep.subr.bf16.mxu1 %v12166_v45 }
 0x1e3   : > { %6615 = vmatprep.mubr.bf16.mxu1 %v12557_v43  ;;  %v5959_v9 = vadd.f32 %v5958_v52, %v13821_v19  ;;  %v14450_v49 = vadd.f32 %v6147_v53, %v5955_v8  ;;  %v6153_v59 = vpop.f32.mrf.mxu1  ;;  %v12560_v53 = vld [vmem:[#allocation2 + $0x3a8] ss:$36 sps:$4 sm:$0xff]  }
 0x1e4   : > { %6413 = vmatmul.mubr.bf16.gmra.mxu0 %v12087_v39  ;;  %v5960_v50 = vpop.f32.mrf.mxu0 }
 0x1e5   : > { %6422 = vmatprep.mubr.bf16.mxu0 %v16596_v58  ;;  %v5961_v13 = vadd.f32 %v5960_v50, %v13830_v36  ;;  %v14454_v10 = vadd.f32 %v6151_v5, %v5959_v9  ;;  %v6155_v51 = vpop.f32.mrf.mxu1  ;;  %v12561_v5 = vld [vmem:[#allocation2 + $0x3f4] ss:$36 sps:$4 sm:$0xff]  }
 0x1e6   : > { %v5962_v31 = vpop.f32.mrf.mxu0 }
 0x1e7   : > { %v5963_v35 = vadd.f32 %v5962_v31, %v13833_v47  ;;  %v14457_v40 = vadd.f32 %v6153_v59, %v5961_v13  ;;  %v6157_v19 = vpop.f32.mrf.mxu1 }
 0x1e8   : > { %v5964_v38 = vpop.f32.mrf.mxu0 }
 0x1e9   : > { %v5965_v36 = vadd.f32 %v5964_v38, %v13840_v3  ;;  %v14463_v2 = vadd.f32 %v6155_v51, %v5963_v35  ;;  %v6161_v27 = vpop.f32.mrf.mxu1 }
 0x1ea   : > { %6616 = vmatmul.mubr.bf16.gmra.mxu1 %v12558_v62  ;;  %v5968_v30 = vpop.f32.mrf.mxu0 }
 0x1eb   : > { %6625 = vmatprep.mubr.bf16.mxu1 %v12559_v46  ;;  %v5969_v47 = vadd.f32 %v5968_v30, %v13849_v16  ;;  %v14466_v60 = vadd.f32 %v6157_v19, %v5965_v36  ;;  %v6163_v54 = vpop.f32.mrf.mxu1  ;;  %v12562_v19 = vld [vmem:[#allocation2 + $0x3f0] ss:$36 sps:$4 sm:$0xff]   ;;  %v12563_v36 = vld [vmem:[#allocation2 + $0x43c] ss:$36 sps:$4 sm:$0xff]  }
 0x1ec   : > { %6423 = vmatmul.mubr.bf16.gmra.mxu0 %v12097_v12  ;;  %v5970_v25 = vpop.f32.mrf.mxu0  ;;  %v12117_v46 = vld [vmem:[#allocation2 + $0x410] ss:$36 sps:$4 sm:$0xff]   ;;  %v16610_v30 = vld [vmem:[#allocation7_spill] sm:$0xff] }
 0x1ed   : > { %6432 = vmatprep.mubr.bf16.mxu0 %v16596_v58  ;;  %v5971_v39 = vadd.f32 %v5970_v25, %v13864_v33  ;;  %v14470_v42 = vadd.f32 %v6161_v27, %v5969_v47  ;;  %v6165_v3 = vpop.f32.mrf.mxu1 }
 0x1ee   : > { %v5972_v43 = vpop.f32.mrf.mxu0 }
 0x1ef   : > { %v5973_v56 = vadd.f32 %v5972_v43, %v13873_v61  ;;  %v14473_v8 = vadd.f32 %v6163_v54, %v5971_v39  ;;  %v6167_v16 = vpop.f32.mrf.mxu1  ;;  %v16612_v43 = vld [vmem:[#allocation9_spill] sm:$0xff] }
 0x1f0   : > { %v5974_v52 = vpop.f32.mrf.mxu0 }
 0x1f1   : > { %v5975_v9 = vadd.f32 %v5974_v52, %v13876_v11  ;;  %v14476_v59 = vadd.f32 %v6165_v3, %v5973_v56  ;;  %v6171_v50 = vpop.f32.mrf.mxu1  ;;  %v12564_v52 = vld [vmem:[#allocation2 + $0x438] ss:$36 sps:$4 sm:$0xff]  }
 0x1f2   : > { %6626 = vmatmul.mubr.bf16.gmra.mxu1 %v12560_v53  ;;  %v5978_v33 = vpop.f32.mrf.mxu0 }
 0x1f3   : > { %6635 = vmatprep.mubr.bf16.mxu1 %v12561_v5  ;;  %v5979_v13 = vadd.f32 %v5978_v33, %v13886_v26  ;;  %v14479_v51 = vadd.f32 %v6167_v16, %v5975_v9  ;;  %v6173_v12 = vpop.f32.mrf.mxu1  ;;  %v16613_v33 = vld [vmem:[#allocation10_spill] sm:$0xff] }
 0x1f4   : > { %6433 = vmatmul.mubr.bf16.gmra.mxu0 %v12107_v14  ;;  %v5980_v61 = vpop.f32.mrf.mxu0  ;;  %v16611_v14 = vld [vmem:[#allocation8_spill] sm:$0xff] }
 0x1f5   : > { %6442 = vmatprep.mubr.bf16.mxu0 %v16596_v58  ;;  %v5981_v62 = vadd.f32 %v5980_v61, %v13889_v44  ;;  %v14483_v31 = vadd.f32 %v6171_v50, %v5979_v13  ;;  %v6175_v35 = vpop.f32.mrf.mxu1  ;;  %v12127_v50 = vld [vmem:[#allocation2 + $0x458] ss:$36 sps:$4 sm:$0xff]  }
 0x1f6   : > { %v5982_v11 = vpop.f32.mrf.mxu0 }
 0x1f7   : > { %v5983_v45 = vadd.f32 %v5982_v11, %v13903_v0  ;;  %v14486_v38 = vadd.f32 %v6173_v12, %v5981_v62  ;;  %v6177_v26 = vpop.f32.mrf.mxu1  ;;  %v12565_v62 = vld [vmem:[#allocation2 + $0x14] ss:$36 sps:$4 sm:$0xff]  }
 0x1f8   : > { %v5984_v27 = vpop.f32.mrf.mxu0 }
 0x1f9   : > { %v5985_v47 = vadd.f32 %v5984_v27, %v16610_v30  ;;  %v14489_v54 = vadd.f32 %v6175_v35, %v5983_v45  ;;  %v6181_v44 = vpop.f32.mrf.mxu1 }
 0x1fa   : > { %6636 = vmatmul.mubr.bf16.gmra.mxu1 %v12562_v19  ;;  %v5988_v25 = vpop.f32.mrf.mxu0  ;;  %v16614_v19 = vld [vmem:[#allocation11_spill] sm:$0xff] }
 0x1fb   : > { %6645 = vmatprep.mubr.bf16.mxu1 %v12563_v36  ;;  %v5989_v39 = vadd.f32 %v5988_v25, %v16611_v14  ;;  %v14492_v3 = vadd.f32 %v6177_v26, %v5985_v47  ;;  %v6183_v53 = vpop.f32.mrf.mxu1  ;;  %v16615_v36 = vld [vmem:[#allocation12_spill] sm:$0xff]  ;;  %v12566_v25 = vld [vmem:[#allocation2 + $0xc] ss:$36 sps:$4 sm:$0xff]  }
 0x1fc   : > { %6443 = vmatmul.mubr.bf16.gmra.mxu0 %v12117_v46  ;;  %v5990_v0 = vpop.f32.mrf.mxu0 }
 0x1fd   : > { %6452 = vmatprep.mubr.bf16.mxu0 %v16596_v58  ;;  %v5991_v56 = vadd.f32 %v5990_v0, %v16612_v43  ;;  %v14496_v16 = vadd.f32 %v6181_v44, %v5989_v39  ;;  %v6185_v5 = vpop.f32.mrf.mxu1  ;;  %v12164_v44 = vld [vmem:[%s16543_s1 + $0xb20] ss:$20 sps:$4 sm:$0xff]   ;;  %v12175_v39 = vld [vmem:[%s16543_s1 + $0xafc] ss:$20 sps:$4 sm:$0xff]  }
 0x1fe   : > { %v5992_v9 = vpop.f32.mrf.mxu0 }
 0x1ff   : > { %v5993_v13 = vadd.f32 %v5992_v9, %v16613_v33  ;;  %v14499_v12 = vadd.f32 %v6183_v53, %v5991_v56  ;;  %v6187_v61 = vpop.f32.mrf.mxu1  ;;  %v16616_v53 = vld [vmem:[#allocation13_spill] sm:$0xff] }
 0x200   : > { %v5994_v35 = vpop.f32.mrf.mxu0 }
 0x201   : > { %v5995_v11 = vadd.f32 %v5994_v35, %v16614_v19  ;;  %v14502_v46 = vadd.f32 %v6185_v5, %v5993_v13  ;;  %v6191_v45 = vpop.f32.mrf.mxu1  ;;  %v12137_v5 = vld [vmem:[%s16543_s1 + $0x8a0] ss:$20 sps:$4 sm:$0xff]   ;;  %v12173_v19 = vld [vmem:[%s16543_s1 + $0xaf8] ss:$20 sps:$4 sm:$0xff]  }
 0x202   : > { %6646 = vmatmul.mubr.bf16.gmra.mxu1 %v12564_v52  ;;  %v5998_v26 = vpop.f32.mrf.mxu0  ;;  %v12567_v52 = vld [vmem:[#allocation2 + $0x10] ss:$36 sps:$4 sm:$0xff]   ;;  %v12568_v35 = vld [vmem:[#allocation2 + $0x5c] ss:$36 sps:$4 sm:$0xff]  }
 0x203   : > { %6881 = vmatprep.mubr.bf16.mxu1 %v12565_v62  ;;  %v5999_v27 = vadd.f32 %v5998_v26, %v16615_v36  ;;  %v14505_v30 = vadd.f32 %v6187_v61, %v5995_v11  ;;  %v6193_v47 = vpop.f32.mrf.mxu1  ;;  %v12142_v62 = vld [vmem:[%s16543_s1 + $0x87c] ss:$20 sps:$4 sm:$0xff]  }
 0x204   : > { %6453 = vmatmul.mubr.bf16.gmra.mxu0 %v12127_v50  ;;  %v6000_v14 = vpop.f32.mrf.mxu0  ;;  %v16617_v50 = vld [vmem:[#allocation14_spill] sm:$0xff]  ;;  %v16619_v26 = vld [vmem:[#allocation15_spill] sm:$0xff] }
 0x205   : > { %6688 = vmatprep.mubr.bf16.mxu0 %v12566_v25  ;;  %v6001_v0 = vadd.f32 %v6000_v14, %v16616_v53  ;;  %v14514_v43 = vadd.f32 %v6191_v45, %v5999_v27  ;;  %v6195_v56 = vpop.f32.mrf.mxu1  ;;  %v12184_v45 = vld [vmem:[%s16543_s1 + $0xad4] ss:$20 sps:$4 sm:$0xff]   ;;  %v12182_v25 = vld [vmem:[%s16543_s1 + $0xad0] ss:$20 sps:$4 sm:$0xff]   ;;  %v12140_v14 = vld [vmem:[%s16543_s1 + $0x878] ss:$20 sps:$4 sm:$0xff]  }
 0x206   : > { %v6002_v9 = vpop.f32.mrf.mxu0  ;;  %v12569_v53 = vld [vmem:[#allocation2 + $0x8] ss:$36 sps:$4 sm:$0xff]  }
 0x207   : > { %v6003_v33 = vadd.f32 %v6002_v9, %v16617_v50  ;;  %v14520_v13 = vadd.f32 %v6193_v47, %v6001_v0  ;;  %v6197_v61 = vpop.f32.mrf.mxu1  ;;  %v16621_v0 = vld [vmem:[#allocation16_spill] sm:$0xff] }
 0x208   : > { %v6004_v11 = vpop.f32.mrf.mxu0  ;;  %v12145_v50 = vld [vmem:[%s16543_s1 + $0x854] ss:$20 sps:$4 sm:$0xff]  }
 0x209   : > { %16618 = vst [vmem:[#allocation7_spill] sm:$0xff] %v14520_v13  ;;  %v6005_v36 = vadd.f32 %v6004_v11, %v16619_v26  ;;  %v14532_v27 = vadd.f32 %v6195_v56, %v6003_v33  ;;  %v6201_v47 = vpop.f32.mrf.mxu1  ;;  %v12570_v33 = vld [vmem:[#allocation2 + $0x54] ss:$36 sps:$4 sm:$0xff]   ;;  %v16623_v11 = vld [vmem:[#allocation17_spill] sm:$0xff] }
 0x20a   : > { %6882 = vmatmul.mubr.bf16.vlgmr.msra.gmra.mxu1 %v12567_v52 }
 0x20b   : > { %6891 = vmatprep.mubr.bf16.mxu1 %v12568_v35  ;;  %7236 = vmatpush1.bf16.msra.mxu1 %v12164_v44  ;;  %16620 = vst [vmem:[#allocation8_spill] sm:$0xff] %v14532_v27  ;;  %v6008_v44 = vpop.f32.mrf.mxu0  ;;  %v14544_v56 = vadd.f32 %v6197_v61, %v6005_v36  ;;  %v6203_v9 = vpop.f32.mrf.mxu1  ;;  %v12188_v61 = vld [vmem:[%s16543_s1 + $0xaa8] ss:$20 sps:$4 sm:$0xff]  }
 0x20c   : > { %7237 = vmatprep.subr.bf16.mxu1 %v12175_v39  ;;  %v12190_v39 = vld [vmem:[%s16543_s1 + $0xaac] ss:$20 sps:$4 sm:$0xff]   ;;  %6689 = vmatmul.mubr.bf16.vlgmr.msra.gmra.mxu0 %v12569_v53  ;;  %v6009_v52 = vadd.f32 %v6008_v44, %v16621_v0  ;;  %v12571_v36 = vld [vmem:[#allocation2 + $0x58] ss:$36 sps:$4 sm:$0xff]  }
 0x20d   : > { %16622 = vst [vmem:[#allocation9_spill] sm:$0xff] %v14544_v56  ;;  %7043 = vmatpush1.bf16.msra.mxu0 %v12137_v5  ;;  %6698 = vmatprep.mubr.bf16.mxu0 %v12570_v33  ;;  %v6010_v35 = vpop.f32.mrf.mxu0  ;;  %v6205_v53 = vpop.f32.mrf.mxu1  ;;  %v12143_v5 = vld [vmem:[%s16543_s1 + $0x850] ss:$20 sps:$4 sm:$0xff]  }
 0x20e   : > { %7044 = vmatprep.subr.bf16.mxu0 %v12142_v62  ;;  %v6011_v26 = vadd.f32 %v6010_v35, %v16623_v11  ;;  %v14550_v27 = vadd.f32 %v6201_v47, %v6009_v52  ;;  %v12572_v47 = vld [vmem:[#allocation2 + $0xa4] ss:$36 sps:$4 sm:$0xff]   ;;  %v12148_v52 = vld [vmem:[%s16543_s1 + $0x82c] ss:$20 sps:$4 sm:$0xff]  }
 0x20f   : > { %7238 = vmatpush1.bf16.msra.mxu1 %v12173_v19  ;;  %v6012_v44 = vpop.f32.mrf.mxu0  ;;  %v16625_v19 = vld [vmem:[#allocation18_spill] sm:$0xff]  ;;  %v6207_v33 = vpop.f32.mrf.mxu1  ;;  %v16627_v11 = vld [vmem:[#allocation19_spill] sm:$0xff] }
 0x210   : > { %16624 = vst [vmem:[#allocation10_spill] sm:$0xff] %v14550_v27  ;;  %7239 = vmatprep.subr.bf16.mxu1 %v12184_v45  ;;  %v6013_v0 = vadd.f32 %v6012_v44, %v16625_v19  ;;  %v14559_v62 = vadd.f32 %v6203_v9, %v6011_v26  ;;  %v12196_v35 = vld [vmem:[%s16543_s1 + $0xa84] ss:$20 sps:$4 sm:$0xff]   ;;  %v12146_v26 = vld [vmem:[%s16543_s1 + $0x828] ss:$20 sps:$4 sm:$0xff]  }
 0x211   : > { %7045 = vmatpush1.bf16.msra.mxu0 %v12140_v14  ;;  %v6014_v45 = vpop.f32.mrf.mxu0  ;;  %v6211_v9 = vpop.f32.mrf.mxu1  ;;  %v12573_v19 = vld [vmem:[#allocation2 + $0x50] ss:$36 sps:$4 sm:$0xff]  }
 0x212   : > { %6892 = vmatmul.mubr.bf16.gmra.mxu1 %v12571_v36  ;;  %16626 = vst [vmem:[#allocation11_spill] sm:$0xff] %v14559_v62  ;;  %v6015_v36 = vadd.f32 %v6014_v45, %v16627_v11  ;;  %v14568_v44 = vadd.f32 %v6205_v53, %v6013_v0  ;;  %7046 = vmatprep.subr.bf16.mxu0 %v12145_v50  ;;  %v12151_v45 = vld [vmem:[%s16543_s1 + $0x804] ss:$20 sps:$4 sm:$0xff]   ;;  %v12574_v11 = vld [vmem:[#allocation2 + $0x9c] ss:$36 sps:$4 sm:$0xff]   ;;  %v16630_v62 = vld [vmem:[#allocation21_spill] sm:$0xff] }
 0x213   : > { %6901 = vmatprep.mubr.bf16.mxu1 %v12572_v47  ;;  %7240 = vmatpush1.bf16.msra.mxu1 %v12182_v25  ;;  %v12194_v25 = vld [vmem:[%s16543_s1 + $0xa80] ss:$20 sps:$4 sm:$0xff]   ;;  %v6018_v14 = vpop.f32.mrf.mxu0  ;;  %v6213_v50 = vpop.f32.mrf.mxu1 }
 0x214   : > { %7241 = vmatprep.subr.bf16.mxu1 %v12190_v39  ;;  %16628 = vst [vmem:[#allocation12_spill] sm:$0xff] %v14568_v44  ;;  %v12199_v39 = vld [vmem:[%s16543_s1 + $0xa5c] ss:$20 sps:$4 sm:$0xff]   ;;  %6699 = vmatmul.mubr.bf16.gmra.mxu0 %v12573_v19  ;;  %v16629_v47 = vld [vmem:[#allocation20_spill] sm:$0xff]  ;;  %v14580_v0 = vadd.f32 %v6207_v33, %v6015_v36  ;;  %v12197_v33 = vld [vmem:[%s16543_s1 + $0xa58] ss:$20 sps:$4 sm:$0xff]  }
 0x215   : > { %v6019_v53 = vadd.f32 %v6018_v14, %v16629_v47  ;;  %6708 = vmatprep.mubr.bf16.mxu0 %v12574_v11  ;;  %7047 = vmatpush1.bf16.msra.mxu0 %v12143_v5  ;;  %v6020_v44 = vpop.f32.mrf.mxu0  ;;  %v6215_v13 = vpop.f32.mrf.mxu1  ;;  %v12575_v36 = vld [vmem:[#allocation2 + $0xa0] ss:$36 sps:$4 sm:$0xff]   ;;  %v16632_v5 = vld [vmem:[#allocation22_spill] sm:$0xff] }
 0x216   : > { %v6021_v27 = vadd.f32 %v6020_v44, %v16630_v62  ;;  %7048 = vmatprep.subr.bf16.mxu0 %v12148_v52  ;;  %v12576_v44 = vld [vmem:[#allocation2 + $0xec] ss:$36 sps:$4 sm:$0xff]  }
 0x217   : > { %7242 = vmatpush1.bf16.msra.mxu1 %v12188_v61  ;;  %v14586_v56 = vadd.f32 %v6211_v9, %v6019_v53  ;;  %v6022_v14 = vpop.f32.mrf.mxu0  ;;  %v12149_v61 = vld [vmem:[%s16543_s1 + $0x800] ss:$20 sps:$4 sm:$0xff]   ;;  %v6217_v62 = vpop.f32.mrf.mxu1  ;;  %v12154_v52 = vld [vmem:[%s16543_s1 + $0x7dc] ss:$20 sps:$4 sm:$0xff]  }
 0x218   : > { %7243 = vmatprep.subr.bf16.mxu1 %v12196_v35  ;;  %v6023_v19 = vadd.f32 %v6022_v14, %v16632_v5  ;;  %v14595_v47 = vadd.f32 %v6213_v50, %v6021_v27  ;;  %v12205_v35 = vld [vmem:[%s16543_s1 + $0xa34] ss:$20 sps:$4 sm:$0xff]   ;;  %v16634_v53 = vld [vmem:[#allocation23_spill] sm:$0xff]  ;;  %v12203_v50 = vld [vmem:[%s16543_s1 + $0xa30] ss:$20 sps:$4 sm:$0xff]  }
 0x219   : > { %16631 = vst [vmem:[#allocation13_spill] sm:$0xff] %v14586_v56  ;;  %v6024_v9 = vpop.f32.mrf.mxu0  ;;  %7049 = vmatpush1.bf16.msra.mxu0 %v12146_v26  ;;  %v6221_v27 = vpop.f32.mrf.mxu1  ;;  %v12208_v14 = vld [vmem:[%s16543_s1 + $0xa0c] ss:$20 sps:$4 sm:$0xff]   ;;  %v12577_v26 = vld [vmem:[#allocation2 + $0x98] ss:$36 sps:$4 sm:$0xff]  }
 0x21a   : > { %6902 = vmatmul.mubr.bf16.gmra.mxu1 %v12575_v36  ;;  %16633 = vst [vmem:[#allocation14_spill] sm:$0xff] %v14595_v47  ;;  %v6025_v11 = vadd.f32 %v6024_v9, %v16634_v53  ;;  %v14604_v36 = vadd.f32 %v6215_v13, %v6023_v19  ;;  %7050 = vmatprep.subr.bf16.mxu0 %v12151_v45  ;;  %v12157_v45 = vld [vmem:[%s16543_s1 + $0x7b4] ss:$20 sps:$4 sm:$0xff]  }
 0x21b   : > { %6911 = vmatprep.mubr.bf16.mxu1 %v12576_v44  ;;  %7244 = vmatpush1.bf16.msra.mxu1 %v12194_v25  ;;  %v12152_v25 = vld [vmem:[%s16543_s1 + $0x7d8] ss:$20 sps:$4 sm:$0xff]   ;;  %v6223_v13 = vpop.f32.mrf.mxu1  ;;  %v12578_v19 = vld [vmem:[#allocation2 + $0xe4] ss:$36 sps:$4 sm:$0xff]  }
 0x21c   : > { %7245 = vmatprep.subr.bf16.mxu1 %v12199_v39  ;;  %16635 = vst [vmem:[#allocation15_spill] sm:$0xff] %v14604_v36  ;;  %6709 = vmatmul.mubr.bf16.gmra.mxu0 %v12577_v26  ;;  %v6028_v39 = vpop.f32.mrf.mxu0  ;;  %v14615_v5 = vadd.f32 %v6217_v62, %v6025_v11  ;;  %v16637_v44 = vld [vmem:[#allocation24_spill] sm:$0xff]  ;;  %v16638_v11 = vld [vmem:[#allocation25_spill] sm:$0xff] }
 0x21d   : > { %6718 = vmatprep.mubr.bf16.mxu0 %v12578_v19  ;;  %v6029_v9 = vadd.f32 %v6028_v39, %v16637_v44  ;;  %7051 = vmatpush1.bf16.msra.mxu0 %v12149_v61  ;;  %v6225_v36 = vpop.f32.mrf.mxu1  ;;  %v12206_v62 = vld [vmem:[%s16543_s1 + $0xa08] ss:$20 sps:$4 sm:$0xff]   ;;  %v12580_v19 = vld [vmem:[#allocation2 + $0x134] ss:$36 sps:$4 sm:$0xff]  }
 0x21e   : > { %16636 = vst [vmem:[#allocation16_spill] sm:$0xff] %v14615_v5  ;;  %v6030_v53 = vpop.f32.mrf.mxu0  ;;  %7052 = vmatprep.subr.bf16.mxu0 %v12154_v52  ;;  %v12579_v47 = vld [vmem:[#allocation2 + $0xe8] ss:$36 sps:$4 sm:$0xff]   ;;  %v16639_v61 = vld [vmem:[#allocation26_spill] sm:$0xff] }
 0x21f   : > { %7246 = vmatpush1.bf16.msra.mxu1 %v12197_v33  ;;  %v6031_v26 = vadd.f32 %v6030_v53, %v16638_v11  ;;  %v14625_v5 = vadd.f32 %v6221_v27, %v6029_v9  ;;  %v6227_v56 = vpop.f32.mrf.mxu1  ;;  %v12155_v52 = vld [vmem:[%s16543_s1 + $0x7b0] ss:$20 sps:$4 sm:$0xff]   ;;  %v16641_v27 = vld [vmem:[#allocation27_spill] sm:$0xff] }
 0x220   : > { %7247 = vmatprep.subr.bf16.mxu1 %v12205_v35  ;;  %v6032_v33 = vpop.f32.mrf.mxu0  ;;  %v12160_v35 = vld [vmem:[%s16543_s1 + $0x78c] ss:$20 sps:$4 sm:$0xff]   ;;  %v12163_v11 = vld [vmem:[%s16543_s1 + $0x9e4] ss:$20 sps:$4 sm:$0xff]  }
 0x221   : > { %v6033_v39 = vadd.f32 %v6032_v33, %v16639_v61  ;;  %v14628_v44 = vadd.f32 %v6223_v13, %v6031_v26  ;;  %7053 = vmatpush1.bf16.msra.mxu0 %v12152_v25  ;;  %v12158_v25 = vld [vmem:[%s16543_s1 + $0x788] ss:$20 sps:$4 sm:$0xff]   ;;  %v12581_v13 = vld [vmem:[#allocation2 + $0xe0] ss:$36 sps:$4 sm:$0xff]   ;;  %v12582_v26 = vld [vmem:[#allocation2 + $0x12c] ss:$36 sps:$4 sm:$0xff]  }
 0x222   : > { %6912 = vmatmul.mubr.bf16.gmra.mxu1 %v12579_v47  ;;  %v6034_v47 = vpop.f32.mrf.mxu0  ;;  %7054 = vmatprep.subr.bf16.mxu0 %v12157_v45  ;;  %v16644_v33 = vld [vmem:[#allocation28_spill] sm:$0xff]  ;;  %v12583_v61 = vld [vmem:[#allocation2 + $0x130] ss:$36 sps:$4 sm:$0xff]  }
 0x223   : > { %6921 = vmatprep.mubr.bf16.mxu1 %v12580_v19  ;;  %7248 = vmatpush1.bf16.msra.mxu1 %v12203_v50  ;;  %16640 = vst [vmem:[#allocation17_spill] sm:$0xff] %v14628_v44  ;;  %v6035_v9 = vadd.f32 %v6034_v47, %v16641_v27  ;;  %v14637_v53 = vadd.f32 %v6225_v36, %v6033_v39  ;;  %v6231_v50 = vpop.f32.mrf.mxu1  ;;  %v12161_v47 = vld [vmem:[%s16543_s1 + $0x9e0] ss:$20 sps:$4 sm:$0xff]  }
 0x224   : > { %7249 = vmatprep.subr.bf16.mxu1 %v12208_v14  ;;  %6719 = vmatmul.mubr.bf16.gmra.mxu0 %v12581_v13  ;;  %v6038_v36 = vpop.f32.mrf.mxu0  ;;  %v12584_v13 = vld [vmem:[#allocation2 + $0x17c] ss:$36 sps:$4 sm:$0xff]  }
 0x225   : > { %16642 = vst [vmem:[#allocation18_spill] sm:$0xff] %v14637_v53  ;;  %6728 = vmatprep.mubr.bf16.mxu0 %v12582_v26  ;;  %v14645_v14 = vadd.f32 %v6227_v56, %v6035_v9  ;;  %v6233_v45 = vpop.f32.mrf.mxu1  ;;  %7055 = vmatpush1.bf16.msra.mxu0 %v12155_v52  ;;  %v6039_v19 = vadd.f32 %v6038_v36, %v16644_v33  ;;  %v12169_v56 = vld [vmem:[%s16543_s1 + $0x9bc] ss:$20 sps:$4 sm:$0xff]  }
 0x226   : > { %7056 = vmatprep.subr.bf16.mxu0 %v12160_v35  ;;  %v6040_v27 = vpop.f32.mrf.mxu0  ;;  %v16646_v36 = vld [vmem:[#allocation30_spill] sm:$0xff] }
 0x227   : > { %7250 = vmatpush1.bf16.msra.mxu1 %v12206_v62  ;;  %16643 = vst [vmem:[#allocation19_spill] sm:$0xff] %v14645_v14  ;;  %v6235_v39 = vpop.f32.mrf.mxu1  ;;  %v16645_v62 = vld [vmem:[#allocation29_spill] sm:$0xff]  ;;  %v14655_v9 = vadd.f32 %v6231_v50, %v6039_v19  ;;  %v16647_v19 = vld [vmem:[#allocation31_spill] sm:$0xff] }
 0x228   : > { %v6041_v52 = vadd.f32 %v6040_v27, %v16645_v62  ;;  %v6042_v26 = vpop.f32.mrf.mxu0  ;;  %v12585_v14 = vld [vmem:[#allocation2 + $0x128] ss:$36 sps:$4 sm:$0xff]  }
 0x229   : > { %v6237_v35 = vpop.f32.mrf.mxu1  ;;  %7057 = vmatpush1.bf16.msra.mxu0 %v12158_v25  ;;  %v6043_v33 = vadd.f32 %v6042_v26, %v16646_v36  ;;  %v12172_v50 = vld [vmem:[%s16543_s1 + $0x994] ss:$20 sps:$4 sm:$0xff]  }
 0x22a   : > { %6922 = vmatmul.mubr.bf16.gmra.mxu1 %v12583_v61  ;;  %7058 = vmatprep.subr.bf16.mxu0 %v12163_v11  ;;  %v14658_v61 = vadd.f32 %v6233_v45, %v6041_v52  ;;  %v6044_v53 = vpop.f32.mrf.mxu0  ;;  %v12586_v11 = vld [vmem:[#allocation2 + $0x174] ss:$36 sps:$4 sm:$0xff]   ;;  %v12588_v26 = vld [vmem:[#allocation2 + $0x1c4] ss:$36 sps:$4 sm:$0xff]  }
 0x22b   : > { %6931 = vmatprep.mubr.bf16.mxu1 %v12584_v13  ;;  %v12167_v13 = vld [vmem:[%s16543_s1 + $0x9b8] ss:$20 sps:$4 sm:$0xff]   ;;  %v6241_v44 = vpop.f32.mrf.mxu1  ;;  %v6045_v25 = vadd.f32 %v6044_v53, %v16647_v19  ;;  %v14667_v27 = vadd.f32 %v6235_v39, %v6043_v33  ;;  %v12170_v53 = vld [vmem:[%s16543_s1 + $0x990] ss:$20 sps:$4 sm:$0xff]   ;;  %v12176_v19 = vld [vmem:[%s16543_s1 + $0x968] ss:$20 sps:$4 sm:$0xff]  }
 0x22c   : > { %6729 = vmatmul.mubr.bf16.gmra.mxu0 %v12585_v14  ;;  %v12587_v52 = vld [vmem:[#allocation2 + $0x178] ss:$36 sps:$4 sm:$0xff]   ;;  %v6048_v36 = vpop.f32.mrf.mxu0  ;;  %v12178_v39 = vld [vmem:[%s16543_s1 + $0x96c] ss:$20 sps:$4 sm:$0xff]  }
 0x22d   : > { %16648 = vst [vmem:[#allocation20_spill] sm:$0xff] %v14667_v27  ;;  %6738 = vmatprep.mubr.bf16.mxu0 %v12586_v11  ;;  %7059 = vmatpush2.bf16.msra.mxu0 %v12161_v47  ;;  %v6243_v45 = vpop.f32.mrf.mxu1  ;;  %v14669_v62 = vadd.f32 %v6237_v35, %v6045_v25  ;;  %v16650_v47 = vld [vmem:[#allocation32_spill] sm:$0xff]  ;;  %v12589_v25 = vld [vmem:[#allocation2 + $0x170] ss:$36 sps:$4 sm:$0xff]  }
 0x22e   : > { %7060 = vmatprep.subr.bf16.mxu0 %v12169_v56  ;;  %v6049_v33 = vadd.f32 %v6048_v36, %v16650_v47  ;;  %v6050_v56 = vpop.f32.mrf.mxu0 }
 0x22f   : > { %16649 = vst [vmem:[#allocation21_spill] sm:$0xff] %v14669_v62  ;;  %v6245_v14 = vpop.f32.mrf.mxu1  ;;  %v12590_v62 = vld [vmem:[#allocation2 + $0x1bc] ss:$36 sps:$4 sm:$0xff]  }
 0x230   : > { %v14682_v11 = vadd.f32 %v6241_v44, %v6049_v33  ;;  %v16652_v44 = vld [vmem:[#allocation33_spill] sm:$0xff] }
 0x231   : > { %7061 = vmatpush2.bf16.msra.mxu0 %v12167_v13  ;;  %v6247_v35 = vpop.f32.mrf.mxu1  ;;  %v6051_v13 = vadd.f32 %v6050_v56, %v14178_v29  ;;  %v12179_v29 = vld [vmem:[%s16543_s1 + $0x940] ss:$20 sps:$4 sm:$0xff]  }
 0x232   : > { %6932 = vmatmul.mubr.bf16.gmra.mxu1 %v12587_v52  ;;  %7062 = vmatprep.subr.bf16.mxu0 %v12172_v50  ;;  %16651 = vst [vmem:[#allocation22_spill] sm:$0xff] %v14682_v11  ;;  %v12181_v52 = vld [vmem:[%s16543_s1 + $0x944] ss:$20 sps:$4 sm:$0xff]   ;;  %v12592_v11 = vld [vmem:[#allocation2 + $0x20c] ss:$36 sps:$4 sm:$0xff]  }
 0x233   : > { %6941 = vmatprep.mubr.bf16.mxu1 %v12588_v26  ;;  %v6052_v26 = vpop.f32.mrf.mxu0  ;;  %v14688_v36 = vadd.f32 %v6243_v45, %v6051_v13  ;;  %v12185_v13 = vld [vmem:[%s16543_s1 + $0x918] ss:$20 sps:$4 sm:$0xff]  }
 0x234   : > { %6739 = vmatmul.mubr.bf16.gmra.mxu0 %v12589_v25  ;;  %v6053_v50 = vadd.f32 %v6052_v26, %v14196_v15  ;;  %v6251_v27 = vpop.f32.mrf.mxu1  ;;  %v12591_v25 = vld [vmem:[#allocation2 + $0x1c0] ss:$36 sps:$4 sm:$0xff]   ;;  %v12187_v15 = vld [vmem:[%s16543_s1 + $0x91c] ss:$20 sps:$4 sm:$0xff]  }
 0x235   : > { %6748 = vmatprep.mubr.bf16.mxu0 %v12590_v62  ;;  %7063 = vmatpush2.bf16.msra.mxu0 %v12170_v53  ;;  %v6054_v47 = vpop.f32.mrf.mxu0  ;;  %v12593_v26 = vld [vmem:[#allocation2 + $0x1b8] ss:$36 sps:$4 sm:$0xff]  }
 0x236   : > { %7064 = vmatprep.subr.bf16.mxu0 %v12178_v39  ;;  %v6055_v33 = vadd.f32 %v6054_v47, %v16652_v44  ;;  %v14694_v56 = vadd.f32 %v6245_v14, %v6053_v50  ;;  %v6253_v45 = vpop.f32.mrf.mxu1  ;;  %v12594_v47 = vld [vmem:[#allocation2 + $0x204] ss:$36 sps:$4 sm:$0xff]  }
 0x238   : > { %16653 = vst [vmem:[#allocation23_spill] sm:$0xff] %v14694_v56  ;;  %v14699_v62 = vadd.f32 %v6247_v35, %v6055_v33  ;;  %v6058_v53 = vpop.f32.mrf.mxu0  ;;  %v6255_v39 = vpop.f32.mrf.mxu1  ;;  %v12595_v33 = vld [vmem:[#allocation2 + $0x208] ss:$36 sps:$4 sm:$0xff]  }
 0x239   : > { %7065 = vmatpush2.bf16.msra.mxu0 %v12176_v19  ;;  %v6059_v14 = vadd.f32 %v6058_v53, %v14225_v18 }
 0x23a   : > { %6942 = vmatmul.mubr.bf16.gmra.mxu1 %v12591_v25  ;;  %16654 = vst [vmem:[#allocation24_spill] sm:$0xff] %v14699_v62  ;;  %7066 = vmatprep.subr.bf16.mxu0 %v12181_v52  ;;  %v6060_v50 = vpop.f32.mrf.mxu0  ;;  %v6257_v35 = vpop.f32.mrf.mxu1 }
 0x23b   : > { %6951 = vmatprep.mubr.bf16.mxu1 %v12592_v11  ;;  %v12193_v11 = vld [vmem:[%s16543_s1 + $0x8f4] ss:$20 sps:$4 sm:$0xff]   ;;  %v6061_v19 = vadd.f32 %v6060_v50, %v14238_v55  ;;  %v14709_v52 = vadd.f32 %v6251_v27, %v6059_v14  ;;  %v12191_v55 = vld [vmem:[%s16543_s1 + $0x8f0] ss:$20 sps:$4 sm:$0xff]   ;;  %v12202_v27 = vld [vmem:[%s16543_s1 + $0x8cc] ss:$20 sps:$4 sm:$0xff]  }
 0x23c   : > { %6749 = vmatmul.mubr.bf16.gmra.mxu0 %v12593_v26  ;;  %v6062_v25 = vpop.f32.mrf.mxu0  ;;  %v6261_v44 = vpop.f32.mrf.mxu1  ;;  %v12596_v26 = vld [vmem:[#allocation2 + $0x254] ss:$36 sps:$4 sm:$0xff]   ;;  %v12597_v50 = vld [vmem:[#allocation2 + $0x200] ss:$36 sps:$4 sm:$0xff]  }
 0x23d   : > { %6758 = vmatprep.mubr.bf16.mxu0 %v12594_v47  ;;  %7067 = vmatpush2.bf16.msra.mxu0 %v12179_v29  ;;  %v6063_v18 = vadd.f32 %v6062_v25, %v14244_v28  ;;  %v14712_v53 = vadd.f32 %v6253_v45, %v6061_v19  ;;  %v12200_v45 = vld [vmem:[%s16543_s1 + $0x8c8] ss:$20 sps:$4 sm:$0xff]  }
 0x23e   : > { %7068 = vmatprep.subr.bf16.mxu0 %v12187_v15  ;;  %v6064_v62 = vpop.f32.mrf.mxu0  ;;  %v6263_v56 = vpop.f32.mrf.mxu1  ;;  %v12209_v47 = vld [vmem:[%s16543_s1 + $0x268] ss:$20 sps:$4 sm:$0xff]  }
 0x23f   : > { %v6065_v29 = vadd.f32 %v6064_v62, %v14255_v1  ;;  %v14721_v15 = vadd.f32 %v6255_v39, %v6063_v18  ;;  %v12598_v1 = vld [vmem:[#allocation2 + $0x24c] ss:$36 sps:$4 sm:$0xff]  }
 0x240   : > { %v6265_v28 = vpop.f32.mrf.mxu1 }
 0x241   : > { %7069 = vmatpush2.bf16.msra.mxu0 %v12185_v13  ;;  %v6068_v14 = vpop.f32.mrf.mxu0  ;;  %v14726_v13 = vadd.f32 %v6257_v35, %v6065_v29 }
 0x242   : > { %6952 = vmatmul.mubr.bf16.gmra.mxu1 %v12595_v33  ;;  %7070 = vmatprep.subr.bf16.mxu0 %v12193_v11  ;;  %v6069_v19 = vadd.f32 %v6068_v14, %v14275_v20  ;;  %v6267_v62 = vpop.f32.mrf.mxu1  ;;  %v12599_v33 = vld [vmem:[#allocation2 + $0x250] ss:$36 sps:$4 sm:$0xff]  }
 0x243   : > { %6961 = vmatprep.mubr.bf16.mxu1 %v12596_v26  ;;  %v6070_v39 = vpop.f32.mrf.mxu0  ;;  %v12600_v26 = vld [vmem:[#allocation2 + $0x29c] ss:$36 sps:$4 sm:$0xff]  }
 0x244   : > { %6759 = vmatmul.mubr.bf16.gmra.mxu0 %v12597_v50  ;;  %v6071_v11 = vadd.f32 %v6070_v39, %v14288_v4  ;;  %v14733_v25 = vadd.f32 %v6261_v44, %v6069_v19  ;;  %v12601_v19 = vld [vmem:[#allocation2 + $0x248] ss:$36 sps:$4 sm:$0xff]  }
 0x245   : > { %6768 = vmatprep.mubr.bf16.mxu0 %v12598_v1  ;;  %7071 = vmatpush2.bf16.msra.mxu0 %v12191_v55  ;;  %v14735_v35 = vpop.f32.mrf.mxu1  ;;  %v6072_v18 = vpop.f32.mrf.mxu0 }
 0x246   : > { %7072 = vmatprep.subr.bf16.mxu0 %v12202_v27  ;;  %v6073_v29 = vadd.f32 %v6072_v18, %v14293_v63  ;;  %v14738_v20 = vadd.f32 %v6263_v56, %v6071_v11  ;;  %v12602_v56 = vld [vmem:[#allocation2 + $0x294] ss:$36 sps:$4 sm:$0xff]  }
 0x247   : > { %v14740_v14 = vpop.f32.mrf.mxu1  ;;  %v6074_v55 = vpop.f32.mrf.mxu0 }
 0x248   : > { %v6075_v4 = vadd.f32 %v6074_v55, %v14303_v32  ;;  %v14743_v44 = vadd.f32 %v6265_v28, %v6073_v29  ;;  %v12603_v32 = vld [vmem:[#allocation2 + $0x298] ss:$36 sps:$4 sm:$0xff]  }
 0x249   : > { %7073 = vmatpush2.bf16.msra.mxu0 %v12200_v45  ;;  %v14745_v27 = vpop.f32.mrf.mxu1  ;;  %v6304_v50 = vpop.f32.mrf.mxu0 }
 0x24a   : > { %6962 = vmatmul.mubr.bf16.gmra.mxu1 %v12599_v33  ;;  %11039 = vmatprep.subr.bf16.mxu0 %v12209_v47  ;;  %v14747_v1 = vadd.f32 %v6267_v62, %v6075_v4  ;;  %v6305_v63 = vadd.f32 %v6304_v50, %v14324_v34  ;;  %v12604_v33 = vld [vmem:[#allocation2 + $0x2e4] ss:$36 sps:$4 sm:$0xff]  }
 0x24b   : > { %6971 = vmatprep.mubr.bf16.mxu1 %v12600_v26  ;;  %v14750_v39 = vpop.f32.mrf.mxu1  ;;  %v6306_v45 = vpop.f32.mrf.mxu0 }
 0x24c   : > { %6769 = vmatmul.mubr.bf16.gmra.mxu0 %v12601_v19  ;;  %v6307_v47 = vadd.f32 %v6306_v45, %v14333_v48  ;;  %v8233_v34 = vmax.f32 %v6305_v63, 0.0  ;;  %v12605_v48 = vld [vmem:[#allocation2 + $0x290] ss:$36 sps:$4 sm:$0xff]  }
 0x24d   : > { %6778 = vmatprep.mubr.bf16.mxu0 %v12602_v56  ;;  %v14753_v11 = vpop.f32.mrf.mxu1  ;;  %v6308_v28 = vpop.f32.mrf.mxu0 }
 0x24e   : > { %16655 = vst [vmem:[#allocation25_spill] sm:$0xff] %v14753_v11  ;;  %v6309_v18 = vadd.f32 %v6308_v28, %v14345_v7  ;;  %v8234_v19 = vmax.f32 %v6307_v47, 0.0 }
 0x24f   : > { %v14756_v62 = vpop.f32.mrf.mxu1  ;;  %v6310_v26 = vpop.f32.mrf.mxu0 }
 0x250   : > { %16656 = vst [vmem:[#allocation26_spill] sm:$0xff] %v14756_v62  ;;  %v8238_v29 = vmax.f32 %v6309_v18, 0.0  ;;  %v6311_v55 = vadd.f32 %v6310_v26, %v14356_v22  ;;  %v16658_v18 = vld [vmem:[#allocation34_spill] sm:$0xff]  ;;  %v12607_v26 = vld [vmem:[#allocation2 + $0x2e0] ss:$36 sps:$4 sm:$0xff]  }
 0x251   : > { %v14759_v4 = vpop.f32.mrf.mxu1  ;;  %v6314_v50 = vpop.f32.mrf.mxu0 }
 0x252   : > { %6972 = vmatmul.mubr.bf16.gmra.mxu1 %v12603_v32  ;;  %16657 = vst [vmem:[#allocation27_spill] sm:$0xff] %v14759_v4  ;;  %v8393_v56 = vadd.f32 %v8238_v29, %v8233_v34  ;;  %v8239_v45 = vmax.f32 %v6311_v55, 0.0  ;;  %v6315_v32 = vadd.f32 %v6314_v50, %v14363_v57  ;;  %v16660_v29 = vld [vmem:[#allocation35_spill] sm:$0xff] }
 0x253   : > { %6981 = vmatprep.mubr.bf16.mxu1 %v12604_v33  ;;  %v12606_v33 = vld [vmem:[#allocation2 + $0x2dc] ss:$36 sps:$4 sm:$0xff]   ;;  %v14762_v7 = vpop.f32.mrf.mxu1  ;;  %v6316_v28 = vpop.f32.mrf.mxu0 }
 0x254   : > { %6779 = vmatmul.mubr.bf16.gmra.mxu0 %v12605_v48  ;;  %v8430_v62 = vadd.f32 %v8239_v45, %v8234_v19  ;;  %v8243_v63 = vmax.f32 %v6315_v32, 0.0  ;;  %v6317_v11 = vadd.f32 %v6316_v28, %v16658_v18  ;;  %v12608_v48 = vld [vmem:[#allocation2 + $0x32c] ss:$36 sps:$4 sm:$0xff]   ;;  %v12218_v50 = vld [vmem:[%s16543_s1 + $0x4e8] ss:$20 sps:$4 sm:$0xff]  }
 0x255   : > { %6788 = vmatprep.mubr.bf16.mxu0 %v12606_v33  ;;  %v14765_v22 = vpop.f32.mrf.mxu1  ;;  %v6318_v4 = vpop.f32.mrf.mxu0  ;;  %v16662_v33 = vld [vmem:[#allocation36_spill] sm:$0xff]  ;;  %11151 = vmatprep.subr.bf16.mxu1 %v12218_v50 }
 0x256   : > { %16659 = vst [vmem:[#allocation28_spill] sm:$0xff] %v14765_v22  ;;  %v8394_v47 = vadd.f32 %v8393_v56, %v8243_v63  ;;  %v8244_v34 = vmax.f32 %v6317_v11, 0.0  ;;  %v6319_v57 = vadd.f32 %v6318_v4, %v16660_v29  ;;  %v12610_v63 = vld [vmem:[#allocation2 + $0x324] ss:$36 sps:$4 sm:$0xff]  }
 0x257   : > { %v14768_v55 = vpop.f32.mrf.mxu1  ;;  %v6320_v19 = vpop.f32.mrf.mxu0 }
 0x258   : > { %16661 = vst [vmem:[#allocation29_spill] sm:$0xff] %v14768_v55  ;;  %v8431_v45 = vadd.f32 %v8430_v62, %v8244_v34  ;;  %v8248_v32 = vmax.f32 %v6319_v57, 0.0  ;;  %v6321_v28 = vadd.f32 %v6320_v19, %v16662_v33  ;;  %v12611_v19 = vld [vmem:[#allocation2 + $0x328] ss:$36 sps:$4 sm:$0xff]   ;;  %v12612_v33 = vld [vmem:[#allocation2 + $0x374] ss:$36 sps:$4 sm:$0xff]  }
 0x259   : > { %v14774_v18 = vpop.f32.mrf.mxu1 }
 0x25a   : > { %6982 = vmatmul.mubr.bf16.gmra.mxu1 %v12607_v26  ;;  %v6324_v26 = vpop.f32.mrf.mxu0  ;;  %v8395_v11 = vadd.f32 %v8394_v47, %v8248_v32  ;;  %v8249_v56 = vmax.f32 %v6321_v28, 0.0 }
 0x25b   : > { %6991 = vmatprep.mubr.bf16.mxu1 %v12608_v48  ;;  %v12609_v48 = vld [vmem:[#allocation2 + $0x2d8] ss:$36 sps:$4 sm:$0xff]   ;;  %v6325_v4 = vadd.f32 %v6324_v26, %v14409_v23  ;;  %v14777_v29 = vpop.f32.mrf.mxu1 }
 0x25c   : > { %6789 = vmatmul.mubr.bf16.gmra.mxu0 %v12609_v48  ;;  %v6326_v55 = vpop.f32.mrf.mxu0  ;;  %v8432_v22 = vadd.f32 %v8431_v45, %v8249_v56 }
 0x25d   : > { %6798 = vmatprep.mubr.bf16.mxu0 %v12610_v63  ;;  %v8253_v62 = vmax.f32 %v6325_v4, 0.0  ;;  %v6327_v34 = vadd.f32 %v6326_v55, %v14415_v17  ;;  %v12613_v55 = vld [vmem:[#allocation2 + $0x320] ss:$36 sps:$4 sm:$0xff]  }
 0x25e   : > { %v6328_v50 = vpop.f32.mrf.mxu0 }
 0x25f   : > { %v8396_v47 = vadd.f32 %v8395_v11, %v8253_v62  ;;  %v8254_v32 = vmax.f32 %v6327_v34, 0.0  ;;  %v6329_v23 = vadd.f32 %v6328_v50, %v14424_v41  ;;  %v12614_v11 = vld [vmem:[#allocation2 + $0x36c] ss:$36 sps:$4 sm:$0xff]  }
 0x260   : > { %v6330_v26 = vpop.f32.mrf.mxu0 }
 0x261   : > { %v14780_v57 = vpop.f32.mrf.mxu1  ;;  %v8433_v48 = vadd.f32 %v8432_v22, %v8254_v32  ;;  %v8258_v63 = vmax.f32 %v6329_v23, 0.0  ;;  %v6331_v45 = vadd.f32 %v6330_v26, %v14432_v6  ;;  %v12615_v6 = vld [vmem:[#allocation2 + $0x370] ss:$36 sps:$4 sm:$0xff]   ;;  %v12616_v26 = vld [vmem:[#allocation2 + $0x3bc] ss:$36 sps:$4 sm:$0xff]  }
 0x262   : > { %6992 = vmatmul.mubr.bf16.gmra.mxu1 %v12611_v19  ;;  %v6334_v17 = vpop.f32.mrf.mxu0 }
 0x263   : > { %7001 = vmatprep.mubr.bf16.mxu1 %v12612_v33  ;;  %v14783_v28 = vpop.f32.mrf.mxu1  ;;  %v8397_v4 = vadd.f32 %v8396_v47, %v8258_v63  ;;  %v8259_v19 = vmax.f32 %v6331_v45, 0.0  ;;  %v6335_v33 = vadd.f32 %v6334_v17, %v14441_v21 }
 0x264   : > { %6799 = vmatmul.mubr.bf16.gmra.mxu0 %v12613_v55  ;;  %v6336_v41 = vpop.f32.mrf.mxu0 }
 0x265   : > { %v14786_v56 = vpop.f32.mrf.mxu1  ;;  %6808 = vmatprep.mubr.bf16.mxu0 %v12614_v11  ;;  %v8434_v34 = vadd.f32 %v8433_v48, %v8259_v19  ;;  %v8263_v50 = vmax.f32 %v6335_v33, 0.0  ;;  %v6337_v22 = vadd.f32 %v6336_v41, %v14444_v24  ;;  %v12617_v33 = vld [vmem:[#allocation2 + $0x368] ss:$36 sps:$4 sm:$0xff]  }
 0x266   : > { %v6338_v23 = vpop.f32.mrf.mxu0 }
 0x267   : > { %v14789_v62 = vpop.f32.mrf.mxu1  ;;  %v8398_v47 = vadd.f32 %v8397_v4, %v8263_v50  ;;  %v8264_v63 = vmax.f32 %v6337_v22, 0.0  ;;  %v6339_v21 = vadd.f32 %v6338_v23, %v14447_v37  ;;  %v12618_v4 = vld [vmem:[#allocation2 + $0x3b4] ss:$36 sps:$4 sm:$0xff]  }
 0x268   : > { %v6340_v17 = vpop.f32.mrf.mxu0 }
 0x269   : > { %v14792_v32 = vpop.f32.mrf.mxu1  ;;  %v8435_v55 = vadd.f32 %v8434_v34, %v8264_v63  ;;  %v8268_v11 = vmax.f32 %v6339_v21, 0.0  ;;  %v6341_v48 = vadd.f32 %v6340_v17, %v14450_v49  ;;  %v12619_v49 = vld [vmem:[#allocation2 + $0x3b8] ss:$36 sps:$4 sm:$0xff]   ;;  %v12620_v17 = vld [vmem:[#allocation2 + $0x404] ss:$36 sps:$4 sm:$0xff]  }
 0x26a   : > { %7002 = vmatmul.mubr.bf16.gmra.mxu1 %v12615_v6  ;;  %v6344_v24 = vpop.f32.mrf.mxu0 }
 0x26b   : > { %7011 = vmatprep.mubr.bf16.mxu1 %v12616_v26  ;;  %v14795_v45 = vpop.f32.mrf.mxu1  ;;  %v8399_v41 = vadd.f32 %v8398_v47, %v8268_v11  ;;  %v8269_v6 = vmax.f32 %v6341_v48, 0.0  ;;  %v6345_v26 = vadd.f32 %v6344_v24, %v14454_v10 }
 0x26c   : > { %6809 = vmatmul.mubr.bf16.gmra.mxu0 %v12617_v33  ;;  %v6346_v37 = vpop.f32.mrf.mxu0 }
 0x26d   : > { %v14798_v19 = vpop.f32.mrf.mxu1  ;;  %6818 = vmatprep.mubr.bf16.mxu0 %v12618_v4  ;;  %v8436_v22 = vadd.f32 %v8435_v55, %v8269_v6  ;;  %v8273_v23 = vmax.f32 %v6345_v26, 0.0  ;;  %v6347_v34 = vadd.f32 %v6346_v37, %v14457_v40  ;;  %v12621_v26 = vld [vmem:[#allocation2 + $0x3b0] ss:$36 sps:$4 sm:$0xff]  }
 0x26e   : > { %v6348_v21 = vpop.f32.mrf.mxu0 }
 0x26f   : > { %v14801_v50 = vpop.f32.mrf.mxu1  ;;  %v8400_v47 = vadd.f32 %v8399_v41, %v8273_v23  ;;  %v8274_v11 = vmax.f32 %v6347_v34, 0.0  ;;  %v6349_v10 = vadd.f32 %v6348_v21, %v14463_v2  ;;  %v12622_v41 = vld [vmem:[#allocation2 + $0x3fc] ss:$36 sps:$4 sm:$0xff]  }
 0x270   : > { %v6350_v24 = vpop.f32.mrf.mxu0 }
 0x271   : > { %v8437_v33 = vadd.f32 %v8436_v22, %v8274_v11  ;;  %v8278_v4 = vmax.f32 %v6349_v10, 0.0  ;;  %v6351_v55 = vadd.f32 %v6350_v24, %v14466_v60  ;;  %v12623_v60 = vld [vmem:[#allocation2 + $0x400] ss:$36 sps:$4 sm:$0xff]   ;;  %v12624_v24 = vld [vmem:[#allocation2 + $0x44c] ss:$36 sps:$4 sm:$0xff]  }
 0x272   : > { %v14804_v63 = vpop.f32.mrf.mxu1  ;;  %7012 = vmatmul.mubr.bf16.gmra.mxu1 %v12619_v49  ;;  %v6354_v40 = vpop.f32.mrf.mxu0 }
 0x273   : > { %7021 = vmatprep.mubr.bf16.mxu1 %v12620_v17  ;;  %v8401_v37 = vadd.f32 %v8400_v47, %v8278_v4  ;;  %v8279_v49 = vmax.f32 %v6351_v55, 0.0  ;;  %v6355_v17 = vadd.f32 %v6354_v40, %v14470_v42 }
 0x274   : > { %v14807_v48 = vpop.f32.mrf.mxu1  ;;  %6819 = vmatmul.mubr.bf16.gmra.mxu0 %v12621_v26  ;;  %v6356_v2 = vpop.f32.mrf.mxu0 }
 0x275   : > { %6828 = vmatprep.mubr.bf16.mxu0 %v12622_v41  ;;  %v8438_v34 = vadd.f32 %v8437_v33, %v8279_v49  ;;  %v8283_v21 = vmax.f32 %v6355_v17, 0.0  ;;  %v6357_v22 = vadd.f32 %v6356_v2, %v14473_v8  ;;  %v12625_v17 = vld [vmem:[#allocation2 + $0x3f8] ss:$36 sps:$4 sm:$0xff]  }
 0x276   : > { %v14810_v6 = vpop.f32.mrf.mxu1  ;;  %v6358_v10 = vpop.f32.mrf.mxu0 }
 0x277   : > { %v8402_v47 = vadd.f32 %v8401_v37, %v8283_v21  ;;  %v8284_v4 = vmax.f32 %v6357_v22, 0.0  ;;  %v6359_v42 = vadd.f32 %v6358_v10, %v14476_v59  ;;  %v12626_v37 = vld [vmem:[#allocation2 + $0x444] ss:$36 sps:$4 sm:$0xff]  }
 0x278   : > { %v14813_v23 = vpop.f32.mrf.mxu1  ;;  %v6360_v40 = vpop.f32.mrf.mxu0 }
 0x279   : > { %v8439_v26 = vadd.f32 %v8438_v34, %v8284_v4  ;;  %v8288_v41 = vmax.f32 %v6359_v42, 0.0  ;;  %v6361_v33 = vadd.f32 %v6360_v40, %v14479_v51  ;;  %v12627_v51 = vld [vmem:[#allocation2 + $0x448] ss:$36 sps:$4 sm:$0xff]  }
 0x27a   : > { %v14816_v11 = vpop.f32.mrf.mxu1  ;;  %7022 = vmatmul.mubr.bf16.gmra.mxu1 %v12623_v60  ;;  %v6364_v8 = vpop.f32.mrf.mxu0 }
 0x27b   : > { %7031 = vmatprep.mubr.bf16.mxu1 %v12624_v24  ;;  %v8403_v2 = vadd.f32 %v8402_v47, %v8288_v41  ;;  %v8289_v60 = vmax.f32 %v6361_v33, 0.0  ;;  %v6365_v24 = vadd.f32 %v6364_v8, %v14483_v31 }
 0x27c   : > { %v14819_v55 = vpop.f32.mrf.mxu1  ;;  %6829 = vmatmul.mubr.bf16.gmra.mxu0 %v12625_v17  ;;  %v6366_v59 = vpop.f32.mrf.mxu0 }
 0x27d   : > { %6838 = vmatprep.mubr.bf16.mxu0 %v12626_v37  ;;  %v8440_v22 = vadd.f32 %v8439_v26, %v8289_v60  ;;  %v8293_v10 = vmax.f32 %v6365_v24, 0.0  ;;  %v6367_v34 = vadd.f32 %v6366_v59, %v14486_v38  ;;  %v12628_v24 = vld [vmem:[#allocation2 + $0x440] ss:$36 sps:$4 sm:$0xff]   ;;  %v12220_v37 = vld [vmem:[%s16543_s1 + $0x3a8] ss:$20 sps:$4 sm:$0xff]  }
 0x27e   : > { %v14822_v49 = vpop.f32.mrf.mxu1  ;;  %v6368_v42 = vpop.f32.mrf.mxu0 }
 0x27f   : > { %v8404_v47 = vadd.f32 %v8403_v2, %v8293_v10  ;;  %v8294_v40 = vmax.f32 %v6367_v34, 0.0  ;;  %v6369_v31 = vadd.f32 %v6368_v42, %v14489_v54  ;;  %v12629_v10 = vld [vmem:[#allocation2 + $0x1c] ss:$36 sps:$4 sm:$0xff]  }
 0x280   : > { %v14825_v21 = vpop.f32.mrf.mxu1  ;;  %v6370_v33 = vpop.f32.mrf.mxu0 }
 0x281   : > { %v8441_v8 = vadd.f32 %v8440_v22, %v8294_v40  ;;  %v8298_v17 = vmax.f32 %v6369_v31, 0.0  ;;  %v6371_v26 = vadd.f32 %v6370_v33, %v14492_v3  ;;  %v12222_v3 = vld [vmem:[%s16543_s1 + $0x4c0] ss:$20 sps:$4 sm:$0xff]  }
 0x282   : > { %v14828_v4 = vpop.f32.mrf.mxu1  ;;  %7032 = vmatmul.mubr.bf16.gmra.mxu1 %v12627_v51  ;;  %v6374_v38 = vpop.f32.mrf.mxu0  ;;  %v12630_v33 = vld [vmem:[#allocation2 + $0x20] ss:$36 sps:$4 sm:$0xff]  }
 0x283   : > { %7267 = vmatprep.mubr.bf16.mxu1 %v16596_v58  ;;  %v8405_v2 = vadd.f32 %v8404_v47, %v8298_v17  ;;  %v8299_v59 = vmax.f32 %v6371_v26, 0.0  ;;  %v6375_v54 = vadd.f32 %v6374_v38, %v14496_v16  ;;  %v12224_v16 = vld [vmem:[%s16543_s1 + $0x380] ss:$20 sps:$4 sm:$0xff]  }
 0x284   : > { %v14832_v41 = vpop.f32.mrf.mxu1  ;;  %6839 = vmatmul.mubr.bf16.gmra.mxu0 %v12628_v24  ;;  %v6376_v22 = vpop.f32.mrf.mxu0 }
 0x285   : > { %7074 = vmatprep.mubr.bf16.mxu0 %v12629_v10  ;;  %v8442_v51 = vadd.f32 %v8441_v8, %v8299_v59  ;;  %v8303_v42 = vmax.f32 %v6375_v54, 0.0  ;;  %v6377_v40 = vadd.f32 %v6376_v22, %v14499_v12  ;;  %v12210_v12 = vld [vmem:[%s16543_s1 + $0x128] ss:$20 sps:$4 sm:$0xff]   ;;  %v12226_v59 = vld [vmem:[%s16543_s1 + $0x498] ss:$20 sps:$4 sm:$0xff]  }
 0x286   : > { %v14835_v60 = vpop.f32.mrf.mxu1  ;;  %v6378_v47 = vpop.f32.mrf.mxu0 }
 0x287   : > { %v8406_v17 = vadd.f32 %v8405_v2, %v8303_v42  ;;  %v8304_v26 = vmax.f32 %v6377_v40, 0.0  ;;  %v6379_v38 = vadd.f32 %v6378_v47, %v14502_v46  ;;  %v12631_v42 = vld [vmem:[#allocation2 + $0x18] ss:$36 sps:$4 sm:$0xff]  }
 0x288   : > { %v14841_v34 = vpop.f32.mrf.mxu1  ;;  %v6380_v24 = vpop.f32.mrf.mxu0 }
 0x289   : > { %v8443_v2 = vadd.f32 %v8442_v51, %v8304_v26  ;;  %v8308_v54 = vmax.f32 %v6379_v38, 0.0  ;;  %v6381_v46 = vadd.f32 %v6380_v24, %v14505_v30  ;;  %v12212_v30 = vld [vmem:[%s16543_s1 + $0x100] ss:$20 sps:$4 sm:$0xff]  }
 0x28a   : > { %v14847_v31 = vpop.f32.mrf.mxu1  ;;  %7268 = vmatmul.mubr.bf16.vlgmr.msra.gmra.mxu1 %v12630_v33 }
 0x28b   : > { %7277 = vmatprep.mubr.bf16.mxu1 %v16596_v58  ;;  %11152 = vmatpush3.bf16.msra.mxu1 %v12220_v37  ;;  %v12211_v37 = vld [vmem:[%s16543_s1 + $0x240] ss:$20 sps:$4 sm:$0xff]   ;;  %v8407_v40 = vadd.f32 %v8406_v17, %v8308_v54  ;;  %v8309_v33 = vmax.f32 %v6381_v46, 0.0  ;;  %v12213_v17 = vld [vmem:[%s16543_s1 + $0x218] ss:$20 sps:$4 sm:$0xff]  }
 0x28c   : > { %v14857_v8 = vpop.f32.mrf.mxu1  ;;  %11153 = vmatprep.subr.bf16.mxu1 %v12222_v3  ;;  %v6384_v22 = vpop.f32.mrf.mxu0  ;;  %7075 = vmatmul.mubr.bf16.vlgmr.msra.gmra.mxu0 %v12631_v42  ;;  %v12228_v3 = vld [vmem:[%s16543_s1 + $0x358] ss:$20 sps:$4 sm:$0xff]  }
 0x28d   : > { %16663 = vst [vmem:[#allocation30_spill] sm:$0xff] %v14857_v8  ;;  %v6385_v47 = vadd.f32 %v6384_v22, %v14514_v43  ;;  %11040 = vmatpush3.bf16.msra.mxu0 %v12210_v12  ;;  %v12632_v8 = vld [vmem:[#allocation2 + $0x64] ss:$36 sps:$4 sm:$0xff]   ;;  %v8444_v43 = vadd.f32 %v8443_v2, %v8309_v33  ;;  %v16666_v12 = vld [vmem:[#allocation7_spill] sm:$0xff] }
 0x28e   : > { %v14866_v10 = vpop.f32.mrf.mxu1  ;;  %7084 = vmatprep.mubr.bf16.mxu0 %v12632_v8  ;;  %v6386_v26 = vpop.f32.mrf.mxu0  ;;  %11041 = vmatprep.subr.bf16.mxu0 %v12211_v37  ;;  %v12633_v54 = vld [vmem:[#allocation2 + $0x68] ss:$36 sps:$4 sm:$0xff]   ;;  %v12230_v37 = vld [vmem:[%s16543_s1 + $0x330] ss:$20 sps:$4 sm:$0xff]  }
 0x28f   : > { %16664 = vst [vmem:[#allocation31_spill] sm:$0xff] %v14866_v10  ;;  %11154 = vmatpush3.bf16.msra.mxu1 %v12224_v16  ;;  %v12229_v16 = vld [vmem:[%s16543_s1 + $0x470] ss:$20 sps:$4 sm:$0xff]   ;;  %v8313_v38 = vmax.f32 %v6385_v47, 0.0  ;;  %v6387_v8 = vadd.f32 %v6386_v26, %v16666_v12  ;;  %v12214_v33 = vld [vmem:[%s16543_s1 + $0xd8] ss:$20 sps:$4 sm:$0xff]  }
 0x290   : > { %v14872_v51 = vpop.f32.mrf.mxu1  ;;  %11155 = vmatprep.subr.bf16.mxu1 %v12226_v59  ;;  %v6388_v46 = vpop.f32.mrf.mxu0  ;;  %v12635_v10 = vld [vmem:[#allocation2 + $0xac] ss:$36 sps:$4 sm:$0xff]  }
 0x291   : > { %16665 = vst [vmem:[#allocation32_spill] sm:$0xff] %v14872_v51  ;;  %v8408_v22 = vadd.f32 %v8407_v40, %v8313_v38  ;;  %v8314_v42 = vmax.f32 %v6387_v8, 0.0  ;;  %v16668_v51 = vld [vmem:[#allocation8_spill] sm:$0xff]  ;;  %11042 = vmatpush3.bf16.msra.mxu0 %v12212_v30  ;;  %v16670_v38 = vld [vmem:[#allocation9_spill] sm:$0xff] }
 0x292   : > { %v14884_v24 = vpop.f32.mrf.mxu1  ;;  %7278 = vmatmul.mubr.bf16.gmra.mxu1 %v12633_v54  ;;  %v6389_v59 = vadd.f32 %v6388_v46, %v16668_v51  ;;  %v6390_v47 = vpop.f32.mrf.mxu0  ;;  %11043 = vmatprep.subr.bf16.mxu0 %v12213_v17  ;;  %v12233_v40 = vld [vmem:[%s16543_s1 + $0x448] ss:$20 sps:$4 sm:$0xff]   ;;  %v12634_v54 = vld [vmem:[#allocation2 + $0x60] ss:$36 sps:$4 sm:$0xff]  }
 0x293   : > { %16667 = vst [vmem:[#allocation33_spill] sm:$0xff] %v14884_v24  ;;  %7287 = vmatprep.mubr.bf16.mxu1 %v16596_v58  ;;  %11156 = vmatpush3.bf16.msra.mxu1 %v12228_v3  ;;  %v12215_v3 = vld [vmem:[%s16543_s1 + $0x1f0] ss:$20 sps:$4 sm:$0xff]   ;;  %v8445_v26 = vadd.f32 %v8444_v43, %v8314_v42  ;;  %v6391_v12 = vadd.f32 %v6390_v47, %v16670_v38  ;;  %v16673_v47 = vld [vmem:[#allocation11_spill] sm:$0xff] }
 0x294   : > { %v14891_v2 = vpop.f32.mrf.mxu1  ;;  %11157 = vmatprep.subr.bf16.mxu1 %v12229_v16  ;;  %v8318_v51 = vmax.f32 %v6389_v59, 0.0  ;;  %v6394_v8 = vpop.f32.mrf.mxu0  ;;  %7085 = vmatmul.mubr.bf16.gmra.mxu0 %v12634_v54  ;;  %v12234_v16 = vld [vmem:[%s16543_s1 + $0x308] ss:$20 sps:$4 sm:$0xff]   ;;  %v12216_v42 = vld [vmem:[%s16543_s1 + $0xb0] ss:$20 sps:$4 sm:$0xff]  }
 0x295   : > { %16669 = vst [vmem:[#allocation34_spill] sm:$0xff] %v14891_v2  ;;  %v8319_v46 = vmax.f32 %v6391_v12, 0.0  ;;  %v16671_v2 = vld [vmem:[#allocation10_spill] sm:$0xff]  ;;  %7094 = vmatprep.mubr.bf16.mxu0 %v12635_v10  ;;  %11044 = vmatpush3.bf16.msra.mxu0 %v12214_v33 }
 0x296   : > { %v14903_v30 = vpop.f32.mrf.mxu1  ;;  %v8409_v17 = vadd.f32 %v8408_v22, %v8318_v51  ;;  %v6395_v24 = vadd.f32 %v6394_v8, %v16671_v2  ;;  %v6396_v59 = vpop.f32.mrf.mxu0  ;;  %11045 = vmatprep.subr.bf16.mxu0 %v12215_v3  ;;  %v12217_v22 = vld [vmem:[%s16543_s1 + $0x1c8] ss:$20 sps:$4 sm:$0xff]   ;;  %v12636_v38 = vld [vmem:[#allocation2 + $0xb0] ss:$36 sps:$4 sm:$0xff]  }
 0x297   : > { %11158 = vmatpush3.bf16.msra.mxu1 %v12230_v37  ;;  %v12235_v37 = vld [vmem:[%s16543_s1 + $0x420] ss:$20 sps:$4 sm:$0xff]   ;;  %v8446_v2 = vadd.f32 %v8445_v26, %v8319_v46  ;;  %v6397_v51 = vadd.f32 %v6396_v59, %v16673_v47 }
 0x298   : > { %v14909_v43 = vpop.f32.mrf.mxu1  ;;  %11159 = vmatprep.subr.bf16.mxu1 %v12233_v40  ;;  %v8323_v10 = vmax.f32 %v6395_v24, 0.0  ;;  %v6398_v12 = vpop.f32.mrf.mxu0  ;;  %v12236_v3 = vld [vmem:[%s16543_s1 + $0x2e0] ss:$20 sps:$4 sm:$0xff]   ;;  %v12219_v24 = vld [vmem:[%s16543_s1 + $0x88] ss:$20 sps:$4 sm:$0xff]  }
 0x299   : > { %16672 = vst [vmem:[#allocation35_spill] sm:$0xff] %v14909_v43  ;;  %v8324_v54 = vmax.f32 %v6397_v51, 0.0  ;;  %v16675_v43 = vld [vmem:[#allocation12_spill] sm:$0xff]  ;;  %11046 = vmatpush3.bf16.msra.mxu0 %v12216_v42 }
 0x29a   : > { %v14921_v33 = vpop.f32.mrf.mxu1  ;;  %7288 = vmatmul.mubr.bf16.gmra.mxu1 %v12636_v38  ;;  %v8410_v8 = vadd.f32 %v8409_v17, %v8323_v10  ;;  %v6399_v40 = vadd.f32 %v6398_v12, %v16675_v43  ;;  %v6400_v46 = vpop.f32.mrf.mxu0  ;;  %11047 = vmatprep.subr.bf16.mxu0 %v12217_v22  ;;  %v12237_v17 = vld [vmem:[%s16543_s1 + $0x3f8] ss:$20 sps:$4 sm:$0xff]  }
 0x29b   : > { %16674 = vst [vmem:[#allocation36_spill] sm:$0xff] %v14921_v33  ;;  %7297 = vmatprep.mubr.bf16.mxu1 %v16596_v58  ;;  %11160 = vmatpush3.bf16.msra.mxu1 %v12234_v16  ;;  %v12221_v16 = vld [vmem:[%s16543_s1 + $0x1a0] ss:$20 sps:$4 sm:$0xff]   ;;  %v8447_v59 = vadd.f32 %v8446_v2, %v8324_v54  ;;  %v6401_v10 = vadd.f32 %v6400_v46, %v14580_v0  ;;  %v12637_v51 = vld [vmem:[#allocation2 + $0xa8] ss:$36 sps:$4 sm:$0xff]  }
 0x29c   : > { %v14928_v26 = vpop.f32.mrf.mxu1  ;;  %11161 = vmatprep.subr.bf16.mxu1 %v12235_v37  ;;  %v8328_v43 = vmax.f32 %v6399_v40, 0.0  ;;  %v6404_v47 = vpop.f32.mrf.mxu0  ;;  %7095 = vmatmul.mubr.bf16.gmra.mxu0 %v12637_v51  ;;  %v12238_v37 = vld [vmem:[%s16543_s1 + $0x2b8] ss:$20 sps:$4 sm:$0xff]   ;;  %v12223_v0 = vld [vmem:[%s16543_s1 + $0x60] ss:$20 sps:$4 sm:$0xff]  }
 0x29d   : > { %16676 = vst [vmem:[#allocation7_spill] sm:$0xff] %v14928_v26  ;;  %v8329_v38 = vmax.f32 %v6401_v10, 0.0  ;;  %v16677_v12 = vld [vmem:[#allocation13_spill] sm:$0xff]  ;;  %v12638_v33 = vld [vmem:[#allocation2 + $0xf4] ss:$36 sps:$4 sm:$0xff]   ;;  %11048 = vmatpush3.bf16.msra.mxu0 %v12219_v24 }
 0x29e   : > { %v14940_v42 = vpop.f32.mrf.mxu1  ;;  %v8411_v22 = vadd.f32 %v8410_v8, %v8328_v43  ;;  %v6405_v26 = vadd.f32 %v6404_v47, %v16677_v12  ;;  %7104 = vmatprep.mubr.bf16.mxu0 %v12638_v33  ;;  %v6406_v54 = vpop.f32.mrf.mxu0  ;;  %11049 = vmatprep.subr.bf16.mxu0 %v12221_v16  ;;  %v12225_v8 = vld [vmem:[%s16543_s1 + $0x178] ss:$20 sps:$4 sm:$0xff]   ;;  %v12240_v16 = vld [vmem:[%s16543_s1 + $0x290] ss:$20 sps:$4 sm:$0xff]  }
 0x29f   : > { %11162 = vmatpush3.bf16.msra.mxu1 %v12236_v3  ;;  %v12239_v3 = vld [vmem:[%s16543_s1 + $0x3d0] ss:$20 sps:$4 sm:$0xff]   ;;  %v8448_v40 = vadd.f32 %v8447_v59, %v8329_v38  ;;  %v12639_v10 = vld [vmem:[#allocation2 + $0xf8] ss:$36 sps:$4 sm:$0xff]  }
 0x2a0   : > { %v14946_v2 = vpop.f32.mrf.mxu1  ;;  %11163 = vmatprep.subr.bf16.mxu1 %v12237_v17  ;;  %v8333_v33 = vmax.f32 %v6405_v26, 0.0  ;;  %v16679_v46 = vld [vmem:[#allocation14_spill] sm:$0xff]  ;;  %v6408_v47 = vpop.f32.mrf.mxu0 }
 0x2a1   : > { %16678 = vst [vmem:[#allocation8_spill] sm:$0xff] %v14946_v2  ;;  %v6407_v43 = vadd.f32 %v6406_v54, %v16679_v46  ;;  %v16681_v2 = vld [vmem:[#allocation15_spill] sm:$0xff]  ;;  %11050 = vmatpush3.bf16.msra.mxu0 %v12223_v0 }
 0x2a2   : > { %v14958_v24 = vpop.f32.mrf.mxu1  ;;  %7298 = vmatmul.mubr.bf16.gmra.mxu1 %v12639_v10  ;;  %v8412_v51 = vadd.f32 %v8411_v22, %v8333_v33  ;;  %v6409_v17 = vadd.f32 %v6408_v47, %v16681_v2  ;;  %v12227_v26 = vld [vmem:[%s16543_s1 + $0x38] ss:$20 sps:$4 sm:$0xff]   ;;  %v6410_v38 = vpop.f32.mrf.mxu0  ;;  %11051 = vmatprep.subr.bf16.mxu0 %v12225_v8  ;;  %v16683_v22 = vld [vmem:[#allocation16_spill] sm:$0xff]  ;;  %v12640_v10 = vld [vmem:[#allocation2 + $0xf0] ss:$36 sps:$4 sm:$0xff]  }
 0x2a3   : > { %16680 = vst [vmem:[#allocation9_spill] sm:$0xff] %v14958_v24  ;;  %7307 = vmatprep.mubr.bf16.mxu1 %v16596_v58  ;;  %11164 = vmatpush3.bf16.msra.mxu1 %v12238_v37  ;;  %v8334_v12 = vmax.f32 %v6407_v43, 0.0  ;;  %v12231_v37 = vld [vmem:[%s16543_s1 + $0x150] ss:$20 sps:$4 sm:$0xff]   ;;  %v6411_v33 = vadd.f32 %v6410_v38, %v16683_v22 }
 0x2a4   : > { %v14965_v59 = vpop.f32.mrf.mxu1  ;;  %11165 = vmatprep.subr.bf16.mxu1 %v12239_v3  ;;  %v8338_v46 = vmax.f32 %v6409_v17, 0.0  ;;  %v6414_v2 = vpop.f32.mrf.mxu0  ;;  %7105 = vmatmul.mubr.bf16.gmra.mxu0 %v12640_v10  ;;  %v12241_v17 = vld [vmem:[%s16543_s1 + $0x768] ss:$20 sps:$4 sm:$0xff]  }
 0x2a5   : > { %16682 = vst [vmem:[#allocation10_spill] sm:$0xff] %v14965_v59  ;;  %v8449_v54 = vadd.f32 %v8448_v40, %v8334_v12  ;;  %v8339_v47 = vmax.f32 %v6411_v33, 0.0  ;;  %v6415_v3 = vadd.f32 %v6414_v2, %v14625_v5  ;;  %v12641_v59 = vld [vmem:[#allocation2 + $0x13c] ss:$36 sps:$4 sm:$0xff]   ;;  %11052 = vmatpush3.bf16.msra.mxu0 %v12227_v26  ;;  %v12232_v40 = vld [vmem:[%s16543_s1 + $0x10] ss:$20 sps:$4 sm:$0xff]  }
 0x2a6   : > { %v14974_v43 = vpop.f32.mrf.mxu1  ;;  %v8413_v0 = vadd.f32 %v8412_v51, %v8338_v46  ;;  %7114 = vmatprep.mubr.bf16.mxu0 %v12641_v59  ;;  %v6416_v12 = vpop.f32.mrf.mxu0  ;;  %11053 = vmatprep.subr.bf16.mxu0 %v12231_v37  ;;  %v16686_v38 = vld [vmem:[#allocation17_spill] sm:$0xff]  ;;  %v12642_v59 = vld [vmem:[#allocation2 + $0x140] ss:$36 sps:$4 sm:$0xff]   ;;  %v16688_v2 = vld [vmem:[#allocation18_spill] sm:$0xff] }
 0x2a7   : > { %16684 = vst [vmem:[#allocation11_spill] sm:$0xff] %v14974_v43  ;;  %11166 = vmatpush3.bf16.msra.mxu1 %v12240_v16  ;;  %v8450_v16 = vadd.f32 %v8449_v54, %v8339_v47  ;;  %v8343_v51 = vmax.f32 %v6415_v3, 0.0  ;;  %v6417_v46 = vadd.f32 %v6416_v12, %v16686_v38  ;;  %v16689_v3 = vld [vmem:[#allocation19_spill] sm:$0xff] }
 0x2a8   : > { %v14977_v8 = vpop.f32.mrf.mxu1  ;;  %v6418_v22 = vpop.f32.mrf.mxu0 }
 0x2a9   : > { %16685 = vst [vmem:[#allocation12_spill] sm:$0xff] %v14977_v8  ;;  %v8414_v26 = vadd.f32 %v8413_v0, %v8343_v51  ;;  %v8344_v33 = vmax.f32 %v6417_v46, 0.0  ;;  %v6419_v10 = vadd.f32 %v6418_v22, %v16688_v2  ;;  %11054 = vmatpush3.bf16.msra.mxu0 %v12232_v40  ;;  %v12644_v51 = vld [vmem:[#allocation2 + $0x184] ss:$36 sps:$4 sm:$0xff]  }
 0x2aa   : > { %v14986_v5 = vpop.f32.mrf.mxu1  ;;  %7308 = vmatmul.mubr.bf16.gmra.mxu1 %v12642_v59  ;;  %v6420_v8 = vpop.f32.mrf.mxu0  ;;  %11263 = vmatprep.subr.bf16.mxu0 %v12241_v17  ;;  %v12643_v59 = vld [vmem:[#allocation2 + $0x138] ss:$36 sps:$4 sm:$0xff]  }
 0x2ab   : > { %16687 = vst [vmem:[#allocation13_spill] sm:$0xff] %v14986_v5  ;;  %7317 = vmatprep.mubr.bf16.mxu1 %v16596_v58  ;;  %v8451_v54 = vadd.f32 %v8450_v16, %v8344_v33  ;;  %v8348_v47 = vmax.f32 %v6419_v10, 0.0  ;;  %v6421_v12 = vadd.f32 %v6420_v8, %v16689_v3  ;;  %v12645_v8 = vld [vmem:[#allocation2 + $0x188] ss:$36 sps:$4 sm:$0xff]  }
 0x2ac   : > { %v14990_v37 = vpop.f32.mrf.mxu1  ;;  %v6424_v5 = vpop.f32.mrf.mxu0  ;;  %7115 = vmatmul.mubr.bf16.gmra.mxu0 %v12643_v59 }
 0x2ad   : > { %v8415_v43 = vadd.f32 %v8414_v26, %v8348_v47  ;;  %v8349_v24 = vmax.f32 %v6421_v12, 0.0  ;;  %v6425_v0 = vadd.f32 %v6424_v5, %v14655_v9  ;;  %7124 = vmatprep.mubr.bf16.mxu0 %v12644_v51  ;;  %v16692_v47 = vld [vmem:[#allocation20_spill] sm:$0xff] }
 0x2ae   : > { %v14993_v38 = vpop.f32.mrf.mxu1  ;;  %v6426_v40 = vpop.f32.mrf.mxu0  ;;  %v12646_v51 = vld [vmem:[#allocation2 + $0x180] ss:$36 sps:$4 sm:$0xff]  }
 0x2af   : > { %v8452_v22 = vadd.f32 %v8451_v54, %v8349_v24  ;;  %v8353_v17 = vmax.f32 %v6425_v0, 0.0  ;;  %v6427_v16 = vadd.f32 %v6426_v40, %v14658_v61  ;;  %v16693_v24 = vld [vmem:[#allocation21_spill] sm:$0xff] }
 0x2b0   : > { %v14996_v46 = vpop.f32.mrf.mxu1  ;;  %v6428_v2 = vpop.f32.mrf.mxu0 }
 0x2b1   : > { %16690 = vst [vmem:[#allocation14_spill] sm:$0xff] %v14996_v46  ;;  %v8416_v26 = vadd.f32 %v8415_v43, %v8353_v17  ;;  %v8354_v10 = vmax.f32 %v6427_v16, 0.0  ;;  %v6429_v9 = vadd.f32 %v6428_v2, %v16692_v47  ;;  %v12647_v43 = vld [vmem:[#allocation2 + $0x1cc] ss:$36 sps:$4 sm:$0xff]  }
 0x2b2   : > { %v14999_v33 = vpop.f32.mrf.mxu1  ;;  %7318 = vmatmul.mubr.bf16.gmra.mxu1 %v12645_v8  ;;  %v6430_v3 = vpop.f32.mrf.mxu0 }
 0x2b3   : > { %16691 = vst [vmem:[#allocation15_spill] sm:$0xff] %v14999_v33  ;;  %7327 = vmatprep.mubr.bf16.mxu1 %v16596_v58  ;;  %v8453_v12 = vadd.f32 %v8452_v22, %v8354_v10  ;;  %v8358_v59 = vmax.f32 %v6429_v9, 0.0  ;;  %v6431_v54 = vadd.f32 %v6430_v3, %v16693_v24  ;;  %v16694_v33 = vld [vmem:[#allocation22_spill] sm:$0xff]  ;;  %v16697_v24 = vld [vmem:[#allocation23_spill] sm:$0xff] }
 0x2b4   : > { %v15003_v5 = vpop.f32.mrf.mxu1  ;;  %v6434_v61 = vpop.f32.mrf.mxu0  ;;  %7125 = vmatmul.mubr.bf16.gmra.mxu0 %v12646_v51  ;;  %v12648_v9 = vld [vmem:[#allocation2 + $0x1d0] ss:$36 sps:$4 sm:$0xff]  }
 0x2b5   : > { %v8417_v40 = vadd.f32 %v8416_v26, %v8358_v59  ;;  %v8359_v8 = vmax.f32 %v6431_v54, 0.0  ;;  %v6435_v46 = vadd.f32 %v6434_v61, %v16694_v33  ;;  %7134 = vmatprep.mubr.bf16.mxu0 %v12647_v43 }
 0x2b6   : > { %v15006_v0 = vpop.f32.mrf.mxu1  ;;  %v6436_v16 = vpop.f32.mrf.mxu0 }
 0x2b7   : > { %v8454_v2 = vadd.f32 %v8453_v12, %v8359_v8  ;;  %v8363_v47 = vmax.f32 %v6435_v46, 0.0  ;;  %v6437_v22 = vadd.f32 %v6436_v16, %v14688_v36  ;;  %v16698_v12 = vld [vmem:[#allocation24_spill] sm:$0xff] }
 0x2b8   : > { %v15009_v17 = vpop.f32.mrf.mxu1  ;;  %v6438_v3 = vpop.f32.mrf.mxu0  ;;  %v12649_v16 = vld [vmem:[#allocation2 + $0x1c8] ss:$36 sps:$4 sm:$0xff]  }
 0x2b9   : > { %16695 = vst [vmem:[#allocation16_spill] sm:$0xff] %v15009_v17  ;;  %v8418_v26 = vadd.f32 %v8417_v40, %v8363_v47  ;;  %v8364_v59 = vmax.f32 %v6437_v22, 0.0  ;;  %v6439_v33 = vadd.f32 %v6438_v3, %v16697_v24  ;;  %v12650_v40 = vld [vmem:[#allocation2 + $0x214] ss:$36 sps:$4 sm:$0xff]  }
 0x2ba   : > { %v15012_v10 = vpop.f32.mrf.mxu1  ;;  %7328 = vmatmul.mubr.bf16.gmra.mxu1 %v12648_v9  ;;  %v6440_v61 = vpop.f32.mrf.mxu0 }
 0x2bb   : > { %16696 = vst [vmem:[#allocation17_spill] sm:$0xff] %v15012_v10  ;;  %7337 = vmatprep.mubr.bf16.mxu1 %v16596_v58  ;;  %v8455_v51 = vadd.f32 %v8454_v2, %v8364_v59  ;;  %v8368_v43 = vmax.f32 %v6439_v33, 0.0  ;;  %v6441_v46 = vadd.f32 %v6440_v61, %v16698_v12  ;;  %v12651_v33 = vld [vmem:[#allocation2 + $0x218] ss:$36 sps:$4 sm:$0xff]  }
 0x2bc   : > { %v15016_v54 = vpop.f32.mrf.mxu1  ;;  %v6444_v36 = vpop.f32.mrf.mxu0  ;;  %7135 = vmatmul.mubr.bf16.gmra.mxu0 %v12649_v16 }
 0x2bd   : > { %v8419_v9 = vadd.f32 %v8418_v26, %v8368_v43  ;;  %v8369_v10 = vmax.f32 %v6441_v46, 0.0  ;;  %v6445_v17 = vadd.f32 %v6444_v36, %v14709_v52  ;;  %7144 = vmatprep.mubr.bf16.mxu0 %v12650_v40  ;;  %v16699_v36 = vld [vmem:[#allocation4_spill] sm:$0xff] }
 0x2be   : > { %v15019_v8 = vpop.f32.mrf.mxu1  ;;  %v6446_v22 = vpop.f32.mrf.mxu0  ;;  %v15032_v16 = vsub.s32 2, %v16699_v36 }
 0x2bf   : > { %v8456_v3 = vadd.f32 %v8455_v51, %v8369_v10  ;;  %v8373_v24 = vmax.f32 %v6445_v17, 0.0  ;;  %v6447_v2 = vadd.f32 %v6446_v22, %v14712_v53  ;;  %v12652_v22 = vld [vmem:[#allocation2 + $0x210] ss:$36 sps:$4 sm:$0xff]  }
 0x2c0   : > { %v15022_v47 = vpop.f32.mrf.mxu1  ;;  %v6448_v61 = vpop.f32.mrf.mxu0  ;;  %16700 = vst [vmem:[#allocation18_spill] sm:$0xff] %v15032_v16 }
 0x2c1   : > { %v8420_v26 = vadd.f32 %v8419_v9, %v8373_v24  ;;  %v8374_v43 = vmax.f32 %v6447_v2, 0.0  ;;  %v6449_v52 = vadd.f32 %v6448_v61, %v14721_v15  ;;  %v15038_v9 = vsub.s32 3, %v16699_v36 }
 0x2c2   : > { %v15025_v59 = vpop.f32.mrf.mxu1  ;;  %7338 = vmatmul.mubr.bf16.gmra.mxu1 %v12651_v33  ;;  %v6450_v46 = vpop.f32.mrf.mxu0  ;;  %v12653_v33 = vld [vmem:[#allocation2 + $0x25c] ss:$36 sps:$4 sm:$0xff]  }
 0x2c3   : > { %7347 = vmatprep.mubr.bf16.mxu1 %v16596_v58  ;;  %v8457_v17 = vadd.f32 %v8456_v3, %v8374_v43  ;;  %v8378_v10 = vmax.f32 %v6449_v52, 0.0  ;;  %v6451_v53 = vadd.f32 %v6450_v46, %v14726_v13  ;;  %16702 = vst [vmem:[#allocation20_spill] sm:$0xff] %v15038_v9  ;;  %v12654_v13 = vld [vmem:[%s16544_s2] sm:$0x1f] }
 0x2c4   : > { %v15029_v12 = vpop.f32.mrf.mxu1  ;;  %v6454_v40 = vpop.f32.mrf.mxu0  ;;  %7145 = vmatmul.mubr.bf16.gmra.mxu0 %v12652_v22  ;;  %v15047_v43 = vrot.slane %v12654_v13, %v15032_v16 }
 0x2c5   : > { %v8421_v24 = vadd.f32 %v8420_v26, %v8378_v10  ;;  %v8379_v15 = vmax.f32 %v6451_v53, 0.0  ;;  %v6455_v2 = vadd.f32 %v6454_v40, %v14733_v25  ;;  %7154 = vmatprep.mubr.bf16.mxu0 %v12653_v33  ;;  %v12655_v10 = vld [vmem:[#allocation2 + $0x260] ss:$36 sps:$4 sm:$0xff]   ;;  %v15052_v53 = vrot.slane %v12654_v13, %v15038_v9 }
 0x2c6   : > { %v15035_v51 = vpop.f32.mrf.mxu1  ;;  %v6456_v3 = vpop.f32.mrf.mxu0 }
 0x2c7   : > { %16701 = vst [vmem:[#allocation19_spill] sm:$0xff] %v15035_v51  ;;  %v8458_v52 = vadd.f32 %v8457_v17, %v8379_v15  ;;  %v8383_v46 = vmax.f32 %v6455_v2, 0.0  ;;  %v6457_v22 = vadd.f32 %v6456_v3, %v14738_v20  ;;  %v6498_v17 = vadd.f32 %v14735_v35, %v15047_v43  ;;  %v12656_v51 = vld [vmem:[#allocation2 + $0x258] ss:$36 sps:$4 sm:$0xff]  }
 0x2c8   : > { %v15041_v61 = vpop.f32.mrf.mxu1  ;;  %v6458_v25 = vpop.f32.mrf.mxu0  ;;  %v6500_v13 = vadd.f32 %v14740_v14, %v15052_v53  ;;  %v12250_v35 = vld [vmem:[%s16543_s1 + $0x9e8] ss:$20 sps:$4 sm:$0xff]  }
 0x2c9   : > { %16703 = vst [vmem:[#allocation21_spill] sm:$0xff] %v15041_v61  ;;  %v8422_v40 = vadd.f32 %v8421_v24, %v8383_v46  ;;  %v8384_v33 = vmax.f32 %v6457_v22, 0.0  ;;  %v6459_v36 = vadd.f32 %v6458_v25, %v14743_v44  ;;  %v12657_v22 = vld [vmem:[#allocation2 + $0x2a4] ss:$36 sps:$4 sm:$0xff]   ;;  %11375 = vmatprep.subr.bf16.mxu1 %v12250_v35 }
 0x2ca   : > { %v6883_v26 = vpop.f32.mrf.mxu1  ;;  %7348 = vmatmul.mubr.bf16.gmra.mxu1 %v12655_v10  ;;  %v6460_v16 = vpop.f32.mrf.mxu0  ;;  %v12659_v35 = vld [vmem:[#allocation2 + $0x2a0] ss:$36 sps:$4 sm:$0xff]  }
 0x2cb   : > { %7357 = vmatprep.mubr.bf16.mxu1 %v16596_v58  ;;  %v8459_v15 = vadd.f32 %v8458_v52, %v8384_v33  ;;  %v8388_v20 = vmax.f32 %v6459_v36, 0.0  ;;  %v6461_v2 = vadd.f32 %v6460_v16, %v14747_v1  ;;  %v6502_v1 = vadd.f32 %v14745_v27, %v15047_v43 }
 0x2cc   : > { %v6885_v61 = vpop.f32.mrf.mxu1  ;;  %v6690_v10 = vpop.f32.mrf.mxu0  ;;  %7155 = vmatmul.mubr.bf16.gmra.mxu0 %v12656_v51 }
 0x2cd   : > { %v15060_v24 = vadd.f32 %v8422_v40, %v8388_v20  ;;  %v8389_v46 = vmax.f32 %v6461_v2, 0.0  ;;  %v6691_v44 = vadd.f32 %v6690_v10, %v6498_v17  ;;  %7164 = vmatprep.mubr.bf16.mxu0 %v12657_v22  ;;  %v12658_v40 = vld [vmem:[#allocation2 + $0x2a8] ss:$36 sps:$4 sm:$0xff]   ;;  %v6504_v17 = vadd.f32 %v14750_v39, %v15052_v53 }
 0x2ce   : > { %v6887_v3 = vpop.f32.mrf.mxu1  ;;  %v6692_v36 = vpop.f32.mrf.mxu0 }
 0x2cf   : > { %16704 = vst [vmem:[#allocation22_spill] sm:$0xff] %v15060_v24  ;;  %v15067_v16 = vadd.f32 %v8459_v15, %v8389_v46  ;;  %v6693_v51 = vadd.f32 %v6692_v36, %v6500_v13  ;;  %v15069_v52 = vadd.f32 %v6883_v26, %v6691_v44  ;;  %v16706_v15 = vld [vmem:[#allocation25_spill] sm:$0xff]  ;;  %v16707_v36 = vld [vmem:[#allocation26_spill] sm:$0xff] }
 0x2d0   : > { %v6889_v25 = vpop.f32.mrf.mxu1  ;;  %v6694_v33 = vpop.f32.mrf.mxu0  ;;  %v6508_v13 = vadd.f32 %v16706_v15, %v15047_v43 }
 0x2d1   : > { %16705 = vst [vmem:[#allocation23_spill] sm:$0xff] %v15067_v16  ;;  %v6695_v20 = vadd.f32 %v6694_v33, %v6502_v1  ;;  %v15074_v2 = vadd.f32 %v6885_v61, %v6693_v51  ;;  %v12660_v61 = vld [vmem:[#allocation2 + $0x2ec] ss:$36 sps:$4 sm:$0xff]   ;;  %v16708_v33 = vld [vmem:[#allocation27_spill] sm:$0xff] }
 0x2d2   : > { %v6893_v14 = vpop.f32.mrf.mxu1  ;;  %7358 = vmatmul.mubr.bf16.gmra.mxu1 %v12658_v40  ;;  %v6696_v10 = vpop.f32.mrf.mxu0  ;;  %v6510_v40 = vadd.f32 %v16707_v36, %v15052_v53  ;;  %v6512_v15 = vadd.f32 %v16708_v33, %v15047_v43  ;;  %v16711_v16 = vld [vmem:[#allocation29_spill] sm:$0xff] }
 0x2d3   : > { %7367 = vmatprep.mubr.bf16.mxu1 %v16596_v58  ;;  %v6697_v26 = vadd.f32 %v6696_v10, %v6504_v17  ;;  %v15078_v46 = vadd.f32 %v6887_v3, %v6695_v20  ;;  %v12661_v10 = vld [vmem:[#allocation2 + $0x2f0] ss:$36 sps:$4 sm:$0xff]   ;;  %v6520_v24 = vadd.f32 %v16711_v16, %v15052_v53  ;;  %v6524_v16 = vadd.f32 %v14777_v29, %v15052_v53 }
 0x2d4   : > { %v6895_v27 = vpop.f32.mrf.mxu1  ;;  %v6700_v22 = vpop.f32.mrf.mxu0  ;;  %7165 = vmatmul.mubr.bf16.gmra.mxu0 %v12659_v35 }
 0x2d5   : > { %v6701_v9 = vadd.f32 %v6700_v22, %v6508_v13  ;;  %v15082_v39 = vadd.f32 %v6889_v25, %v6697_v26  ;;  %7174 = vmatprep.mubr.bf16.mxu0 %v12660_v61  ;;  %v6514_v25 = vadd.f32 %v14762_v7, %v15052_v53  ;;  %v16710_v61 = vld [vmem:[#allocation28_spill] sm:$0xff] }
 0x2d6   : > { %v6897_v44 = vpop.f32.mrf.mxu1  ;;  %v6702_v51 = vpop.f32.mrf.mxu0  ;;  %v6518_v33 = vadd.f32 %v16710_v61, %v15047_v43 }
 0x2d7   : > { %v6703_v17 = vadd.f32 %v6702_v51, %v6510_v40  ;;  %v15086_v3 = vadd.f32 %v6893_v14, %v6701_v9 }
 0x2d8   : > { %v6899_v1 = vpop.f32.mrf.mxu1  ;;  %v6704_v35 = vpop.f32.mrf.mxu0 }
 0x2d9   : > { %16709 = vst [vmem:[#allocation24_spill] sm:$0xff] %v15086_v3  ;;  %v6705_v13 = vadd.f32 %v6704_v35, %v6512_v15  ;;  %v15091_v26 = vadd.f32 %v6895_v27, %v6703_v17  ;;  %v12663_v27 = vld [vmem:[#allocation2 + $0x334] ss:$36 sps:$4 sm:$0xff]   ;;  %v6522_v35 = vadd.f32 %v14774_v18, %v15047_v43  ;;  %v6528_v18 = vadd.f32 %v14780_v57, %v15047_v43 }
 0x2da   : > { %v6903_v20 = vpop.f32.mrf.mxu1  ;;  %7368 = vmatmul.mubr.bf16.gmra.mxu1 %v12661_v10  ;;  %v6706_v36 = vpop.f32.mrf.mxu0  ;;  %v12662_v10 = vld [vmem:[#allocation2 + $0x2e8] ss:$36 sps:$4 sm:$0xff]   ;;  %v6532_v57 = vadd.f32 %v14786_v56, %v15047_v43  ;;  %v6538_v56 = vadd.f32 %v14792_v32, %v15047_v43  ;;  %v6542_v32 = vadd.f32 %v14798_v19, %v15047_v43  ;;  %v6548_v19 = vadd.f32 %v14804_v63, %v15047_v43 }
 0x2db   : > { %7377 = vmatprep.mubr.bf16.mxu1 %v16596_v58  ;;  %v6707_v40 = vadd.f32 %v6706_v36, %v6514_v25  ;;  %v15095_v9 = vadd.f32 %v6897_v44, %v6705_v13  ;;  %v12664_v36 = vld [vmem:[#allocation2 + $0x338] ss:$36 sps:$4 sm:$0xff]   ;;  %v6552_v63 = vadd.f32 %v14810_v6, %v15047_v43  ;;  %v6558_v6 = vadd.f32 %v14816_v11, %v15047_v43 }
 0x2dc   : > { %v6905_v22 = vpop.f32.mrf.mxu1  ;;  %v6710_v51 = vpop.f32.mrf.mxu0  ;;  %7175 = vmatmul.mubr.bf16.gmra.mxu0 %v12662_v10  ;;  %v6562_v11 = vadd.f32 %v14822_v49, %v15047_v43  ;;  %v6568_v49 = vadd.f32 %v14828_v4, %v15047_v43 }
 0x2dd   : > { %v6711_v3 = vadd.f32 %v6710_v51, %v6518_v33  ;;  %v15099_v7 = vadd.f32 %v6899_v1, %v6707_v40  ;;  %7184 = vmatprep.mubr.bf16.mxu0 %v12663_v27  ;;  %v12665_v27 = vld [vmem:[#allocation2 + $0x330] ss:$36 sps:$4 sm:$0xff]  }
 0x2de   : > { %v6907_v14 = vpop.f32.mrf.mxu1  ;;  %v6712_v17 = vpop.f32.mrf.mxu0 }
 0x2df   : > { %v6713_v25 = vadd.f32 %v6712_v17, %v6520_v24  ;;  %v15103_v44 = vadd.f32 %v6903_v20, %v6711_v3  ;;  %v6530_v17 = vadd.f32 %v14783_v28, %v15052_v53  ;;  %v6534_v28 = vadd.f32 %v14789_v62, %v15052_v53 }
 0x2e0   : > { %v6909_v15 = vpop.f32.mrf.mxu1  ;;  %v6714_v61 = vpop.f32.mrf.mxu0 }
 0x2e1   : > { %v6715_v1 = vadd.f32 %v6714_v61, %v6522_v35  ;;  %v15108_v33 = vadd.f32 %v6905_v22, %v6713_v25  ;;  %v12666_v22 = vld [vmem:[#allocation2 + $0x37c] ss:$36 sps:$4 sm:$0xff]  }
 0x2e2   : > { %v6913_v13 = vpop.f32.mrf.mxu1  ;;  %7378 = vmatmul.mubr.bf16.gmra.mxu1 %v12664_v36  ;;  %v6716_v51 = vpop.f32.mrf.mxu0 }
 0x2e3   : > { %7387 = vmatprep.mubr.bf16.mxu1 %v16596_v58  ;;  %v6717_v24 = vadd.f32 %v6716_v51, %v6524_v16  ;;  %v15112_v3 = vadd.f32 %v6907_v14, %v6715_v1  ;;  %v12667_v1 = vld [vmem:[#allocation2 + $0x380] ss:$36 sps:$4 sm:$0xff]  }
 0x2e4   : > { %v6915_v40 = vpop.f32.mrf.mxu1  ;;  %v6720_v10 = vpop.f32.mrf.mxu0  ;;  %7185 = vmatmul.mubr.bf16.gmra.mxu0 %v12665_v27 }
 0x2e5   : > { %v6721_v36 = vadd.f32 %v6720_v10, %v6528_v18  ;;  %v15116_v29 = vadd.f32 %v6909_v15, %v6717_v24  ;;  %7194 = vmatprep.mubr.bf16.mxu0 %v12666_v22  ;;  %v12668_v22 = vld [vmem:[#allocation2 + $0x378] ss:$36 sps:$4 sm:$0xff]  }
 0x2e6   : > { %v6917_v20 = vpop.f32.mrf.mxu1  ;;  %v6722_v25 = vpop.f32.mrf.mxu0 }
 0x2e7   : > { %v6723_v61 = vadd.f32 %v6722_v25, %v6530_v17  ;;  %v15120_v14 = vadd.f32 %v6913_v13, %v6721_v36  ;;  %v6540_v25 = vadd.f32 %v14795_v45, %v15052_v53  ;;  %v6544_v45 = vadd.f32 %v14801_v50, %v15052_v53 }
 0x2e8   : > { %v6919_v35 = vpop.f32.mrf.mxu1  ;;  %v6724_v51 = vpop.f32.mrf.mxu0 }
 0x2e9   : > { %v6725_v15 = vadd.f32 %v6724_v51, %v6532_v57  ;;  %v15125_v18 = vadd.f32 %v6915_v40, %v6723_v61  ;;  %v12669_v40 = vld [vmem:[#allocation2 + $0x3c4] ss:$36 sps:$4 sm:$0xff]  }
 0x2ea   : > { %v6923_v16 = vpop.f32.mrf.mxu1  ;;  %7388 = vmatmul.mubr.bf16.gmra.mxu1 %v12667_v1  ;;  %v6726_v10 = vpop.f32.mrf.mxu0 }
 0x2eb   : > { %7397 = vmatprep.mubr.bf16.mxu1 %v16596_v58  ;;  %v6727_v27 = vadd.f32 %v6726_v10, %v6534_v28  ;;  %v15129_v13 = vadd.f32 %v6917_v20, %v6725_v15  ;;  %v12670_v15 = vld [vmem:[#allocation2 + $0x3c8] ss:$36 sps:$4 sm:$0xff]  }
 0x2ec   : > { %v6925_v24 = vpop.f32.mrf.mxu1  ;;  %v6730_v36 = vpop.f32.mrf.mxu0  ;;  %7195 = vmatmul.mubr.bf16.gmra.mxu0 %v12668_v22 }
 0x2ed   : > { %v6731_v1 = vadd.f32 %v6730_v36, %v6538_v56  ;;  %v15133_v62 = vadd.f32 %v6919_v35, %v6727_v27  ;;  %7204 = vmatprep.mubr.bf16.mxu0 %v12669_v40  ;;  %v12671_v40 = vld [vmem:[#allocation2 + $0x3c0] ss:$36 sps:$4 sm:$0xff]  }
 0x2ee   : > { %v6927_v17 = vpop.f32.mrf.mxu1  ;;  %v6732_v61 = vpop.f32.mrf.mxu0 }
 0x2ef   : > { %v6733_v51 = vadd.f32 %v6732_v61, %v6540_v25  ;;  %v15137_v20 = vadd.f32 %v6923_v16, %v6731_v1  ;;  %v6550_v61 = vadd.f32 %v14807_v48, %v15052_v53  ;;  %v6554_v48 = vadd.f32 %v14813_v23, %v15052_v53 }
 0x2f0   : > { %v6929_v57 = vpop.f32.mrf.mxu1  ;;  %v6734_v10 = vpop.f32.mrf.mxu0 }
 0x2f1   : > { %v6735_v35 = vadd.f32 %v6734_v10, %v6542_v32  ;;  %v15142_v56 = vadd.f32 %v6925_v24, %v6733_v51  ;;  %v12672_v24 = vld [vmem:[#allocation2 + $0x40c] ss:$36 sps:$4 sm:$0xff]  }
 0x2f2   : > { %v6933_v28 = vpop.f32.mrf.mxu1  ;;  %7398 = vmatmul.mubr.bf16.gmra.mxu1 %v12670_v15  ;;  %v6736_v36 = vpop.f32.mrf.mxu0 }
 0x2f3   : > { %7407 = vmatprep.mubr.bf16.mxu1 %v16596_v58  ;;  %v6737_v22 = vadd.f32 %v6736_v36, %v6544_v45  ;;  %v15146_v16 = vadd.f32 %v6927_v17, %v6735_v35  ;;  %v12673_v35 = vld [vmem:[#allocation2 + $0x410] ss:$36 sps:$4 sm:$0xff]  }
 0x2f4   : > { %v6935_v27 = vpop.f32.mrf.mxu1  ;;  %v6740_v1 = vpop.f32.mrf.mxu0  ;;  %7205 = vmatmul.mubr.bf16.gmra.mxu0 %v12671_v40 }
 0x2f5   : > { %v6741_v15 = vadd.f32 %v6740_v1, %v6548_v19  ;;  %v15150_v50 = vadd.f32 %v6929_v57, %v6737_v22  ;;  %7214 = vmatprep.mubr.bf16.mxu0 %v12672_v24  ;;  %v12674_v24 = vld [vmem:[#allocation2 + $0x408] ss:$36 sps:$4 sm:$0xff]  }
 0x2f6   : > { %v6937_v25 = vpop.f32.mrf.mxu1  ;;  %v6742_v51 = vpop.f32.mrf.mxu0 }
 0x2f7   : > { %v6743_v10 = vadd.f32 %v6742_v51, %v6550_v61  ;;  %v15154_v17 = vadd.f32 %v6933_v28, %v6741_v15  ;;  %v6560_v51 = vadd.f32 %v14819_v55, %v15052_v53  ;;  %v6564_v55 = vadd.f32 %v14825_v21, %v15052_v53 }
 0x2f8   : > { %v6939_v32 = vpop.f32.mrf.mxu1  ;;  %v6744_v36 = vpop.f32.mrf.mxu0  ;;  %v6570_v21 = vadd.f32 %v14832_v41, %v15052_v53 }
 0x2f9   : > { %v6745_v57 = vadd.f32 %v6744_v36, %v6552_v63  ;;  %v15159_v19 = vadd.f32 %v6935_v27, %v6743_v10  ;;  %v12675_v27 = vld [vmem:[#allocation2 + $0x454] ss:$36 sps:$4 sm:$0xff]  }
 0x2fa   : > { %v6943_v45 = vpop.f32.mrf.mxu1  ;;  %7408 = vmatmul.mubr.bf16.gmra.mxu1 %v12673_v35  ;;  %v6746_v1 = vpop.f32.mrf.mxu0 }
 0x2fb   : > { %7417 = vmatprep.mubr.bf16.mxu1 %v16596_v58  ;;  %v6747_v40 = vadd.f32 %v6746_v1, %v6554_v48  ;;  %v15163_v28 = vadd.f32 %v6937_v25, %v6745_v57  ;;  %v12676_v57 = vld [vmem:[#allocation2 + $0x458] ss:$36 sps:$4 sm:$0xff]  }
 0x2fc   : > { %v6945_v22 = vpop.f32.mrf.mxu1  ;;  %v6750_v15 = vpop.f32.mrf.mxu0  ;;  %7215 = vmatmul.mubr.bf16.gmra.mxu0 %v12674_v24  ;;  %v12677_v24 = vld [vmem:[#allocation2 + $0xc] ss:$36 sps:$4 sm:$0xff]  }
 0x2fd   : > { %v6751_v35 = vadd.f32 %v6750_v15, %v6558_v6  ;;  %v15167_v23 = vadd.f32 %v6939_v32, %v6747_v40  ;;  %7224 = vmatprep.mubr.bf16.mxu0 %v12675_v27 }
 0x2fe   : > { %v6947_v61 = vpop.f32.mrf.mxu1  ;;  %v6752_v10 = vpop.f32.mrf.mxu0 }
 0x2ff   : > { %v6753_v36 = vadd.f32 %v6752_v10, %v6560_v51  ;;  %v15171_v25 = vadd.f32 %v6943_v45, %v6751_v35  ;;  %v12678_v10 = vld [vmem:[#allocation2 + $0x450] ss:$36 sps:$4 sm:$0xff]  }
 0x300   : > { %v6949_v63 = vpop.f32.mrf.mxu1  ;;  %v6754_v1 = vpop.f32.mrf.mxu0 }
 0x301   : > { %v6755_v32 = vadd.f32 %v6754_v1, %v6562_v11  ;;  %v15175_v6 = vadd.f32 %v6945_v22, %v6753_v36  ;;  %v12679_v36 = vld [vmem:[#allocation2 + $0x4] ss:$36 sps:$4 sm:$0xff]  }
 0x302   : > { %v6953_v48 = vpop.f32.mrf.mxu1  ;;  %7418 = vmatmul.mubr.bf16.gmra.mxu1 %v12676_v57  ;;  %v6756_v15 = vpop.f32.mrf.mxu0  ;;  %v12252_v57 = vld [vmem:[%s16543_s1 + $0x8a8] ss:$20 sps:$4 sm:$0xff]  }
 0x303   : > { %7621 = vmatprep.mubr.bf16.mxu1 %v12677_v24  ;;  %v6757_v51 = vadd.f32 %v6756_v15, %v6564_v55  ;;  %v15179_v45 = vadd.f32 %v6947_v61, %v6755_v32  ;;  %v12254_v61 = vld [vmem:[%s16543_s1 + $0x9c0] ss:$20 sps:$4 sm:$0xff]   ;;  %v6572_v24 = vadd.f32 %v14835_v60, %v15047_v43  ;;  %v12242_v60 = vld [vmem:[%s16543_s1 + $0x628] ss:$20 sps:$4 sm:$0xff]  }
 0x304   : > { %v6955_v40 = vpop.f32.mrf.mxu1  ;;  %v6760_v27 = vpop.f32.mrf.mxu0  ;;  %7225 = vmatmul.mubr.bf16.gmra.mxu0 %v12678_v10  ;;  %v12680_v10 = vld [vmem:[#allocation2 + $0x8] ss:$36 sps:$4 sm:$0xff]  }
 0x305   : > { %v6761_v22 = vadd.f32 %v6760_v27, %v6568_v49  ;;  %v15186_v11 = vadd.f32 %v6949_v63, %v6757_v51  ;;  %7460 = vmatprep.mubr.bf16.mxu0 %v12679_v36  ;;  %v12681_v63 = vld [vmem:[#allocation2 + $0x54] ss:$36 sps:$4 sm:$0xff]   ;;  %v6574_v51 = vadd.f32 %v14841_v34, %v15052_v53  ;;  %v6578_v34 = vadd.f32 %v14847_v31, %v15047_v43  ;;  %v12683_v31 = vld [vmem:[#allocation2 + $0x4c] ss:$36 sps:$4 sm:$0xff]  }
 0x306   : > { %v6957_v35 = vpop.f32.mrf.mxu1  ;;  %v6762_v1 = vpop.f32.mrf.mxu0  ;;  %v12256_v49 = vld [vmem:[%s16543_s1 + $0x880] ss:$20 sps:$4 sm:$0xff]  }
 0x307   : > { %v6763_v55 = vadd.f32 %v6762_v1, %v6570_v21  ;;  %v15193_v32 = vadd.f32 %v6953_v48, %v6761_v22  ;;  %v12258_v22 = vld [vmem:[%s16543_s1 + $0x998] ss:$20 sps:$4 sm:$0xff]  }
 0x308   : > { %v6959_v4 = vpop.f32.mrf.mxu1  ;;  %v6764_v41 = vpop.f32.mrf.mxu0 }
 0x309   : > { %16712 = vst [vmem:[#allocation25_spill] sm:$0xff] %v15193_v32  ;;  %v6765_v27 = vadd.f32 %v6764_v41, %v6572_v24  ;;  %v15200_v36 = vadd.f32 %v6955_v40, %v6763_v55  ;;  %v16715_v41 = vld [vmem:[#allocation30_spill] sm:$0xff] }
 0x30a   : > { %v6963_v15 = vpop.f32.mrf.mxu1  ;;  %7622 = vmatmul.mubr.bf16.vlgmr.msra.gmra.mxu1 %v12680_v10  ;;  %v6766_v21 = vpop.f32.mrf.mxu0  ;;  %v12682_v10 = vld [vmem:[#allocation2] ss:$36 sps:$4 sm:$0xff]  }
 0x30b   : > { %7629 = vmatprep.mubr.bf16.mxu1 %v12681_v63  ;;  %11376 = vmatpush3.bf16.msra.mxu1 %v12252_v57  ;;  %16713 = vst [vmem:[#allocation26_spill] sm:$0xff] %v15200_v36  ;;  %v12243_v57 = vld [vmem:[%s16543_s1 + $0x740] ss:$20 sps:$4 sm:$0xff]   ;;  %v6767_v40 = vadd.f32 %v6766_v21, %v6574_v51  ;;  %v15213_v1 = vadd.f32 %v6957_v35, %v6765_v27  ;;  %v12245_v21 = vld [vmem:[%s16543_s1 + $0x718] ss:$20 sps:$4 sm:$0xff]  }
 0x30c   : > { %v6965_v48 = vpop.f32.mrf.mxu1  ;;  %11377 = vmatprep.subr.bf16.mxu1 %v12254_v61  ;;  %v6770_v55 = vpop.f32.mrf.mxu0  ;;  %7461 = vmatmul.mubr.bf16.vlgmr.msra.gmra.mxu0 %v12682_v10  ;;  %v12260_v61 = vld [vmem:[%s16543_s1 + $0x858] ss:$20 sps:$4 sm:$0xff]   ;;  %v6580_v63 = vadd.f32 %v16715_v41, %v15052_v53  ;;  %v12244_v51 = vld [vmem:[%s16543_s1 + $0x600] ss:$20 sps:$4 sm:$0xff]  }
 0x30d   : > { %16714 = vst [vmem:[#allocation27_spill] sm:$0xff] %v15213_v1  ;;  %v6771_v58 = vadd.f32 %v6770_v55, %v6578_v34  ;;  %v15220_v36 = vadd.f32 %v6959_v4, %v6767_v40  ;;  %11264 = vmatpush3.bf16.msra.mxu0 %v12242_v60  ;;  %7468 = vmatprep.mubr.bf16.mxu0 %v12683_v31  ;;  %v16717_v4 = vld [vmem:[#allocation31_spill] sm:$0xff]  ;;  %v12684_v10 = vld [vmem:[#allocation2 + $0x50] ss:$36 sps:$4 sm:$0xff]  }
 0x30e   : > { %v6967_v24 = vpop.f32.mrf.mxu1  ;;  %v6772_v27 = vpop.f32.mrf.mxu0  ;;  %11265 = vmatprep.subr.bf16.mxu0 %v12243_v57  ;;  %v6582_v60 = vadd.f32 %v16717_v4, %v15047_v43  ;;  %v12685_v31 = vld [vmem:[#allocation2 + $0x9c] ss:$36 sps:$4 sm:$0xff]   ;;  %v12262_v57 = vld [vmem:[%s16543_s1 + $0x830] ss:$20 sps:$4 sm:$0xff]  }
 0x30f   : > { %11378 = vmatpush3.bf16.msra.mxu1 %v12256_v49  ;;  %16716 = vst [vmem:[#allocation28_spill] sm:$0xff] %v15220_v36  ;;  %v12261_v49 = vld [vmem:[%s16543_s1 + $0x970] ss:$20 sps:$4 sm:$0xff]   ;;  %v6773_v34 = vadd.f32 %v6772_v27, %v6580_v63  ;;  %v15233_v40 = vadd.f32 %v6963_v15, %v6771_v58  ;;  %v12246_v58 = vld [vmem:[%s16543_s1 + $0x5d8] ss:$20 sps:$4 sm:$0xff]  }
 0x310   : > { %v6969_v35 = vpop.f32.mrf.mxu1  ;;  %11379 = vmatprep.subr.bf16.mxu1 %v12258_v22  ;;  %v6774_v41 = vpop.f32.mrf.mxu0  ;;  %v16719_v36 = vld [vmem:[#allocation32_spill] sm:$0xff] }
 0x311   : > { %16718 = vst [vmem:[#allocation29_spill] sm:$0xff] %v15233_v40  ;;  %v6584_v22 = vadd.f32 %v16719_v36, %v15052_v53  ;;  %v6775_v1 = vadd.f32 %v6774_v41, %v6582_v60  ;;  %v15240_v32 = vadd.f32 %v6965_v48, %v6773_v34  ;;  %11266 = vmatpush3.bf16.msra.mxu0 %v12244_v51  ;;  %v12265_v36 = vld [vmem:[%s16543_s1 + $0x948] ss:$20 sps:$4 sm:$0xff]   ;;  %v12687_v40 = vld [vmem:[#allocation2 + $0x94] ss:$36 sps:$4 sm:$0xff]  }
 0x312   : > { %v6973_v55 = vpop.f32.mrf.mxu1  ;;  %7630 = vmatmul.mubr.bf16.gmra.mxu1 %v12684_v10  ;;  %v6776_v15 = vpop.f32.mrf.mxu0  ;;  %11267 = vmatprep.subr.bf16.mxu0 %v12245_v21  ;;  %v16721_v48 = vld [vmem:[#allocation33_spill] sm:$0xff]  ;;  %v16722_v21 = vld [vmem:[#allocation34_spill] sm:$0xff] }
 0x313   : > { %7637 = vmatprep.mubr.bf16.mxu1 %v12685_v31  ;;  %11380 = vmatpush3.bf16.msra.mxu1 %v12260_v61  ;;  %16720 = vst [vmem:[#allocation30_spill] sm:$0xff] %v15240_v32  ;;  %v12247_v61 = vld [vmem:[%s16543_s1 + $0x6f0] ss:$20 sps:$4 sm:$0xff]   ;;  %v6588_v27 = vadd.f32 %v16721_v48, %v15047_v43  ;;  %v6777_v4 = vadd.f32 %v6776_v15, %v6584_v22  ;;  %v12686_v10 = vld [vmem:[#allocation2 + $0x48] ss:$36 sps:$4 sm:$0xff]  }
 0x314   : > { %v6975_v63 = vpop.f32.mrf.mxu1  ;;  %11381 = vmatprep.subr.bf16.mxu1 %v12261_v49  ;;  %v15253_v51 = vadd.f32 %v6967_v24, %v6775_v1  ;;  %v6780_v34 = vpop.f32.mrf.mxu0  ;;  %7469 = vmatmul.mubr.bf16.gmra.mxu0 %v12686_v10  ;;  %v12266_v49 = vld [vmem:[%s16543_s1 + $0x808] ss:$20 sps:$4 sm:$0xff]   ;;  %v6590_v41 = vadd.f32 %v16722_v21, %v15052_v53  ;;  %v12248_v1 = vld [vmem:[%s16543_s1 + $0x5b0] ss:$20 sps:$4 sm:$0xff]   ;;  %v12267_v24 = vld [vmem:[%s16543_s1 + $0x920] ss:$20 sps:$4 sm:$0xff]  }
 0x315   : > { %v6781_v31 = vadd.f32 %v6780_v34, %v6588_v27  ;;  %v15260_v32 = vadd.f32 %v6969_v35, %v6777_v4  ;;  %7476 = vmatprep.mubr.bf16.mxu0 %v12687_v40  ;;  %11268 = vmatpush3.bf16.msra.mxu0 %v12246_v58  ;;  %v12249_v15 = vld [vmem:[%s16543_s1 + $0x6c8] ss:$20 sps:$4 sm:$0xff]   ;;  %v6592_v35 = vadd.f32 %v14903_v30, %v15047_v43 }
 0x316   : > { %v6977_v60 = vpop.f32.mrf.mxu1  ;;  %11269 = vmatprep.subr.bf16.mxu0 %v12247_v61  ;;  %v12688_v27 = vld [vmem:[#allocation2 + $0x98] ss:$36 sps:$4 sm:$0xff]   ;;  %v12689_v34 = vld [vmem:[#allocation2 + $0xe4] ss:$36 sps:$4 sm:$0xff]   ;;  %v12268_v61 = vld [vmem:[%s16543_s1 + $0x7e0] ss:$20 sps:$4 sm:$0xff]  }
 0x317   : > { %11382 = vmatpush3.bf16.msra.mxu1 %v12262_v57  ;;  %16723 = vst [vmem:[#allocation31_spill] sm:$0xff] %v15260_v32  ;;  %v6782_v57 = vpop.f32.mrf.mxu0  ;;  %v15273_v58 = vadd.f32 %v6973_v55, %v6781_v31  ;;  %v16725_v10 = vld [vmem:[#allocation35_spill] sm:$0xff] }
 0x318   : > { %v6979_v22 = vpop.f32.mrf.mxu1  ;;  %11383 = vmatprep.subr.bf16.mxu1 %v12265_v36  ;;  %v6783_v40 = vadd.f32 %v6782_v57, %v6590_v41  ;;  %v6594_v36 = vadd.f32 %v16725_v10, %v15052_v53  ;;  %v12251_v55 = vld [vmem:[%s16543_s1 + $0x588] ss:$20 sps:$4 sm:$0xff]   ;;  %v12269_v31 = vld [vmem:[%s16543_s1 + $0x8f8] ss:$20 sps:$4 sm:$0xff]  }
 0x319   : > { %16724 = vst [vmem:[#allocation32_spill] sm:$0xff] %v15273_v58  ;;  %v6784_v4 = vpop.f32.mrf.mxu0  ;;  %11270 = vmatpush3.bf16.msra.mxu0 %v12248_v1  ;;  %v12691_v58 = vld [vmem:[#allocation2 + $0xdc] ss:$36 sps:$4 sm:$0xff]  }
 0x31a   : > { %v6983_v48 = vpop.f32.mrf.mxu1  ;;  %7638 = vmatmul.mubr.bf16.gmra.mxu1 %v12688_v27  ;;  %v6785_v21 = vadd.f32 %v6784_v4, %v6592_v35  ;;  %v15280_v32 = vadd.f32 %v6975_v63, %v6783_v40  ;;  %11271 = vmatprep.subr.bf16.mxu0 %v12249_v15  ;;  %v16727_v63 = vld [vmem:[#allocation36_spill] sm:$0xff]  ;;  %v12690_v4 = vld [vmem:[#allocation2 + $0x90] ss:$36 sps:$4 sm:$0xff]   ;;  %v16728_v15 = vld [vmem:[#allocation7_spill] sm:$0xff] }
 0x31b   : > { %7645 = vmatprep.mubr.bf16.mxu1 %v12689_v34  ;;  %11384 = vmatpush3.bf16.msra.mxu1 %v12266_v49  ;;  %v6786_v41 = vpop.f32.mrf.mxu0  ;;  %v12253_v49 = vld [vmem:[%s16543_s1 + $0x6a0] ss:$20 sps:$4 sm:$0xff]   ;;  %v6598_v57 = vadd.f32 %v16727_v63, %v15047_v43  ;;  %v6600_v34 = vadd.f32 %v16728_v15, %v15052_v53 }
 0x31c   : > { %16726 = vst [vmem:[#allocation33_spill] sm:$0xff] %v15280_v32  ;;  %v6985_v30 = vpop.f32.mrf.mxu1  ;;  %11385 = vmatprep.subr.bf16.mxu1 %v12267_v24  ;;  %v6787_v35 = vadd.f32 %v6786_v41, %v6594_v36  ;;  %v15293_v1 = vadd.f32 %v6977_v60, %v6785_v21  ;;  %7477 = vmatmul.mubr.bf16.gmra.mxu0 %v12690_v4  ;;  %v12270_v24 = vld [vmem:[%s16543_s1 + $0x7b8] ss:$20 sps:$4 sm:$0xff]   ;;  %v12255_v60 = vld [vmem:[%s16543_s1 + $0x560] ss:$20 sps:$4 sm:$0xff]  }
 0x31d   : > { %v6790_v27 = vpop.f32.mrf.mxu0  ;;  %7484 = vmatprep.mubr.bf16.mxu0 %v12691_v58  ;;  %11272 = vmatpush3.bf16.msra.mxu0 %v12251_v55  ;;  %v12257_v41 = vld [vmem:[%s16543_s1 + $0x678] ss:$20 sps:$4 sm:$0xff]   ;;  %v16730_v4 = vld [vmem:[#allocation8_spill] sm:$0xff] }
 0x31e   : > { %v6987_v40 = vpop.f32.mrf.mxu1  ;;  %v6791_v10 = vadd.f32 %v6790_v27, %v6598_v57  ;;  %v15300_v32 = vadd.f32 %v6979_v22, %v6787_v35  ;;  %11273 = vmatprep.subr.bf16.mxu0 %v12253_v49  ;;  %v6602_v22 = vadd.f32 %v14940_v42, %v15047_v43  ;;  %v12692_v57 = vld [vmem:[#allocation2 + $0xe0] ss:$36 sps:$4 sm:$0xff]   ;;  %v12693_v27 = vld [vmem:[#allocation2 + $0x12c] ss:$36 sps:$4 sm:$0xff]  }
 0x31f   : > { %11386 = vmatpush3.bf16.msra.mxu1 %v12268_v61  ;;  %v12271_v61 = vld [vmem:[%s16543_s1 + $0x8d0] ss:$20 sps:$4 sm:$0xff]   ;;  %v6792_v21 = vpop.f32.mrf.mxu0 }
 0x320   : > { %16729 = vst [vmem:[#allocation34_spill] sm:$0xff] %v15300_v32  ;;  %v6989_v36 = vpop.f32.mrf.mxu1  ;;  %11387 = vmatprep.subr.bf16.mxu1 %v12269_v31  ;;  %v6793_v58 = vadd.f32 %v6792_v21, %v6600_v34  ;;  %v15313_v55 = vadd.f32 %v6983_v48, %v6791_v10  ;;  %v12272_v49 = vld [vmem:[%s16543_s1 + $0x790] ss:$20 sps:$4 sm:$0xff]   ;;  %v6604_v31 = vadd.f32 %v16730_v4, %v15052_v53  ;;  %v12259_v48 = vld [vmem:[%s16543_s1 + $0x538] ss:$20 sps:$4 sm:$0xff]  }
 0x321   : > { %v6794_v35 = vpop.f32.mrf.mxu0  ;;  %11274 = vmatpush3.bf16.msra.mxu0 %v12255_v60  ;;  %v16732_v10 = vld [vmem:[#allocation9_spill] sm:$0xff]  ;;  %v12694_v60 = vld [vmem:[#allocation2 + $0xd8] ss:$36 sps:$4 sm:$0xff]  }
 0x322   : > { %v6993_v63 = vpop.f32.mrf.mxu1  ;;  %7646 = vmatmul.mubr.bf16.gmra.mxu1 %v12692_v57  ;;  %v6795_v15 = vadd.f32 %v6794_v35, %v6602_v22  ;;  %v15320_v32 = vadd.f32 %v6985_v30, %v6793_v58  ;;  %11275 = vmatprep.subr.bf16.mxu0 %v12257_v41  ;;  %v6608_v21 = vadd.f32 %v16732_v10, %v15047_v43  ;;  %v16734_v35 = vld [vmem:[#allocation10_spill] sm:$0xff]  ;;  %v12695_v4 = vld [vmem:[#allocation2 + $0x124] ss:$36 sps:$4 sm:$0xff]  }
 0x323   : > { %7653 = vmatprep.mubr.bf16.mxu1 %v12693_v27  ;;  %11388 = vmatpush3.bf16.msra.mxu1 %v12270_v24  ;;  %v6796_v34 = vpop.f32.mrf.mxu0  ;;  %v12263_v24 = vld [vmem:[%s16543_s1 + $0x650] ss:$20 sps:$4 sm:$0xff]  }
 0x324   : > { %16731 = vst [vmem:[#allocation35_spill] sm:$0xff] %v15320_v32  ;;  %v6995_v42 = vpop.f32.mrf.mxu1  ;;  %11389 = vmatprep.subr.bf16.mxu1 %v12271_v61  ;;  %v6797_v57 = vadd.f32 %v6796_v34, %v6604_v31  ;;  %v15330_v22 = vadd.f32 %v6987_v40, %v6795_v15  ;;  %7485 = vmatmul.mubr.bf16.gmra.mxu0 %v12694_v60  ;;  %v12264_v40 = vld [vmem:[%s16543_s1 + $0x510] ss:$20 sps:$4 sm:$0xff]   ;;  %v16736_v15 = vld [vmem:[#allocation11_spill] sm:$0xff] }
 0x325   : > { %v6800_v58 = vpop.f32.mrf.mxu0  ;;  %v6610_v61 = vadd.f32 %v16734_v35, %v15052_v53  ;;  %7492 = vmatprep.mubr.bf16.mxu0 %v12695_v4  ;;  %11276 = vmatpush3.bf16.msra.mxu0 %v12259_v48  ;;  %v6612_v34 = vadd.f32 %v16736_v15, %v15047_v43  ;;  %v16737_v60 = vld [vmem:[#allocation12_spill] sm:$0xff] }
 0x326   : > { %16733 = vst [vmem:[#allocation36_spill] sm:$0xff] %v15330_v22  ;;  %v6997_v30 = vpop.f32.mrf.mxu1  ;;  %v6801_v27 = vadd.f32 %v6800_v58, %v6608_v21  ;;  %v15334_v41 = vadd.f32 %v6989_v36, %v6797_v57  ;;  %11277 = vmatprep.subr.bf16.mxu0 %v12263_v24  ;;  %v12696_v57 = vld [vmem:[#allocation2 + $0x128] ss:$36 sps:$4 sm:$0xff]   ;;  %v12697_v58 = vld [vmem:[#allocation2 + $0x174] ss:$36 sps:$4 sm:$0xff]   ;;  %v6614_v24 = vadd.f32 %v16737_v60, %v15052_v53 }
 0x327   : > { %11390 = vmatpush3.bf16.msra.mxu1 %v12272_v49  ;;  %v6802_v31 = vpop.f32.mrf.mxu0  ;;  %v15342_v49 = vld [vmem:[%s16543_s1 + $0xb28] ss:$20 sps:$4 sm:$0xff]  }
 0x328   : > { %16735 = vst [vmem:[#allocation7_spill] sm:$0xff] %v15334_v41  ;;  %v6999_v32 = vpop.f32.mrf.mxu1  ;;  %v6803_v36 = vadd.f32 %v6802_v31, %v6610_v61  ;;  %v15346_v10 = vadd.f32 %v6993_v63, %v6801_v27  ;;  %v16738_v63 = vld [vmem:[#allocation13_spill] sm:$0xff] }
 0x329   : > { %v6804_v48 = vpop.f32.mrf.mxu0  ;;  %11278 = vmatpush3.bf16.msra.mxu0 %v12264_v40  ;;  %v6618_v61 = vadd.f32 %v16738_v63, %v15047_v43  ;;  %v12699_v40 = vld [vmem:[#allocation2 + $0x16c] ss:$36 sps:$4 sm:$0xff]   ;;  %v6622_v63 = vadd.f32 %v14993_v38, %v15047_v43 }
 0x32a   : > { %v7003_v21 = vpop.f32.mrf.mxu1  ;;  %7654 = vmatmul.mubr.bf16.gmra.mxu1 %v12696_v57  ;;  %v6805_v35 = vadd.f32 %v6804_v48, %v6612_v34  ;;  %v15350_v4 = vadd.f32 %v6995_v42, %v6803_v36  ;;  %11511 = vmatprep.subr.bf16.mxu0 %v15342_v49  ;;  %v6620_v34 = vadd.f32 %v14990_v37, %v15052_v53  ;;  %v16742_v37 = vld [vmem:[#allocation14_spill] sm:$0xff] }
 0x32b   : > { %7661 = vmatprep.mubr.bf16.mxu1 %v12697_v58  ;;  %v6806_v22 = vpop.f32.mrf.mxu0  ;;  %v12698_v58 = vld [vmem:[#allocation2 + $0x120] ss:$36 sps:$4 sm:$0xff]  }
 0x32c   : > { %v7005_v41 = vpop.f32.mrf.mxu1  ;;  %v6807_v27 = vadd.f32 %v6806_v22, %v6614_v24  ;;  %v15355_v31 = vadd.f32 %v6997_v30, %v6805_v35  ;;  %7493 = vmatmul.mubr.bf16.gmra.mxu0 %v12698_v58  ;;  %v12700_v35 = vld [vmem:[#allocation2 + $0x170] ss:$36 sps:$4 sm:$0xff]  }
 0x32d   : > { %v6810_v57 = vpop.f32.mrf.mxu0  ;;  %7500 = vmatprep.mubr.bf16.mxu0 %v12699_v40 }
 0x32e   : > { %16739 = vst [vmem:[#allocation8_spill] sm:$0xff] %v15355_v31  ;;  %v7007_v15 = vpop.f32.mrf.mxu1  ;;  %v6811_v42 = vadd.f32 %v6810_v57, %v6618_v61  ;;  %v15359_v36 = vadd.f32 %v6999_v32, %v6807_v27  ;;  %v12701_v31 = vld [vmem:[#allocation2 + $0x1bc] ss:$36 sps:$4 sm:$0xff]   ;;  %v6624_v32 = vadd.f32 %v16742_v37, %v15052_v53 }
 0x32f   : > { %v6812_v60 = vpop.f32.mrf.mxu0 }
 0x330   : > { %16740 = vst [vmem:[#allocation9_spill] sm:$0xff] %v15359_v36  ;;  %v7009_v48 = vpop.f32.mrf.mxu1  ;;  %v6813_v22 = vadd.f32 %v6812_v60, %v6620_v34  ;;  %v15363_v30 = vadd.f32 %v7003_v21, %v6811_v42  ;;  %v16743_v36 = vld [vmem:[#allocation15_spill] sm:$0xff] }
 0x331   : > { %v6814_v58 = vpop.f32.mrf.mxu0  ;;  %v6628_v38 = vadd.f32 %v16743_v36, %v15047_v43  ;;  %v6632_v36 = vadd.f32 %v15006_v0, %v15047_v43 }
 0x332   : > { %16741 = vst [vmem:[#allocation10_spill] sm:$0xff] %v15363_v30  ;;  %v7013_v24 = vpop.f32.mrf.mxu1  ;;  %7662 = vmatmul.mubr.bf16.gmra.mxu1 %v12700_v35  ;;  %v6815_v61 = vadd.f32 %v6814_v58, %v6622_v63  ;;  %v15367_v27 = vadd.f32 %v7005_v41, %v6813_v22  ;;  %v12702_v35 = vld [vmem:[#allocation2 + $0x168] ss:$36 sps:$4 sm:$0xff]   ;;  %v12703_v41 = vld [vmem:[#allocation2 + $0x1b4] ss:$36 sps:$4 sm:$0xff]  }
 0x333   : > { %7669 = vmatprep.mubr.bf16.mxu1 %v12701_v31  ;;  %v6816_v40 = vpop.f32.mrf.mxu0  ;;  %v6630_v31 = vadd.f32 %v15003_v5, %v15052_v53  ;;  %v16746_v5 = vld [vmem:[#allocation16_spill] sm:$0xff] }
 0x334   : > { %v7015_v57 = vpop.f32.mrf.mxu1  ;;  %v6817_v34 = vadd.f32 %v6816_v40, %v6624_v32  ;;  %v15371_v21 = vadd.f32 %v7007_v15, %v6815_v61  ;;  %7501 = vmatmul.mubr.bf16.gmra.mxu0 %v12702_v35  ;;  %v12704_v61 = vld [vmem:[#allocation2 + $0x1b8] ss:$36 sps:$4 sm:$0xff]   ;;  %v12705_v35 = vld [vmem:[#allocation2 + $0x204] ss:$36 sps:$4 sm:$0xff]  }
 0x335   : > { %v6820_v60 = vpop.f32.mrf.mxu0  ;;  %7508 = vmatprep.mubr.bf16.mxu0 %v12703_v41 }
 0x336   : > { %v7017_v42 = vpop.f32.mrf.mxu1  ;;  %v6821_v30 = vadd.f32 %v6820_v60, %v6628_v38  ;;  %v15375_v37 = vadd.f32 %v7009_v48, %v6817_v34  ;;  %v6634_v48 = vadd.f32 %v16746_v5, %v15052_v53 }
 0x337   : > { %v6822_v22 = vpop.f32.mrf.mxu0 }
 0x338   : > { %16744 = vst [vmem:[#allocation11_spill] sm:$0xff] %v15375_v37  ;;  %v7019_v63 = vpop.f32.mrf.mxu1  ;;  %v6823_v58 = vadd.f32 %v6822_v22, %v6630_v31  ;;  %v15379_v15 = vadd.f32 %v7013_v24, %v6821_v30  ;;  %v16747_v37 = vld [vmem:[#allocation17_spill] sm:$0xff] }
 0x339   : > { %v6824_v40 = vpop.f32.mrf.mxu0  ;;  %v6638_v0 = vadd.f32 %v16747_v37, %v15047_v43  ;;  %v6642_v37 = vadd.f32 %v15019_v8, %v15047_v43  ;;  %v6648_v8 = vadd.f32 %v15025_v59, %v15047_v43 }
 0x33a   : > { %16745 = vst [vmem:[#allocation12_spill] sm:$0xff] %v15379_v15  ;;  %v7023_v32 = vpop.f32.mrf.mxu1  ;;  %7670 = vmatmul.mubr.bf16.gmra.mxu1 %v12704_v61  ;;  %v6825_v38 = vadd.f32 %v6824_v40, %v6632_v36  ;;  %v15383_v34 = vadd.f32 %v7015_v57, %v6823_v58  ;;  %v12706_v61 = vld [vmem:[#allocation2 + $0x1b0] ss:$36 sps:$4 sm:$0xff]   ;;  %v12707_v57 = vld [vmem:[#allocation2 + $0x1fc] ss:$36 sps:$4 sm:$0xff]  }
 0x33b   : > { %7677 = vmatprep.mubr.bf16.mxu1 %v12705_v35  ;;  %v6826_v41 = vpop.f32.mrf.mxu0  ;;  %v6640_v35 = vadd.f32 %v15016_v54, %v15052_v53  ;;  %v6644_v54 = vadd.f32 %v15022_v47, %v15052_v53 }
 0x33c   : > { %v7025_v60 = vpop.f32.mrf.mxu1  ;;  %v6827_v31 = vadd.f32 %v6826_v41, %v6634_v48  ;;  %v15387_v30 = vadd.f32 %v7017_v42, %v6825_v38  ;;  %7509 = vmatmul.mubr.bf16.gmra.mxu0 %v12706_v61  ;;  %v12708_v38 = vld [vmem:[#allocation2 + $0x200] ss:$36 sps:$4 sm:$0xff]   ;;  %v12709_v61 = vld [vmem:[#allocation2 + $0x24c] ss:$36 sps:$4 sm:$0xff]  }
 0x33d   : > { %v6830_v22 = vpop.f32.mrf.mxu0  ;;  %7516 = vmatprep.mubr.bf16.mxu0 %v12707_v57 }
 0x33e   : > { %v7027_v24 = vpop.f32.mrf.mxu1  ;;  %v6831_v15 = vadd.f32 %v6830_v22, %v6638_v0  ;;  %v15391_v5 = vadd.f32 %v7019_v63, %v6827_v31 }
 0x33f   : > { %v6832_v58 = vpop.f32.mrf.mxu0 }
 0x340   : > { %v7029_v36 = vpop.f32.mrf.mxu1  ;;  %v6833_v40 = vadd.f32 %v6832_v58, %v6640_v35  ;;  %v15395_v42 = vadd.f32 %v7023_v32, %v6831_v15  ;;  %v12710_v58 = vld [vmem:[#allocation2 + $0x1f8] ss:$36 sps:$4 sm:$0xff]  }
 0x341   : > { %v6834_v41 = vpop.f32.mrf.mxu0 }
 0x342   : > { %v7033_v48 = vpop.f32.mrf.mxu1  ;;  %7678 = vmatmul.mubr.bf16.gmra.mxu1 %v12708_v38  ;;  %v6835_v63 = vadd.f32 %v6834_v41, %v6642_v37  ;;  %v15399_v0 = vadd.f32 %v7025_v60, %v6833_v40  ;;  %v6650_v38 = vadd.f32 %v15029_v12, %v15052_v53  ;;  %v12711_v60 = vld [vmem:[#allocation2 + $0x244] ss:$36 sps:$4 sm:$0xff]   ;;  %v16751_v41 = vld [vmem:[#allocation19_spill] sm:$0xff] }
 0x343   : > { %7685 = vmatprep.mubr.bf16.mxu1 %v12709_v61  ;;  %v6836_v22 = vpop.f32.mrf.mxu0  ;;  %v6652_v59 = vadd.f32 %v16751_v41, %v15047_v43  ;;  %v16752_v12 = vld [vmem:[#allocation21_spill] sm:$0xff] }
 0x344   : > { %16748 = vst [vmem:[#allocation13_spill] sm:$0xff] %v15399_v0  ;;  %v7035_v31 = vpop.f32.mrf.mxu1  ;;  %v6837_v35 = vadd.f32 %v6836_v22, %v6644_v54  ;;  %v15403_v15 = vadd.f32 %v7027_v24, %v6835_v63  ;;  %7517 = vmatmul.mubr.bf16.gmra.mxu0 %v12710_v58  ;;  %v12712_v22 = vld [vmem:[#allocation2 + $0x248] ss:$36 sps:$4 sm:$0xff]  }
 0x345   : > { %v6840_v57 = vpop.f32.mrf.mxu0  ;;  %7524 = vmatprep.mubr.bf16.mxu0 %v12711_v60 }
 0x346   : > { %16749 = vst [vmem:[#allocation14_spill] sm:$0xff] %v15403_v15  ;;  %v7037_v32 = vpop.f32.mrf.mxu1  ;;  %v6841_v61 = vadd.f32 %v6840_v57, %v6648_v8  ;;  %v15407_v47 = vadd.f32 %v7029_v36, %v6837_v35  ;;  %v12713_v15 = vld [vmem:[#allocation2 + $0x294] ss:$36 sps:$4 sm:$0xff]   ;;  %v6654_v36 = vadd.f32 %v16752_v12, %v15052_v53 }
 0x347   : > { %v6842_v40 = vpop.f32.mrf.mxu0 }
 0x348   : > { %16750 = vst [vmem:[#allocation15_spill] sm:$0xff] %v15407_v47  ;;  %v7039_v37 = vpop.f32.mrf.mxu1  ;;  %v6843_v54 = vadd.f32 %v6842_v40, %v6650_v38  ;;  %v15411_v24 = vadd.f32 %v7033_v48, %v6841_v61  ;;  %v12714_v38 = vld [vmem:[#allocation2 + $0x240] ss:$36 sps:$4 sm:$0xff]  }
 0x349   : > { %v6844_v58 = vpop.f32.mrf.mxu0 }
 0x34a   : > { %v7269_v63 = vpop.f32.mrf.mxu1  ;;  %7686 = vmatmul.mubr.bf16.gmra.mxu1 %v12712_v22  ;;  %v6845_v8 = vadd.f32 %v6844_v58, %v6652_v59  ;;  %v15415_v35 = vadd.f32 %v7035_v31, %v6843_v54  ;;  %v12716_v22 = vld [vmem:[#allocation2 + $0x290] ss:$36 sps:$4 sm:$0xff]   ;;  %v12717_v58 = vld [vmem:[#allocation2 + $0x2dc] ss:$36 sps:$4 sm:$0xff]  }
 0x34b   : > { %7693 = vmatprep.mubr.bf16.mxu1 %v12713_v15  ;;  %v6846_v60 = vpop.f32.mrf.mxu0  ;;  %v12715_v15 = vld [vmem:[#allocation2 + $0x28c] ss:$36 sps:$4 sm:$0xff]  }
 0x34c   : > { %v7271_v57 = vpop.f32.mrf.mxu1  ;;  %v6847_v47 = vadd.f32 %v6846_v60, %v6654_v36  ;;  %v15417_v0 = vadd.f32 %v7037_v32, %v6845_v8  ;;  %7525 = vmatmul.mubr.bf16.gmra.mxu0 %v12714_v38  ;;  %v12718_v38 = vld [vmem:[#allocation2 + $0x288] ss:$36 sps:$4 sm:$0xff]  }
 0x34d   : > { %v7076_v48 = vpop.f32.mrf.mxu0  ;;  %7532 = vmatprep.mubr.bf16.mxu0 %v12715_v15 }
 0x34e   : > { %v7273_v43 = vpop.f32.mrf.mxu1  ;;  %v15419_v61 = vadd.f32 %v7039_v37, %v6847_v47  ;;  %v7077_v40 = vadd.f32 %v7076_v48, %v15069_v52 }
 0x34f   : > { %v7078_v53 = vpop.f32.mrf.mxu0 }
 0x350   : > { %16753 = vst [vmem:[#allocation16_spill] sm:$0xff] %v15419_v61  ;;  %v7275_v41 = vpop.f32.mrf.mxu1  ;;  %v7079_v31 = vadd.f32 %v7078_v53, %v15074_v2  ;;  %v7270_v59 = vadd.f32 %v7269_v63, %v7077_v40  ;;  %v16754_v40 = vld [vmem:[#allocation24_spill] sm:$0xff] }
 0x351   : > { %v7080_v32 = vpop.f32.mrf.mxu0 }
 0x352   : > { %v7279_v54 = vpop.f32.mrf.mxu1  ;;  %7694 = vmatmul.mubr.bf16.gmra.mxu1 %v12716_v22  ;;  %v7081_v12 = vadd.f32 %v7080_v32, %v15078_v46  ;;  %v7272_v36 = vadd.f32 %v7271_v57, %v7079_v31  ;;  %v8235_v2 = vmax.f32 %v7270_v59, 0.0  ;;  %v12719_v22 = vld [vmem:[#allocation2 + $0x2d4] ss:$36 sps:$4 sm:$0xff]  }
 0x353   : > { %7701 = vmatprep.mubr.bf16.mxu1 %v12717_v58  ;;  %v7082_v37 = vpop.f32.mrf.mxu0 }
 0x354   : > { %v7281_v47 = vpop.f32.mrf.mxu1  ;;  %v7083_v52 = vadd.f32 %v7082_v37, %v15082_v39  ;;  %v7274_v8 = vadd.f32 %v7273_v43, %v7081_v12  ;;  %7533 = vmatmul.mubr.bf16.gmra.mxu0 %v12718_v38  ;;  %v8236_v61 = vmax.f32 %v7272_v36, 0.0  ;;  %v12720_v12 = vld [vmem:[#allocation2 + $0x2d8] ss:$36 sps:$4 sm:$0xff]   ;;  %v12721_v38 = vld [vmem:[#allocation2 + $0x324] ss:$36 sps:$4 sm:$0xff]  }
 0x355   : > { %v7086_v48 = vpop.f32.mrf.mxu0  ;;  %7540 = vmatprep.mubr.bf16.mxu0 %v12719_v22 }
 0x356   : > { %v7283_v60 = vpop.f32.mrf.mxu1  ;;  %v8240_v63 = vmax.f32 %v7274_v8, 0.0  ;;  %v7087_v15 = vadd.f32 %v7086_v48, %v16754_v40  ;;  %v7276_v53 = vadd.f32 %v7275_v41, %v7083_v52 }
 0x357   : > { %v7088_v46 = vpop.f32.mrf.mxu0 }
 0x358   : > { %v7285_v58 = vpop.f32.mrf.mxu1  ;;  %v8467_v57 = vadd.f32 %v8240_v63, %v8235_v2  ;;  %v8241_v31 = vmax.f32 %v7276_v53, 0.0  ;;  %v7089_v32 = vadd.f32 %v7088_v46, %v15091_v26  ;;  %v7280_v39 = vadd.f32 %v7279_v54, %v7087_v15  ;;  %v12722_v15 = vld [vmem:[#allocation2 + $0x2d0] ss:$36 sps:$4 sm:$0xff]  }
 0x359   : > { %v7090_v37 = vpop.f32.mrf.mxu0 }
 0x35a   : > { %v7289_v43 = vpop.f32.mrf.mxu1  ;;  %7702 = vmatmul.mubr.bf16.gmra.mxu1 %v12720_v12  ;;  %v8504_v59 = vadd.f32 %v8241_v31, %v8236_v61  ;;  %v8245_v8 = vmax.f32 %v7280_v39, 0.0  ;;  %v7091_v41 = vadd.f32 %v7090_v37, %v15095_v9  ;;  %v7282_v52 = vadd.f32 %v7281_v47, %v7089_v32  ;;  %v12723_v31 = vld [vmem:[#allocation2 + $0x31c] ss:$36 sps:$4 sm:$0xff]  }
 0x35b   : > { %7709 = vmatprep.mubr.bf16.mxu1 %v12721_v38  ;;  %v7092_v40 = vpop.f32.mrf.mxu0 }
 0x35c   : > { %v7291_v48 = vpop.f32.mrf.mxu1  ;;  %v8468_v36 = vadd.f32 %v8467_v57, %v8245_v8  ;;  %v8246_v22 = vmax.f32 %v7282_v52, 0.0  ;;  %v7093_v2 = vadd.f32 %v7092_v40, %v15099_v7  ;;  %v7284_v63 = vadd.f32 %v7283_v60, %v7091_v41  ;;  %7541 = vmatmul.mubr.bf16.gmra.mxu0 %v12722_v15  ;;  %v12724_v60 = vld [vmem:[#allocation2 + $0x320] ss:$36 sps:$4 sm:$0xff]   ;;  %v12725_v8 = vld [vmem:[#allocation2 + $0x36c] ss:$36 sps:$4 sm:$0xff]  }
 0x35d   : > { %v7096_v54 = vpop.f32.mrf.mxu0  ;;  %7548 = vmatprep.mubr.bf16.mxu0 %v12723_v31 }
 0x35e   : > { %v7293_v26 = vpop.f32.mrf.mxu1  ;;  %v8505_v53 = vadd.f32 %v8504_v59, %v8246_v22  ;;  %v8250_v46 = vmax.f32 %v7284_v63, 0.0  ;;  %v7097_v12 = vadd.f32 %v7096_v54, %v15103_v44  ;;  %v7286_v61 = vadd.f32 %v7285_v58, %v7093_v2  ;;  %v12726_v54 = vld [vmem:[#allocation2 + $0x318] ss:$36 sps:$4 sm:$0xff]  }
 0x35f   : > { %v7098_v47 = vpop.f32.mrf.mxu0 }
 0x360   : > { %v7295_v9 = vpop.f32.mrf.mxu1  ;;  %v8469_v32 = vadd.f32 %v8468_v36, %v8250_v46  ;;  %v8251_v39 = vmax.f32 %v7286_v61, 0.0  ;;  %v7099_v57 = vadd.f32 %v7098_v47, %v15108_v33  ;;  %v7290_v37 = vadd.f32 %v7289_v43, %v7097_v12  ;;  %v12727_v61 = vld [vmem:[#allocation2 + $0x364] ss:$36 sps:$4 sm:$0xff]  }
 0x361   : > { %v7100_v38 = vpop.f32.mrf.mxu0 }
 0x362   : > { %v7299_v7 = vpop.f32.mrf.mxu1  ;;  %7710 = vmatmul.mubr.bf16.gmra.mxu1 %v12724_v60  ;;  %v8506_v59 = vadd.f32 %v8505_v53, %v8251_v39  ;;  %v8255_v41 = vmax.f32 %v7290_v37, 0.0  ;;  %v7101_v44 = vadd.f32 %v7100_v38, %v15112_v3  ;;  %v7292_v58 = vadd.f32 %v7291_v48, %v7099_v57  ;;  %v12729_v37 = vld [vmem:[#allocation2 + $0x3b4] ss:$36 sps:$4 sm:$0xff]  }
 0x363   : > { %7717 = vmatprep.mubr.bf16.mxu1 %v12725_v8  ;;  %v7102_v40 = vpop.f32.mrf.mxu0 }
 0x364   : > { %v7301_v52 = vpop.f32.mrf.mxu1  ;;  %v8470_v22 = vadd.f32 %v8469_v32, %v8255_v41  ;;  %v8256_v2 = vmax.f32 %v7292_v58, 0.0  ;;  %v7103_v36 = vadd.f32 %v7102_v40, %v15116_v29  ;;  %v7294_v63 = vadd.f32 %v7293_v26, %v7101_v44  ;;  %7549 = vmatmul.mubr.bf16.gmra.mxu0 %v12726_v54  ;;  %v12728_v26 = vld [vmem:[#allocation2 + $0x368] ss:$36 sps:$4 sm:$0xff]  }
 0x365   : > { %v7106_v43 = vpop.f32.mrf.mxu0  ;;  %7556 = vmatprep.mubr.bf16.mxu0 %v12727_v61  ;;  %v12731_v54 = vld [vmem:[#allocation2 + $0x3ac] ss:$36 sps:$4 sm:$0xff]  }
 0x366   : > { %v7303_v33 = vpop.f32.mrf.mxu1  ;;  %v8507_v15 = vadd.f32 %v8506_v59, %v8256_v2  ;;  %v8260_v46 = vmax.f32 %v7294_v63, 0.0  ;;  %v7107_v12 = vadd.f32 %v7106_v43, %v15120_v14  ;;  %v7296_v53 = vadd.f32 %v7295_v9, %v7103_v36 }
 0x367   : > { %v7108_v48 = vpop.f32.mrf.mxu0 }
 0x368   : > { %v7305_v3 = vpop.f32.mrf.mxu1  ;;  %v8471_v31 = vadd.f32 %v8470_v22, %v8260_v46  ;;  %v8261_v47 = vmax.f32 %v7296_v53, 0.0  ;;  %v7109_v32 = vadd.f32 %v7108_v48, %v15125_v18  ;;  %v7300_v39 = vadd.f32 %v7299_v7, %v7107_v12  ;;  %v12730_v22 = vld [vmem:[#allocation2 + $0x360] ss:$36 sps:$4 sm:$0xff]  }
 0x369   : > { %v7110_v57 = vpop.f32.mrf.mxu0  ;;  %v12733_v48 = vld [vmem:[#allocation2 + $0x3fc] ss:$36 sps:$4 sm:$0xff]  }
 0x36a   : > { %v7309_v29 = vpop.f32.mrf.mxu1  ;;  %7718 = vmatmul.mubr.bf16.gmra.mxu1 %v12728_v26  ;;  %v8508_v60 = vadd.f32 %v8507_v15, %v8261_v47  ;;  %v8265_v38 = vmax.f32 %v7300_v39, 0.0  ;;  %v7111_v14 = vadd.f32 %v7110_v57, %v15129_v13  ;;  %v7302_v9 = vadd.f32 %v7301_v52, %v7109_v32 }
 0x36b   : > { %7725 = vmatprep.mubr.bf16.mxu1 %v12729_v37  ;;  %v7112_v59 = vpop.f32.mrf.mxu0 }
 0x36c   : > { %v7311_v8 = vpop.f32.mrf.mxu1  ;;  %v8472_v41 = vadd.f32 %v8471_v31, %v8265_v38  ;;  %v8266_v44 = vmax.f32 %v7302_v9, 0.0  ;;  %v7113_v58 = vadd.f32 %v7112_v59, %v15133_v62  ;;  %v7304_v40 = vadd.f32 %v7303_v33, %v7111_v14  ;;  %7557 = vmatmul.mubr.bf16.gmra.mxu0 %v12730_v22  ;;  %v12732_v33 = vld [vmem:[#allocation2 + $0x3b0] ss:$36 sps:$4 sm:$0xff]   ;;  %v12734_v38 = vld [vmem:[#allocation2 + $0x3a8] ss:$36 sps:$4 sm:$0xff]  }
 0x36d   : > { %v7116_v7 = vpop.f32.mrf.mxu0  ;;  %7564 = vmatprep.mubr.bf16.mxu0 %v12731_v54 }
 0x36e   : > { %v7313_v18 = vpop.f32.mrf.mxu1  ;;  %v8509_v2 = vadd.f32 %v8508_v60, %v8266_v44  ;;  %v8270_v36 = vmax.f32 %v7304_v40, 0.0  ;;  %v7117_v63 = vadd.f32 %v7116_v7, %v15137_v20  ;;  %v7306_v43 = vadd.f32 %v7305_v3, %v7113_v58  ;;  %v12735_v44 = vld [vmem:[#allocation2 + $0x3f4] ss:$36 sps:$4 sm:$0xff]  }
 0x36f   : > { %v7118_v52 = vpop.f32.mrf.mxu0 }
 0x370   : > { %v7315_v13 = vpop.f32.mrf.mxu1  ;;  %v8473_v15 = vadd.f32 %v8472_v41, %v8270_v36  ;;  %v8271_v46 = vmax.f32 %v7306_v43, 0.0  ;;  %v7119_v12 = vadd.f32 %v7118_v52, %v15142_v56  ;;  %v7310_v53 = vadd.f32 %v7309_v29, %v7117_v63  ;;  %v12737_v36 = vld [vmem:[#allocation2 + $0x444] ss:$36 sps:$4 sm:$0xff]  }
 0x371   : > { %v7120_v61 = vpop.f32.mrf.mxu0 }
 0x372   : > { %v7319_v62 = vpop.f32.mrf.mxu1  ;;  %7726 = vmatmul.mubr.bf16.gmra.mxu1 %v12732_v33  ;;  %v8510_v31 = vadd.f32 %v8509_v2, %v8271_v46  ;;  %v8275_v47 = vmax.f32 %v7310_v53, 0.0  ;;  %v7121_v20 = vadd.f32 %v7120_v61, %v15146_v16  ;;  %v7312_v3 = vadd.f32 %v7311_v8, %v7119_v12  ;;  %v12738_v33 = vld [vmem:[#allocation2 + $0x3f0] ss:$36 sps:$4 sm:$0xff]  }
 0x373   : > { %7733 = vmatprep.mubr.bf16.mxu1 %v12733_v48  ;;  %v7122_v39 = vpop.f32.mrf.mxu0 }
 0x374   : > { %v7321_v32 = vpop.f32.mrf.mxu1  ;;  %v8474_v26 = vadd.f32 %v8473_v15, %v8275_v47  ;;  %v8276_v57 = vmax.f32 %v7312_v3, 0.0  ;;  %v7123_v37 = vadd.f32 %v7122_v39, %v15150_v50  ;;  %v7314_v60 = vadd.f32 %v7313_v18, %v7121_v20  ;;  %7565 = vmatmul.mubr.bf16.gmra.mxu0 %v12734_v38  ;;  %v12736_v18 = vld [vmem:[#allocation2 + $0x3f8] ss:$36 sps:$4 sm:$0xff]  }
 0x375   : > { %v7126_v29 = vpop.f32.mrf.mxu0  ;;  %7572 = vmatprep.mubr.bf16.mxu0 %v12735_v44  ;;  %v12739_v20 = vld [vmem:[#allocation2 + $0x43c] ss:$36 sps:$4 sm:$0xff]  }
 0x376   : > { %v7323_v56 = vpop.f32.mrf.mxu1  ;;  %v8511_v14 = vadd.f32 %v8510_v31, %v8276_v57  ;;  %v8280_v9 = vmax.f32 %v7314_v60, 0.0  ;;  %v7127_v59 = vadd.f32 %v7126_v29, %v15154_v17  ;;  %v7316_v41 = vadd.f32 %v7315_v13, %v7123_v37  ;;  %v12740_v37 = vld [vmem:[#allocation2 + $0x440] ss:$36 sps:$4 sm:$0xff]  }
 0x377   : > { %v7128_v8 = vpop.f32.mrf.mxu0 }
 0x378   : > { %v7325_v16 = vpop.f32.mrf.mxu1  ;;  %v8475_v58 = vadd.f32 %v8474_v26, %v8280_v9  ;;  %v8281_v40 = vmax.f32 %v7316_v41, 0.0  ;;  %v7129_v7 = vadd.f32 %v7128_v8, %v15159_v19  ;;  %v7320_v22 = vadd.f32 %v7319_v62, %v7127_v59 }
 0x379   : > { %v7130_v2 = vpop.f32.mrf.mxu0 }
 0x37a   : > { %v7329_v50 = vpop.f32.mrf.mxu1  ;;  %7734 = vmatmul.mubr.bf16.gmra.mxu1 %v12736_v18  ;;  %v8512_v63 = vadd.f32 %v8511_v14, %v8281_v40  ;;  %v8285_v43 = vmax.f32 %v7320_v22, 0.0  ;;  %v7131_v17 = vadd.f32 %v7130_v2, %v15163_v28  ;;  %v7322_v54 = vadd.f32 %v7321_v32, %v7129_v7  ;;  %v12742_v40 = vld [vmem:[#allocation2 + $0x438] ss:$36 sps:$4 sm:$0xff]  }
 0x37b   : > { %7741 = vmatprep.mubr.bf16.mxu1 %v12737_v36  ;;  %v7132_v52 = vpop.f32.mrf.mxu0  ;;  %v12743_v36 = vld [vmem:[#allocation2 + $0x14] ss:$36 sps:$4 sm:$0xff]  }
 0x37c   : > { %v7331_v13 = vpop.f32.mrf.mxu1  ;;  %v8476_v15 = vadd.f32 %v8475_v58, %v8285_v43  ;;  %v8286_v46 = vmax.f32 %v7322_v54, 0.0  ;;  %v7133_v12 = vadd.f32 %v7132_v52, %v15167_v23  ;;  %v7324_v53 = vadd.f32 %v7323_v56, %v7131_v17  ;;  %7573 = vmatmul.mubr.bf16.gmra.mxu0 %v12738_v33  ;;  %v12741_v56 = vld [vmem:[#allocation2 + $0x1c] ss:$36 sps:$4 sm:$0xff]   ;;  %v16756_v54 = vld [vmem:[#allocation26_spill] sm:$0xff] }
 0x37d   : > { %v7136_v62 = vpop.f32.mrf.mxu0  ;;  %7580 = vmatprep.mubr.bf16.mxu0 %v12739_v20 }
 0x37e   : > { %v7333_v19 = vpop.f32.mrf.mxu1  ;;  %v8513_v61 = vadd.f32 %v8512_v63, %v8286_v46  ;;  %v8290_v48 = vmax.f32 %v7324_v53, 0.0  ;;  %v7137_v31 = vadd.f32 %v7136_v62, %v15171_v25  ;;  %v7326_v47 = vadd.f32 %v7325_v16, %v7133_v12  ;;  %v12745_v12 = vld [vmem:[#allocation2 + $0x64] ss:$36 sps:$4 sm:$0xff]   ;;  %v16757_v62 = vld [vmem:[#allocation27_spill] sm:$0xff] }
 0x37f   : > { %v7138_v3 = vpop.f32.mrf.mxu0 }
 0x380   : > { %v7335_v28 = vpop.f32.mrf.mxu1  ;;  %v8477_v32 = vadd.f32 %v8476_v15, %v8290_v48  ;;  %v8291_v39 = vmax.f32 %v7326_v47, 0.0  ;;  %v7139_v26 = vadd.f32 %v7138_v3, %v15175_v6  ;;  %v7330_v57 = vadd.f32 %v7329_v50, %v7137_v31  ;;  %v16755_v50 = vld [vmem:[#allocation25_spill] sm:$0xff]  ;;  %v12744_v15 = vld [vmem:[#allocation2 + $0x18] ss:$36 sps:$4 sm:$0xff]   ;;  %v12274_v47 = vld [vmem:[%s16543_s1 + $0xb00] ss:$20 sps:$4 sm:$0xff]  }
 0x381   : > { %v7140_v60 = vpop.f32.mrf.mxu0  ;;  %v16758_v3 = vld [vmem:[#allocation28_spill] sm:$0xff] }
 0x382   : > { %v7339_v23 = vpop.f32.mrf.mxu1  ;;  %7742 = vmatmul.mubr.bf16.gmra.mxu1 %v12740_v37  ;;  %v8514_v29 = vadd.f32 %v8513_v61, %v8291_v39  ;;  %v8295_v38 = vmax.f32 %v7330_v57, 0.0  ;;  %v7141_v25 = vadd.f32 %v7140_v60, %v15179_v45  ;;  %v7332_v14 = vadd.f32 %v7331_v13, %v7139_v26 }
 0x383   : > { %7943 = vmatprep.mubr.bf16.mxu1 %v12741_v56  ;;  %v7142_v59 = vpop.f32.mrf.mxu0  ;;  %v16759_v56 = vld [vmem:[#allocation29_spill] sm:$0xff] }
 0x384   : > { %v7341_v9 = vpop.f32.mrf.mxu1  ;;  %v8478_v41 = vadd.f32 %v8477_v32, %v8295_v38  ;;  %v8296_v44 = vmax.f32 %v7332_v14, 0.0  ;;  %v7143_v16 = vadd.f32 %v7142_v59, %v15186_v11  ;;  %v7334_v8 = vadd.f32 %v7333_v19, %v7141_v25  ;;  %7581 = vmatmul.mubr.bf16.gmra.mxu0 %v12742_v40  ;;  %v12747_v25 = vld [vmem:[#allocation2 + $0x5c] ss:$36 sps:$4 sm:$0xff]   ;;  %v12275_v59 = vld [vmem:[%s16543_s1 + $0xad8] ss:$20 sps:$4 sm:$0xff]  }
 0x385   : > { %v7146_v58 = vpop.f32.mrf.mxu0  ;;  %7782 = vmatprep.mubr.bf16.mxu0 %v12743_v36  ;;  %v12748_v40 = vld [vmem:[#allocation2 + $0x60] ss:$36 sps:$4 sm:$0xff]  }
 0x386   : > { %v7343_v6 = vpop.f32.mrf.mxu1  ;;  %v8515_v7 = vadd.f32 %v8514_v29, %v8296_v44  ;;  %v8300_v22 = vmax.f32 %v7334_v8, 0.0  ;;  %v7147_v18 = vadd.f32 %v7146_v58, %v16755_v50  ;;  %v7336_v2 = vadd.f32 %v7335_v28, %v7143_v16  ;;  %v16760_v16 = vld [vmem:[#allocation30_spill] sm:$0xff] }
 0x387   : > { %v7148_v63 = vpop.f32.mrf.mxu0 }
 0x388   : > { %v7345_v45 = vpop.f32.mrf.mxu1  ;;  %v8479_v43 = vadd.f32 %v8478_v41, %v8300_v22  ;;  %v8301_v17 = vmax.f32 %v7336_v2, 0.0  ;;  %v7149_v13 = vadd.f32 %v7148_v63, %v16756_v54  ;;  %v7340_v52 = vadd.f32 %v7339_v23, %v7147_v18  ;;  %v12746_v23 = vld [vmem:[#allocation2 + $0x10] ss:$36 sps:$4 sm:$0xff]   ;;  %v16761_v54 = vld [vmem:[#allocation31_spill] sm:$0xff] }
 0x389   : > { %v7150_v46 = vpop.f32.mrf.mxu0  ;;  %v12749_v22 = vld [vmem:[#allocation2 + $0xac] ss:$36 sps:$4 sm:$0xff]  }
 0x38a   : > { %v7349_v11 = vpop.f32.mrf.mxu1  ;;  %7944 = vmatmul.mubr.bf16.vlgmr.msra.gmra.mxu1 %v12744_v15  ;;  %v8516_v53 = vadd.f32 %v8515_v7, %v8301_v17  ;;  %v8305_v19 = vmax.f32 %v7340_v52, 0.0  ;;  %v7151_v33 = vadd.f32 %v7150_v46, %v16757_v62  ;;  %v7342_v61 = vadd.f32 %v7341_v9, %v7149_v13  ;;  %v12276_v63 = vld [vmem:[%s16543_s1 + $0xab0] ss:$20 sps:$4 sm:$0xff]   ;;  %v12750_v46 = vld [vmem:[#allocation2 + $0x58] ss:$36 sps:$4 sm:$0xff]  }
 0x38b   : > { %7951 = vmatprep.mubr.bf16.mxu1 %v12745_v12  ;;  %v7152_v31 = vpop.f32.mrf.mxu0 }
 0x38c   : > { %v7351_v48 = vpop.f32.mrf.mxu1  ;;  %v8480_v20 = vadd.f32 %v8479_v43, %v8305_v19  ;;  %v8306_v28 = vmax.f32 %v7342_v61, 0.0  ;;  %v7153_v32 = vadd.f32 %v7152_v31, %v16758_v3  ;;  %v7344_v39 = vadd.f32 %v7343_v6, %v7151_v33  ;;  %7783 = vmatmul.mubr.bf16.vlgmr.msra.gmra.mxu0 %v12746_v23  ;;  %v12751_v33 = vld [vmem:[#allocation2 + $0xa4] ss:$36 sps:$4 sm:$0xff]   ;;  %v12753_v23 = vld [vmem:[#allocation2 + $0xf4] ss:$36 sps:$4 sm:$0xff]  }
 0x38d   : > { %v7156_v57 = vpop.f32.mrf.mxu0  ;;  %11512 = vmatpush3.bf16.msra.mxu0 %v15342_v49  ;;  %7790 = vmatprep.mubr.bf16.mxu0 %v12747_v25  ;;  %v12277_v31 = vld [vmem:[%s16543_s1 + $0xa88] ss:$20 sps:$4 sm:$0xff]  }
 0x38e   : > { %v7353_v26 = vpop.f32.mrf.mxu1  ;;  %v8517_v37 = vadd.f32 %v8516_v53, %v8306_v28  ;;  %v8310_v60 = vmax.f32 %v7344_v39, 0.0  ;;  %v7157_v29 = vadd.f32 %v7156_v57, %v16759_v56  ;;  %v7346_v38 = vadd.f32 %v7345_v45, %v7153_v32  ;;  %11513 = vmatprep.subr.bf16.mxu0 %v12274_v47  ;;  %v16762_v53 = vld [vmem:[#allocation32_spill] sm:$0xff]  ;;  %v16763_v28 = vld [vmem:[#allocation33_spill] sm:$0xff] }
 0x38f   : > { %v7158_v9 = vpop.f32.mrf.mxu0 }
 0x390   : > { %v7355_v14 = vpop.f32.mrf.mxu1  ;;  %v8481_v41 = vadd.f32 %v8480_v20, %v8310_v60  ;;  %v8311_v44 = vmax.f32 %v7346_v38, 0.0  ;;  %v7159_v8 = vadd.f32 %v7158_v9, %v16760_v16  ;;  %v7350_v6 = vadd.f32 %v7349_v11, %v7157_v29 }
 0x391   : > { %v7160_v7 = vpop.f32.mrf.mxu0  ;;  %11514 = vmatpush3.bf16.msra.mxu0 %v12274_v47 }
 0x392   : > { %v7359_v58 = vpop.f32.mrf.mxu1  ;;  %7952 = vmatmul.mubr.bf16.gmra.mxu1 %v12748_v40  ;;  %v8518_v49 = vadd.f32 %v8517_v37, %v8311_v44  ;;  %v8315_v50 = vmax.f32 %v7350_v6, 0.0  ;;  %v7161_v18 = vadd.f32 %v7160_v7, %v15253_v51  ;;  %v7352_v2 = vadd.f32 %v7351_v48, %v7159_v8  ;;  %11515 = vmatprep.subr.bf16.mxu0 %v12275_v59 }
 0x393   : > { %7959 = vmatprep.mubr.bf16.mxu1 %v12749_v22  ;;  %v7162_v45 = vpop.f32.mrf.mxu0 }
 0x394   : > { %v7361_v36 = vpop.f32.mrf.mxu1  ;;  %v8482_v43 = vadd.f32 %v8481_v41, %v8315_v50  ;;  %v8316_v17 = vmax.f32 %v7352_v2, 0.0  ;;  %v7163_v13 = vadd.f32 %v7162_v45, %v16761_v54  ;;  %v7354_v52 = vadd.f32 %v7353_v26, %v7161_v18  ;;  %7791 = vmatmul.mubr.bf16.gmra.mxu0 %v12750_v46  ;;  %v12752_v26 = vld [vmem:[#allocation2 + $0xa8] ss:$36 sps:$4 sm:$0xff]   ;;  %v16764_v41 = vld [vmem:[#allocation34_spill] sm:$0xff] }
 0x395   : > { %v7166_v15 = vpop.f32.mrf.mxu0  ;;  %7798 = vmatprep.mubr.bf16.mxu0 %v12751_v33  ;;  %11516 = vmatpush3.bf16.msra.mxu0 %v12275_v59  ;;  %v12279_v2 = vld [vmem:[%s16543_s1 + $0xa38] ss:$20 sps:$4 sm:$0xff]   ;;  %v16766_v46 = vld [vmem:[#allocation36_spill] sm:$0xff] }
 0x396   : > { %v7363_v11 = vpop.f32.mrf.mxu1  ;;  %v8519_v12 = vadd.f32 %v8518_v49, %v8316_v17  ;;  %v8320_v51 = vmax.f32 %v7354_v52, 0.0  ;;  %v7167_v19 = vadd.f32 %v7166_v15, %v16762_v53  ;;  %v7356_v62 = vadd.f32 %v7355_v14, %v7163_v13  ;;  %11517 = vmatprep.subr.bf16.mxu0 %v12276_v63  ;;  %v12278_v14 = vld [vmem:[%s16543_s1 + $0xa60] ss:$20 sps:$4 sm:$0xff]   ;;  %v12755_v49 = vld [vmem:[#allocation2 + $0xec] ss:$36 sps:$4 sm:$0xff]  }
 0x397   : > { %v7168_v48 = vpop.f32.mrf.mxu0  ;;  %v12756_v13 = vld [vmem:[#allocation2 + $0xf0] ss:$36 sps:$4 sm:$0xff]   ;;  %v12757_v52 = vld [vmem:[#allocation2 + $0x13c] ss:$36 sps:$4 sm:$0xff]  }
 0x398   : > { %v7365_v61 = vpop.f32.mrf.mxu1  ;;  %v8483_v47 = vadd.f32 %v8482_v43, %v8320_v51  ;;  %v8321_v20 = vmax.f32 %v7356_v62, 0.0  ;;  %v7169_v3 = vadd.f32 %v7168_v48, %v16763_v28  ;;  %v7360_v32 = vadd.f32 %v7359_v58, %v7167_v19  ;;  %v12754_v58 = vld [vmem:[#allocation2 + $0xa0] ss:$36 sps:$4 sm:$0xff]  }
 0x399   : > { %v7170_v57 = vpop.f32.mrf.mxu0  ;;  %11518 = vmatpush3.bf16.msra.mxu0 %v12276_v63  ;;  %v16765_v63 = vld [vmem:[#allocation35_spill] sm:$0xff]  ;;  %v12280_v62 = vld [vmem:[%s16543_s1 + $0xa10] ss:$20 sps:$4 sm:$0xff]  }
 0x39a   : > { %v7369_v39 = vpop.f32.mrf.mxu1  ;;  %7960 = vmatmul.mubr.bf16.gmra.mxu1 %v12752_v26  ;;  %v8520_v37 = vadd.f32 %v8519_v12, %v8321_v20  ;;  %v8325_v60 = vmax.f32 %v7360_v32, 0.0  ;;  %v7171_v56 = vadd.f32 %v7170_v57, %v15293_v1  ;;  %v7362_v29 = vadd.f32 %v7361_v36, %v7169_v3  ;;  %11519 = vmatprep.subr.bf16.mxu0 %v12277_v31  ;;  %v16767_v48 = vld [vmem:[#allocation7_spill] sm:$0xff]  ;;  %v12758_v3 = vld [vmem:[#allocation2 + $0xe8] ss:$36 sps:$4 sm:$0xff]  }
 0x39b   : > { %7967 = vmatprep.mubr.bf16.mxu1 %v12753_v23  ;;  %v7172_v25 = vpop.f32.mrf.mxu0  ;;  %v12759_v23 = vld [vmem:[#allocation2 + $0x134] ss:$36 sps:$4 sm:$0xff]  }
 0x39c   : > { %v7371_v38 = vpop.f32.mrf.mxu1  ;;  %v8484_v9 = vadd.f32 %v8483_v47, %v8325_v60  ;;  %v8326_v59 = vmax.f32 %v7362_v29, 0.0  ;;  %v7173_v44 = vadd.f32 %v7172_v25, %v16764_v41  ;;  %v7364_v16 = vadd.f32 %v7363_v11, %v7171_v56  ;;  %7799 = vmatmul.mubr.bf16.gmra.mxu0 %v12754_v58  ;;  %v12761_v41 = vld [vmem:[#allocation2 + $0x184] ss:$36 sps:$4 sm:$0xff]  }
 0x39d   : > { %v7176_v6 = vpop.f32.mrf.mxu0  ;;  %7806 = vmatprep.mubr.bf16.mxu0 %v12755_v49  ;;  %11520 = vmatpush3.bf16.msra.mxu0 %v12277_v31 }
 0x39e   : > { %v7373_v8 = vpop.f32.mrf.mxu1  ;;  %v8521_v40 = vadd.f32 %v8520_v37, %v8326_v59  ;;  %v8330_v1 = vmax.f32 %v7364_v16, 0.0  ;;  %v7177_v7 = vadd.f32 %v7176_v6, %v15313_v55  ;;  %v7366_v22 = vadd.f32 %v7365_v61, %v7173_v44  ;;  %11521 = vmatprep.subr.bf16.mxu0 %v12278_v14  ;;  %v16768_v16 = vld [vmem:[#allocation8_spill] sm:$0xff] }
 0x39f   : > { %v7178_v18 = vpop.f32.mrf.mxu0 }
 0x3a0   : > { %v7375_v50 = vpop.f32.mrf.mxu1  ;;  %v8485_v36 = vadd.f32 %v8484_v9, %v8330_v1  ;;  %v8331_v45 = vmax.f32 %v7366_v22, 0.0  ;;  %v7179_v43 = vadd.f32 %v7178_v18, %v16765_v63  ;;  %v7370_v17 = vadd.f32 %v7369_v39, %v7177_v7  ;;  %v12760_v9 = vld [vmem:[#allocation2 + $0x138] ss:$36 sps:$4 sm:$0xff]   ;;  %v16769_v22 = vld [vmem:[#allocation9_spill] sm:$0xff] }
 0x3a1   : > { %v7180_v55 = vpop.f32.mrf.mxu0  ;;  %11522 = vmatpush3.bf16.msra.mxu0 %v12278_v14  ;;  %v16770_v63 = vld [vmem:[#allocation10_spill] sm:$0xff] }
 0x3a2   : > { %v7379_v54 = vpop.f32.mrf.mxu1  ;;  %7968 = vmatmul.mubr.bf16.gmra.mxu1 %v12756_v13  ;;  %v8522_v11 = vadd.f32 %v8521_v40, %v8331_v45  ;;  %v8335_v15 = vmax.f32 %v7370_v17, 0.0  ;;  %v7181_v12 = vadd.f32 %v7180_v55, %v16766_v46  ;;  %v7372_v51 = vadd.f32 %v7371_v38, %v7179_v43  ;;  %11523 = vmatprep.subr.bf16.mxu0 %v12279_v2 }
 0x3a3   : > { %7975 = vmatprep.mubr.bf16.mxu1 %v12757_v52  ;;  %v7182_v19 = vpop.f32.mrf.mxu0 }
 0x3a4   : > { %v7381_v53 = vpop.f32.mrf.mxu1  ;;  %v8486_v33 = vadd.f32 %v8485_v36, %v8335_v15  ;;  %v8336_v61 = vmax.f32 %v7372_v51, 0.0  ;;  %v7183_v31 = vadd.f32 %v7182_v19, %v16767_v48  ;;  %v7374_v47 = vadd.f32 %v7373_v8, %v7181_v12  ;;  %7807 = vmatmul.mubr.bf16.gmra.mxu0 %v12758_v3  ;;  %v12764_v51 = vld [vmem:[#allocation2 + $0x180] ss:$36 sps:$4 sm:$0xff]   ;;  %v12765_v19 = vld [vmem:[#allocation2 + $0x1cc] ss:$36 sps:$4 sm:$0xff]  }
 0x3a5   : > { %v7186_v28 = vpop.f32.mrf.mxu0  ;;  %7814 = vmatprep.mubr.bf16.mxu0 %v12759_v23  ;;  %11524 = vmatpush3.bf16.msra.mxu0 %v12279_v2  ;;  %v12762_v2 = vld [vmem:[#allocation2 + $0x130] ss:$36 sps:$4 sm:$0xff]   ;;  %v16771_v3 = vld [vmem:[#allocation11_spill] sm:$0xff] }
 0x3a6   : > { %v7383_v20 = vpop.f32.mrf.mxu1  ;;  %v8523_v32 = vadd.f32 %v8522_v11, %v8336_v61  ;;  %v8340_v39 = vmax.f32 %v7374_v47, 0.0  ;;  %v7187_v26 = vadd.f32 %v7186_v28, %v15346_v10  ;;  %v7376_v57 = vadd.f32 %v7375_v50, %v7183_v31  ;;  %11525 = vmatprep.subr.bf16.mxu0 %v12280_v62 }
 0x3a7   : > { %v7188_v60 = vpop.f32.mrf.mxu0 }
 0x3a8   : > { %v7385_v37 = vpop.f32.mrf.mxu1  ;;  %v8487_v56 = vadd.f32 %v8486_v33, %v8340_v39  ;;  %v8341_v29 = vmax.f32 %v7376_v57, 0.0  ;;  %v7189_v38 = vadd.f32 %v7188_v60, %v15350_v4  ;;  %v7380_v25 = vadd.f32 %v7379_v54, %v7187_v26  ;;  %v12763_v54 = vld [vmem:[#allocation2 + $0x17c] ss:$36 sps:$4 sm:$0xff]  }
 0x3a9   : > { %v7190_v59 = vpop.f32.mrf.mxu0  ;;  %11526 = vmatpush3.bf16.msra.mxu0 %v12280_v62  ;;  %v12766_v57 = vld [vmem:[#allocation2 + $0x178] ss:$36 sps:$4 sm:$0xff]   ;;  %v16772_v60 = vld [vmem:[#allocation12_spill] sm:$0xff] }
 0x3aa   : > { %v7389_v14 = vpop.f32.mrf.mxu1  ;;  %7976 = vmatmul.mubr.bf16.gmra.mxu1 %v12760_v9  ;;  %v8524_v44 = vadd.f32 %v8523_v32, %v8341_v29  ;;  %v8345_v10 = vmax.f32 %v7380_v25, 0.0  ;;  %v7191_v8 = vadd.f32 %v7190_v59, %v16768_v16  ;;  %v7382_v6 = vadd.f32 %v7381_v53, %v7189_v38  ;;  %v12767_v38 = vld [vmem:[#allocation2 + $0x1c4] ss:$36 sps:$4 sm:$0xff]  }
 0x3ab   : > { %7983 = vmatprep.mubr.bf16.mxu1 %v12761_v41  ;;  %v7192_v40 = vpop.f32.mrf.mxu0 }
 0x3ac   : > { %v7391_v58 = vpop.f32.mrf.mxu1  ;;  %v8488_v1 = vadd.f32 %v8487_v56, %v8345_v10  ;;  %v8346_v7 = vmax.f32 %v7382_v6, 0.0  ;;  %v7193_v49 = vadd.f32 %v7192_v40, %v16769_v22  ;;  %v7384_v4 = vadd.f32 %v7383_v20, %v7191_v8  ;;  %7815 = vmatmul.mubr.bf16.gmra.mxu0 %v12762_v2  ;;  %v12768_v10 = vld [vmem:[#allocation2 + $0x1c8] ss:$36 sps:$4 sm:$0xff]   ;;  %v12769_v8 = vld [vmem:[#allocation2 + $0x214] ss:$36 sps:$4 sm:$0xff]  }
 0x3ad   : > { %v7196_v18 = vpop.f32.mrf.mxu0  ;;  %7822 = vmatprep.mubr.bf16.mxu0 %v12763_v54  ;;  %v12771_v54 = vld [vmem:[#allocation2 + $0x20c] ss:$36 sps:$4 sm:$0xff]  }
 0x3ae   : > { %v7393_v50 = vpop.f32.mrf.mxu1  ;;  %v8525_v36 = vadd.f32 %v8524_v44, %v8346_v7  ;;  %v8350_v45 = vmax.f32 %v7384_v4, 0.0  ;;  %v7197_v43 = vadd.f32 %v7196_v18, %v16770_v63  ;;  %v7386_v17 = vadd.f32 %v7385_v37, %v7193_v49 }
 0x3af   : > { %v7198_v55 = vpop.f32.mrf.mxu0 }
 0x3b0   : > { %v7395_v13 = vpop.f32.mrf.mxu1  ;;  %v8489_v52 = vadd.f32 %v8488_v1, %v8350_v45  ;;  %v8351_v11 = vmax.f32 %v7386_v17, 0.0  ;;  %v7199_v15 = vadd.f32 %v7198_v55, %v15367_v27  ;;  %v7390_v46 = vadd.f32 %v7389_v14, %v7197_v43 }
 0x3b1   : > { %v7200_v53 = vpop.f32.mrf.mxu0 }
 0x3b2   : > { %v7399_v12 = vpop.f32.mrf.mxu1  ;;  %7984 = vmatmul.mubr.bf16.gmra.mxu1 %v12764_v51  ;;  %v8526_v62 = vadd.f32 %v8525_v36, %v8351_v11  ;;  %v8355_v33 = vmax.f32 %v7390_v46, 0.0  ;;  %v7201_v61 = vadd.f32 %v7200_v53, %v15371_v21  ;;  %v7392_v48 = vadd.f32 %v7391_v58, %v7199_v15  ;;  %v12770_v36 = vld [vmem:[#allocation2 + $0x1c0] ss:$36 sps:$4 sm:$0xff]   ;;  %v16773_v11 = vld [vmem:[#allocation13_spill] sm:$0xff] }
 0x3b3   : > { %7991 = vmatprep.mubr.bf16.mxu1 %v12765_v19  ;;  %v7202_v47 = vpop.f32.mrf.mxu0  ;;  %v12773_v53 = vld [vmem:[#allocation2 + $0x25c] ss:$36 sps:$4 sm:$0xff]  }
 0x3b4   : > { %v7401_v31 = vpop.f32.mrf.mxu1  ;;  %v8490_v20 = vadd.f32 %v8489_v52, %v8355_v33  ;;  %v8356_v28 = vmax.f32 %v7392_v48, 0.0  ;;  %v7203_v32 = vadd.f32 %v7202_v47, %v16771_v3  ;;  %v7394_v39 = vadd.f32 %v7393_v50, %v7201_v61  ;;  %7823 = vmatmul.mubr.bf16.gmra.mxu0 %v12766_v57  ;;  %v16774_v33 = vld [vmem:[#allocation14_spill] sm:$0xff] }
 0x3b5   : > { %v7206_v26 = vpop.f32.mrf.mxu0  ;;  %7830 = vmatprep.mubr.bf16.mxu0 %v12767_v38 }
 0x3b6   : > { %v7403_v27 = vpop.f32.mrf.mxu1  ;;  %v8527_v23 = vadd.f32 %v8526_v62, %v8356_v28  ;;  %v8360_v37 = vmax.f32 %v7394_v39, 0.0  ;;  %v7207_v56 = vadd.f32 %v7206_v26, %v16772_v60  ;;  %v7396_v29 = vadd.f32 %v7395_v13, %v7203_v32  ;;  %v16775_v28 = vld [vmem:[#allocation15_spill] sm:$0xff]  ;;  %v12774_v26 = vld [vmem:[#allocation2 + $0x208] ss:$36 sps:$4 sm:$0xff]  }
 0x3b7   : > { %v7208_v25 = vpop.f32.mrf.mxu0 }
 0x3b8   : > { %v7405_v21 = vpop.f32.mrf.mxu1  ;;  %v8491_v14 = vadd.f32 %v8490_v20, %v8360_v37  ;;  %v8361_v9 = vmax.f32 %v7396_v29, 0.0  ;;  %v7209_v59 = vadd.f32 %v7208_v25, %v15383_v34  ;;  %v7400_v41 = vadd.f32 %v7399_v12, %v7207_v56  ;;  %v12772_v12 = vld [vmem:[#allocation2 + $0x210] ss:$36 sps:$4 sm:$0xff]  }
 0x3b9   : > { %v7210_v16 = vpop.f32.mrf.mxu0  ;;  %v12775_v56 = vld [vmem:[#allocation2 + $0x254] ss:$36 sps:$4 sm:$0xff]  }
 0x3ba   : > { %v7409_v44 = vpop.f32.mrf.mxu1  ;;  %7992 = vmatmul.mubr.bf16.gmra.mxu1 %v12768_v10  ;;  %v8528_v6 = vadd.f32 %v8527_v23, %v8361_v9  ;;  %v8365_v58 = vmax.f32 %v7400_v41, 0.0  ;;  %v7211_v40 = vadd.f32 %v7210_v16, %v15387_v30  ;;  %v7402_v1 = vadd.f32 %v7401_v31, %v7209_v59  ;;  %v12776_v41 = vld [vmem:[#allocation2 + $0x258] ss:$36 sps:$4 sm:$0xff]   ;;  %v16776_v10 = vld [vmem:[#allocation4_spill] sm:$0xff] }
 0x3bb   : > { %7999 = vmatprep.mubr.bf16.mxu1 %v12769_v8  ;;  %v7212_v22 = vpop.f32.mrf.mxu0  ;;  %v15506_v16 = vsub.s32 4, %v16776_v10  ;;  %v12777_v8 = vld [vmem:[#allocation2 + $0x2a4] ss:$36 sps:$4 sm:$0xff]  }
 0x3bc   : > { %v7411_v7 = vpop.f32.mrf.mxu1  ;;  %v8492_v49 = vadd.f32 %v8491_v14, %v8365_v58  ;;  %v8366_v4 = vmax.f32 %v7402_v1, 0.0  ;;  %v7213_v50 = vadd.f32 %v7212_v22, %v15391_v5  ;;  %v7404_v18 = vadd.f32 %v7403_v27, %v7211_v40  ;;  %7831 = vmatmul.mubr.bf16.gmra.mxu0 %v12770_v36  ;;  %v12778_v36 = vld [vmem:[#allocation2 + $0x250] ss:$36 sps:$4 sm:$0xff]  }
 0x3bd   : > { %v7216_v2 = vpop.f32.mrf.mxu0  ;;  %7838 = vmatprep.mubr.bf16.mxu0 %v12771_v54  ;;  %16777 = vst [vmem:[#allocation17_spill] sm:$0xff] %v15506_v16  ;;  %v12780_v54 = vld [vmem:[#allocation2 + $0x29c] ss:$36 sps:$4 sm:$0xff]  }
 0x3be   : > { %v7413_v34 = vpop.f32.mrf.mxu1  ;;  %v8529_v45 = vadd.f32 %v8528_v6, %v8366_v4  ;;  %v8370_v63 = vmax.f32 %v7404_v18, 0.0  ;;  %v7217_v43 = vadd.f32 %v7216_v2, %v15395_v42  ;;  %v7406_v17 = vadd.f32 %v7405_v21, %v7213_v50  ;;  %v16778_v4 = vld [vmem:[#allocation16_spill] sm:$0xff] }
 0x3bf   : > { %v7218_v13 = vpop.f32.mrf.mxu0 }
 0x3c0   : > { %v7415_v30 = vpop.f32.mrf.mxu1  ;;  %v8493_v55 = vadd.f32 %v8492_v49, %v8370_v63  ;;  %v8371_v52 = vmax.f32 %v7406_v17, 0.0  ;;  %v7219_v15 = vadd.f32 %v7218_v13, %v16773_v11  ;;  %v7410_v46 = vadd.f32 %v7409_v44, %v7217_v43 }
 0x3c1   : > { %v7220_v51 = vpop.f32.mrf.mxu0 }
 0x3c2   : > { %v7419_v5 = vpop.f32.mrf.mxu1  ;;  %8000 = vmatmul.mubr.bf16.gmra.mxu1 %v12772_v12  ;;  %v8530_v19 = vadd.f32 %v8529_v45, %v8371_v52  ;;  %v8375_v62 = vmax.f32 %v7410_v46, 0.0  ;;  %v7221_v42 = vadd.f32 %v7220_v51, %v16774_v33  ;;  %v7412_v61 = vadd.f32 %v7411_v7, %v7219_v15  ;;  %v12782_v51 = vld [vmem:[#allocation2 + $0x2ec] ss:$36 sps:$4 sm:$0xff]  }
 0x3c3   : > { %8007 = vmatprep.mubr.bf16.mxu1 %v12773_v53  ;;  %v7222_v31 = vpop.f32.mrf.mxu0 }
 0x3c4   : > { %v7421_v48 = vpop.f32.mrf.mxu1  ;;  %v8494_v47 = vadd.f32 %v8493_v55, %v8375_v62  ;;  %v8376_v20 = vmax.f32 %v7412_v61, 0.0  ;;  %v7223_v3 = vadd.f32 %v7222_v31, %v16775_v28  ;;  %v7414_v32 = vadd.f32 %v7413_v34, %v7221_v42  ;;  %7839 = vmatmul.mubr.bf16.gmra.mxu0 %v12774_v26 }
 0x3c5   : > { %v7226_v27 = vpop.f32.mrf.mxu0  ;;  %7846 = vmatprep.mubr.bf16.mxu0 %v12775_v56  ;;  %v12786_v56 = vld [vmem:[#allocation2 + $0x334] ss:$36 sps:$4 sm:$0xff]  }
 0x3c6   : > { %v7423_v39 = vpop.f32.mrf.mxu1  ;;  %v8531_v57 = vadd.f32 %v8530_v19, %v8376_v20  ;;  %v8380_v23 = vmax.f32 %v7414_v32, 0.0  ;;  %v7227_v37 = vadd.f32 %v7226_v27, %v15411_v24  ;;  %v7416_v60 = vadd.f32 %v7415_v30, %v7223_v3  ;;  %v12783_v20 = vld [vmem:[#allocation2 + $0x298] ss:$36 sps:$4 sm:$0xff]   ;;  %v12784_v3 = vld [vmem:[#allocation2 + $0x2e4] ss:$36 sps:$4 sm:$0xff]  }
 0x3c7   : > { %v7228_v38 = vpop.f32.mrf.mxu0 }
 0x3c8   : > { %v7425_v29 = vpop.f32.mrf.mxu1  ;;  %v8495_v21 = vadd.f32 %v8494_v47, %v8380_v23  ;;  %v8381_v25 = vmax.f32 %v7416_v60, 0.0  ;;  %v7229_v14 = vadd.f32 %v7228_v38, %v15415_v35  ;;  %v7420_v9 = vadd.f32 %v7419_v5, %v7227_v37  ;;  %v12781_v5 = vld [vmem:[#allocation2 + $0x2a0] ss:$36 sps:$4 sm:$0xff]   ;;  %v12785_v37 = vld [vmem:[#allocation2 + $0x2e8] ss:$36 sps:$4 sm:$0xff]  }
 0x3c9   : > { %v7230_v44 = vpop.f32.mrf.mxu0 }
 0x3ca   : > { %v11167_v59 = vpop.f32.mrf.mxu1  ;;  %8008 = vmatmul.mubr.bf16.gmra.mxu1 %v12776_v41  ;;  %v8532_v24 = vadd.f32 %v8531_v57, %v8381_v25  ;;  %v8385_v6 = vmax.f32 %v7420_v9, 0.0  ;;  %v7231_v58 = vadd.f32 %v7230_v44, %v15417_v0  ;;  %v7422_v40 = vadd.f32 %v7421_v48, %v7229_v14  ;;  %v12779_v0 = vld [vmem:[%s16544_s2] sm:$0x1f] }
 0x3cb   : > { %8015 = vmatprep.mubr.bf16.mxu1 %v12777_v8  ;;  %v7232_v7 = vpop.f32.mrf.mxu0  ;;  %v15514_v17 = vrot.slane %v12779_v0, %v15506_v16  ;;  %v12787_v44 = vld [vmem:[#allocation2 + $0x2e0] ss:$36 sps:$4 sm:$0xff]   ;;  %v12788_v8 = vld [vmem:[#allocation2 + $0x32c] ss:$36 sps:$4 sm:$0xff]  }
 0x3cc   : > { %v11168_v1 = vpop.f32.mrf.mxu1  ;;  %v8496_v49 = vadd.f32 %v8495_v21, %v8385_v6  ;;  %v8386_v35 = vmax.f32 %v7422_v40, 0.0  ;;  %v7233_v50 = vadd.f32 %v7232_v7, %v16778_v4  ;;  %v7424_v18 = vadd.f32 %v7423_v39, %v7231_v58  ;;  %7847 = vmatmul.mubr.bf16.gmra.mxu0 %v12778_v36 }
 0x3cd   : > { %v11169_v22 = vadd.f32 %v11168_v1, %v11167_v59  ;;  %v11055_v2 = vpop.f32.mrf.mxu0  ;;  %7854 = vmatprep.mubr.bf16.mxu0 %v12780_v54  ;;  %v12792_v54 = vld [vmem:[#allocation2 + $0x374] ss:$36 sps:$4 sm:$0xff]  }
 0x3ce   : > { %v11170_v34 = vpop.f32.mrf.mxu1  ;;  %v8533_v45 = vadd.f32 %v8532_v24, %v8386_v35  ;;  %v8390_v63 = vmax.f32 %v7424_v18, 0.0  ;;  %v7426_v43 = vadd.f32 %v7425_v29, %v7233_v50  ;;  %v12790_v35 = vld [vmem:[#allocation2 + $0x37c] ss:$36 sps:$4 sm:$0xff]  }
 0x3cf   : > { %v11056_v13 = vpop.f32.mrf.mxu0 }
 0x3d0   : > { %v11171_v30 = vpop.f32.mrf.mxu1  ;;  %v15516_v52 = vadd.f32 %v8496_v49, %v8390_v63  ;;  %v8391_v11 = vmax.f32 %v7426_v43, 0.0  ;;  %v11057_v15 = vadd.f32 %v11056_v13, %v11055_v2  ;;  %v12791_v43 = vld [vmem:[#allocation2 + $0x328] ss:$36 sps:$4 sm:$0xff]  }
 0x3d1   : > { %v11172_v55 = vadd.f32 %v11171_v30, %v11170_v34  ;;  %v11058_v12 = vpop.f32.mrf.mxu0 }
 0x3d2   : > { %16779 = vst [vmem:[#allocation19_spill] sm:$0xff] %v15516_v52  ;;  %v11173_v46 = vpop.f32.mrf.mxu1  ;;  %8016 = vmatmul.mubr.bf16.gmra.mxu1 %v12781_v5  ;;  %v15518_v53 = vadd.f32 %v8533_v45, %v8391_v11  ;;  %v7463_v19 = vadd.f32 %v11057_v15, %v15514_v17  ;;  %v12793_v5 = vld [vmem:[#allocation2 + $0x378] ss:$36 sps:$4 sm:$0xff]  }
 0x3d3   : > { %8023 = vmatprep.mubr.bf16.mxu1 %v12782_v51  ;;  %v11059_v33 = vpop.f32.mrf.mxu0  ;;  %v12794_v51 = vld [vmem:[#allocation2 + $0x3c4] ss:$36 sps:$4 sm:$0xff]  }
 0x3d4   : > { %16780 = vst [vmem:[#allocation21_spill] sm:$0xff] %v15518_v53  ;;  %v11174_v62 = vpop.f32.mrf.mxu1  ;;  %v15521_v61 = vadd.f32 %v11169_v22, %v7463_v19  ;;  %v11060_v48 = vadd.f32 %v11059_v33, %v11058_v12  ;;  %7855 = vmatmul.mubr.bf16.gmra.mxu0 %v12783_v20  ;;  %v12789_v22 = vld [vmem:[#allocation2 + $0x330] ss:$36 sps:$4 sm:$0xff]  }
 0x3d5   : > { %v11175_v42 = vadd.f32 %v11174_v62, %v11173_v46  ;;  %v11061_v47 = vpop.f32.mrf.mxu0  ;;  %7862 = vmatprep.mubr.bf16.mxu0 %v12784_v3 }
 0x3d6   : > { %v11176_v31 = vpop.f32.mrf.mxu1  ;;  %v7466_v28 = vadd.f32 %v11060_v48, %v15514_v17 }
 0x3d7   : > { %v11062_v39 = vpop.f32.mrf.mxu0 }
 0x3d8   : > { %v11177_v32 = vpop.f32.mrf.mxu1  ;;  %v15524_v26 = vadd.f32 %v11172_v55, %v7466_v28  ;;  %v11063_v57 = vadd.f32 %v11062_v39, %v11061_v47  ;;  %v12795_v28 = vld [vmem:[#allocation2 + $0x370] ss:$36 sps:$4 sm:$0xff]  }
 0x3d9   : > { %v11178_v27 = vadd.f32 %v11177_v32, %v11176_v31  ;;  %v11064_v60 = vpop.f32.mrf.mxu0  ;;  %v12796_v32 = vld [vmem:[#allocation2 + $0x3bc] ss:$36 sps:$4 sm:$0xff]  }
 0x3da   : > { %v11179_v23 = vpop.f32.mrf.mxu1  ;;  %8024 = vmatmul.mubr.bf16.gmra.mxu1 %v12785_v37  ;;  %v7471_v29 = vadd.f32 %v11063_v57, %v15514_v17 }
 0x3db   : > { %8031 = vmatprep.mubr.bf16.mxu1 %v12786_v56  ;;  %v11065_v21 = vpop.f32.mrf.mxu0 }
 0x3dc   : > { %v11180_v38 = vpop.f32.mrf.mxu1  ;;  %v15527_v14 = vadd.f32 %v11175_v42, %v7471_v29  ;;  %v11066_v9 = vadd.f32 %v11065_v21, %v11064_v60  ;;  %7863 = vmatmul.mubr.bf16.gmra.mxu0 %v12787_v44  ;;  %v12797_v60 = vld [vmem:[#allocation2 + $0x3c0] ss:$36 sps:$4 sm:$0xff]   ;;  %v12798_v29 = vld [vmem:[#allocation2 + $0x40c] ss:$36 sps:$4 sm:$0xff]  }
 0x3dd   : > { %v11181_v25 = vadd.f32 %v11180_v38, %v11179_v23  ;;  %v11067_v41 = vpop.f32.mrf.mxu0  ;;  %7870 = vmatprep.mubr.bf16.mxu0 %v12788_v8 }
 0x3de   : > { %v11182_v59 = vpop.f32.mrf.mxu1  ;;  %v7474_v10 = vadd.f32 %v11066_v9, %v15514_v17 }
 0x3df   : > { %v11068_v6 = vpop.f32.mrf.mxu0 }
 0x3e0   : > { %v11183_v24 = vpop.f32.mrf.mxu1  ;;  %v15530_v40 = vadd.f32 %v11178_v27, %v7474_v10  ;;  %v11069_v1 = vadd.f32 %v11068_v6, %v11067_v41 }
 0x3e1   : > { %v11184_v58 = vadd.f32 %v11183_v24, %v11182_v59  ;;  %v11070_v49 = vpop.f32.mrf.mxu0  ;;  %v12799_v24 = vld [vmem:[#allocation2 + $0x3b8] ss:$36 sps:$4 sm:$0xff]  }
 0x3e2   : > { %v11185_v7 = vpop.f32.mrf.mxu1  ;;  %8032 = vmatmul.mubr.bf16.gmra.mxu1 %v12789_v22  ;;  %v7479_v4 = vadd.f32 %v11069_v1, %v15514_v17 }
 0x3e3   : > { %8039 = vmatprep.mubr.bf16.mxu1 %v12790_v35  ;;  %v11071_v18 = vpop.f32.mrf.mxu0 }
 0x3e4   : > { %v11186_v50 = vpop.f32.mrf.mxu1  ;;  %v15533_v2 = vadd.f32 %v11181_v25, %v7479_v4  ;;  %v11072_v36 = vadd.f32 %v11071_v18, %v11070_v49  ;;  %7871 = vmatmul.mubr.bf16.gmra.mxu0 %v12791_v43  ;;  %v12801_v4 = vld [vmem:[#allocation2 + $0x408] ss:$36 sps:$4 sm:$0xff]   ;;  %v12802_v18 = vld [vmem:[#allocation2 + $0x454] ss:$36 sps:$4 sm:$0xff]  }
 0x3e5   : > { %v11187_v34 = vadd.f32 %v11186_v50, %v11185_v7  ;;  %v11073_v63 = vpop.f32.mrf.mxu0  ;;  %7878 = vmatprep.mubr.bf16.mxu0 %v12792_v54 }
 0x3e6   : > { %v11188_v45 = vpop.f32.mrf.mxu1  ;;  %v7482_v0 = vadd.f32 %v11072_v36, %v15514_v17 }
 0x3e7   : > { %v11074_v13 = vpop.f32.mrf.mxu0 }
 0x3e8   : > { %v11189_v30 = vpop.f32.mrf.mxu1  ;;  %v15536_v11 = vadd.f32 %v11184_v58, %v7482_v0  ;;  %v11075_v15 = vadd.f32 %v11074_v13, %v11073_v63  ;;  %v12800_v58 = vld [vmem:[#allocation2 + $0x404] ss:$36 sps:$4 sm:$0xff]  }
 0x3e9   : > { %v11190_v55 = vadd.f32 %v11189_v30, %v11188_v45  ;;  %v11076_v12 = vpop.f32.mrf.mxu0 }
 0x3ea   : > { %v11191_v46 = vpop.f32.mrf.mxu1  ;;  %8040 = vmatmul.mubr.bf16.gmra.mxu1 %v12793_v5  ;;  %v7487_v19 = vadd.f32 %v11075_v15, %v15514_v17 }
 0x3eb   : > { %8047 = vmatprep.mubr.bf16.mxu1 %v12794_v51  ;;  %v11077_v33 = vpop.f32.mrf.mxu0 }
 0x3ec   : > { %v11192_v62 = vpop.f32.mrf.mxu1  ;;  %v15539_v48 = vadd.f32 %v11187_v34, %v7487_v19  ;;  %v11078_v31 = vadd.f32 %v11077_v33, %v11076_v12  ;;  %7879 = vmatmul.mubr.bf16.gmra.mxu0 %v12795_v28  ;;  %v12805_v33 = vld [vmem:[#allocation2 + $0x450] ss:$36 sps:$4 sm:$0xff]  }
 0x3ed   : > { %v11193_v42 = vadd.f32 %v11192_v62, %v11191_v46  ;;  %v11079_v20 = vpop.f32.mrf.mxu0  ;;  %7886 = vmatprep.mubr.bf16.mxu0 %v12796_v32  ;;  %v12804_v46 = vld [vmem:[#allocation2 + $0x44c] ss:$36 sps:$4 sm:$0xff]  }
 0x3ee   : > { %v11194_v47 = vpop.f32.mrf.mxu1  ;;  %v7490_v3 = vadd.f32 %v11078_v31, %v15514_v17 }
 0x3ef   : > { %v11080_v27 = vpop.f32.mrf.mxu0 }
 0x3f0   : > { %v11195_v39 = vpop.f32.mrf.mxu1  ;;  %v15542_v57 = vadd.f32 %v11190_v55, %v7490_v3  ;;  %v11081_v23 = vadd.f32 %v11080_v27, %v11079_v20  ;;  %v12803_v55 = vld [vmem:[#allocation2 + $0x400] ss:$36 sps:$4 sm:$0xff]  }
 0x3f1   : > { %v11082_v56 = vpop.f32.mrf.mxu0  ;;  %v11196_v44 = vadd.f32 %v11195_v39, %v11194_v47 }
 0x3f2   : > { %v11197_v37 = vpop.f32.mrf.mxu1  ;;  %8048 = vmatmul.mubr.bf16.gmra.mxu1 %v12797_v60  ;;  %v7495_v38 = vadd.f32 %v11081_v23, %v15514_v17 }
 0x3f3   : > { %8055 = vmatprep.mubr.bf16.mxu1 %v12798_v29  ;;  %v11083_v25 = vpop.f32.mrf.mxu0 }
 0x3f4   : > { %v11198_v21 = vpop.f32.mrf.mxu1  ;;  %v15545_v59 = vadd.f32 %v11193_v42, %v7495_v38  ;;  %v11084_v41 = vadd.f32 %v11083_v25, %v11082_v56  ;;  %7887 = vmatmul.mubr.bf16.gmra.mxu0 %v12799_v24  ;;  %v12807_v56 = vld [vmem:[#allocation2 + $0x20] ss:$36 sps:$4 sm:$0xff]  }
 0x3f5   : > { %v11199_v9 = vadd.f32 %v11198_v21, %v11197_v37  ;;  %v11085_v8 = vpop.f32.mrf.mxu0  ;;  %7894 = vmatprep.mubr.bf16.mxu0 %v12800_v58  ;;  %v12806_v37 = vld [vmem:[#allocation2 + $0x448] ss:$36 sps:$4 sm:$0xff]  }
 0x3f6   : > { %v11200_v10 = vpop.f32.mrf.mxu1  ;;  %v7498_v6 = vadd.f32 %v11084_v41, %v15514_v17 }
 0x3f7   : > { %v11086_v7 = vpop.f32.mrf.mxu0 }
 0x3f8   : > { %v11201_v1 = vpop.f32.mrf.mxu1  ;;  %v15548_v22 = vadd.f32 %v11196_v44, %v7498_v6  ;;  %v11087_v49 = vadd.f32 %v11086_v7, %v11085_v8 }
 0x3f9   : > { %v11088_v50 = vpop.f32.mrf.mxu0  ;;  %v11202_v54 = vadd.f32 %v11201_v1, %v11200_v10 }
 0x3fa   : > { %v11203_v35 = vpop.f32.mrf.mxu1  ;;  %8056 = vmatmul.mubr.bf16.gmra.mxu1 %v12801_v4  ;;  %v7503_v34 = vadd.f32 %v11087_v49, %v15514_v17 }
 0x3fb   : > { %8063 = vmatprep.mubr.bf16.mxu1 %v12802_v18  ;;  %v11089_v45 = vpop.f32.mrf.mxu0 }
 0x3fc   : > { %v11204_v36 = vpop.f32.mrf.mxu1  ;;  %v15551_v43 = vadd.f32 %v11199_v9, %v7503_v34  ;;  %v11090_v0 = vadd.f32 %v11089_v45, %v11088_v50  ;;  %7895 = vmatmul.mubr.bf16.gmra.mxu0 %v12803_v55  ;;  %v12809_v50 = vld [vmem:[#allocation2 + $0xb0] ss:$36 sps:$4 sm:$0xff]  }
 0x3fd   : > { %v11205_v63 = vadd.f32 %v11204_v36, %v11203_v35  ;;  %v11091_v13 = vpop.f32.mrf.mxu0  ;;  %7902 = vmatprep.mubr.bf16.mxu0 %v12804_v46  ;;  %v12808_v35 = vld [vmem:[#allocation2 + $0x68] ss:$36 sps:$4 sm:$0xff]  }
 0x3fe   : > { %v11206_v30 = vpop.f32.mrf.mxu1  ;;  %v7506_v15 = vadd.f32 %v11090_v0, %v15514_v17 }
 0x3ff   : > { %v11092_v12 = vpop.f32.mrf.mxu0 }
 0x400   : > { %v11207_v5 = vpop.f32.mrf.mxu1  ;;  %v15554_v51 = vadd.f32 %v11202_v54, %v7506_v15  ;;  %v11093_v19 = vadd.f32 %v11092_v12, %v11091_v13 }
 0x401   : > { %v11094_v42 = vpop.f32.mrf.mxu0  ;;  %v11208_v39 = vadd.f32 %v11207_v5, %v11206_v30 }
 0x402   : > { %v11209_v62 = vpop.f32.mrf.mxu1  ;;  %8064 = vmatmul.mubr.bf16.gmra.mxu1 %v12805_v33  ;;  %v7511_v31 = vadd.f32 %v11093_v19, %v15514_v17 }
 0x403   : > { %v11095_v20 = vpop.f32.mrf.mxu0 }
 0x404   : > { %v11210_v47 = vpop.f32.mrf.mxu1  ;;  %v15557_v3 = vadd.f32 %v11205_v63, %v7511_v31  ;;  %v11096_v32 = vadd.f32 %v11095_v20, %v11094_v42  ;;  %7903 = vmatmul.mubr.bf16.gmra.mxu0 %v12806_v37  ;;  %v12811_v42 = vld [vmem:[#allocation2 + $0x140] ss:$36 sps:$4 sm:$0xff]  }
 0x405   : > { %v11211_v28 = vadd.f32 %v11210_v47, %v11209_v62  ;;  %v11097_v23 = vpop.f32.mrf.mxu0  ;;  %11527 = vmatprep.mubr.bf16.mxu0 %v12807_v56  ;;  %v12810_v62 = vld [vmem:[#allocation2 + $0xf8] ss:$36 sps:$4 sm:$0xff]  }
 0x406   : > { %v11212_v27 = vpop.f32.mrf.mxu1  ;;  %v7514_v60 = vadd.f32 %v11096_v32, %v15514_v17 }
 0x407   : > { %v11098_v38 = vpop.f32.mrf.mxu0 }
 0x408   : > { %v11213_v29 = vpop.f32.mrf.mxu1  ;;  %v15560_v21 = vadd.f32 %v11208_v39, %v7514_v60  ;;  %v11099_v25 = vadd.f32 %v11098_v38, %v11097_v23 }
 0x409   : > { %v11100_v41 = vpop.f32.mrf.mxu0  ;;  %v11214_v1 = vadd.f32 %v11213_v29, %v11212_v27 }
 0x40a   : > { %v11215_v9 = vpop.f32.mrf.mxu1  ;;  %v7519_v44 = vadd.f32 %v11099_v25, %v15514_v17 }
 0x40b   : > { %v11101_v8 = vpop.f32.mrf.mxu0 }
 0x40c   : > { %v11216_v10 = vpop.f32.mrf.mxu1  ;;  %v15563_v6 = vadd.f32 %v11211_v28, %v7519_v44  ;;  %v11102_v58 = vadd.f32 %v11101_v8, %v11100_v41  ;;  %11528 = vmatmul.mubr.bf16.vlgmr.msra.gmra.mxu0 %v12808_v35  ;;  %v12812_v41 = vld [vmem:[#allocation2 + $0x188] ss:$36 sps:$4 sm:$0xff]  }
 0x40d   : > { %v11217_v24 = vadd.f32 %v11216_v10, %v11215_v9  ;;  %v11103_v49 = vpop.f32.mrf.mxu0  ;;  %11531 = vmatprep.mubr.bf16.mxu0 %v12809_v50  ;;  %v12813_v10 = vld [vmem:[#allocation2 + $0x1d0] ss:$36 sps:$4 sm:$0xff]  }
 0x40e   : > { %v11218_v7 = vpop.f32.mrf.mxu1  ;;  %v7522_v4 = vadd.f32 %v11102_v58, %v15514_v17 }
 0x40f   : > { %v11104_v34 = vpop.f32.mrf.mxu0 }
 0x410   : > { %v11219_v18 = vpop.f32.mrf.mxu1  ;;  %v15566_v45 = vadd.f32 %v11214_v1, %v7522_v4  ;;  %v11105_v63 = vadd.f32 %v11104_v34, %v11103_v49 }
 0x411   : > { %v11220_v36 = vadd.f32 %v11219_v18, %v11218_v7  ;;  %v11106_v54 = vpop.f32.mrf.mxu0 }
 0x412   : > { %v11221_v0 = vpop.f32.mrf.mxu1  ;;  %v7527_v30 = vadd.f32 %v11105_v63, %v15514_v17 }
 0x413   : > { %v11107_v55 = vpop.f32.mrf.mxu0 }
 0x414   : > { %v11222_v13 = vpop.f32.mrf.mxu1  ;;  %v15569_v46 = vadd.f32 %v11217_v24, %v7527_v30  ;;  %v11108_v5 = vadd.f32 %v11107_v55, %v11106_v54  ;;  %11532 = vmatmul.mubr.bf16.gmra.mxu0 %v12810_v62  ;;  %v12814_v30 = vld [vmem:[#allocation2 + $0x218] ss:$36 sps:$4 sm:$0xff]   ;;  %v12815_v55 = vld [vmem:[#allocation2 + $0x260] ss:$36 sps:$4 sm:$0xff]  }
 0x415   : > { %v11223_v15 = vadd.f32 %v11222_v13, %v11221_v0  ;;  %v11109_v19 = vpop.f32.mrf.mxu0  ;;  %11535 = vmatprep.mubr.bf16.mxu0 %v12811_v42 }
 0x416   : > { %v11224_v12 = vpop.f32.mrf.mxu1  ;;  %v7530_v33 = vadd.f32 %v11108_v5, %v15514_v17 }
 0x417   : > { %v11110_v47 = vpop.f32.mrf.mxu0 }
 0x418   : > { %v11225_v31 = vpop.f32.mrf.mxu1  ;;  %v15572_v28 = vadd.f32 %v11220_v36, %v7530_v33  ;;  %v11111_v32 = vadd.f32 %v11110_v47, %v11109_v19 }
 0x419   : > { %v11226_v20 = vadd.f32 %v11225_v31, %v11224_v12  ;;  %v11112_v27 = vpop.f32.mrf.mxu0 }
 0x41a   : > { %v11227_v39 = vpop.f32.mrf.mxu1  ;;  %v7535_v23 = vadd.f32 %v11111_v32, %v15514_v17 }
 0x41b   : > { %v11113_v60 = vpop.f32.mrf.mxu0 }
 0x41c   : > { %v11228_v37 = vpop.f32.mrf.mxu1  ;;  %v15575_v29 = vadd.f32 %v11223_v15, %v7535_v23  ;;  %v11114_v38 = vadd.f32 %v11113_v60, %v11112_v27  ;;  %11536 = vmatmul.mubr.bf16.gmra.mxu0 %v12812_v41  ;;  %v12816_v60 = vld [vmem:[#allocation2 + $0x2a8] ss:$36 sps:$4 sm:$0xff]  }
 0x41d   : > { %v11229_v56 = vadd.f32 %v11228_v37, %v11227_v39  ;;  %v11115_v9 = vpop.f32.mrf.mxu0  ;;  %11539 = vmatprep.mubr.bf16.mxu0 %v12813_v10 }
 0x41e   : > { %v11230_v25 = vpop.f32.mrf.mxu1  ;;  %v7538_v44 = vadd.f32 %v11114_v38, %v15514_v17  ;;  %v12817_v38 = vld [vmem:[#allocation2 + $0x2f0] ss:$36 sps:$4 sm:$0xff]  }
 0x41f   : > { %v11116_v24 = vpop.f32.mrf.mxu0 }
 0x420   : > { %v11231_v8 = vpop.f32.mrf.mxu1  ;;  %v15578_v1 = vadd.f32 %v11226_v20, %v7538_v44  ;;  %v11117_v7 = vadd.f32 %v11116_v24, %v11115_v9 }
 0x421   : > { %v11232_v58 = vadd.f32 %v11231_v8, %v11230_v25  ;;  %v11118_v35 = vpop.f32.mrf.mxu0 }
 0x422   : > { %v11233_v49 = vpop.f32.mrf.mxu1  ;;  %v7543_v4 = vadd.f32 %v11117_v7, %v15514_v17 }
 0x423   : > { %v11119_v18 = vpop.f32.mrf.mxu0 }
 0x424   : > { %v11234_v50 = vpop.f32.mrf.mxu1  ;;  %v15581_v36 = vadd.f32 %v11229_v56, %v7543_v4  ;;  %v11120_v63 = vadd.f32 %v11119_v18, %v11118_v35  ;;  %11540 = vmatmul.mubr.bf16.gmra.mxu0 %v12814_v30 }
 0x425   : > { %v11235_v34 = vadd.f32 %v11234_v50, %v11233_v49  ;;  %v11121_v54 = vpop.f32.mrf.mxu0  ;;  %11543 = vmatprep.mubr.bf16.mxu0 %v12815_v55 }
 0x426   : > { %v11236_v0 = vpop.f32.mrf.mxu1  ;;  %v7546_v13 = vadd.f32 %v11120_v63, %v15514_v17  ;;  %v12818_v63 = vld [vmem:[#allocation2 + $0x338] ss:$36 sps:$4 sm:$0xff]  }
 0x427   : > { %v11122_v5 = vpop.f32.mrf.mxu0 }
 0x428   : > { %v11237_v15 = vpop.f32.mrf.mxu1  ;;  %v15584_v19 = vadd.f32 %v11232_v58, %v7546_v13  ;;  %v11123_v62 = vadd.f32 %v11122_v5, %v11121_v54  ;;  %v12819_v54 = vld [vmem:[#allocation2 + $0x380] ss:$36 sps:$4 sm:$0xff]  }
 0x429   : > { %v11238_v12 = vadd.f32 %v11237_v15, %v11236_v0  ;;  %v11124_v42 = vpop.f32.mrf.mxu0 }
 0x42a   : > { %v11239_v33 = vpop.f32.mrf.mxu1  ;;  %v7551_v31 = vadd.f32 %v11123_v62, %v15514_v17 }
 0x42b   : > { %v11125_v20 = vpop.f32.mrf.mxu0 }
 0x42c   : > { %v11240_v47 = vpop.f32.mrf.mxu1  ;;  %v15587_v39 = vadd.f32 %v11235_v34, %v7551_v31  ;;  %v11126_v27 = vadd.f32 %v11125_v20, %v11124_v42  ;;  %11544 = vmatmul.mubr.bf16.gmra.mxu0 %v12816_v60 }
 0x42d   : > { %v11241_v32 = vadd.f32 %v11240_v47, %v11239_v33  ;;  %v11127_v37 = vpop.f32.mrf.mxu0  ;;  %11547 = vmatprep.mubr.bf16.mxu0 %v12817_v38 }
 0x42e   : > { %v11242_v23 = vpop.f32.mrf.mxu1  ;;  %v7554_v56 = vadd.f32 %v11126_v27, %v15514_v17 }
 0x42f   : > { %v11128_v9 = vpop.f32.mrf.mxu0 }
 0x430   : > { %v11243_v25 = vpop.f32.mrf.mxu1  ;;  %v15590_v44 = vadd.f32 %v11238_v12, %v7554_v56  ;;  %v11129_v10 = vadd.f32 %v11128_v9, %v11127_v37  ;;  %v12820_v37 = vld [vmem:[#allocation2 + $0x3c8] ss:$36 sps:$4 sm:$0xff]   ;;  %v12821_v56 = vld [vmem:[#allocation2 + $0x410] ss:$36 sps:$4 sm:$0xff]  }
 0x431   : > { %v11244_v41 = vadd.f32 %v11243_v25, %v11242_v23  ;;  %v11130_v24 = vpop.f32.mrf.mxu0 }
 0x432   : > { %v11245_v8 = vpop.f32.mrf.mxu1  ;;  %v7559_v58 = vadd.f32 %v11129_v10, %v15514_v17 }
 0x433   : > { %v11131_v49 = vpop.f32.mrf.mxu0 }
 0x434   : > { %v11246_v7 = vpop.f32.mrf.mxu1  ;;  %v15593_v4 = vadd.f32 %v11241_v32, %v7559_v58  ;;  %v11132_v50 = vadd.f32 %v11131_v49, %v11130_v24  ;;  %11548 = vmatmul.mubr.bf16.gmra.mxu0 %v12818_v63 }
 0x435   : > { %v11247_v35 = vadd.f32 %v11246_v7, %v11245_v8  ;;  %v11133_v34 = vpop.f32.mrf.mxu0  ;;  %11551 = vmatprep.mubr.bf16.mxu0 %v12819_v54 }
 0x436   : > { %v11248_v18 = vpop.f32.mrf.mxu1  ;;  %v7562_v0 = vadd.f32 %v11132_v50, %v15514_v17 }
 0x437   : > { %v11134_v13 = vpop.f32.mrf.mxu0 }
 0x438   : > { %v11249_v30 = vpop.f32.mrf.mxu1  ;;  %v15596_v15 = vadd.f32 %v11244_v41, %v7562_v0  ;;  %v11135_v5 = vadd.f32 %v11134_v13, %v11133_v34  ;;  %v12822_v0 = vld [vmem:[#allocation2 + $0x458] ss:$36 sps:$4 sm:$0xff]  }
 0x439   : > { %v11250_v55 = vadd.f32 %v11249_v30, %v11248_v18  ;;  %v11136_v62 = vpop.f32.mrf.mxu0 }
 0x43a   : > { %v11251_v12 = vpop.f32.mrf.mxu1  ;;  %v7567_v33 = vadd.f32 %v11135_v5, %v15514_v17 }
 0x43b   : > { %v11137_v31 = vpop.f32.mrf.mxu0 }
 0x43c   : > { %v11252_v42 = vpop.f32.mrf.mxu1  ;;  %v15599_v20 = vadd.f32 %v11247_v35, %v7567_v33  ;;  %v11138_v32 = vadd.f32 %v11137_v31, %v11136_v62  ;;  %11552 = vmatmul.mubr.bf16.gmra.mxu0 %v12820_v37 }
 0x43d   : > { %v11253_v47 = vadd.f32 %v11252_v42, %v11251_v12  ;;  %v11139_v23 = vpop.f32.mrf.mxu0  ;;  %11555 = vmatprep.mubr.bf16.mxu0 %v12821_v56 }
 0x43e   : > { %v11254_v27 = vpop.f32.mrf.mxu1  ;;  %v7570_v60 = vadd.f32 %v11138_v32, %v15514_v17 }
 0x43f   : > { %v11140_v25 = vpop.f32.mrf.mxu0 }
 0x440   : > { %v11255_v38 = vpop.f32.mrf.mxu1  ;;  %v15602_v41 = vadd.f32 %v11250_v55, %v7570_v60  ;;  %v11141_v10 = vadd.f32 %v11140_v25, %v11139_v23 }
 0x441   : > { %v11256_v9 = vadd.f32 %v11255_v38, %v11254_v27  ;;  %v11142_v24 = vpop.f32.mrf.mxu0 }
 0x442   : > { %v11257_v8 = vpop.f32.mrf.mxu1  ;;  %v7575_v58 = vadd.f32 %v11141_v10, %v15514_v17 }
 0x443   : > { %v11143_v49 = vpop.f32.mrf.mxu0 }
 0x444   : > { %v11258_v7 = vpop.f32.mrf.mxu1  ;;  %v15605_v50 = vadd.f32 %v11253_v47, %v7575_v58  ;;  %v11144_v18 = vadd.f32 %v11143_v49, %v11142_v24  ;;  %11556 = vmatmul.mubr.bf16.gmra.mxu0 %v12822_v0 }
 0x445   : > { %v11259_v35 = vadd.f32 %v11258_v7, %v11257_v8  ;;  %v11145_v63 = vpop.f32.mrf.mxu0 }
 0x446   : > { %v11260_v34 = vpop.f32.mrf.mxu1  ;;  %v7578_v54 = vadd.f32 %v11144_v18, %v15514_v17 }
 0x447   : > { %v11146_v13 = vpop.f32.mrf.mxu0 }
 0x448   : > { %v11261_v30 = vpop.f32.mrf.mxu1  ;;  %v15608_v5 = vadd.f32 %v11256_v9, %v7578_v54  ;;  %v11147_v12 = vadd.f32 %v11146_v13, %v11145_v63 }
 0x449   : > { %v11262_v55 = vadd.f32 %v11261_v30, %v11260_v34  ;;  %v11148_v33 = vpop.f32.mrf.mxu0 }
 0x44a   : > { %v11391_v62 = vpop.f32.mrf.mxu1  ;;  %v7583_v42 = vadd.f32 %v11147_v12, %v15514_v17 }
 0x44b   : > { %v11149_v47 = vpop.f32.mrf.mxu0 }
 0x44c   : > { %v11392_v31 = vpop.f32.mrf.mxu1  ;;  %v15611_v27 = vadd.f32 %v11259_v35, %v7583_v42  ;;  %v11150_v23 = vadd.f32 %v11149_v47, %v11148_v33 }
 0x44d   : > { %v11393_v32 = vadd.f32 %v11392_v31, %v11391_v62  ;;  %v11279_v60 = vpop.f32.mrf.mxu0 }
 0x44e   : > { %v15613_v37 = vpop.f32.mrf.mxu1  ;;  %v7586_v56 = vadd.f32 %v11150_v23, %v15514_v17 }
 0x44f   : > { %v11280_v25 = vpop.f32.mrf.mxu0 }
 0x450   : > { %v15616_v38 = vpop.f32.mrf.mxu1  ;;  %v15618_v9 = vadd.f32 %v11262_v55, %v7586_v56  ;;  %v11281_v10 = vadd.f32 %v11280_v25, %v11279_v60 }
 0x451   : > { %v11282_v24 = vpop.f32.mrf.mxu0 }
 0x452   : > { %v15620_v8 = vpop.f32.mrf.mxu1  ;;  %v7785_v58 = vadd.f32 %v11281_v10, %v15521_v61 }
 0x453   : > { %v11283_v49 = vpop.f32.mrf.mxu0 }
 0x454   : > { %v15623_v7 = vpop.f32.mrf.mxu1  ;;  %v11284_v35 = vadd.f32 %v11283_v49, %v11282_v24  ;;  %v15627_v34 = vadd.f32 %v11393_v32, %v7785_v58 }
 0x455   : > { %v11285_v17 = vpop.f32.mrf.mxu0 }
 0x456   : > { %v15625_v18 = vpop.f32.mrf.mxu1  ;;  %v15630_v63 = vadd.f32 %v11284_v35, %v15524_v26 }
 0x457   : > { %v11286_v54 = vpop.f32.mrf.mxu0 }
 0x458   : > { %v15632_v0 = vpop.f32.mrf.mxu1  ;;  %v11287_v30 = vadd.f32 %v11286_v54, %v11285_v17 }
 0x459   : > { %v11288_v55 = vpop.f32.mrf.mxu0 }
 0x45a   : > { %v15634_v13 = vpop.f32.mrf.mxu1  ;;  %v15637_v61 = vadd.f32 %v11287_v30, %v15527_v14 }
 0x45b   : > { %v11289_v62 = vpop.f32.mrf.mxu0 }
 0x45c   : > { %v15639_v12 = vpop.f32.mrf.mxu1  ;;  %v11290_v33 = vadd.f32 %v11289_v62, %v11288_v55 }
 0x45d   : > { %v11291_v31 = vpop.f32.mrf.mxu0 }
 0x45e   : > { %v15641_v42 = vpop.f32.mrf.mxu1  ;;  %v15644_v26 = vadd.f32 %v11290_v33, %v15530_v40 }
 0x45f   : > { %v11292_v32 = vpop.f32.mrf.mxu0 }
 0x460   : > { %v15646_v47 = vpop.f32.mrf.mxu1  ;;  %v11293_v23 = vadd.f32 %v11292_v32, %v11291_v31 }
 0x461   : > { %v11294_v56 = vpop.f32.mrf.mxu0 }
 0x462   : > { %v15648_v60 = vpop.f32.mrf.mxu1  ;;  %v15651_v14 = vadd.f32 %v11293_v23, %v15533_v2 }
 0x463   : > { %v11295_v10 = vpop.f32.mrf.mxu0 }
 0x464   : > { %v15653_v25 = vpop.f32.mrf.mxu1  ;;  %v11296_v24 = vadd.f32 %v11295_v10, %v11294_v56 }
 0x465   : > { %v11297_v49 = vpop.f32.mrf.mxu0 }
 0x466   : > { %v15655_v58 = vpop.f32.mrf.mxu1  ;;  %v15658_v40 = vadd.f32 %v11296_v24, %v15536_v11 }
 0x467   : > { %v11298_v17 = vpop.f32.mrf.mxu0 }
 0x468   : > { %v15660_v35 = vpop.f32.mrf.mxu1  ;;  %v11299_v54 = vadd.f32 %v11298_v17, %v11297_v49 }
 0x469   : > { %v11300_v55 = vpop.f32.mrf.mxu0 }
 0x46a   : > { %v15662_v30 = vpop.f32.mrf.mxu1  ;;  %v15665_v2 = vadd.f32 %v11299_v54, %v15539_v48 }
 0x46b   : > { %v11301_v33 = vpop.f32.mrf.mxu0 }
 0x46c   : > { %v15667_v62 = vpop.f32.mrf.mxu1  ;;  %v11302_v31 = vadd.f32 %v11301_v33, %v11300_v55 }
 0x46d   : > { %v11303_v23 = vpop.f32.mrf.mxu0 }
 0x46e   : > { %v15669_v32 = vpop.f32.mrf.mxu1  ;;  %v15672_v11 = vadd.f32 %v11302_v31, %v15542_v57 }
 0x46f   : > { %v11304_v10 = vpop.f32.mrf.mxu0 }
 0x470   : > { %v15674_v56 = vpop.f32.mrf.mxu1  ;;  %v11305_v24 = vadd.f32 %v11304_v10, %v11303_v23 }
 0x471   : > { %v11306_v17 = vpop.f32.mrf.mxu0 }
 0x472   : > { %v15676_v49 = vpop.f32.mrf.mxu1  ;;  %v15679_v48 = vadd.f32 %v11305_v24, %v15545_v59 }
 0x473   : > { %16781 = vst [vmem:[#allocation24_spill] sm:$0xff] %v15676_v49  ;;  %v11307_v16 = vpop.f32.mrf.mxu0 }
 0x474   : > { %16782 = vst [vmem:[#allocation25_spill] sm:$0xff] %v15679_v48  ;;  %v15681_v54 = vpop.f32.mrf.mxu1  ;;  %v11308_v55 = vadd.f32 %v11307_v16, %v11306_v17 }
 0x475   : > { %v11309_v53 = vpop.f32.mrf.mxu0 }
 0x476   : > { %v15683_v33 = vpop.f32.mrf.mxu1  ;;  %v15686_v57 = vadd.f32 %v11308_v55, %v15548_v22 }
 0x477   : > { %16783 = vst [vmem:[#allocation26_spill] sm:$0xff] %v15683_v33  ;;  %v11310_v52 = vpop.f32.mrf.mxu0 }
 0x478   : > { %16784 = vst [vmem:[#allocation27_spill] sm:$0xff] %v15686_v57  ;;  %v15688_v31 = vpop.f32.mrf.mxu1  ;;  %v11311_v23 = vadd.f32 %v11310_v52, %v11309_v53 }
 0x479   : > { %v11312_v49 = vpop.f32.mrf.mxu0 }
 0x47a   : > { %v15690_v10 = vpop.f32.mrf.mxu1  ;;  %v15693_v59 = vadd.f32 %v11311_v23, %v15551_v43 }
 0x47b   : > { %16785 = vst [vmem:[#allocation28_spill] sm:$0xff] %v15690_v10  ;;  %v11313_v48 = vpop.f32.mrf.mxu0 }
 0x47c   : > { %16786 = vst [vmem:[#allocation29_spill] sm:$0xff] %v15693_v59  ;;  %v15695_v24 = vpop.f32.mrf.mxu1  ;;  %v11314_v16 = vadd.f32 %v11313_v48, %v11312_v49 }
 0x47d   : > { %v11315_v33 = vpop.f32.mrf.mxu0 }
 0x47e   : > { %v15697_v17 = vpop.f32.mrf.mxu1  ;;  %v15700_v22 = vadd.f32 %v11314_v16, %v15554_v51 }
 0x47f   : > { %16787 = vst [vmem:[#allocation30_spill] sm:$0xff] %v15697_v17  ;;  %v11316_v57 = vpop.f32.mrf.mxu0 }
 0x480   : > { %v15702_v55 = vpop.f32.mrf.mxu1  ;;  %v11317_v52 = vadd.f32 %v11316_v57, %v11315_v33 }
 0x481   : > { %16788 = vst [vmem:[#allocation31_spill] sm:$0xff] %v15702_v55  ;;  %v11318_v10 = vpop.f32.mrf.mxu0 }
 0x482   : > { %v15704_v53 = vpop.f32.mrf.mxu1  ;;  %v15707_v43 = vadd.f32 %v11317_v52, %v15557_v3 }
 0x483   : > { %16789 = vst [vmem:[#allocation32_spill] sm:$0xff] %v15704_v53  ;;  %v11319_v59 = vpop.f32.mrf.mxu0 }
 0x484   : > { %16790 = vst [vmem:[#allocation33_spill] sm:$0xff] %v15707_v43  ;;  %v15709_v23 = vpop.f32.mrf.mxu1  ;;  %v11320_v49 = vadd.f32 %v11319_v59, %v11318_v10 }
 0x485   : > { %16791 = vst [vmem:[#allocation34_spill] sm:$0xff] %v15709_v23  ;;  %v11321_v17 = vpop.f32.mrf.mxu0 }
 0x486   : > { %v15711_v48 = vpop.f32.mrf.mxu1  ;;  %v15714_v51 = vadd.f32 %v11320_v49, %v15560_v21 }
 0x487   : > { %v11322_v55 = vpop.f32.mrf.mxu0 }
 0x488   : > { %16792 = vst [vmem:[#allocation35_spill] sm:$0xff] %v15714_v51  ;;  %v15716_v16 = vpop.f32.mrf.mxu1  ;;  %v11323_v33 = vadd.f32 %v11322_v55, %v11321_v17 }
 0x489   : > { %16793 = vst [vmem:[#allocation36_spill] sm:$0xff] %v15716_v16  ;;  %v11324_v53 = vpop.f32.mrf.mxu0 }
 0x48a   : > { %v15718_v57 = vpop.f32.mrf.mxu1  ;;  %v15721_v3 = vadd.f32 %v11323_v33, %v15563_v6 }
 0x48b   : > { %16794 = vst [vmem:[#allocation7_spill] sm:$0xff] %v15718_v57  ;;  %v11325_v52 = vpop.f32.mrf.mxu0 }
 0x48c   : > { %16795 = vst [vmem:[#allocation8_spill] sm:$0xff] %v15721_v3  ;;  %v11326_v43 = vadd.f32 %v11325_v52, %v11324_v53  ;;  %v15723_v23 = vpop.f32.mrf.mxu1 }
 0x48d   : > { %v11327_v10 = vpop.f32.mrf.mxu0 }
 0x48e   : > { %v15726_v59 = vadd.f32 %v11326_v43, %v15566_v45  ;;  %v15728_v51 = vpop.f32.mrf.mxu1 }
 0x48f   : > { %v11328_v21 = vpop.f32.mrf.mxu0  ;;  %16796 = vst [vmem:[#allocation9_spill] sm:$0xff] %v15728_v51 }
 0x490   : > { %v11329_v49 = vadd.f32 %v11328_v21, %v11327_v10  ;;  %v15733_v6 = vpop.f32.mrf.mxu1 }
 0x491   : > { %v11330_v16 = vpop.f32.mrf.mxu0 }
 0x492   : > { %v15731_v17 = vadd.f32 %v11329_v49, %v15569_v46  ;;  %v15738_v45 = vpop.f32.mrf.mxu1 }
 0x493   : > { %v11331_v55 = vpop.f32.mrf.mxu0 }
 0x494   : > { %16797 = vst [vmem:[#allocation10_spill] sm:$0xff] %v15731_v17  ;;  %v11332_v57 = vadd.f32 %v11331_v55, %v11330_v16  ;;  %v15743_v51 = vpop.f32.mrf.mxu1 }
 0x495   : > { %v11333_v33 = vpop.f32.mrf.mxu0 }
 0x496   : > { %v15736_v53 = vadd.f32 %v11332_v57, %v15572_v28  ;;  %v15748_v17 = vpop.f32.mrf.mxu1 }
 0x497   : > { %v11334_v52 = vpop.f32.mrf.mxu0 }
 0x498   : > { %16798 = vst [vmem:[#allocation11_spill] sm:$0xff] %v15736_v53  ;;  %v11335_v3 = vadd.f32 %v11334_v52, %v11333_v33  ;;  %v15753_v53 = vpop.f32.mrf.mxu1 }
 0x499   : > { %v11336_v43 = vpop.f32.mrf.mxu0 }
 0x49a   : > { %v15741_v10 = vadd.f32 %v11335_v3, %v15575_v29 }
 0x49b   : > { %v11337_v21 = vpop.f32.mrf.mxu0 }
 0x49c   : > { %16799 = vst [vmem:[#allocation12_spill] sm:$0xff] %v15741_v10  ;;  %v11338_v46 = vadd.f32 %v11337_v21, %v11336_v43  ;;  %v15758_v21 = vpop.f32.mrf.mxu1 }
 0x49d   : > { %v11339_v49 = vpop.f32.mrf.mxu0 }
 0x49e   : > { %v15746_v16 = vadd.f32 %v11338_v46, %v15578_v1 }
 0x49f   : > { %v11340_v55 = vpop.f32.mrf.mxu0 }
 0x4a0   : > { %16800 = vst [vmem:[#allocation13_spill] sm:$0xff] %v15746_v16  ;;  %v11341_v28 = vadd.f32 %v11340_v55, %v11339_v49  ;;  %v15763_v55 = vpop.f32.mrf.mxu1 }
 0x4a1   : > { %v11342_v57 = vpop.f32.mrf.mxu0 }
 0x4a2   : > { %v15751_v33 = vadd.f32 %v11341_v28, %v15581_v36 }
 0x4a3   : > { %v11343_v52 = vpop.f32.mrf.mxu0 }
 0x4a4   : > { %16801 = vst [vmem:[#allocation14_spill] sm:$0xff] %v15751_v33  ;;  %v11344_v29 = vadd.f32 %v11343_v52, %v11342_v57  ;;  %v15768_v52 = vpop.f32.mrf.mxu1 }
 0x4a5   : > { %v11345_v3 = vpop.f32.mrf.mxu0 }
 0x4a6   : > { %v15756_v10 = vadd.f32 %v11344_v29, %v15584_v19 }
 0x4a7   : > { %v11346_v43 = vpop.f32.mrf.mxu0 }
 0x4a8   : > { %16802 = vst [vmem:[#allocation15_spill] sm:$0xff] %v15756_v10  ;;  %v11347_v1 = vadd.f32 %v11346_v43, %v11345_v3  ;;  %v15773_v43 = vpop.f32.mrf.mxu1 }
 0x4a9   : > { %v11348_v46 = vpop.f32.mrf.mxu0 }
 0x4aa   : > { %v15761_v16 = vadd.f32 %v11347_v1, %v15587_v39 }
 0x4ab   : > { %v11349_v49 = vpop.f32.mrf.mxu0 }
 0x4ac   : > { %16803 = vst [vmem:[#allocation4_spill] sm:$0xff] %v15761_v16  ;;  %v11350_v36 = vadd.f32 %v11349_v49, %v11348_v46  ;;  %v15778_v49 = vpop.f32.mrf.mxu1 }
 0x4ad   : > { %v11351_v28 = vpop.f32.mrf.mxu0 }
 0x4ae   : > { %v15766_v33 = vadd.f32 %v11350_v36, %v15590_v44 }
 0x4af   : > { %v11352_v57 = vpop.f32.mrf.mxu0 }
 0x4b0   : > { %16804 = vst [vmem:[#allocation16_spill] sm:$0xff] %v15766_v33  ;;  %v11353_v19 = vadd.f32 %v11352_v57, %v11351_v28  ;;  %v15783_v57 = vpop.f32.mrf.mxu1 }
 0x4b1   : > { %v11354_v29 = vpop.f32.mrf.mxu0 }
 0x4b2   : > { %v15771_v10 = vadd.f32 %v11353_v19, %v15593_v4 }
 0x4b3   : > { %v11355_v3 = vpop.f32.mrf.mxu0 }
 0x4b4   : > { %16805 = vst [vmem:[#allocation37_spill] sm:$0xff] %v15771_v10  ;;  %v11356_v39 = vadd.f32 %v11355_v3, %v11354_v29  ;;  %v15788_v3 = vpop.f32.mrf.mxu1 }
 0x4b5   : > { %v11357_v1 = vpop.f32.mrf.mxu0 }
 0x4b6   : > { %v15776_v16 = vadd.f32 %v11356_v39, %v15596_v15 }
 0x4b7   : > { %v11358_v46 = vpop.f32.mrf.mxu0 }
 0x4b8   : > { %16806 = vst [vmem:[#allocation38_spill] sm:$0xff] %v15776_v16  ;;  %v11359_v44 = vadd.f32 %v11358_v46, %v11357_v1  ;;  %v15793_v46 = vpop.f32.mrf.mxu1 }
 0x4b9   : > { %v11360_v36 = vpop.f32.mrf.mxu0 }
 0x4ba   : > { %v15781_v33 = vadd.f32 %v11359_v44, %v15599_v20 }
 0x4bb   : > { %v11361_v28 = vpop.f32.mrf.mxu0 }
 0x4bc   : > { %16807 = vst [vmem:[#allocation39_spill] sm:$0xff] %v15781_v33  ;;  %v11362_v4 = vadd.f32 %v11361_v28, %v11360_v36  ;;  %v15798_v28 = vpop.f32.mrf.mxu1 }
 0x4bd   : > { %v11363_v19 = vpop.f32.mrf.mxu0 }
 0x4be   : > { %v15786_v10 = vadd.f32 %v11362_v4, %v15602_v41 }
 0x4bf   : > { %v11364_v29 = vpop.f32.mrf.mxu0 }
 0x4c0   : > { %16808 = vst [vmem:[#allocation40_spill] sm:$0xff] %v15786_v10  ;;  %v11365_v15 = vadd.f32 %v11364_v29, %v11363_v19  ;;  %v15803_v29 = vpop.f32.mrf.mxu1 }
 0x4c1   : > { %v11366_v39 = vpop.f32.mrf.mxu0 }
 0x4c2   : > { %v15791_v16 = vadd.f32 %v11365_v15, %v15605_v50 }
 0x4c3   : > { %v11367_v1 = vpop.f32.mrf.mxu0 }
 0x4c4   : > { %v11368_v20 = vadd.f32 %v11367_v1, %v11366_v39  ;;  %v11396_v39 = vadd.f32 %v15616_v38, %v15613_v37 }
 0x4c5   : > { %v11369_v44 = vpop.f32.mrf.mxu0 }
 0x4c6   : > { %v15796_v33 = vadd.f32 %v11368_v20, %v15608_v5  ;;  %v11399_v5 = vadd.f32 %v15623_v7, %v15620_v8  ;;  %v7949_v38 = vadd.f32 %v11396_v39, %v15630_v63  ;;  %v11414_v63 = vadd.f32 %v15660_v35, %v15655_v58 }
 0x4c7   : > { %v11370_v36 = vpop.f32.mrf.mxu0 }
 0x4c8   : > { %v11371_v41 = vadd.f32 %v11370_v36, %v11369_v44  ;;  %v11402_v44 = vadd.f32 %v15632_v0, %v15625_v18  ;;  %v11408_v18 = vadd.f32 %v15646_v47, %v15641_v42  ;;  %v11411_v0 = vadd.f32 %v15653_v25, %v15648_v60 }
 0x4c9   : > { %v11372_v4 = vpop.f32.mrf.mxu0  ;;  %v11417_v47 = vadd.f32 %v15667_v62, %v15662_v30 }
 0x4ca   : > { %v15801_v10 = vadd.f32 %v11371_v41, %v15611_v27  ;;  %v15814_v27 = vpop.f32.mrf.mxu1  ;;  %v11405_v41 = vadd.f32 %v15639_v12, %v15634_v13  ;;  %v7965_v42 = vadd.f32 %v11408_v18, %v15658_v40  ;;  %v16809_v40 = vld [vmem:[#allocation24_spill] sm:$0xff] }
 0x4cb   : > { %v11373_v19 = vpop.f32.mrf.mxu0 }
 0x4cc   : > { %v11374_v50 = vadd.f32 %v11373_v19, %v11372_v4  ;;  %v7954_v4 = vadd.f32 %v11399_v5, %v15637_v61  ;;  %v15821_v7 = vpop.f32.mrf.mxu1  ;;  %v7957_v19 = vadd.f32 %v11402_v44, %v15644_v26 }
 0x4cd   : > { %v11529_v15 = vpop.f32.mrf.mxu0 }
 0x4ce   : > { %v15810_v1 = vadd.f32 %v11374_v50, %v15618_v9  ;;  %v8115_v9 = vadd.f32 %v11529_v15, %v7954_v4  ;;  %v15831_v15 = vpop.f32.mrf.mxu1 }
 0x4cf   : > { %v8106_v20 = vpop.f32.mrf.mxu0 }
 0x4d0   : > { %v8107_v37 = vadd.f32 %v8106_v20, %v15627_v34  ;;  %v7962_v34 = vadd.f32 %v11405_v41, %v15651_v14  ;;  %v8247_v26 = vmax.f32 %v8115_v9, 0.0  ;;  %v7973_v14 = vadd.f32 %v11414_v63, %v15672_v11  ;;  %v15838_v58 = vpop.f32.mrf.mxu1  ;;  %v16811_v11 = vld [vmem:[#allocation26_spill] sm:$0xff] }
 0x4d1   : > { %v11530_v36 = vpop.f32.mrf.mxu0  ;;  %v11420_v9 = vadd.f32 %v15674_v56, %v15669_v32  ;;  %v16812_v32 = vld [vmem:[#allocation27_spill] sm:$0xff] }
 0x4d2   : > { %v8237_v12 = vmax.f32 %v8107_v37, 0.0  ;;  %v8118_v61 = vadd.f32 %v11530_v36, %v7957_v19  ;;  %v7970_v36 = vadd.f32 %v11411_v0, %v15665_v2  ;;  %v11423_v19 = vadd.f32 %v15681_v54, %v16809_v40  ;;  %v16810_v2 = vld [vmem:[#allocation25_spill] sm:$0xff] }
 0x4d3   : > { %v8109_v8 = vpop.f32.mrf.mxu0  ;;  %v7978_v0 = vadd.f32 %v11417_v47, %v16810_v2  ;;  %v7981_v56 = vadd.f32 %v11420_v9, %v16812_v32  ;;  %v16818_v9 = vld [vmem:[#allocation34_spill] sm:$0xff] }
 0x4d4   : > { %v8110_v50 = vadd.f32 %v8109_v8, %v7949_v38  ;;  %v8252_v60 = vmax.f32 %v8118_v61, 0.0 }
 0x4d5   : > { %v11533_v13 = vpop.f32.mrf.mxu0 }
 0x4d6   : > { %v8242_v5 = vmax.f32 %v8110_v50, 0.0  ;;  %v8131_v35 = vadd.f32 %v11533_v13, %v7970_v36  ;;  %v15847_v13 = vpop.f32.mrf.mxu1 }
 0x4d7   : > { %v8122_v39 = vpop.f32.mrf.mxu0 }
 0x4d8   : > { %v8541_v20 = vadd.f32 %v8242_v5, %v8237_v12  ;;  %v8123_v44 = vadd.f32 %v8122_v39, %v7962_v34  ;;  %v11426_v12 = vadd.f32 %v15688_v31, %v16811_v11  ;;  %v8267_v5 = vmax.f32 %v8131_v35, 0.0  ;;  %v15854_v31 = vpop.f32.mrf.mxu1  ;;  %v16815_v35 = vld [vmem:[#allocation30_spill] sm:$0xff] }
 0x4d9   : > { %v11534_v4 = vpop.f32.mrf.mxu0 }
 0x4da   : > { %v8542_v25 = vadd.f32 %v8541_v20, %v8247_v26  ;;  %v8257_v37 = vmax.f32 %v8123_v44, 0.0  ;;  %v8134_v50 = vadd.f32 %v11534_v4, %v7973_v14  ;;  %v16813_v26 = vld [vmem:[#allocation28_spill] sm:$0xff]  ;;  %v16814_v4 = vld [vmem:[#allocation29_spill] sm:$0xff]  ;;  %v7989_v47 = vadd.f32 %v11426_v12, %v15700_v22 }
 0x4db   : > { %v8125_v41 = vpop.f32.mrf.mxu0  ;;  %v11429_v54 = vadd.f32 %v15695_v24, %v16813_v26  ;;  %v16820_v22 = vld [vmem:[#allocation36_spill] sm:$0xff] }
 0x4dc   : > { %v8543_v38 = vadd.f32 %v8542_v25, %v8252_v60  ;;  %v8126_v8 = vadd.f32 %v8125_v41, %v7965_v42  ;;  %v8272_v20 = vmax.f32 %v8134_v50, 0.0  ;;  %v7986_v42 = vadd.f32 %v11423_v19, %v16814_v4  ;;  %v16819_v19 = vld [vmem:[#allocation33_spill] sm:$0xff] }
 0x4dd   : > { %v11537_v30 = vpop.f32.mrf.mxu0  ;;  %v7994_v2 = vadd.f32 %v11429_v54, %v16819_v19 }
 0x4de   : > { %v8544_v62 = vadd.f32 %v8543_v38, %v8257_v37  ;;  %v8262_v18 = vmax.f32 %v8126_v8, 0.0  ;;  %v8147_v25 = vadd.f32 %v11537_v30, %v7986_v42  ;;  %v16816_v37 = vld [vmem:[#allocation31_spill] sm:$0xff]  ;;  %v16817_v8 = vld [vmem:[#allocation32_spill] sm:$0xff]  ;;  %v15863_v30 = vpop.f32.mrf.mxu1 }
 0x4df   : > { %v8138_v61 = vpop.f32.mrf.mxu0  ;;  %v11432_v38 = vadd.f32 %v16816_v37, %v16815_v35  ;;  %v11435_v40 = vadd.f32 %v16818_v9, %v16817_v8  ;;  %v11447_v35 = vadd.f32 %v15743_v51, %v15738_v45  ;;  %v16825_v9 = vld [vmem:[#allocation10_spill] sm:$0xff]  ;;  %v11453_v51 = vadd.f32 %v15763_v55, %v15758_v21 }
 0x4e0   : > { %v8545_v34 = vadd.f32 %v8544_v62, %v8262_v18  ;;  %v8139_v63 = vadd.f32 %v8138_v61, %v7978_v0  ;;  %v11438_v0 = vadd.f32 %v16820_v22, %v15711_v48  ;;  %v8287_v12 = vmax.f32 %v8147_v25, 0.0  ;;  %v15870_v48 = vpop.f32.mrf.mxu1 }
 0x4e1   : > { %v11538_v39 = vpop.f32.mrf.mxu0 }
 0x4e2   : > { %v8546_v44 = vadd.f32 %v8545_v34, %v8267_v5  ;;  %v8277_v36 = vmax.f32 %v8139_v63, 0.0  ;;  %v8150_v50 = vadd.f32 %v11538_v39, %v7989_v47  ;;  %v16821_v63 = vld [vmem:[#allocation35_spill] sm:$0xff]  ;;  %v8005_v54 = vadd.f32 %v11438_v0, %v15726_v59 }
 0x4e3   : > { %v8141_v60 = vpop.f32.mrf.mxu0  ;;  %v7997_v32 = vadd.f32 %v11432_v38, %v16821_v63  ;;  %v11450_v59 = vadd.f32 %v15753_v53, %v15748_v17 }
 0x4e4   : > { %v8547_v14 = vadd.f32 %v8546_v44, %v8272_v20  ;;  %v8142_v41 = vadd.f32 %v8141_v60, %v7981_v56  ;;  %v16822_v56 = vld [vmem:[#allocation7_spill] sm:$0xff]  ;;  %v8292_v20 = vmax.f32 %v8150_v50, 0.0  ;;  %v16823_v44 = vld [vmem:[#allocation8_spill] sm:$0xff] }
 0x4e5   : > { %v11541_v24 = vpop.f32.mrf.mxu0  ;;  %v11441_v26 = vadd.f32 %v15723_v23, %v16822_v56  ;;  %v8002_v4 = vadd.f32 %v11435_v40, %v16823_v44 }
 0x4e6   : > { %v8548_v62 = vadd.f32 %v8547_v14, %v8277_v36  ;;  %v8282_v18 = vmax.f32 %v8142_v41, 0.0  ;;  %v16824_v14 = vld [vmem:[#allocation9_spill] sm:$0xff] }
 0x4e7   : > { %v8154_v11 = vpop.f32.mrf.mxu0  ;;  %v8163_v47 = vadd.f32 %v11541_v24, %v8002_v4  ;;  %v11444_v41 = vadd.f32 %v15733_v6, %v16824_v14  ;;  %v8010_v40 = vadd.f32 %v11441_v26, %v16825_v9  ;;  %v15879_v24 = vpop.f32.mrf.mxu1  ;;  %v16826_v6 = vld [vmem:[#allocation11_spill] sm:$0xff]  ;;  %v11456_v26 = vadd.f32 %v15773_v43, %v15768_v52  ;;  %v16829_v4 = vld [vmem:[#allocation14_spill] sm:$0xff] }
 0x4e8   : > { %v8549_v61 = vadd.f32 %v8548_v62, %v8282_v18  ;;  %v8155_v5 = vadd.f32 %v8154_v11, %v7994_v2  ;;  %v16827_v11 = vld [vmem:[#allocation12_spill] sm:$0xff]  ;;  %v11465_v43 = vadd.f32 %v15803_v29, %v15798_v28 }
 0x4e9   : > { %v11542_v34 = vpop.f32.mrf.mxu0  ;;  %v8307_v50 = vmax.f32 %v8163_v47, 0.0  ;;  %v8013_v22 = vadd.f32 %v11444_v41, %v16826_v6  ;;  %v15886_v17 = vpop.f32.mrf.mxu1  ;;  %v16833_v6 = vld [vmem:[#allocation37_spill] sm:$0xff] }
 0x4ea   : > { %v8550_v39 = vadd.f32 %v8549_v61, %v8287_v12  ;;  %v8297_v60 = vmax.f32 %v8155_v5, 0.0  ;;  %v8166_v38 = vadd.f32 %v11542_v34, %v8005_v54  ;;  %v8018_v12 = vadd.f32 %v11447_v35, %v16827_v11  ;;  %v16828_v61 = vld [vmem:[#allocation13_spill] sm:$0xff]  ;;  %v16830_v35 = vld [vmem:[#allocation15_spill] sm:$0xff] }
 0x4eb   : > { %v8157_v42 = vpop.f32.mrf.mxu0  ;;  %v8021_v5 = vadd.f32 %v11450_v59, %v16828_v61  ;;  %v8026_v54 = vadd.f32 %v11453_v51, %v16829_v4  ;;  %v8029_v52 = vadd.f32 %v11456_v26, %v16830_v35  ;;  %v16834_v51 = vld [vmem:[#allocation22_spill] sm:$0xff] }
 0x4ec   : > { %v8551_v25 = vadd.f32 %v8550_v39, %v8292_v20  ;;  %v8158_v36 = vadd.f32 %v8157_v42, %v7997_v32  ;;  %v8312_v45 = vmax.f32 %v8166_v38, 0.0  ;;  %v11459_v20 = vadd.f32 %v15783_v57, %v15778_v49  ;;  %v16832_v38 = vld [vmem:[#allocation16_spill] sm:$0xff] }
 0x4ed   : > { %v11545_v23 = vpop.f32.mrf.mxu0  ;;  %v11462_v42 = vadd.f32 %v15793_v46, %v15788_v3 }
 0x4ee   : > { %v8552_v37 = vadd.f32 %v8551_v25, %v8297_v60  ;;  %v8302_v8 = vmax.f32 %v8158_v36, 0.0  ;;  %v8179_v53 = vadd.f32 %v11545_v23, %v8018_v12  ;;  %v11481_v60 = vpop.f32.mrf.mxu1  ;;  %v16831_v23 = vld [vmem:[#allocation4_spill] sm:$0xff]  ;;  %v11474_v12 = vadd.f32 %v15854_v31, %v15847_v13 }
 0x4ef   : > { %v8170_v62 = vpop.f32.mrf.mxu0  ;;  %v16839_v31 = vld [vmem:[#allocation40_spill] sm:$0xff] }
 0x4f0   : > { %v8553_v18 = vadd.f32 %v8552_v37, %v8302_v8  ;;  %v8171_v19 = vadd.f32 %v8170_v62, %v8010_v40  ;;  %v8327_v25 = vmax.f32 %v8179_v53, 0.0  ;;  %v8034_v37 = vadd.f32 %v11459_v20, %v16831_v23  ;;  %v11482_v40 = vpop.f32.mrf.mxu1  ;;  %v16836_v53 = vld [vmem:[#allocation19_spill] sm:$0xff] }
 0x4f1   : > { %v11546_v2 = vpop.f32.mrf.mxu0  ;;  %v8037_v8 = vadd.f32 %v11462_v42, %v16832_v38  ;;  %v11483_v35 = vadd.f32 %v11482_v40, %v11481_v60 }
 0x4f2   : > { %v8554_v0 = vadd.f32 %v8553_v18, %v8307_v50  ;;  %v8317_v63 = vmax.f32 %v8171_v19, 0.0  ;;  %v8182_v39 = vadd.f32 %v11546_v2, %v8021_v5  ;;  %v11468_v50 = vadd.f32 %v15821_v7, %v15814_v27  ;;  %v11484_v5 = vpop.f32.mrf.mxu1 }
 0x4f3   : > { %v8173_v34 = vpop.f32.mrf.mxu0  ;;  %v11471_v18 = vadd.f32 %v15838_v58, %v15831_v15  ;;  %v8498_v15 = vrot.slane %v16836_v53, 4 }
 0x4f4   : > { %v8555_v32 = vadd.f32 %v8554_v0, %v8312_v45  ;;  %v8174_v56 = vadd.f32 %v8173_v34, %v8013_v22  ;;  %v8332_v49 = vmax.f32 %v8182_v39, 0.0  ;;  %v8042_v22 = vadd.f32 %v11465_v43, %v16833_v6  ;;  %v16835_v0 = vld [vmem:[#allocation23_spill] sm:$0xff] }
 0x4f5   : > { %v11549_v21 = vpop.f32.mrf.mxu0  ;;  %v8424_v45 = vrot.slane %v16834_v51, 4  ;;  %v8461_v11 = vrot.slane %v16835_v0, 4 }
 0x4f6   : > { %v8556_v55 = vadd.f32 %v8555_v32, %v8317_v63  ;;  %v8322_v44 = vmax.f32 %v8174_v56, 0.0  ;;  %v8195_v3 = vadd.f32 %v11549_v21, %v8034_v37  ;;  %v16837_v63 = vld [vmem:[#allocation38_spill] sm:$0xff]  ;;  %v11477_v56 = vadd.f32 %v15870_v48, %v15863_v30  ;;  %v16838_v21 = vld [vmem:[#allocation39_spill] sm:$0xff] }
 0x4f7   : > { %v8186_v47 = vpop.f32.mrf.mxu0  ;;  %v8045_v32 = vadd.f32 %v11468_v50, %v16837_v63  ;;  %v8425_v39 = vadd.f32 %v8424_v45, %v16834_v51  ;;  %v8462_v13 = vadd.f32 %v8461_v11, %v16835_v0  ;;  %v11480_v48 = vadd.f32 %v15886_v17, %v15879_v24 }
 0x4f8   : > { %v8557_v36 = vadd.f32 %v8556_v55, %v8322_v44  ;;  %v8187_v14 = vadd.f32 %v8186_v47, %v8026_v54  ;;  %v8347_v34 = vmax.f32 %v8195_v3, 0.0  ;;  %v8050_v55 = vadd.f32 %v11471_v18, %v16838_v21  ;;  %v11485_v54 = vpop.f32.mrf.mxu1 }
 0x4f9   : > { %v11550_v41 = vpop.f32.mrf.mxu0  ;;  %v8053_v44 = vadd.f32 %v11474_v12, %v16839_v31  ;;  %v8058_v23 = vadd.f32 %v11477_v56, %v15791_v16  ;;  %v8463_v37 = vrot.slane %v8462_v13, 2  ;;  %v11486_v38 = vadd.f32 %v11485_v54, %v11484_v5 }
 0x4fa   : > { %v8558_v57 = vadd.f32 %v8557_v36, %v8327_v25  ;;  %v8337_v46 = vmax.f32 %v8187_v14, 0.0  ;;  %v8198_v29 = vadd.f32 %v11550_v41, %v8037_v8  ;;  %v8499_v14 = vadd.f32 %v8498_v15, %v16836_v53  ;;  %v16840_v41 = vld [vmem:[#allocation21_spill] sm:$0xff] }
 0x4fb   : > { %v8189_v9 = vpop.f32.mrf.mxu0  ;;  %v8535_v30 = vrot.slane %v16840_v41, 4  ;;  %v8066_v17 = vadd.f32 %v11483_v35, %v15801_v10  ;;  %v8061_v60 = vadd.f32 %v11480_v48, %v15796_v33  ;;  %v8464_v40 = vadd.f32 %v8463_v37, %v8462_v13  ;;  %v12283_v48 = vld [vmem:[%s16547_s5 + $0xe4] ss:$16 sps:$4 sm:$0xff]  }
 0x4fc   : > { %v8559_v59 = vadd.f32 %v8558_v57, %v8332_v49  ;;  %v8190_v62 = vadd.f32 %v8189_v9, %v8029_v52  ;;  %v8352_v26 = vmax.f32 %v8198_v29, 0.0  ;;  %v8069_v16 = vadd.f32 %v11486_v38, %v15810_v1  ;;  %v12286_v35 = vld [vmem:[%s16547_s5 + $0xc4] ss:$16 sps:$4 sm:$0xff]   ;;  %9667 = vmatprep.subr.bf16.mxu1 %v12283_v48 }
 0x4fd   : > { %v11553_v19 = vpop.f32.mrf.mxu0  ;;  %v8536_v50 = vadd.f32 %v8535_v30, %v16840_v41  ;;  %v8465_v5 = vrot.slane %v8464_v40, 1  ;;  %v12281_v30 = vld [vmem:[%s16547_s5 + $0xe0] ss:$16 sps:$4 sm:$0xff]   ;;  %v12313_v37 = vld [vmem:[%s16547_s5 + $0x2c4] ss:$16 sps:$4 sm:$0xff]  }
 0x4fe   : > { %v8560_v28 = vadd.f32 %v8559_v59, %v8337_v46  ;;  %v8342_v2 = vmax.f32 %v8190_v62, 0.0  ;;  %v8211_v42 = vadd.f32 %v11553_v19, %v8050_v55  ;;  %v8426_v59 = vrot.slane %v8425_v39, 2  ;;  %9668 = vmatpush1.bf16.msra.mxu1 %v12281_v30  ;;  %v12292_v38 = vld [vmem:[%s16547_s5 + $0x84] ss:$16 sps:$4 sm:$0xff]   ;;  %v12353_v30 = vld [vmem:[%s16547_s5 + $0x140] ss:$16 sps:$4 sm:$0xff]  }
 0x4ff   : > { %v8202_v61 = vpop.f32.mrf.mxu0  ;;  %v8500_v62 = vrot.slane %v8499_v14, 2  ;;  %v8537_v0 = vrot.slane %v8536_v50, 2  ;;  %9669 = vmatprep.subr.bf16.mxu1 %v12286_v35  ;;  %v12355_v48 = vld [vmem:[%s16547_s5 + $0x144] ss:$16 sps:$4 sm:$0xff]   ;;  %v12356_v35 = vld [vmem:[%s16547_s5 + $0x380] ss:$16 sps:$4 sm:$0xff]  }
 0x500   : > { %v8561_v27 = vadd.f32 %v8560_v28, %v8342_v2  ;;  %v8203_v7 = vadd.f32 %v8202_v61, %v8042_v22  ;;  %v8367_v9 = vmax.f32 %v8211_v42, 0.0  ;;  %v8427_v51 = vadd.f32 %v8426_v59, %v8425_v39  ;;  %v12314_v59 = vld [vmem:[%s16547_s5 + $0x2a0] ss:$16 sps:$4 sm:$0xff]  }
 0x501   : > { %v11554_v58 = vpop.f32.mrf.mxu0  ;;  %v8501_v45 = vadd.f32 %v8500_v62, %v8499_v14  ;;  %v8538_v15 = vadd.f32 %v8537_v0, %v8536_v50  ;;  %v12322_v62 = vld [vmem:[%s16547_s5 + $0x284] ss:$16 sps:$4 sm:$0xff]   ;;  %v12293_v50 = vld [vmem:[%s16547_s5 + $0x60] ss:$16 sps:$4 sm:$0xff]  }
 0x502   : > { %v8562_v20 = vadd.f32 %v8561_v27, %v8347_v34  ;;  %v8357_v47 = vmax.f32 %v8203_v7, 0.0  ;;  %v8214_v49 = vadd.f32 %v11554_v58, %v8053_v44  ;;  %v8428_v10 = vrot.slane %v8427_v51, 1  ;;  %v12340_v0 = vld [vmem:[%s16547_s5 + $0x204] ss:$16 sps:$4 sm:$0xff]  }
 0x503   : > { %v8205_v4 = vpop.f32.mrf.mxu0  ;;  %v8502_v53 = vrot.slane %v8501_v45, 1  ;;  %v8466_v58 = vadd.f32 %v8465_v5, %v8464_v40  ;;  %v8539_v56 = vrot.slane %v8538_v15, 1  ;;  %v12323_v40 = vld [vmem:[%s16547_s5 + $0x260] ss:$16 sps:$4 sm:$0xff]   ;;  %v12343_v5 = vld [vmem:[%s16547_s5 + $0x3e4] ss:$16 sps:$4 sm:$0xff]  }
 0x504   : > { %v8563_v25 = vadd.f32 %v8562_v20, %v8352_v26  ;;  %v8206_v36 = vadd.f32 %v8205_v4, %v8045_v32  ;;  %v8372_v19 = vmax.f32 %v8214_v49, 0.0  ;;  %v8429_v63 = vadd.f32 %v8428_v10, %v8427_v51  ;;  %v12305_v49 = vld [vmem:[%s16547_s5 + $0x2e0] ss:$16 sps:$4 sm:$0xff]   ;;  %v12310_v51 = vld [vmem:[%s16547_s5 + $0x1e4] ss:$16 sps:$4 sm:$0xff]  }
 0x505   : > { %v11557_v52 = vpop.f32.mrf.mxu0  ;;  %v8503_v32 = vadd.f32 %v8502_v53, %v8501_v45  ;;  %v15926_v21 = vmul.f32 0.00390625, %v8466_v58  ;;  %v8540_v55 = vadd.f32 %v8539_v56, %v8538_v15  ;;  %v12332_v45 = vld [vmem:[%s16547_s5 + $0x220] ss:$16 sps:$4 sm:$0xff]   ;;  %v12337_v53 = vld [vmem:[%s16547_s5 + $0x184] ss:$16 sps:$4 sm:$0xff]  }
 0x506   : > { %v8564_v43 = vadd.f32 %v8563_v25, %v8357_v47  ;;  %v8362_v57 = vmax.f32 %v8206_v36, 0.0  ;;  %v8227_v29 = vadd.f32 %v11557_v52, %v8066_v17  ;;  %v15928_v13 = vmul.f32 0.00390625, %v8429_v63  ;;  %v12284_v52 = vld [vmem:[%s16547_s5 + $0xc0] ss:$16 sps:$4 sm:$0xff]   ;;  %v12346_v58 = vld [vmem:[%s16547_s5 + $0x164] ss:$16 sps:$4 sm:$0xff]  }
 0x507   : > { %v8218_v8 = vpop.f32.mrf.mxu0  ;;  %v15930_v31 = vmul.f32 0.00390625, %v8503_v32  ;;  %v15934_v42 = vmul.f32 0.00390625, %v8540_v55  ;;  %9670 = vmatpush1.bf16.msra.mxu1 %v12284_v52  ;;  %v12296_v17 = vld [vmem:[%s16547_s5 + $0x40] ss:$16 sps:$4 sm:$0xff]   ;;  %v12358_v52 = vld [vmem:[%s16547_s5 + $0x384] ss:$16 sps:$4 sm:$0xff]  }
 0x508   : > { %v8565_v3 = vadd.f32 %v8564_v43, %v8362_v57  ;;  %v8219_v46 = vadd.f32 %v8218_v8, %v8058_v23  ;;  %v8387_v34 = vmax.f32 %v8227_v29, 0.0  ;;  %v8584_v4 = vadd.f32 %v15926_v21, %v15928_v13  ;;  %v12289_v43 = vld [vmem:[%s16547_s5 + $0xa4] ss:$16 sps:$4 sm:$0xff]   ;;  %v12287_v23 = vld [vmem:[%s16547_s5 + $0xa0] ss:$16 sps:$4 sm:$0xff]  }
 0x509   : > { %v11558_v18 = vpop.f32.mrf.mxu0  ;;  %v12307_v57 = vld [vmem:[%s16547_s5 + $0x2e4] ss:$16 sps:$4 sm:$0xff]   ;;  %9671 = vmatprep.subr.bf16.mxu1 %v12289_v43  ;;  %v12311_v8 = vld [vmem:[%s16547_s5 + $0x2c0] ss:$16 sps:$4 sm:$0xff]  }
 0x50a   : > { %v8566_v24 = vadd.f32 %v8565_v3, %v8367_v9  ;;  %v8377_v2 = vmax.f32 %v8219_v46, 0.0  ;;  %v8230_v12 = vadd.f32 %v11558_v18, %v8069_v16  ;;  %v8585_v47 = vadd.f32 %v8584_v4, %v15930_v31  ;;  %9708 = vmatprep.subr.bf16.mxu0 %v12307_v57  ;;  %v12316_v9 = vld [vmem:[%s16547_s5 + $0x2a4] ss:$16 sps:$4 sm:$0xff]   ;;  %v12290_v3 = vld [vmem:[%s16547_s5 + $0x80] ss:$16 sps:$4 sm:$0xff]  }
 0x50b   : > { %v8221_v28 = vpop.f32.mrf.mxu0  ;;  %9709 = vmatpush1.bf16.msra.mxu0 %v12305_v49  ;;  %9672 = vmatpush1.bf16.msra.mxu1 %v12287_v23  ;;  %v12295_v46 = vld [vmem:[%s16547_s5 + $0x64] ss:$16 sps:$4 sm:$0xff]   ;;  %v12341_v10 = vld [vmem:[%s16547_s5 + $0x3e0] ss:$16 sps:$4 sm:$0xff]  }
 0x50c   : > { %v8567_v6 = vadd.f32 %v8566_v24, %v8372_v19  ;;  %v8222_v22 = vadd.f32 %v8221_v28, %v8061_v60  ;;  %v8392_v7 = vmax.f32 %v8230_v12, 0.0  ;;  %v8586_v14 = vadd.f32 %v8585_v47, %v15934_v42  ;;  %9710 = vmatprep.subr.bf16.mxu0 %v12313_v37  ;;  %9673 = vmatprep.subr.bf16.mxu1 %v12292_v38  ;;  %v12298_v18 = vld [vmem:[%s16547_s5 + $0x44] ss:$16 sps:$4 sm:$0xff]   ;;  %v12320_v19 = vld [vmem:[%s16547_s5 + $0x280] ss:$16 sps:$4 sm:$0xff]  }
 0x50d   : > { %v12325_v24 = vld [vmem:[%s16547_s5 + $0x264] ss:$16 sps:$4 sm:$0xff]   ;;  %v12299_v28 = vld [vmem:[%s16547_s5 + $0x20] ss:$16 sps:$4 sm:$0xff]  }
 0x50e   : > { %v8568_v11 = vadd.f32 %v8567_v6, %v8377_v2  ;;  %v8382_v61 = vmax.f32 %v8222_v22, 0.0  ;;  %v12301_v60 = vld [vmem:[%s16547_s5 + $0x24] ss:$16 sps:$4 sm:$0xff]   ;;  %v12329_v2 = vld [vmem:[%s16547_s5 + $0x240] ss:$16 sps:$4 sm:$0xff]  }
 0x50f   : > { %9711 = vmatpush1.bf16.msra.mxu0 %v12311_v8  ;;  %9674 = vmatpush1.bf16.msra.mxu1 %v12290_v3  ;;  %v12331_v16 = vld [vmem:[%s16547_s5 + $0x244] ss:$16 sps:$4 sm:$0xff]   ;;  %v12302_v22 = vld [vmem:[%s16547_s5] ss:$16 sps:$4 sm:$0xff]  }
 0x510   : > { %v8569_v27 = vadd.f32 %v8568_v11, %v8382_v61  ;;  %9712 = vmatprep.subr.bf16.mxu0 %v12316_v9  ;;  %9675 = vmatprep.subr.bf16.mxu1 %v12295_v46  ;;  %v12304_v29 = vld [vmem:[%s16547_s5 + $0x4] ss:$16 sps:$4 sm:$0xff]   ;;  %v12308_v11 = vld [vmem:[%s16547_s5 + $0x1e0] ss:$16 sps:$4 sm:$0xff]  }
 0x511   : > { %v12334_v6 = vld [vmem:[%s16547_s5 + $0x224] ss:$16 sps:$4 sm:$0xff]   ;;  %v12338_v61 = vld [vmem:[%s16547_s5 + $0x200] ss:$16 sps:$4 sm:$0xff]  }
 0x512   : > { %v8570_v33 = vadd.f32 %v8569_v27, %v8387_v34  ;;  %v12319_v12 = vld [vmem:[%s16547_s5 + $0x1c4] ss:$16 sps:$4 sm:$0xff]   ;;  %v12317_v34 = vld [vmem:[%s16547_s5 + $0x1c0] ss:$16 sps:$4 sm:$0xff]  }
 0x513   : > { %9713 = vmatpush1.bf16.msra.mxu0 %v12314_v59  ;;  %9676 = vmatpush1.bf16.msra.mxu1 %v12293_v50  ;;  %v12328_v27 = vld [vmem:[%s16547_s5 + $0x1a4] ss:$16 sps:$4 sm:$0xff]   ;;  %v12347_v15 = vld [vmem:[%s16547_s5 + $0x3c0] ss:$16 sps:$4 sm:$0xff]  }
 0x514   : > { %v8571_v1 = vadd.f32 %v8570_v33, %v8392_v7  ;;  %9714 = vmatprep.subr.bf16.mxu0 %v12322_v62  ;;  %9677 = vmatprep.subr.bf16.mxu1 %v12298_v18  ;;  %v12349_v7 = vld [vmem:[%s16547_s5 + $0x3c4] ss:$16 sps:$4 sm:$0xff]   ;;  %v12326_v33 = vld [vmem:[%s16547_s5 + $0x1a0] ss:$16 sps:$4 sm:$0xff]   ;;  %v12382_v18 = vld [vmem:[%s16547_s5 + $0x2ec] ss:$16 sps:$4 sm:$0xff]  }
 0x515   : > { %v12344_v63 = vld [vmem:[%s16547_s5 + $0x160] ss:$16 sps:$4 sm:$0xff]   ;;  %v12361_v43 = vld [vmem:[%s16547_s5 + $0x364] ss:$16 sps:$4 sm:$0xff]  }
 0x516   : > { %v8572_v26 = vrot.slane %v8571_v1, 4  ;;  %v12364_v49 = vld [vmem:[%s16547_s5 + $0x124] ss:$16 sps:$4 sm:$0xff]   ;;  %v12362_v57 = vld [vmem:[%s16547_s5 + $0x120] ss:$16 sps:$4 sm:$0xff]  }
 0x517   : > { %9715 = vmatpush1.bf16.msra.mxu0 %v12320_v19  ;;  %9678 = vmatpush1.bf16.msra.mxu1 %v12296_v17  ;;  %v12359_v23 = vld [vmem:[%s16547_s5 + $0x360] ss:$16 sps:$4 sm:$0xff]   ;;  %v12373_v37 = vld [vmem:[%s16547_s5 + $0x104] ss:$16 sps:$4 sm:$0xff]  }
 0x518   : > { %v8573_v20 = vadd.f32 %v8572_v26, %v8571_v1  ;;  %9716 = vmatprep.subr.bf16.mxu0 %v12325_v24  ;;  %9679 = vmatprep.subr.bf16.mxu1 %v12301_v60  ;;  %v12335_v1 = vld [vmem:[%s16547_s5 + $0x180] ss:$16 sps:$4 sm:$0xff]   ;;  %v12367_v38 = vld [vmem:[%s16547_s5 + $0x344] ss:$16 sps:$4 sm:$0xff]  }
 0x519   : > { %v12371_v8 = vld [vmem:[%s16547_s5 + $0x100] ss:$16 sps:$4 sm:$0xff]   ;;  %v12370_v3 = vld [vmem:[%s16547_s5 + $0x324] ss:$16 sps:$4 sm:$0xff]  }
 0x51a   : > { %v8574_v39 = vrot.slane %v8573_v20, 2  ;;  %v12365_v9 = vld [vmem:[%s16547_s5 + $0x340] ss:$16 sps:$4 sm:$0xff]   ;;  %v12376_v59 = vld [vmem:[%s16547_s5 + $0x304] ss:$16 sps:$4 sm:$0xff]  }
 0x51b   : > { %9717 = vmatpush1.bf16.msra.mxu0 %v12323_v40  ;;  %9680 = vmatpush1.bf16.msra.mxu1 %v12299_v28  ;;  %v12368_v46 = vld [vmem:[%s16547_s5 + $0x320] ss:$16 sps:$4 sm:$0xff]   ;;  %v12379_v50 = vld [vmem:[%s16547_s5 + $0x4e4] ss:$16 sps:$4 sm:$0xff]  }
 0x51c   : > { %v8575_v44 = vadd.f32 %v8574_v39, %v8573_v20  ;;  %9718 = vmatprep.subr.bf16.mxu0 %v12331_v16  ;;  %9681 = vmatprep.subr.bf16.mxu1 %v12304_v29  ;;  %v12374_v62 = vld [vmem:[%s16547_s5 + $0x300] ss:$16 sps:$4 sm:$0xff]  }
 0x51d   : > { %v16167_v60 = vld [vmem:[%s16545_s3] sm:$0x1f]  ;;  %v16841_v16 = vld [vmem:[#allocation5_spill] sm:$0xff]  ;;  %v16842_v29 = vld [vmem:[#allocation6_spill] sm:$0xff] }
 0x51e   : > { %v8576_v54 = vrot.slane %v8575_v44, 1  ;;  %v16172_v40 = vld [vmem:[%s16546_s4] sm:$0x1f]  ;;  %v8621_v28 = vrot.slane %v16167_v60, %v16841_v16 }
 0x51f   : > { %9719 = vmatpush1.bf16.msra.mxu0 %v12329_v2  ;;  %9682 = vmatpush1.bf16.msra.mxu1 %v12302_v22  ;;  %v8625_v2 = vrot.slane %v16167_v60, %v16842_v29 }
 0x520   : > { %v8577_v25 = vadd.f32 %v8576_v54, %v8575_v44  ;;  %9720 = vmatprep.subr.bf16.mxu0 %v12334_v6  ;;  %9683 = vmatprep.subr.bf16.mxu1 %v12310_v51  ;;  %v16843_v6 = vld [vmem:[#allocation18_spill] sm:$0xff]  ;;  %v16844_v51 = vld [vmem:[#allocation20_spill] sm:$0xff] }
 0x521   : > { %v8629_v22 = vrot.slane %v16167_v60, %v16843_v6 }
 0x522   : > { %v15937_v36 = vmul.f32 0.00390625, %v8577_v25 }
 0x523   : > { %9721 = vmatpush1.bf16.msra.mxu0 %v12332_v45  ;;  %9684 = vmatpush2.bf16.msra.mxu1 %v12308_v11  ;;  %v8633_v45 = vrot.slane %v16167_v60, %v16844_v51  ;;  %v8653_v11 = vrot.slane %v16172_v40, %v16841_v16 }
 0x524   : > { %v8587_v41 = vadd.f32 %v8586_v14, %v15937_v36  ;;  %9722 = vmatprep.subr.bf16.mxu0 %v12340_v0  ;;  %9685 = vmatprep.subr.bf16.mxu1 %v12319_v12  ;;  %v8657_v12 = vrot.slane %v16172_v40, %v16842_v29 }
 0x526   : > { %8588 = vadd.xlane.f32.xlu0 %v8587_v41  ;;  %v12352_v41 = vld [vmem:[%s16547_s5 + $0x3a4] ss:$16 sps:$4 sm:$0xff]  }
 0x527   : > { %9723 = vmatpush1.bf16.msra.mxu0 %v12338_v61  ;;  %9686 = vmatpush2.bf16.msra.mxu1 %v12317_v34  ;;  %v8661_v61 = vrot.slane %v16172_v40, %v16843_v6 }
 0x528   : > { %9724 = vmatprep.subr.bf16.mxu0 %v12343_v5  ;;  %9687 = vmatprep.subr.bf16.mxu1 %v12328_v27  ;;  %v8665_v5 = vrot.slane %v16172_v40, %v16844_v51 }
 0x52b   : > { %9725 = vmatpush2.bf16.msra.mxu0 %v12341_v10  ;;  %9688 = vmatpush2.bf16.msra.mxu1 %v12326_v33 }
 0x52c   : > { %9726 = vmatprep.subr.bf16.mxu0 %v12349_v7  ;;  %9689 = vmatprep.subr.bf16.mxu1 %v12337_v53 }
 0x52f   : > { %9727 = vmatpush2.bf16.msra.mxu0 %v12347_v15  ;;  %9690 = vmatpush2.bf16.msra.mxu1 %v12335_v1 }
 0x530   : > { %9691 = vmatprep.subr.bf16.mxu1 %v12346_v58  ;;  %9728 = vmatprep.subr.bf16.mxu0 %v12352_v41  ;;  %v12389_v41 = vld [vmem:[%s16547_s5 + $0x4a0] ss:$16 sps:$4 sm:$0xff]  }
 0x533   : > { %9692 = vmatpush2.bf16.msra.mxu1 %v12344_v63 }
 0x534   : > { %9693 = vmatprep.subr.bf16.mxu1 %v12355_v48  ;;  %v12400_v48 = vld [vmem:[%s16547_s5 + $0x28c] ss:$16 sps:$4 sm:$0xff]  }
 0x537   : > { %9694 = vmatpush2.bf16.msra.mxu1 %v12353_v30  ;;  %v12397_v30 = vld [vmem:[%s16547_s5 + $0x484] ss:$16 sps:$4 sm:$0xff]  }
 0x538   : > { %9695 = vmatprep.subr.bf16.mxu1 %v12364_v49  ;;  %v12406_v49 = vld [vmem:[%s16547_s5 + $0x26c] ss:$16 sps:$4 sm:$0xff]  }
 0x53b   : > { %9696 = vmatpush2.bf16.msra.mxu1 %v12362_v57  ;;  %v12401_v57 = vld [vmem:[%s16547_s5 + $0x460] ss:$16 sps:$4 sm:$0xff]  }
 0x53c   : > { %9697 = vmatprep.subr.bf16.mxu1 %v12373_v37  ;;  %v12409_v37 = vld [vmem:[%s16547_s5 + $0x444] ss:$16 sps:$4 sm:$0xff]  }
 0x53f   : > { %9698 = vmatpush2.bf16.msra.mxu1 %v12371_v8  ;;  %v12407_v8 = vld [vmem:[%s16547_s5 + $0x440] ss:$16 sps:$4 sm:$0xff]  }
 0x540   : > { %9749 = vmatprep.subr.bf16.mxu1 %v12379_v50 }
 0x5af   : > { %v8589_v32 = vpop.xlane.xlu0 %8588 }
 0x5b0   : > { %v8591_v56 = vmul.f32 0.0015625, %v8589_v32 }
 0x5b2   : > { %v16080_v26 = vsub.f32 %v15928_v13, %v8591_v56  ;;  %v16083_v20 = vsub.f32 %v15926_v21, %v8591_v56  ;;  %v16086_v55 = vsub.f32 %v15930_v31, %v8591_v56  ;;  %v16089_v39 = vsub.f32 %v15934_v42, %v8591_v56 }
 0x5b3   : > { %v16096_v54 = vsub.f32 %v15937_v36, %v8591_v56  ;;  %v12350_v36 = vld [vmem:[%s16547_s5 + $0x3a0] ss:$16 sps:$4 sm:$0xff]  }
 0x5b4   : > { %v8597_v44 = vmul.f32 %v16080_v26, %v16080_v26  ;;  %v8598_v4 = vmul.f32 %v16083_v20, %v16083_v20  ;;  %v8599_v13 = vmul.f32 %v16086_v55, %v16086_v55  ;;  %v8600_v31 = vmul.f32 %v16089_v39, %v16089_v39  ;;  %9729 = vmatpush2.bf16.msra.mxu0 %v12350_v36  ;;  %v12392_v36 = vld [vmem:[%s16547_s5 + $0x2a8] ss:$16 sps:$4 sm:$0xff]  }
 0x5b5   : > { %v8601_v42 = vmul.f32 %v16096_v54, %v16096_v54  ;;  %9730 = vmatprep.subr.bf16.mxu0 %v12358_v52  ;;  %v12398_v52 = vld [vmem:[%s16547_s5 + $0x288] ss:$16 sps:$4 sm:$0xff]  }
 0x5b6   : > { %v8602_v21 = vadd.f32 %v8598_v4, %v8597_v44 }
 0x5b8   : > { %v8603_v47 = vadd.f32 %v8602_v21, %v8599_v13  ;;  %9731 = vmatpush2.bf16.msra.mxu0 %v12356_v35  ;;  %v12385_v13 = vld [vmem:[%s16547_s5 + $0x4c4] ss:$16 sps:$4 sm:$0xff]   ;;  %v12388_v21 = vld [vmem:[%s16547_s5 + $0x2cc] ss:$16 sps:$4 sm:$0xff]   ;;  %v12395_v35 = vld [vmem:[%s16547_s5 + $0x480] ss:$16 sps:$4 sm:$0xff]  }
 0x5b9   : > { %9732 = vmatprep.subr.bf16.mxu0 %v12361_v43  ;;  %v12403_v43 = vld [vmem:[%s16547_s5 + $0x464] ss:$16 sps:$4 sm:$0xff]  }
 0x5ba   : > { %v8604_v25 = vadd.f32 %v8603_v47, %v8600_v31  ;;  %v12383_v31 = vld [vmem:[%s16547_s5 + $0x4c0] ss:$16 sps:$4 sm:$0xff]   ;;  %v12386_v47 = vld [vmem:[%s16547_s5 + $0x2c8] ss:$16 sps:$4 sm:$0xff]  }
 0x5bc   : > { %v8605_v14 = vadd.f32 %v8604_v25, %v8601_v42  ;;  %9733 = vmatpush2.bf16.msra.mxu0 %v12359_v23  ;;  %v12391_v42 = vld [vmem:[%s16547_s5 + $0x4a4] ss:$16 sps:$4 sm:$0xff]   ;;  %v12394_v25 = vld [vmem:[%s16547_s5 + $0x2ac] ss:$16 sps:$4 sm:$0xff]   ;;  %v12404_v23 = vld [vmem:[%s16547_s5 + $0x268] ss:$16 sps:$4 sm:$0xff]  }
 0x5bd   : > { %9734 = vmatprep.subr.bf16.mxu0 %v12367_v38  ;;  %v12412_v38 = vld [vmem:[%s16547_s5 + $0x24c] ss:$16 sps:$4 sm:$0xff]  }
 0x5be   : > { %8606 = vadd.xlane.f32.xlu0 %v8605_v14  ;;  %v16845_v14 = vmov 0  }
 0x5c0   : > { %9735 = vmatpush2.bf16.msra.mxu0 %v12365_v9  ;;  %v12410_v9 = vld [vmem:[%s16547_s5 + $0x248] ss:$16 sps:$4 sm:$0xff]  }
 0x5c1   : > { %9736 = vmatprep.subr.bf16.mxu0 %v12370_v3  ;;  %v12415_v3 = vld [vmem:[%s16547_s5 + $0x424] ss:$16 sps:$4 sm:$0xff]  }
 0x5c4   : > { %9737 = vmatpush2.bf16.msra.mxu0 %v12368_v46  ;;  %v12418_v46 = vld [vmem:[%s16547_s5 + $0x22c] ss:$16 sps:$4 sm:$0xff]  }
 0x5c5   : > { %9738 = vmatprep.subr.bf16.mxu0 %v12376_v59 }
 0x5c8   : > { %9739 = vmatpush2.bf16.msra.mxu0 %v12374_v62  ;;  %v16846_v62 = vld [vmem:[#allocation17_spill] sm:$0xff] }
 0x5c9   : > { %9831 = vmatprep.subr.bf16.mxu0 %v12382_v18  ;;  %v8637_v50 = vrot.slane %v16167_v60, %v16846_v62  ;;  %v12413_v18 = vld [vmem:[%s16547_s5 + $0x420] ss:$16 sps:$4 sm:$0xff]   ;;  %v8669_v60 = vrot.slane %v16172_v40, %v16846_v62  ;;  %v12430_v40 = vld [vmem:[%s16547_s5 + $0x3ec] ss:$16 sps:$4 sm:$0xff]  }
 0x5ca   : > { %v12496_v62 = vld [vmem:[%s16547_s5 + $0x10c] ss:$16 sps:$4 sm:$0xff]  }
 0x647   : > { %v8607_v19 = vpop.xlane.xlu0 %8606 }
 0x648   : > { %v8608_v24 = vmul.f32 0.0015625, %v8607_v19  ;;  %v12416_v19 = vld [vmem:[%s16547_s5 + $0x228] ss:$16 sps:$4 sm:$0xff]  }
 0x64a   : > { %v8609_v17 = vadd.f32 1e-05, %v8608_v24  ;;  %v12421_v24 = vld [vmem:[%s16547_s5 + $0x404] ss:$16 sps:$4 sm:$0xff]  }
 0x64c   : > { %12521 = vrsqrt.f32 %v8609_v17 }
 0x659   : > { %v16182_v0 = vpop.eup %12521 }
 0x65a   : > { %v8612_v34 = vmul.f32 %v16182_v0, %v16083_v20  ;;  %v8614_v27 = vmul.f32 %v16182_v0, %v16089_v39  ;;  %v8611_v10 = vmul.f32 %v16182_v0, %v16080_v26  ;;  %v8613_v7 = vmul.f32 %v16182_v0, %v16086_v55  ;;  %v12377_v39 = vld [vmem:[%s16547_s5 + $0x4e0] ss:$16 sps:$4 sm:$0xff]   ;;  %v12380_v26 = vld [vmem:[%s16547_s5 + $0x2e8] ss:$16 sps:$4 sm:$0xff]  }
 0x65b   : > { %v8615_v59 = vmul.f32 %v16182_v0, %v16096_v54  ;;  %v12424_v54 = vld [vmem:[%s16547_s5 + $0x20c] ss:$16 sps:$4 sm:$0xff]   ;;  %v12425_v0 = vld [vmem:[%s16547_s5 + $0xe8] ss:$16 sps:$4 sm:$0xff]  }
 0x65c   : > { %v8644_v33 = vmul.f32 %v8625_v2, %v8612_v34  ;;  %v8646_v53 = vmul.f32 %v8633_v45, %v8614_v27  ;;  %v8643_v15 = vmul.f32 %v8621_v28, %v8611_v10  ;;  %v8645_v1 = vmul.f32 %v8629_v22, %v8613_v7  ;;  %v12419_v28 = vld [vmem:[%s16547_s5 + $0x400] ss:$16 sps:$4 sm:$0xff]   ;;  %v12422_v2 = vld [vmem:[%s16547_s5 + $0x208] ss:$16 sps:$4 sm:$0xff]   ;;  %v12427_v45 = vld [vmem:[%s16547_s5 + $0xec] ss:$16 sps:$4 sm:$0xff]  }
 0x65d   : > { %v8647_v17 = vmul.f32 %v8637_v50, %v8615_v59  ;;  %v12431_v34 = vld [vmem:[%s16547_s5 + $0xc8] ss:$16 sps:$4 sm:$0xff]   ;;  %v12439_v10 = vld [vmem:[%s16547_s5 + $0xac] ss:$16 sps:$4 sm:$0xff]  }
 0x65e   : > { %v8676_v58 = vadd.f32 %v8657_v12, %v8644_v33  ;;  %v8678_v63 = vadd.f32 %v8665_v5, %v8646_v53  ;;  %v8675_v32 = vadd.f32 %v8653_v11, %v8643_v15  ;;  %v8677_v56 = vadd.f32 %v8661_v61, %v8645_v1  ;;  %v12428_v12 = vld [vmem:[%s16547_s5 + $0x3e8] ss:$16 sps:$4 sm:$0xff]   ;;  %v12433_v61 = vld [vmem:[%s16547_s5 + $0xcc] ss:$16 sps:$4 sm:$0xff]  }
 0x65f   : > { %v8679_v22 = vadd.f32 %v8669_v60, %v8647_v17  ;;  %v12436_v5 = vld [vmem:[%s16547_s5 + $0x3cc] ss:$16 sps:$4 sm:$0xff]   ;;  %v12434_v27 = vld [vmem:[%s16547_s5 + $0x3c8] ss:$16 sps:$4 sm:$0xff]  }
 0x660   : > { %v16200_v44 = vpack.c.bf16 %v8676_v58, %v8676_v58  ;;  %v8683_v20 = vpack.c.bf16 %v8678_v63, %v8678_v63  ;;  %v16208_v55 = vpack.c.bf16 %v8675_v32, %v8675_v32  ;;  %v16210_v4 = vpack.c.bf16 %v8677_v56, %v8677_v56  ;;  %v12442_v7 = vld [vmem:[%s16547_s5 + $0x3ac] ss:$16 sps:$4 sm:$0xff]   ;;  %v12437_v33 = vld [vmem:[%s16547_s5 + $0xa8] ss:$16 sps:$4 sm:$0xff]  }
 0x661   : > { %v16315_v11 = vpack.c.bf16 %v8679_v22, %v8679_v22  ;;  %v12440_v53 = vld [vmem:[%s16547_s5 + $0x3a8] ss:$16 sps:$4 sm:$0xff]   ;;  %v12445_v15 = vld [vmem:[%s16547_s5 + $0x8c] ss:$16 sps:$4 sm:$0xff]  }
 0x662   : > { %9699 = vmatprep.mubr.bf16.mxu1 %v16200_v44  ;;  %9740 = vmatprep.mubr.bf16.mxu0 %v8683_v20  ;;  %v12448_v1 = vld [vmem:[%s16547_s5 + $0x38c] ss:$16 sps:$4 sm:$0xff]   ;;  %v12443_v58 = vld [vmem:[%s16547_s5 + $0x88] ss:$16 sps:$4 sm:$0xff]  }
 0x663   : > { %9700 = vmatmul.mubr.bf16.vlgmr.msra.gmra.mxu1 %v16208_v55  ;;  %9741 = vmatmul.mubr.bf16.vlgmr.msra.gmra.mxu0 %v16210_v4  ;;  %v12446_v63 = vld [vmem:[%s16547_s5 + $0x388] ss:$16 sps:$4 sm:$0xff]   ;;  %v12451_v32 = vld [vmem:[%s16547_s5 + $0x6c] ss:$16 sps:$4 sm:$0xff]  }
 0x664   : > { %9750 = vmatpush1.bf16.msra.mxu1 %v12377_v39  ;;  %9832 = vmatpush1.bf16.msra.mxu0 %v12380_v26  ;;  %v12454_v56 = vld [vmem:[%s16547_s5 + $0x36c] ss:$16 sps:$4 sm:$0xff]   ;;  %v12491_v59 = vld [vmem:[%s16547_s5 + $0x128] ss:$16 sps:$4 sm:$0xff]  }
 0x665   : > { %9863 = vmatprep.mubr.bf16.mxu0 %v8683_v20  ;;  %9751 = vmatprep.subr.bf16.mxu1 %v12385_v13  ;;  %v12452_v20 = vld [vmem:[%s16547_s5 + $0x368] ss:$16 sps:$4 sm:$0xff]   ;;  %v12457_v39 = vld [vmem:[%s16547_s5 + $0x4c] ss:$16 sps:$4 sm:$0xff]  }
 0x666   : > { %9833 = vmatprep.subr.bf16.mxu0 %v12388_v21  ;;  %9781 = vmatprep.mubr.bf16.mxu1 %v16845_v14  ;;  %v12460_v26 = vld [vmem:[%s16547_s5 + $0x34c] ss:$16 sps:$4 sm:$0xff]   ;;  %v12455_v13 = vld [vmem:[%s16547_s5 + $0x48] ss:$16 sps:$4 sm:$0xff]  }
 0x667   : > { %v12458_v21 = vld [vmem:[%s16547_s5 + $0x348] ss:$16 sps:$4 sm:$0xff]   ;;  %v12505_v17 = vld [vmem:[%s16547_s5 + $0x4ac] ss:$16 sps:$4 sm:$0xff]  }
 0x668   : > { %9752 = vmatpush1.bf16.msra.mxu1 %v12383_v31  ;;  %9834 = vmatpush1.bf16.msra.mxu0 %v12386_v47  ;;  %v12463_v31 = vld [vmem:[%s16547_s5 + $0x2c] ss:$16 sps:$4 sm:$0xff]   ;;  %v12494_v50 = vld [vmem:[%s16547_s5 + $0x108] ss:$16 sps:$4 sm:$0xff]  }
 0x669   : > { %9753 = vmatprep.subr.bf16.mxu1 %v12391_v42  ;;  %9835 = vmatprep.subr.bf16.mxu0 %v12394_v25  ;;  %v12466_v47 = vld [vmem:[%s16547_s5 + $0x32c] ss:$16 sps:$4 sm:$0xff]   ;;  %v12461_v42 = vld [vmem:[%s16547_s5 + $0x28] ss:$16 sps:$4 sm:$0xff]  }
 0x66a   : > { %v12464_v25 = vld [vmem:[%s16547_s5 + $0x328] ss:$16 sps:$4 sm:$0xff]   ;;  %v12514_v22 = vld [vmem:[%s16547_s5 + $0x44c] ss:$16 sps:$4 sm:$0xff]  }
 0x66b   : > { %v12503_v60 = vld [vmem:[%s16547_s5 + $0x4a8] ss:$16 sps:$4 sm:$0xff]  }
 0x66c   : > { %9754 = vmatpush1.bf16.msra.mxu1 %v12389_v41  ;;  %9836 = vmatpush1.bf16.msra.mxu0 %v12392_v36  ;;  %v12469_v41 = vld [vmem:[%s16547_s5 + $0xc] ss:$16 sps:$4 sm:$0xff]  }
 0x66d   : > { %9755 = vmatprep.subr.bf16.mxu1 %v12397_v30  ;;  %9837 = vmatprep.subr.bf16.mxu0 %v12400_v48  ;;  %v12472_v36 = vld [vmem:[%s16547_s5 + $0x30c] ss:$16 sps:$4 sm:$0xff]   ;;  %v12467_v30 = vld [vmem:[%s16547_s5 + $0x8] ss:$16 sps:$4 sm:$0xff]  }
 0x66e   : > { %v12470_v48 = vld [vmem:[%s16547_s5 + $0x308] ss:$16 sps:$4 sm:$0xff]  }
 0x670   : > { %9756 = vmatpush1.bf16.msra.mxu1 %v12395_v35  ;;  %9838 = vmatpush1.bf16.msra.mxu0 %v12398_v52  ;;  %v12475_v35 = vld [vmem:[%s16547_s5 + $0x1ec] ss:$16 sps:$4 sm:$0xff]   ;;  %v12473_v52 = vld [vmem:[%s16547_s5 + $0x1e8] ss:$16 sps:$4 sm:$0xff]  }
 0x671   : > { %9757 = vmatprep.subr.bf16.mxu1 %v12403_v43  ;;  %9839 = vmatprep.subr.bf16.mxu0 %v12406_v49  ;;  %v12478_v43 = vld [vmem:[%s16547_s5 + $0x1cc] ss:$16 sps:$4 sm:$0xff]   ;;  %v12476_v49 = vld [vmem:[%s16547_s5 + $0x1c8] ss:$16 sps:$4 sm:$0xff]  }
 0x674   : > { %9758 = vmatpush1.bf16.msra.mxu1 %v12401_v57  ;;  %9840 = vmatpush1.bf16.msra.mxu0 %v12404_v23  ;;  %v12481_v57 = vld [vmem:[%s16547_s5 + $0x1ac] ss:$16 sps:$4 sm:$0xff]   ;;  %v12479_v23 = vld [vmem:[%s16547_s5 + $0x1a8] ss:$16 sps:$4 sm:$0xff]  }
 0x675   : > { %9759 = vmatprep.subr.bf16.mxu1 %v12409_v37  ;;  %9841 = vmatprep.subr.bf16.mxu0 %v12412_v38  ;;  %v12482_v37 = vld [vmem:[%s16547_s5 + $0x188] ss:$16 sps:$4 sm:$0xff]   ;;  %v12487_v38 = vld [vmem:[%s16547_s5 + $0x16c] ss:$16 sps:$4 sm:$0xff]  }
 0x678   : > { %9760 = vmatpush1.bf16.msra.mxu1 %v12407_v8  ;;  %9842 = vmatpush1.bf16.msra.mxu0 %v12410_v9  ;;  %v12485_v8 = vld [vmem:[%s16547_s5 + $0x168] ss:$16 sps:$4 sm:$0xff]   ;;  %v12490_v9 = vld [vmem:[%s16547_s5 + $0x14c] ss:$16 sps:$4 sm:$0xff]  }
 0x679   : > { %9761 = vmatprep.subr.bf16.mxu1 %v12415_v3  ;;  %9843 = vmatprep.subr.bf16.mxu0 %v12418_v46  ;;  %v12488_v3 = vld [vmem:[%s16547_s5 + $0x148] ss:$16 sps:$4 sm:$0xff]   ;;  %v12493_v46 = vld [vmem:[%s16547_s5 + $0x12c] ss:$16 sps:$4 sm:$0xff]  }
 0x67c   : > { %9762 = vmatpush1.bf16.msra.mxu1 %v12413_v18  ;;  %9844 = vmatpush1.bf16.msra.mxu0 %v12416_v19  ;;  %v12499_v18 = vld [vmem:[%s16547_s5 + $0x4ec] ss:$16 sps:$4 sm:$0xff]   ;;  %v12497_v19 = vld [vmem:[%s16547_s5 + $0x4e8] ss:$16 sps:$4 sm:$0xff]  }
 0x67d   : > { %9763 = vmatprep.subr.bf16.mxu1 %v12421_v24  ;;  %9845 = vmatprep.subr.bf16.mxu0 %v12424_v54  ;;  %v12502_v24 = vld [vmem:[%s16547_s5 + $0x4cc] ss:$16 sps:$4 sm:$0xff]   ;;  %v12500_v54 = vld [vmem:[%s16547_s5 + $0x4c8] ss:$16 sps:$4 sm:$0xff]  }
 0x680   : > { %9764 = vmatpush1.bf16.msra.mxu1 %v12419_v28  ;;  %9846 = vmatpush1.bf16.msra.mxu0 %v12422_v2  ;;  %v12511_v28 = vld [vmem:[%s16547_s5 + $0x46c] ss:$16 sps:$4 sm:$0xff]   ;;  %v12509_v2 = vld [vmem:[%s16547_s5 + $0x468] ss:$16 sps:$4 sm:$0xff]  }
 0x681   : > { %9790 = vmatprep.subr.bf16.mxu1 %v12427_v45  ;;  %9847 = vmatprep.subr.bf16.mxu0 %v12430_v40  ;;  %v12512_v45 = vld [vmem:[%s16547_s5 + $0x448] ss:$16 sps:$4 sm:$0xff]   ;;  %v12517_v40 = vld [vmem:[%s16547_s5 + $0x42c] ss:$16 sps:$4 sm:$0xff]  }
 0x683   : > { %9782 = vmatmul.mubr.bf16.vlgmr.msra.gmra.mxu1 %v16315_v11 }
 0x684   : > { %9791 = vmatpush1.bf16.msra.mxu1 %v12425_v0  ;;  %9822 = vmatprep.mubr.bf16.mxu1 %v16200_v44  ;;  %v12449_v44 = vld [vmem:[%s16547_s5 + $0x68] ss:$16 sps:$4 sm:$0xff]  }
 0x685   : > { %9848 = vmatpush2.bf16.msra.mxu0 %v12428_v12  ;;  %9792 = vmatprep.subr.bf16.mxu1 %v12433_v61  ;;  %v12515_v0 = vld [vmem:[%s16547_s5 + $0x428] ss:$16 sps:$4 sm:$0xff]   ;;  %v12520_v12 = vld [vmem:[%s16547_s5 + $0x40c] ss:$16 sps:$4 sm:$0xff]  }
 0x686   : > { %9849 = vmatprep.subr.bf16.mxu0 %v12436_v5  ;;  %v12518_v61 = vld [vmem:[%s16547_s5 + $0x408] ss:$16 sps:$4 sm:$0xff]   ;;  %v8845_v5 = vld [vmem:[%s16548_s6] sm:$0xf] }
 0x688   : > { %9793 = vmatpush1.bf16.msra.mxu1 %v12431_v34  ;;  %v8850_v34 = vrot.slane %v8845_v5, %v16841_v16 }
 0x689   : > { %9850 = vmatpush2.bf16.msra.mxu0 %v12434_v27  ;;  %9794 = vmatprep.subr.bf16.mxu1 %v12439_v10  ;;  %v8854_v27 = vrot.slane %v8845_v5, %v16842_v29 }
 0x68a   : > { %9851 = vmatprep.subr.bf16.mxu0 %v12442_v7 }
 0x68c   : > { %9795 = vmatpush1.bf16.msra.mxu1 %v12437_v33 }
 0x68d   : > { %9852 = vmatpush2.bf16.msra.mxu0 %v12440_v53  ;;  %9796 = vmatprep.subr.bf16.mxu1 %v12445_v15 }
 0x68e   : > { %9853 = vmatprep.subr.bf16.mxu0 %v12448_v1 }
 0x690   : > { %9797 = vmatpush1.bf16.msra.mxu1 %v12443_v58 }
 0x691   : > { %9854 = vmatpush2.bf16.msra.mxu0 %v12446_v63  ;;  %9798 = vmatprep.subr.bf16.mxu1 %v12451_v32 }
 0x692   : > { %9855 = vmatprep.subr.bf16.mxu0 %v12454_v56 }
 0x694   : > { %9799 = vmatpush1.bf16.msra.mxu1 %v12449_v44 }
 0x695   : > { %9856 = vmatpush2.bf16.msra.mxu0 %v12452_v20  ;;  %9800 = vmatprep.subr.bf16.mxu1 %v12457_v39 }
 0x696   : > { %9857 = vmatprep.subr.bf16.mxu0 %v12460_v26 }
 0x698   : > { %9801 = vmatpush1.bf16.msra.mxu1 %v12455_v13 }
 0x699   : > { %9858 = vmatpush2.bf16.msra.mxu0 %v12458_v21  ;;  %9802 = vmatprep.subr.bf16.mxu1 %v12463_v31 }
 0x69a   : > { %9859 = vmatprep.subr.bf16.mxu0 %v12466_v47 }
 0x69c   : > { %9803 = vmatpush1.bf16.msra.mxu1 %v12461_v42 }
 0x69d   : > { %9860 = vmatpush2.bf16.msra.mxu0 %v12464_v25  ;;  %9804 = vmatprep.subr.bf16.mxu1 %v12469_v41 }
 0x69e   : > { %9861 = vmatprep.subr.bf16.mxu0 %v12472_v36 }
 0x6a0   : > { %9805 = vmatpush1.bf16.msra.mxu1 %v12467_v30 }
 0x6a1   : > { %9862 = vmatpush2.bf16.msra.mxu0 %v12470_v48  ;;  %9806 = vmatprep.subr.bf16.mxu1 %v12475_v35 }
 0x6a4   : > { %9864 = vmatmul.mubr.bf16.vlgmr.msra.gmra.mxu0 %v16210_v4  ;;  %9807 = vmatpush2.bf16.msra.mxu1 %v12473_v52  ;;  %v12484_v4 = vld [vmem:[%s16547_s5 + $0x18c] ss:$16 sps:$4 sm:$0xff]  }
 0x6a5   : > { %9808 = vmatprep.subr.bf16.mxu1 %v12478_v43 }
 0x6a8   : > { %9809 = vmatpush2.bf16.msra.mxu1 %v12476_v49 }
 0x6a9   : > { %9810 = vmatprep.subr.bf16.mxu1 %v12481_v57 }
 0x6ac   : > { %9811 = vmatpush2.bf16.msra.mxu1 %v12479_v23 }
 0x6ad   : > { %9812 = vmatprep.subr.bf16.mxu1 %v12484_v4  ;;  %v8858_v4 = vrot.slane %v8845_v5, %v16843_v6 }
 0x6b0   : > { %9813 = vmatpush2.bf16.msra.mxu1 %v12482_v37 }
 0x6b1   : > { %9814 = vmatprep.subr.bf16.mxu1 %v12487_v38  ;;  %v8862_v38 = vrot.slane %v8845_v5, %v16844_v51 }
 0x6b4   : > { %9815 = vmatpush2.bf16.msra.mxu1 %v12485_v8 }
 0x6b5   : > { %9816 = vmatprep.subr.bf16.mxu1 %v12490_v9 }
 0x6b8   : > { %9817 = vmatpush2.bf16.msra.mxu1 %v12488_v3 }
 0x6b9   : > { %9818 = vmatprep.subr.bf16.mxu1 %v12493_v46 }
 0x6bc   : > { %9819 = vmatpush2.bf16.msra.mxu1 %v12491_v59 }
 0x6bd   : > { %9820 = vmatprep.subr.bf16.mxu1 %v12496_v62 }
 0x6c0   : > { %9821 = vmatpush2.bf16.msra.mxu1 %v12494_v50 }
 0x6c1   : > { %9872 = vmatprep.subr.bf16.mxu1 %v12499_v18 }
 0x6c3   : > { %9823 = vmatmul.mubr.bf16.vlgmr.msra.gmra.mxu1 %v16208_v55  ;;  %v12508_v55 = vld [vmem:[%s16547_s5 + $0x48c] ss:$16 sps:$4 sm:$0xff]  }
 0x6c4   : > { %9873 = vmatpush1.bf16.msra.mxu1 %v12497_v19  ;;  %9904 = vmatprep.mubr.bf16.mxu1 %v16845_v14  ;;  %v12506_v14 = vld [vmem:[%s16547_s5 + $0x488] ss:$16 sps:$4 sm:$0xff]  }
 0x6c5   : > { %9874 = vmatprep.subr.bf16.mxu1 %v12502_v24 }
 0x6c8   : > { %9875 = vmatpush1.bf16.msra.mxu1 %v12500_v54 }
 0x6c9   : > { %9876 = vmatprep.subr.bf16.mxu1 %v12505_v17 }
 0x6cc   : > { %9877 = vmatpush1.bf16.msra.mxu1 %v12503_v60 }
 0x6cd   : > { %9878 = vmatprep.subr.bf16.mxu1 %v12508_v55 }
 0x6d0   : > { %9879 = vmatpush1.bf16.msra.mxu1 %v12506_v14 }
 0x6d1   : > { %9880 = vmatprep.subr.bf16.mxu1 %v12511_v28 }
 0x6d4   : > { %9881 = vmatpush1.bf16.msra.mxu1 %v12509_v2 }
 0x6d5   : > { %9882 = vmatprep.subr.bf16.mxu1 %v12514_v22 }
 0x6d8   : > { %9883 = vmatpush1.bf16.msra.mxu1 %v12512_v45 }
 0x6d9   : > { %9884 = vmatprep.subr.bf16.mxu1 %v12517_v40 }
 0x6dc   : > { %9885 = vmatpush1.bf16.msra.mxu1 %v12515_v0 }
 0x6dd   : > { %9886 = vmatprep.subr.bf16.mxu1 %v12520_v12 }
 0x6e0   : > { %9887 = vmatpush1.bf16.msra.mxu1 %v12518_v61 }
 0x6e3   : > { %9905 = vmatmul.mubr.bf16.vlgmr.msra.gmra.mxu1 %v16315_v11 }
 0x723   : > { %v9701_v10 = vpop.f32.mrf.mxu1  ;;  %v9742_v7 = vpop.f32.mrf.mxu0 }
 0x724   : > { %v9702_v33 = vadd.f32 %v9701_v10, %v8850_v34 }
 0x725   : > { %v9703_v53 = vpop.f32.mrf.mxu1  ;;  %v9744_v15 = vpop.f32.mrf.mxu0 }
 0x726   : > { %v9743_v1 = vadd.f32 %v9742_v7, %v9702_v33  ;;  %v9704_v58 = vadd.f32 %v9703_v53, %v8854_v27 }
 0x727   : > { %v9705_v63 = vpop.f32.mrf.mxu1  ;;  %v9746_v32 = vpop.f32.mrf.mxu0 }
 0x728   : > { %v9745_v56 = vadd.f32 %v9744_v15, %v9704_v58 }
 0x729   : > { %v9706_v44 = vpop.f32.mrf.mxu1  ;;  %v9747_v11 = vpop.f32.mrf.mxu0 }
 0x743   : > { %v9783_v20 = vpop.f32.mrf.mxu1 }
 0x744   : > { %v9784_v39 = vadd.f32 %v9783_v20, %v9743_v1 }
 0x745   : > { %v9785_v26 = vpop.f32.mrf.mxu1 }
 0x746   : > { %v9786_v13 = vadd.f32 %v9785_v26, %v9745_v56  ;;  %v9913_v43 = vmul.f32 %v9784_v39, %v9784_v39 }
 0x747   : > { %v9787_v21 = vpop.f32.mrf.mxu1 }
 0x748   : > { %v9914_v52 = vmul.f32 %v9786_v13, %v9786_v13  ;;  %v9917_v57 = vmul.f32 %v9913_v43, %v9784_v39 }
 0x749   : > { %v9788_v31 = vpop.f32.mrf.mxu1 }
 0x74a   : > { %v9918_v49 = vmul.f32 %v9914_v52, %v9786_v13  ;;  %v9921_v37 = vmul.f32 0.044715, %v9917_v57 }
 0x74c   : > { %v9922_v23 = vmul.f32 0.044715, %v9918_v49  ;;  %v9925_v3 = vadd.f32 %v9921_v37, %v9784_v39 }
 0x74e   : > { %v9926_v8 = vadd.f32 %v9922_v23, %v9786_v13  ;;  %v9929_v18 = vmul.f32 0.7978846, %v9925_v3 }
 0x750   : > { %v9930_v59 = vmul.f32 0.7978846, %v9926_v8  ;;  %v10002_v8 = vld [vmem:[%s16550_s8] sm:$0xf] }
 0x752   : > { %12523 = vtanh.f32 %v9930_v59 }
 0x753   : > { %12525 = vtanh.f32 %v9929_v18  ;;  %v10007_v18 = vrot.slane %v10002_v8, %v16841_v16 }
 0x75f   : > { %v12524_v34 = vpop.eup %12523 }
 0x760   : > { %v12526_v27 = vpop.eup %12525  ;;  %v9938_v10 = vadd.f32 1.0, %v12524_v34 }
 0x761   : > { %v9937_v7 = vadd.f32 1.0, %v12526_v27 }
 0x762   : > { %v9942_v33 = vmul.f32 0.5, %v9938_v10 }
 0x763   : > { %v9941_v53 = vmul.f32 0.5, %v9937_v7 }
 0x764   : > { %v9865_v47 = vpop.f32.mrf.mxu0  ;;  %v9946_v58 = vmul.f32 %v9942_v33, %v9786_v13 }
 0x765   : > { %v9945_v44 = vmul.f32 %v9941_v53, %v9784_v39 }
 0x766   : > { %v9867_v42 = vpop.f32.mrf.mxu0 }
 0x767   : > { %v9949_v26 = vadd.f32 %v9946_v58, %v9945_v44 }
 0x768   : > { %v9869_v25 = vpop.f32.mrf.mxu0 }
 0x76a   : > { %v9870_v41 = vpop.f32.mrf.mxu0 }
 0x783   : > { %v9824_v36 = vpop.f32.mrf.mxu1 }
 0x784   : > { %v9825_v9 = vadd.f32 %v9824_v36, %v8858_v4 }
 0x785   : > { %v9826_v30 = vpop.f32.mrf.mxu1 }
 0x786   : > { %v9827_v46 = vadd.f32 %v9826_v30, %v8862_v38  ;;  %v9866_v62 = vadd.f32 %v9865_v47, %v9825_v9  ;;  %v9976_v38 = vld [vmem:[%s16549_s7] sm:$0xf] }
 0x787   : > { %v9828_v48 = vpop.f32.mrf.mxu1  ;;  %v9981_v9 = vrot.slane %v9976_v38, %v16841_v16  ;;  %v9985_v3 = vrot.slane %v9976_v38, %v16842_v29  ;;  %v9993_v59 = vrot.slane %v9976_v38, %v16844_v51 }
 0x788   : > { %v9868_v24 = vadd.f32 %v9867_v42, %v9827_v46  ;;  %v9989_v46 = vrot.slane %v9976_v38, %v16843_v6 }
 0x789   : > { %v9829_v35 = vpop.f32.mrf.mxu1 }
 0x7a3   : > { %v9906_v50 = vpop.f32.mrf.mxu1 }
 0x7a4   : > { %v9907_v19 = vadd.f32 %v9906_v50, %v9866_v62  ;;  %v10028_v62 = vld [vmem:[%s16551_s9] sm:$0xf] }
 0x7a5   : > { %v9908_v54 = vpop.f32.mrf.mxu1  ;;  %v10041_v34 = vrot.slane %v10028_v62, %v16843_v6  ;;  %v10045_v10 = vrot.slane %v10028_v62, %v16844_v51 }
 0x7a6   : > { %v9915_v17 = vmul.f32 %v9907_v19, %v9907_v19  ;;  %v9909_v60 = vadd.f32 %v9908_v54, %v9868_v24  ;;  %v10015_v24 = vrot.slane %v10002_v8, %v16843_v6 }
 0x7a7   : > { %v9910_v55 = vpop.f32.mrf.mxu1 }
 0x7a8   : > { %v9919_v14 = vmul.f32 %v9915_v17, %v9907_v19  ;;  %v9916_v28 = vmul.f32 %v9909_v60, %v9909_v60 }
 0x7a9   : > { %v9911_v2 = vpop.f32.mrf.mxu1 }
 0x7aa   : > { %v9923_v22 = vmul.f32 0.044715, %v9919_v14  ;;  %v9920_v45 = vmul.f32 %v9916_v28, %v9909_v60  ;;  %v10019_v14 = vrot.slane %v10002_v8, %v16844_v51  ;;  %v10033_v28 = vrot.slane %v10028_v62, %v16841_v16 }
 0x7ab   : > { %v10037_v2 = vrot.slane %v10028_v62, %v16842_v29 }
 0x7ac   : > { %v9927_v40 = vadd.f32 %v9923_v22, %v9907_v19  ;;  %v9924_v0 = vmul.f32 0.044715, %v9920_v45 }
 0x7ae   : > { %v9931_v12 = vmul.f32 0.7978846, %v9927_v40  ;;  %v9928_v61 = vadd.f32 %v9924_v0, %v9909_v60 }
 0x7b0   : > { %12527 = vtanh.f32 %v9931_v12  ;;  %v9932_v5 = vmul.f32 0.7978846, %v9928_v61 }
 0x7b2   : > { %12529 = vtanh.f32 %v9932_v5 }
 0x7bd   : > { %v12528_v15 = vpop.eup %12527 }
 0x7be   : > { %v9939_v1 = vadd.f32 1.0, %v12528_v15 }
 0x7bf   : > { %v12530_v63 = vpop.eup %12529 }
 0x7c0   : > { %v9940_v32 = vadd.f32 1.0, %v12530_v63  ;;  %v9943_v56 = vmul.f32 0.5, %v9939_v1 }
 0x7c2   : > { %v9944_v11 = vmul.f32 0.5, %v9940_v32  ;;  %v9947_v20 = vmul.f32 %v9943_v56, %v9907_v19  ;;  %v10011_v19 = vrot.slane %v10002_v8, %v16842_v29 }
 0x7c4   : > { %v9948_v21 = vmul.f32 %v9944_v11, %v9909_v60  ;;  %v9950_v31 = vadd.f32 %v9949_v26, %v9947_v20 }
 0x7c6   : > { %v9951_v47 = vadd.f32 %v9950_v31, %v9948_v21 }
 0x7c8   : > { %9952 = vadd.xlane.f32.xlu1 %v9951_v47 }
 0x851   : > { %v9953_v42 = vpop.xlane.xlu1 %9952 }
 0x852   : > { %v9955_v25 = vmul.f32 0.001953125, %v9953_v42 }
 0x854   : > { %v9956_v41 = vsub.f32 %v9945_v44, %v9955_v25  ;;  %v9957_v36 = vsub.f32 %v9946_v58, %v9955_v25  ;;  %v9958_v30 = vsub.f32 %v9947_v20, %v9955_v25  ;;  %v9959_v48 = vsub.f32 %v9948_v21, %v9955_v25  ;;  %v10059_v58 = vld [vmem:[#allocation3] sm:$0x1] }
 0x856   : > { %v9960_v35 = vmul.f32 %v9956_v41, %v9956_v41  ;;  %v9961_v52 = vmul.f32 %v9957_v36, %v9957_v36  ;;  %v9962_v13 = vmul.f32 %v9958_v30, %v9958_v30  ;;  %v9963_v49 = vmul.f32 %v9959_v48, %v9959_v48 }
 0x858   : > { %v9964_v43 = vadd.f32 %v9961_v52, %v9960_v35 }
 0x85a   : > { %v9965_v57 = vadd.f32 %v9964_v43, %v9962_v13 }
 0x85c   : > { %v9966_v39 = vadd.f32 %v9965_v57, %v9963_v49 }
 0x85e   : > { %9967 = vadd.xlane.f32.xlu1 %v9966_v39 }
 0x8e7   : > { %v9968_v23 = vpop.xlane.xlu1 %9967 }
 0x8e8   : > { %v9969_v4 = vmul.f32 0.001953125, %v9968_v23 }
 0x8ea   : > { %v9970_v37 = vadd.f32 1e-05, %v9969_v4 }
 0x8ec   : > { %12531 = vrsqrt.f32 %v9970_v37 }
 0x8f9   : > { %v12532_v50 = vpop.eup %12531 }
 0x8fa   : > { %v9972_v54 = vmul.f32 %v12532_v50, %v9956_v41  ;;  %v9973_v17 = vmul.f32 %v12532_v50, %v9957_v36  ;;  %v9974_v60 = vmul.f32 %v12532_v50, %v9958_v30  ;;  %v9975_v55 = vmul.f32 %v12532_v50, %v9959_v48 }
 0x8fc   : > { %v9998_v22 = vmul.f32 %v9981_v9, %v9972_v54  ;;  %v9999_v45 = vmul.f32 %v9985_v3, %v9973_v17  ;;  %v10000_v40 = vmul.f32 %v9989_v46, %v9974_v60  ;;  %v10001_v0 = vmul.f32 %v9993_v59, %v9975_v55 }
 0x8fe   : > { %v10024_v12 = vadd.f32 %v10007_v18, %v9998_v22  ;;  %v10025_v61 = vadd.f32 %v10011_v19, %v9999_v45  ;;  %v10026_v5 = vadd.f32 %v10015_v24, %v10000_v40  ;;  %v10027_v27 = vadd.f32 %v10019_v14, %v10001_v0 }
 0x900   : > { %v10050_v7 = vmul.f32 %v10033_v28, %v10024_v12  ;;  %v10051_v33 = vmul.f32 %v10037_v2, %v10025_v61  ;;  %v10052_v53 = vmul.f32 %v10041_v34, %v10026_v5  ;;  %v10053_v15 = vmul.f32 %v10045_v10, %v10027_v27 }
 0x902   : > { %v10054_v16 = vadd.f32 %v10051_v33, %v10050_v7 }
 0x904   : > { %v10055_v29 = vadd.f32 %v10054_v16, %v10052_v53 }
 0x906   : > { %v10056_v1 = vadd.f32 %v10055_v29, %v10053_v15 }
 0x908   : > { %10057 = vadd.xlane.f32.xlu0 %v10056_v1 }
 0x991   : > { %v10058_v6 = vpop.xlane.xlu0 %10057 }
 0x992   : > { %v10060_v63 = vadd.f32 %v10059_v58, %v10058_v6 }
 0x994   : > { %10062 = vst.msk [vmem:[%s389_s28] sm:$0x1] %vm10061_vm3, %v10060_v63 }
 0x995 PF: > { %s23_s19 = sadd.s32 1, %s12829_s19  }
 0x996   : > { %p20_p5 = scmp.ge.s32.totalorder %s23_s19, 4  }
 0x998   :  { %22 = sbr.rel (!%p20_p5) target bundleno = 3 (0x3), region = 99 }

</bundles_post_ra>
